<compile_context>
chip_gen: v7x
topology: tpu7x:2x2x1
jax: 0.10.0
libtpu: 0.0.40
codegen_flags: <defaults>
</compile_context>

<pallas_src>
import functools

import jax
import jax.numpy as jnp
from jax import lax
from jax.experimental import pallas as pl
from jax.experimental.pallas import tpu as pltpu


# ----------------------------------------------------------------------------
# Pallas kernels: GEMM with fused bias add and optional ReLU.
# ----------------------------------------------------------------------------
def _mm_bias_kernel_single(a_ref, b_ref, bias_ref, o_ref, *, apply_relu):
    """Single K step: whole reduction in one dot, write straight to o_ref."""
    out = jnp.dot(a_ref[...], b_ref[...], preferred_element_type=jnp.float32)
    out = out + bias_ref[...]                       # (tm,tn) + (1,tn) broadcast
    if apply_relu:
        out = jnp.maximum(out, 0.0)
    o_ref[...] = out.astype(o_ref.dtype)


def _mm_bias_kernel_multi(a_ref, b_ref, bias_ref, o_ref, acc_ref, *, apply_relu):
    """3-D grid (i, j, k); k is the reduction axis, f32 accumulator in VMEM."""
    @pl.when(pl.program_id(2) == 0)
    def _():
        acc_ref[...] = jnp.zeros_like(acc_ref)

    acc_ref[...] += jnp.dot(a_ref[...], b_ref[...],
                            preferred_element_type=jnp.float32)

    @pl.when(pl.program_id(2) == pl.num_programs(2) - 1)
    def _():
        out = acc_ref[...] + bias_ref[...]
        if apply_relu:
            out = jnp.maximum(out, 0.0)
        o_ref[...] = out.astype(o_ref.dtype)


# ----------------------------------------------------------------------------
# Tiling helpers (generation-aware VMEM budget).
# ----------------------------------------------------------------------------
def _round_up(x, m):
    return (x + m - 1) // m * m


@functools.lru_cache(maxsize=None)
def _vmem_capacity_bytes():
    try:
        return int(pltpu.get_tpu_info().vmem_capacity_bytes)
    except Exception:
        return 64 * 1024 * 1024          # conservative fallback (v7x-sized VMEM)


def _vmem_limit_bytes():
    # leave ~25% headroom for Mosaic internal scratch / double-buffer slack
    return int(_vmem_capacity_bytes() * 3 // 4)


def _pick_k_tile(K, tn, bytes_budget, buffers=3):
    """Largest multiple-of-128 K tile whose `buffers` bf16 B tiles fit the
    budget, preferring tiles that minimize zero-padding of K (exact divisors)."""
    max_t = bytes_budget // (buffers * tn * 2)
    max_t = max(128, min(_round_up(K, 128), (max_t // 128) * 128))
    best_t, best_waste = 128, _round_up(K, 128) - K
    t = 256
    while t <= max_t:
        waste = _round_up(K, t) - K
        if waste <= best_waste:          # prefer the largest tile at equal waste
            best_t, best_waste = t, waste
        t += 128
    return best_t


def pallas_matmul_bias(a, b, bias, *, relu, out_dtype=jnp.float32):
    """a: (M,K), b: (K,N) bf16, bias: (1,N)/(N,) f32 -> (M,N) out_dtype.

    Operands feed the MXU as bf16 with f32 accumulation.
    """
    M, K = a.shape
    K2, N = b.shape
    assert K == K2
    bias = bias.reshape(1, N).astype(jnp.float32)

    a = a.astype(jnp.bfloat16)
    b = b.astype(jnp.bfloat16)

    vmem_limit = _vmem_limit_bytes()
    single_k = K <= 4096

    if single_k:
        # Whole reduction in one dot; full-dim blocks for small/odd M, K, N
        # (no padding, no output slice).
        tm = M if M <= 256 else 256
        if N <= 512:
            tn = N
        else:
            tn = min(2048, _round_up(N, 128))    # >=2 j-blocks for v7x when N=4096
        tk = K
    else:
        cap = _vmem_capacity_bytes()
        small_vmem = cap <= 64 * 1024 * 1024     # v7x-class: keep 2 j-blocks
        tm = M if M <= 256 else 256
        tn = min(_round_up(N, 128), 2048 if small_vmem else 4096)
        tk = _pick_k_tile(K, tn, int(vmem_limit * 0.6), buffers=3)

    Mp, Np, Kp = _round_up(M, tm), _round_up(N, tn), _round_up(K, tk)
    if (Mp - M) or (Kp - K):
        a = jnp.pad(a, ((0, Mp - M), (0, Kp - K)))
    if (Kp - K) or (Np - N):
        b = jnp.pad(b, ((0, Kp - K), (0, Np - N)))
    if Np - N:
        bias = jnp.pad(bias, ((0, 0), (0, Np - N)))

    if single_k:
        grid = (Mp // tm, Np // tn)
        out = pl.pallas_call(
            functools.partial(_mm_bias_kernel_single, apply_relu=relu),
            out_shape=jax.ShapeDtypeStruct((Mp, Np), out_dtype),
            grid_spec=pltpu.PrefetchScalarGridSpec(
                num_scalar_prefetch=0,
                grid=grid,
                in_specs=[
                    pl.BlockSpec((tm, Kp), lambda i, j: (i, 0)),
                    pl.BlockSpec((Kp, tn), lambda i, j: (0, j)),
                    pl.BlockSpec((1, tn), lambda i, j: (0, j)),
                ],
                out_specs=pl.BlockSpec((tm, tn), lambda i, j: (i, j)),
            ),
            compiler_params=pltpu.CompilerParams(
                dimension_semantics=("parallel", "parallel"),
                vmem_limit_bytes=vmem_limit),
        )(a, b, bias)
    else:
        grid = (Mp // tm, Np // tn, Kp // tk)
        out = pl.pallas_call(
            functools.partial(_mm_bias_kernel_multi, apply_relu=relu),
            out_shape=jax.ShapeDtypeStruct((Mp, Np), out_dtype),
            grid_spec=pltpu.PrefetchScalarGridSpec(
                num_scalar_prefetch=0,
                grid=grid,
                in_specs=[
                    pl.BlockSpec((tm, tk), lambda i, j, k: (i, k)),
                    # 3-deep pipeline on the streamed weight: keeps the HBM
                    # DMA back-to-back when per-step compute is negligible.
                    pl.BlockSpec((tk, tn), lambda i, j, k: (k, j),
                                 pipeline_mode=pl.Buffered(3)),
                    pl.BlockSpec((1, tn), lambda i, j, k: (0, j)),
                ],
                out_specs=pl.BlockSpec((tm, tn), lambda i, j, k: (i, j)),
                scratch_shapes=[pltpu.VMEM((tm, tn), jnp.float32)],
            ),
            compiler_params=pltpu.CompilerParams(
                dimension_semantics=("parallel", "parallel", "arbitrary"),
                vmem_limit_bytes=vmem_limit),
        )(a, b, bias)

    if (Mp - M) or (Np - N):
        out = out[:M, :N]
    return out


# ----------------------------------------------------------------------------
# Glue: im2col conv (C>=64), max-pool, adaptive avg-pool (all NHWC).
# ----------------------------------------------------------------------------
def _im2col_nhwc(x, kh, kw, stride, pad):
    """x: (N,H,W,C) -> cols (N*Ho*Wo, kh*kw*C), lane-contiguous concat."""
    N, H, W, C = x.shape
    xp = jnp.pad(x, ((0, 0), (pad, pad), (pad, pad), (0, 0)))
    Ho = (H + 2 * pad - kh) // stride + 1
    Wo = (W + 2 * pad - kw) // stride + 1
    patches = []
    for i in range(kh):
        for j in range(kw):
            patches.append(xp[:,
                              i:i + stride * (Ho - 1) + 1:stride,
                              j:j + stride * (Wo - 1) + 1:stride,
                              :])                        # (N,Ho,Wo,C)
    cols = jnp.concatenate(patches, axis=-1)             # (N,Ho,Wo,kh*kw*C)
    return cols.reshape(N * Ho * Wo, kh * kw * C), Ho, Wo


def conv2d(x, w_gemm, b, *, kh, kw, stride, pad, relu):
    """x: (N,H,W,C) bf16; w_gemm: (kh*kw*C, O) bf16; b: (1,O) -> (N,Ho,Wo,O) bf16."""
    N = x.shape[0]
    cols, Ho, Wo = _im2col_nhwc(x, kh, kw, stride, pad)
    y = pallas_matmul_bias(cols, w_gemm, b, relu=relu, out_dtype=jnp.bfloat16)
    return y.reshape(N, Ho, Wo, -1)


def maxpool2d(x, k=3, s=2):
    return lax.reduce_window(x, jnp.array(-jnp.inf, x.dtype), lax.max,
                             (1, k, k, 1), (1, s, s, 1), "VALID")


def adaptive_avg_pool2d(x, out_h, out_w):
    """Matches torch.nn.AdaptiveAvgPool2d bin boundaries (NHWC)."""
    N, H, W, C = x.shape
    if H == 1 and W == 1:                                # pure broadcast
        return jnp.broadcast_to(x, (N, out_h, out_w, C))
    if H % out_h == 0 and W % out_w == 0:                # even bins: reshape+mean
        return x.reshape(N, out_h, H // out_h, out_w, W // out_w, C).mean(axis=(2, 4))
    rows = []                                            # general fallback
    for i in range(out_h):
        hs, he = (i * H) // out_h, -(-((i + 1) * H) // out_h)
        cols = []
        for j in range(out_w):
            ws, we = (j * W) // out_w, -(-((j + 1) * W) // out_w)
            cols.append(jnp.mean(x[:, hs:he, ws:we, :], axis=(1, 2)))
        rows.append(jnp.stack(cols, axis=1))
    return jnp.stack(rows, axis=1)


# ----------------------------------------------------------------------------
# FineTuner forward (input NCHW like PyTorch; NHWC bf16 internally)
# ----------------------------------------------------------------------------
def finetuner_forward(params, x):
    x = jnp.transpose(x, (0, 2, 3, 1)).astype(jnp.bfloat16)   # NCHW -> NHWC bf16

    # --- AlexNet features ---
    # conv1 (C=3): im2col would emit 121 three-lane masked copies; XLA's native
    # conv keeps it on the MXU with proper layout instead.
    x = lax.conv_general_dilated(
        x, params["conv1_w"], window_strides=(4, 4), padding=((2, 2), (2, 2)),
        dimension_numbers=("NHWC", "HWIO", "NHWC"),
        preferred_element_type=jnp.float32)
    x = jnp.maximum(x + params["conv1_b"], 0.0).astype(jnp.bfloat16)
    x = maxpool2d(x)
    x = conv2d(x, params["conv2_w"], params["conv2_b"], kh=5, kw=5, stride=1, pad=2, relu=True)
    x = maxpool2d(x)
    x = conv2d(x, params["conv3_w"], params["conv3_b"], kh=3, kw=3, stride=1, pad=1, relu=True)
    x = conv2d(x, params["conv4_w"], params["conv4_b"], kh=3, kw=3, stride=1, pad=1, relu=True)
    x = conv2d(x, params["conv5_w"], params["conv5_b"], kh=3, kw=3, stride=1, pad=1, relu=True)
    x = maxpool2d(x)

    # --- avgpool + flatten + truncated classifier ---
    # TODO(synk): torch Dropout in training mode not modeled; eval semantics used.
    N, H, W, C = x.shape
    folded = params.get("fc1_w_folded")
    if H == 1 and W == 1 and folded is not None and folded.shape[0] == C:
        # Adaptive pool of a 1x1 map just replicates the pixel 36x; FC1 then
        # collapses exactly onto the folded (C,4096) weight (36x less traffic).
        feat = x.reshape(N, C)
        x = pallas_matmul_bias(feat, folded, params["fc1_b"],
                               relu=True, out_dtype=jnp.bfloat16)
    else:
        x = adaptive_avg_pool2d(x, 6, 6)                           # (N,6,6,C)
        x = jnp.transpose(x, (0, 3, 1, 2)).reshape(N, -1)          # torch (c,h,w) flatten
        x = pallas_matmul_bias(x, params["fc1_w"], params["fc1_b"],
                               relu=True, out_dtype=jnp.bfloat16)

    # --- FineTuner head: Linear(4096, num_classes), f32 logits ---
    return pallas_matmul_bias(x, params["clf_w"], params["clf_b"],
                              relu=False, out_dtype=jnp.float32)


# ----------------------------------------------------------------------------
# Parameter init: random weights in PyTorch shapes, converted ONCE to GEMM
# layouts (K, N) bf16 and (1, N) f32 biases; no per-forward transpose/pad/cast.
# ----------------------------------------------------------------------------
def _conv_w_to_gemm(w):
    # (O, C, kh, kw) -> (kh*kw*C, O), matching im2col column order (i, j, c)
    O, C, kh, kw = w.shape
    return jnp.transpose(w, (2, 3, 1, 0)).reshape(kh * kw * C, O).astype(jnp.bfloat16)


def init_params(key, num_classes=50):
    torch_shapes = {
        "conv1_w": (64, 3, 11, 11),
        "conv2_w": (192, 64, 5, 5),
        "conv3_w": (384, 192, 3, 3),
        "conv4_w": (256, 384, 3, 3),
        "conv5_w": (256, 256, 3, 3),
        "fc1_w": (4096, 9216),
        "clf_w": (num_classes, 4096),
    }
    keys = jax.random.split(key, len(torch_shapes))
    raw = {}
    for k, (name, shp) in zip(keys, sorted(torch_shapes.items())):
        fan_in = 1
        for d in shp[1:]:
            fan_in *= d
        raw[name] = jax.random.normal(k, shp, jnp.float32) / jnp.sqrt(jnp.float32(fan_in))

    params = {}
    # conv1: HWIO bf16 for lax.conv
    params["conv1_w"] = jnp.transpose(raw["conv1_w"], (2, 3, 1, 0)).astype(jnp.bfloat16)
    params["conv1_b"] = jnp.zeros((1, 64), jnp.float32)
    # conv2-5: im2col GEMM layout
    out_ch = {2: 192, 3: 384, 4: 256, 5: 256}
    for i in range(2, 6):
        params[f"conv{i}_w"] = _conv_w_to_gemm(raw[f"conv{i}_w"])
        params[f"conv{i}_b"] = jnp.zeros((1, out_ch[i]), jnp.float32)
    # FC1 (9216 -> 4096): full GEMM weight + folded variant for 1x1 feature maps
    fc1_gemm_f32 = raw["fc1_w"].T                                   # (9216, 4096)
    params["fc1_w"] = fc1_gemm_f32.astype(jnp.bfloat16)
    params["fc1_w_folded"] = (fc1_gemm_f32.reshape(256, 36, 4096)
                              .sum(axis=1).astype(jnp.bfloat16))    # (256, 4096)
    params["fc1_b"] = jnp.zeros((1, 4096), jnp.float32)
    # classifier head
    params["clf_w"] = raw["clf_w"].T.astype(jnp.bfloat16)           # (4096, nc)
    params["clf_b"] = jnp.zeros((1, num_classes), jnp.float32)
    return params


if __name__ == "__main__":
    key = jax.random.PRNGKey(0)
    kp, kx = jax.random.split(key)
    params = init_params(kp, num_classes=50)
    # Smallest spatial size that survives AlexNet's conv/pool stack is 63.
    x = jax.random.normal(kx, (2, 3, 63, 63), jnp.float32)

    out = jax.block_until_ready(jax.jit(finetuner_forward)(params, x))
    assert out.shape == (2, 50) and out.dtype == jnp.float32
    print("KERNEL_OK")
</pallas_src>

<mosaic_0001>
module attributes {stable_mosaic.version = 11 : i64} {
  func.func @_mm_bias_kernel_single(%arg0: i32, %arg1: i32, %arg2: memref<98x1600xbf16, #tpu.memory_space<vmem>>, %arg3: memref<1600x192xbf16, #tpu.memory_space<vmem>>, %arg4: memref<1x192xf32, #tpu.memory_space<vmem>>, %arg5: memref<98x192xbf16, #tpu.memory_space<vmem>>) attributes {dimension_semantics = [#tpu.dimension_semantics<parallel>, #tpu.dimension_semantics<parallel>], iteration_bounds = array<i64: 1, 1>, scalar_prefetch = 0 : i64, scratch_operands = 0 : i64, tpu.core_type = #tpu.core_type<tc>, window_params = [{transform_indices = @transform_0, window_bounds = array<i64: 98, 1600>}, {transform_indices = @transform_1, window_bounds = array<i64: 1600, 192>}, {transform_indices = @transform_2, window_bounds = array<i64: 1, 192>}, {transform_indices = @transform_3, window_bounds = array<i64: 98, 192>}]} {
    %c0 = arith.constant 0 : index
    %c0_0 = arith.constant 0 : index
    %0 = vector.load %arg2[%c0, %c0_0] : memref<98x1600xbf16, #tpu.memory_space<vmem>>, vector<98x1600xbf16>
    %c0_1 = arith.constant 0 : index
    %c0_2 = arith.constant 0 : index
    %1 = vector.load %arg3[%c0_1, %c0_2] : memref<1600x192xbf16, #tpu.memory_space<vmem>>, vector<1600x192xbf16>
    %cst = arith.constant dense<0.000000e+00> : vector<98x192xf32>
    %2 = tpu.matmul %0, %1, %cst {dimension_numbers = #tpu.dot_dimension_numbers<[1], [0], [0], [1], [0, 0, 1, 1], [], []>} : vector<98x1600xbf16>, vector<1600x192xbf16>, vector<98x192xf32> -> vector<98x192xf32>
    %c0_3 = arith.constant 0 : index
    %c0_4 = arith.constant 0 : index
    %3 = vector.load %arg4[%c0_3, %c0_4] : memref<1x192xf32, #tpu.memory_space<vmem>>, vector<1x192xf32>
    %4 = vector.broadcast %3 : vector<1x192xf32> to vector<98x192xf32>
    %5 = arith.addf %2, %4 : vector<98x192xf32>
    %cst_5 = arith.constant 0.000000e+00 : f32
    %6 = vector.broadcast %cst_5 : f32 to vector<98x192xf32>
    %7 = arith.maximumf %5, %6 : vector<98x192xf32>
    %8 = arith.truncf %7 : vector<98x192xf32> to vector<98x192xbf16>
    %c0_6 = arith.constant 0 : index
    %c0_7 = arith.constant 0 : index
    %9 = vector.load %arg5[%c0_6, %c0_7] : memref<98x192xbf16, #tpu.memory_space<vmem>>, vector<98x192xbf16>
    tpu.vector_store %arg5[%c0_6, %c0_7], %8 {strides = array<i32>} : memref<98x192xbf16, #tpu.memory_space<vmem>>, vector<98x192xbf16>,
    return
  }
  func.func @transform_0(%arg0: i32, %arg1: i32) -> (i32, i32) {
    %c0_i32 = arith.constant 0 : i32
    %c0_i32_0 = arith.constant 0 : i32
    return %arg0, %c0_i32 : i32, i32
  }
  func.func @transform_1(%arg0: i32, %arg1: i32) -> (i32, i32) {
    %c0_i32 = arith.constant 0 : i32
    %c0_i32_0 = arith.constant 0 : i32
    return %c0_i32, %arg1 : i32, i32
  }
  func.func @transform_2(%arg0: i32, %arg1: i32) -> (i32, i32) {
    %c0_i32 = arith.constant 0 : i32
    %c0_i32_0 = arith.constant 0 : i32
    return %c0_i32, %arg1 : i32, i32
  }
  func.func @transform_3(%arg0: i32, %arg1: i32) -> (i32, i32) {
    %c0_i32 = arith.constant 0 : i32
    return %arg0, %arg1 : i32, i32
  }
}

module attributes {stable_mosaic.version = 11 : i64} {
  func.func @_mm_bias_kernel_single(%arg0: i32, %arg1: i32, %arg2: memref<18x1728xbf16, #tpu.memory_space<vmem>>, %arg3: memref<1728x384xbf16, #tpu.memory_space<vmem>>, %arg4: memref<1x384xf32, #tpu.memory_space<vmem>>, %arg5: memref<18x384xbf16, #tpu.memory_space<vmem>>) attributes {dimension_semantics = [#tpu.dimension_semantics<parallel>, #tpu.dimension_semantics<parallel>], iteration_bounds = array<i64: 1, 1>, scalar_prefetch = 0 : i64, scratch_operands = 0 : i64, tpu.core_type = #tpu.core_type<tc>, window_params = [{transform_indices = @transform_0, window_bounds = array<i64: 18, 1728>}, {transform_indices = @transform_1, window_bounds = array<i64: 1728, 384>}, {transform_indices = @transform_2, window_bounds = array<i64: 1, 384>}, {transform_indices = @transform_3, window_bounds = array<i64: 18, 384>}]} {
    %c0 = arith.constant 0 : index
    %c0_0 = arith.constant 0 : index
    %0 = vector.load %arg2[%c0, %c0_0] : memref<18x1728xbf16, #tpu.memory_space<vmem>>, vector<18x1728xbf16>
    %c0_1 = arith.constant 0 : index
    %c0_2 = arith.constant 0 : index
    %1 = vector.load %arg3[%c0_1, %c0_2] : memref<1728x384xbf16, #tpu.memory_space<vmem>>, vector<1728x384xbf16>
    %cst = arith.constant dense<0.000000e+00> : vector<18x384xf32>
    %2 = tpu.matmul %0, %1, %cst {dimension_numbers = #tpu.dot_dimension_numbers<[1], [0], [0], [1], [0, 0, 1, 1], [], []>} : vector<18x1728xbf16>, vector<1728x384xbf16>, vector<18x384xf32> -> vector<18x384xf32>
    %c0_3 = arith.constant 0 : index
    %c0_4 = arith.constant 0 : index
    %3 = vector.load %arg4[%c0_3, %c0_4] : memref<1x384xf32, #tpu.memory_space<vmem>>, vector<1x384xf32>
    %4 = vector.broadcast %3 : vector<1x384xf32> to vector<18x384xf32>
    %5 = arith.addf %2, %4 : vector<18x384xf32>
    %cst_5 = arith.constant 0.000000e+00 : f32
    %6 = vector.broadcast %cst_5 : f32 to vector<18x384xf32>
    %7 = arith.maximumf %5, %6 : vector<18x384xf32>
    %8 = arith.truncf %7 : vector<18x384xf32> to vector<18x384xbf16>
    %c0_6 = arith.constant 0 : index
    %c0_7 = arith.constant 0 : index
    %9 = vector.load %arg5[%c0_6, %c0_7] : memref<18x384xbf16, #tpu.memory_space<vmem>>, vector<18x384xbf16>
    tpu.vector_store %arg5[%c0_6, %c0_7], %8 {strides = array<i32>} : memref<18x384xbf16, #tpu.memory_space<vmem>>, vector<18x384xbf16>,
    return
  }
  func.func @transform_0(%arg0: i32, %arg1: i32) -> (i32, i32) {
    %c0_i32 = arith.constant 0 : i32
    %c0_i32_0 = arith.constant 0 : i32
    return %arg0, %c0_i32 : i32, i32
  }
  func.func @transform_1(%arg0: i32, %arg1: i32) -> (i32, i32) {
    %c0_i32 = arith.constant 0 : i32
    %c0_i32_0 = arith.constant 0 : i32
    return %c0_i32, %arg1 : i32, i32
  }
  func.func @transform_2(%arg0: i32, %arg1: i32) -> (i32, i32) {
    %c0_i32 = arith.constant 0 : i32
    %c0_i32_0 = arith.constant 0 : i32
    return %c0_i32, %arg1 : i32, i32
  }
  func.func @transform_3(%arg0: i32, %arg1: i32) -> (i32, i32) {
    %c0_i32 = arith.constant 0 : i32
    return %arg0, %arg1 : i32, i32
  }
}

module attributes {stable_mosaic.version = 11 : i64} {
  func.func @_mm_bias_kernel_single(%arg0: i32, %arg1: i32, %arg2: memref<18x3456xbf16, #tpu.memory_space<vmem>>, %arg3: memref<3456x256xbf16, #tpu.memory_space<vmem>>, %arg4: memref<1x256xf32, #tpu.memory_space<vmem>>, %arg5: memref<18x256xbf16, #tpu.memory_space<vmem>>) attributes {dimension_semantics = [#tpu.dimension_semantics<parallel>, #tpu.dimension_semantics<parallel>], iteration_bounds = array<i64: 1, 1>, scalar_prefetch = 0 : i64, scratch_operands = 0 : i64, tpu.core_type = #tpu.core_type<tc>, window_params = [{transform_indices = @transform_0, window_bounds = array<i64: 18, 3456>}, {transform_indices = @transform_1, window_bounds = array<i64: 3456, 256>}, {transform_indices = @transform_2, window_bounds = array<i64: 1, 256>}, {transform_indices = @transform_3, window_bounds = array<i64: 18, 256>}]} {
    %c0 = arith.constant 0 : index
    %c0_0 = arith.constant 0 : index
    %0 = vector.load %arg2[%c0, %c0_0] : memref<18x3456xbf16, #tpu.memory_space<vmem>>, vector<18x3456xbf16>
    %c0_1 = arith.constant 0 : index
    %c0_2 = arith.constant 0 : index
    %1 = vector.load %arg3[%c0_1, %c0_2] : memref<3456x256xbf16, #tpu.memory_space<vmem>>, vector<3456x256xbf16>
    %cst = arith.constant dense<0.000000e+00> : vector<18x256xf32>
    %2 = tpu.matmul %0, %1, %cst {dimension_numbers = #tpu.dot_dimension_numbers<[1], [0], [0], [1], [0, 0, 1, 1], [], []>} : vector<18x3456xbf16>, vector<3456x256xbf16>, vector<18x256xf32> -> vector<18x256xf32>
    %c0_3 = arith.constant 0 : index
    %c0_4 = arith.constant 0 : index
    %3 = vector.load %arg4[%c0_3, %c0_4] : memref<1x256xf32, #tpu.memory_space<vmem>>, vector<1x256xf32>
    %4 = vector.broadcast %3 : vector<1x256xf32> to vector<18x256xf32>
    %5 = arith.addf %2, %4 : vector<18x256xf32>
    %cst_5 = arith.constant 0.000000e+00 : f32
    %6 = vector.broadcast %cst_5 : f32 to vector<18x256xf32>
    %7 = arith.maximumf %5, %6 : vector<18x256xf32>
    %8 = arith.truncf %7 : vector<18x256xf32> to vector<18x256xbf16>
    %c0_6 = arith.constant 0 : index
    %c0_7 = arith.constant 0 : index
    %9 = vector.load %arg5[%c0_6, %c0_7] : memref<18x256xbf16, #tpu.memory_space<vmem>>, vector<18x256xbf16>
    tpu.vector_store %arg5[%c0_6, %c0_7], %8 {strides = array<i32>} : memref<18x256xbf16, #tpu.memory_space<vmem>>, vector<18x256xbf16>,
    return
  }
  func.func @transform_0(%arg0: i32, %arg1: i32) -> (i32, i32) {
    %c0_i32 = arith.constant 0 : i32
    %c0_i32_0 = arith.constant 0 : i32
    return %arg0, %c0_i32 : i32, i32
  }
  func.func @transform_1(%arg0: i32, %arg1: i32) -> (i32, i32) {
    %c0_i32 = arith.constant 0 : i32
    %c0_i32_0 = arith.constant 0 : i32
    return %c0_i32, %arg1 : i32, i32
  }
  func.func @transform_2(%arg0: i32, %arg1: i32) -> (i32, i32) {
    %c0_i32 = arith.constant 0 : i32
    %c0_i32_0 = arith.constant 0 : i32
    return %c0_i32, %arg1 : i32, i32
  }
  func.func @transform_3(%arg0: i32, %arg1: i32) -> (i32, i32) {
    %c0_i32 = arith.constant 0 : i32
    return %arg0, %arg1 : i32, i32
  }
}

module attributes {stable_mosaic.version = 11 : i64} {
  func.func @_mm_bias_kernel_single(%arg0: i32, %arg1: i32, %arg2: memref<18x2304xbf16, #tpu.memory_space<vmem>>, %arg3: memref<2304x256xbf16, #tpu.memory_space<vmem>>, %arg4: memref<1x256xf32, #tpu.memory_space<vmem>>, %arg5: memref<18x256xbf16, #tpu.memory_space<vmem>>) attributes {dimension_semantics = [#tpu.dimension_semantics<parallel>, #tpu.dimension_semantics<parallel>], iteration_bounds = array<i64: 1, 1>, scalar_prefetch = 0 : i64, scratch_operands = 0 : i64, tpu.core_type = #tpu.core_type<tc>, window_params = [{transform_indices = @transform_0, window_bounds = array<i64: 18, 2304>}, {transform_indices = @transform_1, window_bounds = array<i64: 2304, 256>}, {transform_indices = @transform_2, window_bounds = array<i64: 1, 256>}, {transform_indices = @transform_3, window_bounds = array<i64: 18, 256>}]} {
    %c0 = arith.constant 0 : index
    %c0_0 = arith.constant 0 : index
    %0 = vector.load %arg2[%c0, %c0_0] : memref<18x2304xbf16, #tpu.memory_space<vmem>>, vector<18x2304xbf16>
    %c0_1 = arith.constant 0 : index
    %c0_2 = arith.constant 0 : index
    %1 = vector.load %arg3[%c0_1, %c0_2] : memref<2304x256xbf16, #tpu.memory_space<vmem>>, vector<2304x256xbf16>
    %cst = arith.constant dense<0.000000e+00> : vector<18x256xf32>
    %2 = tpu.matmul %0, %1, %cst {dimension_numbers = #tpu.dot_dimension_numbers<[1], [0], [0], [1], [0, 0, 1, 1], [], []>} : vector<18x2304xbf16>, vector<2304x256xbf16>, vector<18x256xf32> -> vector<18x256xf32>
    %c0_3 = arith.constant 0 : index
    %c0_4 = arith.constant 0 : index
    %3 = vector.load %arg4[%c0_3, %c0_4] : memref<1x256xf32, #tpu.memory_space<vmem>>, vector<1x256xf32>
    %4 = vector.broadcast %3 : vector<1x256xf32> to vector<18x256xf32>
    %5 = arith.addf %2, %4 : vector<18x256xf32>
    %cst_5 = arith.constant 0.000000e+00 : f32
    %6 = vector.broadcast %cst_5 : f32 to vector<18x256xf32>
    %7 = arith.maximumf %5, %6 : vector<18x256xf32>
    %8 = arith.truncf %7 : vector<18x256xf32> to vector<18x256xbf16>
    %c0_6 = arith.constant 0 : index
    %c0_7 = arith.constant 0 : index
    %9 = vector.load %arg5[%c0_6, %c0_7] : memref<18x256xbf16, #tpu.memory_space<vmem>>, vector<18x256xbf16>
    tpu.vector_store %arg5[%c0_6, %c0_7], %8 {strides = array<i32>} : memref<18x256xbf16, #tpu.memory_space<vmem>>, vector<18x256xbf16>,
    return
  }
  func.func @transform_0(%arg0: i32, %arg1: i32) -> (i32, i32) {
    %c0_i32 = arith.constant 0 : i32
    %c0_i32_0 = arith.constant 0 : i32
    return %arg0, %c0_i32 : i32, i32
  }
  func.func @transform_1(%arg0: i32, %arg1: i32) -> (i32, i32) {
    %c0_i32 = arith.constant 0 : i32
    %c0_i32_0 = arith.constant 0 : i32
    return %c0_i32, %arg1 : i32, i32
  }
  func.func @transform_2(%arg0: i32, %arg1: i32) -> (i32, i32) {
    %c0_i32 = arith.constant 0 : i32
    %c0_i32_0 = arith.constant 0 : i32
    return %c0_i32, %arg1 : i32, i32
  }
  func.func @transform_3(%arg0: i32, %arg1: i32) -> (i32, i32) {
    %c0_i32 = arith.constant 0 : i32
    return %arg0, %arg1 : i32, i32
  }
}

module attributes {stable_mosaic.version = 11 : i64} {
  func.func @_mm_bias_kernel_single(%arg0: i32, %arg1: i32, %arg2: memref<2x256xbf16, #tpu.memory_space<vmem>>, %arg3: memref<256x2048xbf16, #tpu.memory_space<vmem>>, %arg4: memref<1x2048xf32, #tpu.memory_space<vmem>>, %arg5: memref<2x2048xbf16, #tpu.memory_space<vmem>>) attributes {dimension_semantics = [#tpu.dimension_semantics<parallel>, #tpu.dimension_semantics<parallel>], iteration_bounds = array<i64: 1, 2>, scalar_prefetch = 0 : i64, scratch_operands = 0 : i64, tpu.core_type = #tpu.core_type<tc>, window_params = [{transform_indices = @transform_0, window_bounds = array<i64: 2, 256>}, {transform_indices = @transform_1, window_bounds = array<i64: 256, 2048>}, {transform_indices = @transform_2, window_bounds = array<i64: 1, 2048>}, {transform_indices = @transform_3, window_bounds = array<i64: 2, 2048>}]} {
    %c0 = arith.constant 0 : index
    %c0_0 = arith.constant 0 : index
    %0 = vector.load %arg2[%c0, %c0_0] : memref<2x256xbf16, #tpu.memory_space<vmem>>, vector<2x256xbf16>
    %c0_1 = arith.constant 0 : index
    %c0_2 = arith.constant 0 : index
    %1 = vector.load %arg3[%c0_1, %c0_2] : memref<256x2048xbf16, #tpu.memory_space<vmem>>, vector<256x2048xbf16>
    %cst = arith.constant dense<0.000000e+00> : vector<2x2048xf32>
    %2 = tpu.matmul %0, %1, %cst {dimension_numbers = #tpu.dot_dimension_numbers<[1], [0], [0], [1], [0, 0, 1, 1], [], []>} : vector<2x256xbf16>, vector<256x2048xbf16>, vector<2x2048xf32> -> vector<2x2048xf32>
    %c0_3 = arith.constant 0 : index
    %c0_4 = arith.constant 0 : index
    %3 = vector.load %arg4[%c0_3, %c0_4] : memref<1x2048xf32, #tpu.memory_space<vmem>>, vector<1x2048xf32>
    %4 = vector.broadcast %3 : vector<1x2048xf32> to vector<2x2048xf32>
    %5 = arith.addf %2, %4 : vector<2x2048xf32>
    %cst_5 = arith.constant 0.000000e+00 : f32
    %6 = vector.broadcast %cst_5 : f32 to vector<2x2048xf32>
    %7 = arith.maximumf %5, %6 : vector<2x2048xf32>
    %8 = arith.truncf %7 : vector<2x2048xf32> to vector<2x2048xbf16>
    %c0_6 = arith.constant 0 : index
    %c0_7 = arith.constant 0 : index
    %9 = vector.load %arg5[%c0_6, %c0_7] : memref<2x2048xbf16, #tpu.memory_space<vmem>>, vector<2x2048xbf16>
    tpu.vector_store %arg5[%c0_6, %c0_7], %8 {strides = array<i32>} : memref<2x2048xbf16, #tpu.memory_space<vmem>>, vector<2x2048xbf16>,
    return
  }
  func.func @transform_0(%arg0: i32, %arg1: i32) -> (i32, i32) {
    %c0_i32 = arith.constant 0 : i32
    %c0_i32_0 = arith.constant 0 : i32
    return %arg0, %c0_i32 : i32, i32
  }
  func.func @transform_1(%arg0: i32, %arg1: i32) -> (i32, i32) {
    %c0_i32 = arith.constant 0 : i32
    %c0_i32_0 = arith.constant 0 : i32
    return %c0_i32, %arg1 : i32, i32
  }
  func.func @transform_2(%arg0: i32, %arg1: i32) -> (i32, i32) {
    %c0_i32 = arith.constant 0 : i32
    %c0_i32_0 = arith.constant 0 : i32
    return %c0_i32, %arg1 : i32, i32
  }
  func.func @transform_3(%arg0: i32, %arg1: i32) -> (i32, i32) {
    %c0_i32 = arith.constant 0 : i32
    return %arg0, %arg1 : i32, i32
  }
}

module attributes {stable_mosaic.version = 11 : i64} {
  func.func @_mm_bias_kernel_single(%arg0: i32, %arg1: i32, %arg2: memref<2x4096xbf16, #tpu.memory_space<vmem>>, %arg3: memref<4096x50xbf16, #tpu.memory_space<vmem>>, %arg4: memref<1x50xf32, #tpu.memory_space<vmem>>, %arg5: memref<2x50xf32, #tpu.memory_space<vmem>>) attributes {dimension_semantics = [#tpu.dimension_semantics<parallel>, #tpu.dimension_semantics<parallel>], iteration_bounds = array<i64: 1, 1>, scalar_prefetch = 0 : i64, scratch_operands = 0 : i64, tpu.core_type = #tpu.core_type<tc>, window_params = [{transform_indices = @transform_0, window_bounds = array<i64: 2, 4096>}, {transform_indices = @transform_1, window_bounds = array<i64: 4096, 50>}, {transform_indices = @transform_2, window_bounds = array<i64: 1, 50>}, {transform_indices = @transform_3, window_bounds = array<i64: 2, 50>}]} {
    %c0 = arith.constant 0 : index
    %c0_0 = arith.constant 0 : index
    %0 = vector.load %arg2[%c0, %c0_0] : memref<2x4096xbf16, #tpu.memory_space<vmem>>, vector<2x4096xbf16>
    %c0_1 = arith.constant 0 : index
    %c0_2 = arith.constant 0 : index
    %1 = vector.load %arg3[%c0_1, %c0_2] : memref<4096x50xbf16, #tpu.memory_space<vmem>>, vector<4096x50xbf16>
    %cst = arith.constant dense<0.000000e+00> : vector<2x50xf32>
    %2 = tpu.matmul %0, %1, %cst {dimension_numbers = #tpu.dot_dimension_numbers<[1], [0], [0], [1], [0, 0, 1, 1], [], []>} : vector<2x4096xbf16>, vector<4096x50xbf16>, vector<2x50xf32> -> vector<2x50xf32>
    %c0_3 = arith.constant 0 : index
    %c0_4 = arith.constant 0 : index
    %3 = vector.load %arg4[%c0_3, %c0_4] : memref<1x50xf32, #tpu.memory_space<vmem>>, vector<1x50xf32>
    %4 = vector.broadcast %3 : vector<1x50xf32> to vector<2x50xf32>
    %5 = arith.addf %2, %4 : vector<2x50xf32>
    %c0_5 = arith.constant 0 : index
    %c0_6 = arith.constant 0 : index
    %6 = vector.load %arg5[%c0_5, %c0_6] : memref<2x50xf32, #tpu.memory_space<vmem>>, vector<2x50xf32>
    tpu.vector_store %arg5[%c0_5, %c0_6], %5 {strides = array<i32>} : memref<2x50xf32, #tpu.memory_space<vmem>>, vector<2x50xf32>,
    return
  }
  func.func @transform_0(%arg0: i32, %arg1: i32) -> (i32, i32) {
    %c0_i32 = arith.constant 0 : i32
    %c0_i32_0 = arith.constant 0 : i32
    return %arg0, %c0_i32 : i32, i32
  }
  func.func @transform_1(%arg0: i32, %arg1: i32) -> (i32, i32) {
    %c0_i32 = arith.constant 0 : i32
    %c0_i32_0 = arith.constant 0 : i32
    return %c0_i32, %arg1 : i32, i32
  }
  func.func @transform_2(%arg0: i32, %arg1: i32) -> (i32, i32) {
    %c0_i32 = arith.constant 0 : i32
    %c0_i32_0 = arith.constant 0 : i32
    return %c0_i32, %arg1 : i32, i32
  }
  func.func @transform_3(%arg0: i32, %arg1: i32) -> (i32, i32) {
    %c0_i32 = arith.constant 0 : i32
    return %arg0, %arg1 : i32, i32
  }
}

</mosaic_0001>

<bundles_post_ra>
// kernel: finetuner_forward.6
= control target key start
LH: loop header
LB: loop body
LE: loop exit
PB: predicated region body
PF: predicated region fallthrough
CT: control target
= control target key end

     0   :  { %vm1753_vm0 = vcmask 523264   ;;  %vm2588_vm1 = vcmask 1043456   ;;  %vm2589_vm2 = vcmask 523268   ;;  %vm2603_vm4 = vcmask 1040384   ;;  %s4773_s1 = inlined_call_operand.vmem [shape: bf16[1600,192], index: 1, kind: input, shape index: {}]   ;;  %s4774_s0 = inlined_call_operand.vmem [shape: bf16[98,1600], index: 0, kind: input, shape index: {}]   ;;  %s4775_s2 = inlined_call_operand.vmem [shape: f32[1,192], index: 2, kind: input, shape index: {}]   ;;  %s4776_s3 = inlined_call_operand.vmem [shape: bf16[98,192], index: 3, kind: output, shape index: {}]  }
   0x1   :  { %v3156_v0 = vld [vmem:[%s4773_s1 + $0x4] ss:$8 sps:$4 sm:$0xff]   ;;  %v3160_v2 = vld [vmem:[%s4773_s1] ss:$8 sps:$4 sm:$0xff]   ;;  %v3162_v4 = vld [vmem:[%s4773_s1 + $0x14] ss:$8 sps:$4 sm:$0xff]  }
   0x2   :  { %v3158_v1 = vld [vmem:[%s4773_s1 + $0x304] ss:$8 sps:$4 sm:$0xff]   ;;  %1775 = vmatprep.subr.bf16.mxu1 %v3156_v0  ;;  %v3161_v3 = vld [vmem:[%s4773_s1 + $0x300] ss:$8 sps:$4 sm:$0xff]   ;;  %v3164_v5 = vld [vmem:[%s4773_s1 + $0x314] ss:$8 sps:$4 sm:$0xff]  }
   0x3   :  { %2078 = vmatprep.subr.bf16.mxu0 %v3158_v1  ;;  %1776 = vmatpush1.bf16.msra.mxu1 %v3160_v2  ;;  %v3166_v6 = vld [vmem:[%s4773_s1 + $0x10] ss:$8 sps:$4 sm:$0xff]   ;;  %v3168_v8 = vld [vmem:[%s4773_s1 + $0x24] ss:$8 sps:$4 sm:$0xff]   ;;  %v3172_v10 = vld [vmem:[%s4773_s1 + $0x20] ss:$8 sps:$4 sm:$0xff]  }
   0x4   :  { %2079 = vmatpush1.bf16.msra.mxu0 %v3161_v3  ;;  %1777 = vmatprep.subr.bf16.mxu1 %v3162_v4  ;;  %v3167_v7 = vld [vmem:[%s4773_s1 + $0x310] ss:$8 sps:$4 sm:$0xff]   ;;  %v3170_v9 = vld [vmem:[%s4773_s1 + $0x324] ss:$8 sps:$4 sm:$0xff]   ;;  %v3173_v11 = vld [vmem:[%s4773_s1 + $0x320] ss:$8 sps:$4 sm:$0xff]  }
   0x5   :  { %2080 = vmatprep.subr.bf16.mxu0 %v3164_v5  ;;  %v3174_v12 = vld [vmem:[%s4773_s1 + $0x34] ss:$8 sps:$4 sm:$0xff]   ;;  %v3178_v14 = vld [vmem:[%s4773_s1 + $0x30] ss:$8 sps:$4 sm:$0xff]   ;;  %v3180_v16 = vld [vmem:[%s4773_s1 + $0x44] ss:$8 sps:$4 sm:$0xff]  }
   0x6   :  { %v3176_v13 = vld [vmem:[%s4773_s1 + $0x334] ss:$8 sps:$4 sm:$0xff]   ;;  %v3179_v15 = vld [vmem:[%s4773_s1 + $0x330] ss:$8 sps:$4 sm:$0xff]   ;;  %v3182_v17 = vld [vmem:[%s4773_s1 + $0x344] ss:$8 sps:$4 sm:$0xff]  }
   0x7   :  { %1778 = vmatpush1.bf16.msra.mxu1 %v3166_v6  ;;  %v3184_v18 = vld [vmem:[%s4773_s1 + $0x40] ss:$8 sps:$4 sm:$0xff]   ;;  %v3186_v20 = vld [vmem:[%s4773_s1 + $0x54] ss:$8 sps:$4 sm:$0xff]   ;;  %v3190_v22 = vld [vmem:[%s4773_s1 + $0x50] ss:$8 sps:$4 sm:$0xff]  }
   0x8   :  { %2081 = vmatpush1.bf16.msra.mxu0 %v3167_v7  ;;  %1779 = vmatprep.subr.bf16.mxu1 %v3168_v8  ;;  %v3185_v19 = vld [vmem:[%s4773_s1 + $0x340] ss:$8 sps:$4 sm:$0xff]   ;;  %v3188_v21 = vld [vmem:[%s4773_s1 + $0x354] ss:$8 sps:$4 sm:$0xff]   ;;  %v3191_v23 = vld [vmem:[%s4773_s1 + $0x350] ss:$8 sps:$4 sm:$0xff]  }
   0x9   :  { %2082 = vmatprep.subr.bf16.mxu0 %v3170_v9  ;;  %v3192_v24 = vld [vmem:[%s4773_s1 + $0x64] ss:$8 sps:$4 sm:$0xff]   ;;  %v3196_v26 = vld [vmem:[%s4773_s1 + $0x60] ss:$8 sps:$4 sm:$0xff]   ;;  %v3198_v28 = vld [vmem:[%s4773_s1 + $0x74] ss:$8 sps:$4 sm:$0xff]  }
   0xa   :  { %v3194_v25 = vld [vmem:[%s4773_s1 + $0x364] ss:$8 sps:$4 sm:$0xff]   ;;  %v3197_v27 = vld [vmem:[%s4773_s1 + $0x360] ss:$8 sps:$4 sm:$0xff]   ;;  %v3200_v29 = vld [vmem:[%s4773_s1 + $0x374] ss:$8 sps:$4 sm:$0xff]  }
   0xb   :  { %1780 = vmatpush1.bf16.msra.mxu1 %v3172_v10  ;;  %v3202_v30 = vld [vmem:[%s4773_s1 + $0x70] ss:$8 sps:$4 sm:$0xff]   ;;  %v3204_v32 = vld [vmem:[%s4773_s1 + $0x84] ss:$8 sps:$4 sm:$0xff]   ;;  %v3208_v34 = vld [vmem:[%s4773_s1 + $0x80] ss:$8 sps:$4 sm:$0xff]  }
   0xc   :  { %2083 = vmatpush1.bf16.msra.mxu0 %v3173_v11  ;;  %1781 = vmatprep.subr.bf16.mxu1 %v3174_v12  ;;  %v3203_v31 = vld [vmem:[%s4773_s1 + $0x370] ss:$8 sps:$4 sm:$0xff]   ;;  %v3206_v33 = vld [vmem:[%s4773_s1 + $0x384] ss:$8 sps:$4 sm:$0xff]   ;;  %v3209_v35 = vld [vmem:[%s4773_s1 + $0x380] ss:$8 sps:$4 sm:$0xff]  }
   0xd   :  { %2084 = vmatprep.subr.bf16.mxu0 %v3176_v13  ;;  %v3210_v36 = vld [vmem:[%s4773_s1 + $0x94] ss:$8 sps:$4 sm:$0xff]   ;;  %v3214_v38 = vld [vmem:[%s4773_s1 + $0x90] ss:$8 sps:$4 sm:$0xff]   ;;  %v3216_v40 = vld [vmem:[%s4773_s1 + $0xa4] ss:$8 sps:$4 sm:$0xff]  }
   0xe   :  { %v3212_v37 = vld [vmem:[%s4773_s1 + $0x394] ss:$8 sps:$4 sm:$0xff]   ;;  %v3215_v39 = vld [vmem:[%s4773_s1 + $0x390] ss:$8 sps:$4 sm:$0xff]   ;;  %v3218_v41 = vld [vmem:[%s4773_s1 + $0x3a4] ss:$8 sps:$4 sm:$0xff]  }
   0xf   :  { %1782 = vmatpush1.bf16.msra.mxu1 %v3178_v14  ;;  %v3220_v42 = vld [vmem:[%s4773_s1 + $0xa0] ss:$8 sps:$4 sm:$0xff]   ;;  %v3222_v44 = vld [vmem:[%s4773_s1 + $0xb4] ss:$8 sps:$4 sm:$0xff]   ;;  %v3226_v46 = vld [vmem:[%s4773_s1 + $0xb0] ss:$8 sps:$4 sm:$0xff]  }
  0x10   :  { %2085 = vmatpush1.bf16.msra.mxu0 %v3179_v15  ;;  %1783 = vmatprep.subr.bf16.mxu1 %v3180_v16  ;;  %v3221_v43 = vld [vmem:[%s4773_s1 + $0x3a0] ss:$8 sps:$4 sm:$0xff]   ;;  %v3224_v45 = vld [vmem:[%s4773_s1 + $0x3b4] ss:$8 sps:$4 sm:$0xff]   ;;  %v3227_v47 = vld [vmem:[%s4773_s1 + $0x3b0] ss:$8 sps:$4 sm:$0xff]  }
  0x11   :  { %2086 = vmatprep.subr.bf16.mxu0 %v3182_v17  ;;  %v3254_v48 = vld [vmem:[%s4774_s0 + $0x4] ss:$52 sps:$4 sm:$0xff]   ;;  %v3260_v51 = vld [vmem:[%s4774_s0 + $0x1c] ss:$52 sps:$4 sm:$0xff]   ;;  %v3232_v52 = vld [vmem:[%s4773_s1 + $0xc0] ss:$8 sps:$4 sm:$0xff]  }
  0x12   :  { %v3228_v49 = vld [vmem:[%s4773_s1 + $0xc4] ss:$8 sps:$4 sm:$0xff]   ;;  %1807 = vmatprep.mubr.bf16.mxu1 %v3254_v48  ;;  %v3233_v53 = vld [vmem:[%s4773_s1 + $0x3c0] ss:$8 sps:$4 sm:$0xff]   ;;  %v3234_v54 = vld [vmem:[%s4773_s1 + $0xd4] ss:$8 sps:$4 sm:$0xff]   ;;  %2110 = vmatprep.mubr.bf16.mxu0 %v3260_v51 }
  0x13   :  { %1784 = vmatpush1.bf16.msra.mxu1 %v3184_v18  ;;  %v3230_v50 = vld [vmem:[%s4773_s1 + $0x3c4] ss:$8 sps:$4 sm:$0xff]   ;;  %v3236_v55 = vld [vmem:[%s4773_s1 + $0x3d4] ss:$8 sps:$4 sm:$0xff]   ;;  %v3238_v56 = vld [vmem:[%s4773_s1 + $0xd0] ss:$8 sps:$4 sm:$0xff]  }
  0x14   :  { %2087 = vmatpush1.bf16.msra.mxu0 %v3185_v19  ;;  %1785 = vmatprep.subr.bf16.mxu1 %v3186_v20  ;;  %v3239_v57 = vld [vmem:[%s4773_s1 + $0x3d0] ss:$8 sps:$4 sm:$0xff]   ;;  %v3240_v58 = vld [vmem:[%s4773_s1 + $0xe4] ss:$8 sps:$4 sm:$0xff]   ;;  %v3244_v60 = vld [vmem:[%s4773_s1 + $0xe0] ss:$8 sps:$4 sm:$0xff]  }
  0x15   :  { %2088 = vmatprep.subr.bf16.mxu0 %v3188_v21  ;;  %v3242_v59 = vld [vmem:[%s4773_s1 + $0x3e4] ss:$8 sps:$4 sm:$0xff]   ;;  %v3245_v61 = vld [vmem:[%s4773_s1 + $0x3e0] ss:$8 sps:$4 sm:$0xff]   ;;  %v3246_v62 = vld [vmem:[%s4773_s1 + $0xf4] ss:$8 sps:$4 sm:$0xff]  }
  0x16   :  { %v3248_v63 = vld [vmem:[%s4773_s1 + $0x3f4] ss:$8 sps:$4 sm:$0xff]   ;;  %v3250_v0 = vld [vmem:[%s4773_s1 + $0xf0] ss:$8 sps:$4 sm:$0xff]   ;;  %v3257_v2 = vld [vmem:[%s4773_s1 + $0x104] ss:$8 sps:$4 sm:$0xff]  }
  0x17   :  { %1786 = vmatpush1.bf16.msra.mxu1 %v3190_v22  ;;  %v3251_v1 = vld [vmem:[%s4773_s1 + $0x3f0] ss:$8 sps:$4 sm:$0xff]   ;;  %v3252_v3 = vld [vmem:[%s4774_s0] ss:$52 sps:$4 sm:$0xff]   ;;  %v3263_v4 = vld [vmem:[%s4773_s1 + $0x404] ss:$8 sps:$4 sm:$0xff]  }
  0x18   :  { %2089 = vmatpush1.bf16.msra.mxu0 %v3191_v23  ;;  %1787 = vmatprep.subr.bf16.mxu1 %v3192_v24  ;;  %v3255_v5 = vld [vmem:[%s4773_s1 + $0x100] ss:$8 sps:$4 sm:$0xff]   ;;  %v3258_v6 = vld [vmem:[%s4774_s0 + $0x18] ss:$52 sps:$4 sm:$0xff]   ;;  %v3266_v8 = vld [vmem:[%s4773_s1 + $0x114] ss:$8 sps:$4 sm:$0xff]  }
  0x19   :  { %2090 = vmatprep.subr.bf16.mxu0 %v3194_v25  ;;  %v3261_v7 = vld [vmem:[%s4773_s1 + $0x400] ss:$8 sps:$4 sm:$0xff]   ;;  %v3269_v9 = vld [vmem:[%s4773_s1 + $0x414] ss:$8 sps:$4 sm:$0xff]   ;;  %v3282_v10 = vld [vmem:[%s4774_s0 + $0x84] ss:$52 sps:$4 sm:$0xff]  }
  0x1a   :  { %v3284_v11 = vld [vmem:[%s4774_s0 + $0x6c] ss:$52 sps:$4 sm:$0xff]   ;;  %v3264_v12 = vld [vmem:[%s4773_s1 + $0x110] ss:$8 sps:$4 sm:$0xff]   ;;  %v3278_v18 = vld [vmem:[%s4773_s1 + $0x134] ss:$8 sps:$4 sm:$0xff]  }
  0x1b   :  { %1788 = vmatpush1.bf16.msra.mxu1 %v3196_v26  ;;  %v3267_v13 = vld [vmem:[%s4773_s1 + $0x410] ss:$8 sps:$4 sm:$0xff]   ;;  %v3272_v14 = vld [vmem:[%s4773_s1 + $0x124] ss:$8 sps:$4 sm:$0xff]   ;;  %v3270_v16 = vld [vmem:[%s4773_s1 + $0x120] ss:$8 sps:$4 sm:$0xff]  }
  0x1c   :  { %2091 = vmatpush1.bf16.msra.mxu0 %v3197_v27  ;;  %1789 = vmatprep.subr.bf16.mxu1 %v3198_v28  ;;  %v3275_v15 = vld [vmem:[%s4773_s1 + $0x424] ss:$8 sps:$4 sm:$0xff]   ;;  %v3273_v17 = vld [vmem:[%s4773_s1 + $0x420] ss:$8 sps:$4 sm:$0xff]   ;;  %v3281_v21 = vld [vmem:[%s4773_s1 + $0x434] ss:$8 sps:$4 sm:$0xff]  }
  0x1d   :  { %2092 = vmatprep.subr.bf16.mxu0 %v3200_v29  ;;  %v3289_v19 = vld [vmem:[%s4774_s0 + $0x80] ss:$52 sps:$4 sm:$0xff]   ;;  %v3293_v20 = vld [vmem:[%s4774_s0 + $0x68] ss:$52 sps:$4 sm:$0xff]   ;;  %v3276_v24 = vld [vmem:[%s4773_s1 + $0x130] ss:$8 sps:$4 sm:$0xff]  }
  0x1e   :  { %v3300_v22 = vld [vmem:[%s4774_s0 + $0xec] ss:$52 sps:$4 sm:$0xff]   ;;  %v3302_v23 = vld [vmem:[%s4774_s0 + $0xd4] ss:$52 sps:$4 sm:$0xff]   ;;  %v3279_v25 = vld [vmem:[%s4773_s1 + $0x430] ss:$8 sps:$4 sm:$0xff]  }
  0x1f   :  { %1790 = vmatpush1.bf16.msra.mxu1 %v3202_v30  ;;  %v3288_v26 = vld [vmem:[%s4773_s1 + $0x144] ss:$8 sps:$4 sm:$0xff]   ;;  %v3286_v28 = vld [vmem:[%s4773_s1 + $0x140] ss:$8 sps:$4 sm:$0xff]   ;;  %v3296_v30 = vld [vmem:[%s4773_s1 + $0x154] ss:$8 sps:$4 sm:$0xff]  }
  0x20   :  { %2093 = vmatpush1.bf16.msra.mxu0 %v3203_v31  ;;  %1791 = vmatprep.subr.bf16.mxu1 %v3204_v32  ;;  %v3292_v27 = vld [vmem:[%s4773_s1 + $0x444] ss:$8 sps:$4 sm:$0xff]   ;;  %v3290_v29 = vld [vmem:[%s4773_s1 + $0x440] ss:$8 sps:$4 sm:$0xff]   ;;  %v3312_v48 = vld [vmem:[%s4773_s1 + $0x170] ss:$8 sps:$4 sm:$0xff]  }
  0x21   :  { %2094 = vmatprep.subr.bf16.mxu0 %v3206_v33  ;;  %v3307_v31 = vld [vmem:[%s4774_s0 + $0xe8] ss:$52 sps:$4 sm:$0xff]   ;;  %v3311_v32 = vld [vmem:[%s4774_s0 + $0xd0] ss:$52 sps:$4 sm:$0xff]   ;;  %vm4646_vm3 = vmor %vm2589_vm2, %vm2588_vm1  ;;  %vm2604_vm5 = vcmask 520196  }
  0x22   :  { %v3299_v33 = vld [vmem:[%s4773_s1 + $0x454] ss:$8 sps:$4 sm:$0xff]   ;;  %v3328_v51 = vld [vmem:[%s4773_s1 + $0x484] ss:$8 sps:$4 sm:$0xff]   ;;  %vm2605_vm6 = vmor %vm2604_vm5, %vm2603_vm4 }
  0x23   :  { %1792 = vmatpush1.bf16.msra.mxu1 %v3208_v34  ;;  %v3318_v34 = vld [vmem:[%s4774_s0 + $0x154] ss:$52 sps:$4 sm:$0xff]  }
  0x24   :  { %2095 = vmatpush1.bf16.msra.mxu0 %v3209_v35  ;;  %1793 = vmatprep.subr.bf16.mxu1 %v3210_v36  ;;  %v3320_v35 = vld [vmem:[%s4774_s0 + $0x13c] ss:$52 sps:$4 sm:$0xff]  }
  0x25   :  { %2096 = vmatprep.subr.bf16.mxu0 %v3212_v37  ;;  %v3294_v36 = vld [vmem:[%s4773_s1 + $0x150] ss:$8 sps:$4 sm:$0xff]  }
  0x26   :  { %v3297_v37 = vld [vmem:[%s4773_s1 + $0x450] ss:$8 sps:$4 sm:$0xff]  }
  0x27   :  { %1794 = vmatpush1.bf16.msra.mxu1 %v3214_v38  ;;  %v3306_v38 = vld [vmem:[%s4773_s1 + $0x164] ss:$8 sps:$4 sm:$0xff]  }
  0x28   :  { %2097 = vmatpush1.bf16.msra.mxu0 %v3215_v39  ;;  %1795 = vmatprep.subr.bf16.mxu1 %v3216_v40  ;;  %v3310_v39 = vld [vmem:[%s4773_s1 + $0x464] ss:$8 sps:$4 sm:$0xff]   ;;  %v3304_v40 = vld [vmem:[%s4773_s1 + $0x160] ss:$8 sps:$4 sm:$0xff]  }
  0x29   :  { %2098 = vmatprep.subr.bf16.mxu0 %v3218_v41  ;;  %v3308_v41 = vld [vmem:[%s4773_s1 + $0x460] ss:$8 sps:$4 sm:$0xff]  }
  0x2b   :  { %1796 = vmatpush1.bf16.msra.mxu1 %v3220_v42  ;;  %v3314_v42 = vld [vmem:[%s4773_s1 + $0x174] ss:$8 sps:$4 sm:$0xff]  }
  0x2c   :  { %2099 = vmatpush1.bf16.msra.mxu0 %v3221_v43  ;;  %1797 = vmatprep.subr.bf16.mxu1 %v3222_v44  ;;  %v3325_v43 = vld [vmem:[%s4774_s0 + $0x150] ss:$52 sps:$4 sm:$0xff]   ;;  %v3329_v44 = vld [vmem:[%s4774_s0 + $0x138] ss:$52 sps:$4 sm:$0xff]  }
  0x2d   :  { %2100 = vmatprep.subr.bf16.mxu0 %v3224_v45  ;;  %v3317_v45 = vld [vmem:[%s4773_s1 + $0x474] ss:$8 sps:$4 sm:$0xff]  }
  0x2f   :  { %1798 = vmatpush1.bf16.msra.mxu1 %v3226_v46  ;;  %v3336_v46 = vld [vmem:[%s4774_s0 + $0x1bc] ss:$52 sps:$4 sm:$0xff]  }
  0x30   :  { %2101 = vmatpush1.bf16.msra.mxu0 %v3227_v47  ;;  %1799 = vmatprep.subr.bf16.mxu1 %v3228_v49  ;;  %v3338_v47 = vld [vmem:[%s4774_s0 + $0x1a4] ss:$52 sps:$4 sm:$0xff]  }
  0x31   :  { %2102 = vmatprep.subr.bf16.mxu0 %v3230_v50  ;;  %v3315_v49 = vld [vmem:[%s4773_s1 + $0x470] ss:$8 sps:$4 sm:$0xff]   ;;  %v3324_v50 = vld [vmem:[%s4773_s1 + $0x184] ss:$8 sps:$4 sm:$0xff]  }
  0x33   :  { %1800 = vmatpush1.bf16.msra.mxu1 %v3232_v52  ;;  %v3322_v52 = vld [vmem:[%s4773_s1 + $0x180] ss:$8 sps:$4 sm:$0xff]  }
  0x34   :  { %2103 = vmatpush1.bf16.msra.mxu0 %v3233_v53  ;;  %1801 = vmatprep.subr.bf16.mxu1 %v3234_v54  ;;  %v3343_v53 = vld [vmem:[%s4774_s0 + $0x1b8] ss:$52 sps:$4 sm:$0xff]   ;;  %v3347_v54 = vld [vmem:[%s4774_s0 + $0x1a0] ss:$52 sps:$4 sm:$0xff]  }
  0x35   :  { %2104 = vmatprep.subr.bf16.mxu0 %v3236_v55  ;;  %v3326_v55 = vld [vmem:[%s4773_s1 + $0x480] ss:$8 sps:$4 sm:$0xff]  }
  0x37   :  { %1802 = vmatpush1.bf16.msra.mxu1 %v3238_v56  ;;  %v3332_v56 = vld [vmem:[%s4773_s1 + $0x194] ss:$8 sps:$4 sm:$0xff]  }
  0x38   :  { %2105 = vmatpush1.bf16.msra.mxu0 %v3239_v57  ;;  %1803 = vmatprep.subr.bf16.mxu1 %v3240_v58  ;;  %v3335_v57 = vld [vmem:[%s4773_s1 + $0x494] ss:$8 sps:$4 sm:$0xff]   ;;  %v3354_v58 = vld [vmem:[%s4774_s0 + $0x224] ss:$52 sps:$4 sm:$0xff]  }
  0x39   :  { %2106 = vmatprep.subr.bf16.mxu0 %v3242_v59  ;;  %v3330_v59 = vld [vmem:[%s4773_s1 + $0x190] ss:$8 sps:$4 sm:$0xff]  }
  0x3b   :  { %1804 = vmatpush1.bf16.msra.mxu1 %v3244_v60  ;;  %v3356_v60 = vld [vmem:[%s4774_s0 + $0x20c] ss:$52 sps:$4 sm:$0xff]  }
  0x3c   :  { %2107 = vmatpush1.bf16.msra.mxu0 %v3245_v61  ;;  %1805 = vmatprep.subr.bf16.mxu1 %v3246_v62  ;;  %v3333_v61 = vld [vmem:[%s4773_s1 + $0x490] ss:$8 sps:$4 sm:$0xff]   ;;  %v3342_v62 = vld [vmem:[%s4773_s1 + $0x1a4] ss:$8 sps:$4 sm:$0xff]  }
  0x3d   :  { %2108 = vmatprep.subr.bf16.mxu0 %v3248_v63  ;;  %v3346_v63 = vld [vmem:[%s4773_s1 + $0x4a4] ss:$8 sps:$4 sm:$0xff]  }
  0x3f   :  { %1806 = vmatpush1.bf16.msra.mxu1 %v3250_v0  ;;  %v3361_v0 = vld [vmem:[%s4774_s0 + $0x220] ss:$52 sps:$4 sm:$0xff]  }
  0x40   :  { %2109 = vmatpush1.bf16.msra.mxu0 %v3251_v1  ;;  %1876 = vmatprep.subr.bf16.mxu1 %v3257_v2  ;;  %v3365_v1 = vld [vmem:[%s4774_s0 + $0x208] ss:$52 sps:$4 sm:$0xff]  }
  0x41   :  { %2179 = vmatprep.subr.bf16.mxu0 %v3263_v4  ;;  %v102_v2 = vld [vmem:[%s4774_s0 + $0x288] sm:$0x11] }
  0x42   :  { %1808 = vmatmul.mubr.bf16.vlgmr.msra.gmra.mrb[0].mxu1 %v3252_v3  ;;  %v99_v3 = vld [vmem:[%s4774_s0 + $0x270] sm:$0x11]  ;;  %v3340_v4 = vld [vmem:[%s4773_s1 + $0x1a0] ss:$8 sps:$4 sm:$0xff]  }
  0x43   :  { %2111 = vmatmul.mubr.bf16.vlgmr.msra.gmra.mrb[0].mxu0 %v3258_v6  ;;  %1877 = vmatpush1.bf16.msra.mxu1 %v3255_v5  ;;  %v3344_v5 = vld [vmem:[%s4773_s1 + $0x4a0] ss:$8 sps:$4 sm:$0xff]   ;;  %v3350_v6 = vld [vmem:[%s4773_s1 + $0x1b4] ss:$8 sps:$4 sm:$0xff]  }
  0x44   :  { %2180 = vmatpush1.bf16.msra.mxu0 %v3261_v7  ;;  %1878 = vmatprep.subr.bf16.mxu1 %v3266_v8  ;;  %v3353_v7 = vld [vmem:[%s4773_s1 + $0x4b4] ss:$8 sps:$4 sm:$0xff]   ;;  %v2696_v8 = vcombine.high %v102_v2, %v102_v2 }
  0x45   :  { %2181 = vmatprep.subr.bf16.mxu0 %v3269_v9  ;;  %2120 = vmatprep.mubr.bf16.mxu0 %v3282_v10  ;;  %v2690_v9 = vcombine.high %v99_v3, %v99_v3  ;;  %v3348_v10 = vld [vmem:[%s4773_s1 + $0x1b0] ss:$8 sps:$4 sm:$0xff]  }
  0x46   :  { %1817 = vmatprep.mubr.bf16.mxu1 %v3284_v11  ;;  %v3351_v11 = vld [vmem:[%s4773_s1 + $0x4b0] ss:$8 sps:$4 sm:$0xff]  }
  0x47   :  { %1879 = vmatpush1.bf16.msra.mxu1 %v3264_v12  ;;  %v3360_v12 = vld [vmem:[%s4773_s1 + $0x1c4] ss:$8 sps:$4 sm:$0xff]  }
  0x48   :  { %2182 = vmatpush1.bf16.msra.mxu0 %v3267_v13  ;;  %1880 = vmatprep.subr.bf16.mxu1 %v3272_v14  ;;  %v3364_v13 = vld [vmem:[%s4773_s1 + $0x4c4] ss:$8 sps:$4 sm:$0xff]   ;;  %v3358_v14 = vld [vmem:[%s4773_s1 + $0x1c0] ss:$8 sps:$4 sm:$0xff]  }
  0x49   :  { %2183 = vmatprep.subr.bf16.mxu0 %v3275_v15  ;;  %v2695_v15 = vcombine.low %v102_v2, %v102_v2  ;;  %v3433_v2 = vld [vmem:[%s4773_s1 + $0x250] ss:$8 sps:$4 sm:$0xff]  }
  0x4a   :  { %1818 = vmatmul.mubr.bf16.gmra.mrb[4].mxu1 %v3293_v20  ;;  %v3390_v20 = vld [vmem:[%s4774_s0 + $0x24] ss:$52 sps:$4 sm:$0xff]  }
  0x4b   :  { %2121 = vmatmul.mubr.bf16.gmra.mrb[4].mxu0 %v3289_v19  ;;  %1881 = vmatpush1.bf16.msra.mxu1 %v3270_v16  ;;  %v2689_v16 = vcombine.low %v99_v3, %v99_v3  ;;  %v3371_v19 = vld [vmem:[%s4773_s1 + $0x4d4] ss:$8 sps:$4 sm:$0xff]   ;;  %v4212_v3 = vld [vmem:[%s4773_s1 + $0x550] ss:$8 sps:$4 sm:$0xff]  }
  0x4c   :  { %2184 = vmatpush1.bf16.msra.mxu0 %v3273_v17  ;;  %1882 = vmatprep.subr.bf16.mxu1 %v3278_v18  ;;  %v3362_v17 = vld [vmem:[%s4773_s1 + $0x4c0] ss:$8 sps:$4 sm:$0xff]   ;;  %v3368_v18 = vld [vmem:[%s4773_s1 + $0x1d4] ss:$8 sps:$4 sm:$0xff]  }
  0x4d   :  { %2185 = vmatprep.subr.bf16.mxu0 %v3281_v21  ;;  %2130 = vmatprep.mubr.bf16.mxu0 %v3300_v22  ;;  %v3393_v21 = vld [vmem:[%s4774_s0 + $0xc] ss:$52 sps:$4 sm:$0xff]   ;;  %v3366_v22 = vld [vmem:[%s4773_s1 + $0x1d0] ss:$8 sps:$4 sm:$0xff]  }
  0x4e   :  { %1827 = vmatprep.mubr.bf16.mxu1 %v3302_v23  ;;  %v3369_v23 = vld [vmem:[%s4773_s1 + $0x4d0] ss:$8 sps:$4 sm:$0xff]  }
  0x4f   :  { %1883 = vmatpush1.bf16.msra.mxu1 %v3276_v24  ;;  %v3376_v24 = vld [vmem:[%s4773_s1 + $0x1e4] ss:$8 sps:$4 sm:$0xff]  }
  0x50   :  { %2186 = vmatpush1.bf16.msra.mxu0 %v3279_v25  ;;  %1884 = vmatprep.subr.bf16.mxu1 %v3288_v26  ;;  %v3380_v25 = vld [vmem:[%s4773_s1 + $0x4e4] ss:$8 sps:$4 sm:$0xff]   ;;  %v3374_v26 = vld [vmem:[%s4773_s1 + $0x1e0] ss:$8 sps:$4 sm:$0xff]  }
  0x51   :  { %2187 = vmatprep.subr.bf16.mxu0 %v3292_v27  ;;  %v3378_v27 = vld [vmem:[%s4773_s1 + $0x4e0] ss:$8 sps:$4 sm:$0xff]  }
  0x52   :  { %1828 = vmatmul.mubr.bf16.gmra.mrb[8].mxu1 %v3311_v32  ;;  %v3396_v32 = vld [vmem:[%s4773_s1 + $0x204] ss:$8 sps:$4 sm:$0xff]  }
  0x53   :  { %2131 = vmatmul.mubr.bf16.gmra.mrb[8].mxu0 %v3307_v31  ;;  %1885 = vmatpush1.bf16.msra.mxu1 %v3286_v28  ;;  %v3384_v28 = vld [vmem:[%s4773_s1 + $0x1f4] ss:$8 sps:$4 sm:$0xff]   ;;  %v3385_v31 = vld [vmem:[%s4773_s1 + $0x4f0] ss:$8 sps:$4 sm:$0xff]  }
  0x54   :  { %2188 = vmatpush1.bf16.msra.mxu0 %v3290_v29  ;;  %1886 = vmatprep.subr.bf16.mxu1 %v3296_v30  ;;  %v3387_v29 = vld [vmem:[%s4773_s1 + $0x4f4] ss:$8 sps:$4 sm:$0xff]   ;;  %v3382_v30 = vld [vmem:[%s4773_s1 + $0x1f0] ss:$8 sps:$4 sm:$0xff]  }
  0x55   :  { %2189 = vmatprep.subr.bf16.mxu0 %v3299_v33  ;;  %2140 = vmatprep.mubr.bf16.mxu0 %v3318_v34  ;;  %v4078_v33 = vld [vmem:[%s4773_s1 + $0x504] ss:$8 sps:$4 sm:$0xff]   ;;  %v3388_v34 = vld [vmem:[%s4774_s0 + $0x20] ss:$52 sps:$4 sm:$0xff]  }
  0x56   :  { %1837 = vmatprep.mubr.bf16.mxu1 %v3320_v35  ;;  %v3391_v35 = vld [vmem:[%s4774_s0 + $0x8] ss:$52 sps:$4 sm:$0xff]  }
  0x57   :  { %1887 = vmatpush1.bf16.msra.mxu1 %v3294_v36  ;;  %v3394_v36 = vld [vmem:[%s4773_s1 + $0x200] ss:$8 sps:$4 sm:$0xff]  }
  0x58   :  { %2190 = vmatpush1.bf16.msra.mxu0 %v3297_v37  ;;  %1888 = vmatprep.subr.bf16.mxu1 %v3306_v38  ;;  %v4092_v37 = vld [vmem:[%s4773_s1 + $0x500] ss:$8 sps:$4 sm:$0xff]   ;;  %v3402_v38 = vld [vmem:[%s4773_s1 + $0x214] ss:$8 sps:$4 sm:$0xff]  }
  0x59   :  { %2191 = vmatprep.subr.bf16.mxu0 %v3310_v39  ;;  %v4101_v39 = vld [vmem:[%s4773_s1 + $0x514] ss:$8 sps:$4 sm:$0xff]  }
  0x5a   :  { %1838 = vmatmul.mubr.bf16.gmra.mrb[12].mxu1 %v3329_v44  ;;  %v3410_v44 = vld [vmem:[%s4773_s1 + $0x224] ss:$8 sps:$4 sm:$0xff]  }
  0x5b   :  { %2141 = vmatmul.mubr.bf16.gmra.mrb[12].mxu0 %v3325_v43  ;;  %1889 = vmatpush1.bf16.msra.mxu1 %v3304_v40  ;;  %v3406_v40 = vld [vmem:[%s4774_s0 + $0x8c] ss:$52 sps:$4 sm:$0xff]   ;;  %v4116_v43 = vld [vmem:[%s4773_s1 + $0x510] ss:$8 sps:$4 sm:$0xff]  }
  0x5c   :  { %2192 = vmatpush1.bf16.msra.mxu0 %v3308_v41  ;;  %1890 = vmatprep.subr.bf16.mxu1 %v3314_v42  ;;  %v3421_v41 = vld [vmem:[%s4774_s0 + $0x74] ss:$52 sps:$4 sm:$0xff]   ;;  %v3400_v42 = vld [vmem:[%s4773_s1 + $0x210] ss:$8 sps:$4 sm:$0xff]  }
  0x5d   :  { %2193 = vmatprep.subr.bf16.mxu0 %v3317_v45  ;;  %2150 = vmatprep.mubr.bf16.mxu0 %v3336_v46  ;;  %v4125_v45 = vld [vmem:[%s4773_s1 + $0x524] ss:$8 sps:$4 sm:$0xff]   ;;  %v3408_v46 = vld [vmem:[%s4773_s1 + $0x220] ss:$8 sps:$4 sm:$0xff]  }
  0x5e   :  { %1847 = vmatprep.mubr.bf16.mxu1 %v3338_v47  ;;  %v3411_v47 = vld [vmem:[%s4774_s0 + $0x88] ss:$52 sps:$4 sm:$0xff]  }
  0x5f   :  { %1891 = vmatpush1.bf16.msra.mxu1 %v3312_v48  ;;  %v3425_v48 = vld [vmem:[%s4774_s0 + $0x70] ss:$52 sps:$4 sm:$0xff]  }
  0x60   :  { %2194 = vmatpush1.bf16.msra.mxu0 %v3315_v49  ;;  %1892 = vmatprep.subr.bf16.mxu1 %v3324_v50  ;;  %v4140_v49 = vld [vmem:[%s4773_s1 + $0x520] ss:$8 sps:$4 sm:$0xff]   ;;  %v3417_v50 = vld [vmem:[%s4773_s1 + $0x234] ss:$8 sps:$4 sm:$0xff]  }
  0x61   :  { %2195 = vmatprep.subr.bf16.mxu0 %v3328_v51  ;;  %v4149_v51 = vld [vmem:[%s4773_s1 + $0x534] ss:$8 sps:$4 sm:$0xff]  }
  0x62   :  { %1848 = vmatmul.mubr.bf16.gmra.mrb[16].mxu1 %v3347_v54  ;;  %v3415_v54 = vld [vmem:[%s4773_s1 + $0x230] ss:$8 sps:$4 sm:$0xff]  }
  0x63   :  { %2151 = vmatmul.mubr.bf16.gmra.mrb[16].mxu0 %v3343_v53  ;;  %1893 = vmatpush1.bf16.msra.mxu1 %v3322_v52  ;;  %v3423_v52 = vld [vmem:[%s4774_s0 + $0xf4] ss:$52 sps:$4 sm:$0xff]   ;;  %v3439_v53 = vld [vmem:[%s4774_s0 + $0xdc] ss:$52 sps:$4 sm:$0xff]  }
  0x64   :  { %2196 = vmatpush1.bf16.msra.mxu0 %v3326_v55  ;;  %1894 = vmatprep.subr.bf16.mxu1 %v3332_v56  ;;  %v4164_v55 = vld [vmem:[%s4773_s1 + $0x530] ss:$8 sps:$4 sm:$0xff]   ;;  %v3428_v56 = vld [vmem:[%s4773_s1 + $0x244] ss:$8 sps:$4 sm:$0xff]  }
  0x65   :  { %2197 = vmatprep.subr.bf16.mxu0 %v3335_v57  ;;  %2160 = vmatprep.mubr.bf16.mxu0 %v3354_v58  ;;  %v4173_v57 = vld [vmem:[%s4773_s1 + $0x544] ss:$8 sps:$4 sm:$0xff]   ;;  %v3426_v58 = vld [vmem:[%s4773_s1 + $0x240] ss:$8 sps:$4 sm:$0xff]  }
  0x66   :  { %1857 = vmatprep.mubr.bf16.mxu1 %v3356_v60  ;;  %v3443_v60 = vld [vmem:[%s4774_s0 + $0xd8] ss:$52 sps:$4 sm:$0xff]  }
  0x67   :  { %1895 = vmatpush1.bf16.msra.mxu1 %v3330_v59  ;;  %v3429_v59 = vld [vmem:[%s4774_s0 + $0xf0] ss:$52 sps:$4 sm:$0xff]  }
  0x68   :  { %2198 = vmatpush1.bf16.msra.mxu0 %v3333_v61  ;;  %1896 = vmatprep.subr.bf16.mxu1 %v3342_v62  ;;  %v4188_v61 = vld [vmem:[%s4773_s1 + $0x540] ss:$8 sps:$4 sm:$0xff]   ;;  %v3435_v62 = vld [vmem:[%s4773_s1 + $0x254] ss:$8 sps:$4 sm:$0xff]  }
  0x69   :  { %2199 = vmatprep.subr.bf16.mxu0 %v3346_v63  ;;  %v4197_v63 = vld [vmem:[%s4773_s1 + $0x554] ss:$8 sps:$4 sm:$0xff]  }
  0x6a   :  { %1858 = vmatmul.mubr.bf16.gmra.mrb[20].mxu1 %v3365_v1  ;;  %v3457_v1 = vld [vmem:[%s4774_s0 + $0x144] ss:$52 sps:$4 sm:$0xff]  }
  0x6b   :  { %2161 = vmatmul.mubr.bf16.gmra.mrb[20].mxu0 %v3361_v0  ;;  %1897 = vmatpush1.bf16.msra.mxu1 %v3340_v4  ;;  %v3441_v0 = vld [vmem:[%s4774_s0 + $0x15c] ss:$52 sps:$4 sm:$0xff]   ;;  %v3446_v4 = vld [vmem:[%s4773_s1 + $0x264] ss:$8 sps:$4 sm:$0xff]  }
  0x6c   :  { %2200 = vmatpush1.bf16.msra.mxu0 %v3344_v5  ;;  %1898 = vmatprep.subr.bf16.mxu1 %v3350_v6  ;;  %v4221_v5 = vld [vmem:[%s4773_s1 + $0x564] ss:$8 sps:$4 sm:$0xff]   ;;  %v3444_v6 = vld [vmem:[%s4773_s1 + $0x260] ss:$8 sps:$4 sm:$0xff]  }
  0x6d   :  { %2201 = vmatprep.subr.bf16.mxu0 %v3353_v7  ;;  %2170 = vmatprep.mubr.bf16.mxu0 %v2696_v8  ;;  %v3447_v7 = vld [vmem:[%s4774_s0 + $0x158] ss:$52 sps:$4 sm:$0xff]   ;;  %v4232_v8 = vld [vmem:[%s4773_s1 + $0x560] ss:$8 sps:$4 sm:$0xff]  }
  0x6e   :  { %1867 = vmatprep.mubr.bf16.mxu1 %v2690_v9  ;;  %v3461_v9 = vld [vmem:[%s4774_s0 + $0x140] ss:$52 sps:$4 sm:$0xff]  }
  0x6f   :  { %1899 = vmatpush1.bf16.msra.mxu1 %v3348_v10  ;;  %v3453_v10 = vld [vmem:[%s4773_s1 + $0x274] ss:$8 sps:$4 sm:$0xff]  }
  0x70   :  { %2202 = vmatpush1.bf16.msra.mxu0 %v3351_v11  ;;  %1900 = vmatprep.subr.bf16.mxu1 %v3360_v12  ;;  %v4244_v11 = vld [vmem:[%s4773_s1 + $0x574] ss:$8 sps:$4 sm:$0xff]   ;;  %v3459_v12 = vld [vmem:[%s4774_s0 + $0x1c4] ss:$52 sps:$4 sm:$0xff]  }
  0x71   :  { %2203 = vmatprep.subr.bf16.mxu0 %v3364_v13  ;;  %v3475_v13 = vld [vmem:[%s4774_s0 + $0x1ac] ss:$52 sps:$4 sm:$0xff]  }
  0x72   :  { %1868 = vmatmul.mubr.bf16.gmra.mrb[24].mxu1 %v2689_v16  ;;  %v3464_v16 = vld [vmem:[%s4773_s1 + $0x284] ss:$8 sps:$4 sm:$0xff]  }
  0x73   :  { %2171 = vmatmul.mubr.bf16.gmra.mrb[24].mxu0 %v2695_v15  ;;  %1901 = vmatpush1.bf16.msra.mxu1 %v3358_v14  ;;  %v3451_v14 = vld [vmem:[%s4773_s1 + $0x270] ss:$8 sps:$4 sm:$0xff]  }
  0x74   :  { %2204 = vmatpush1.bf16.msra.mxu0 %v3362_v17  ;;  %1902 = vmatprep.subr.bf16.mxu1 %v3368_v18  ;;  %v4259_v15 = vld [vmem:[%s4773_s1 + $0x570] ss:$8 sps:$4 sm:$0xff]   ;;  %v4269_v17 = vld [vmem:[%s4773_s1 + $0x584] ss:$8 sps:$4 sm:$0xff]   ;;  %v3462_v18 = vld [vmem:[%s4773_s1 + $0x280] ss:$8 sps:$4 sm:$0xff]  }
  0x75   :  { %2205 = vmatprep.subr.bf16.mxu0 %v3371_v19  ;;  %2211 = vmatprep.mubr.bf16.mxu0 %v3390_v20  ;;  %v3465_v19 = vld [vmem:[%s4774_s0 + $0x1c0] ss:$52 sps:$4 sm:$0xff]  }
  0x76   :  { %1908 = vmatprep.mubr.bf16.mxu1 %v3393_v21  ;;  %v4280_v20 = vld [vmem:[%s4773_s1 + $0x580] ss:$8 sps:$4 sm:$0xff]  }
  0x77   :  { %1903 = vmatpush1.bf16.msra.mxu1 %v3366_v22  ;;  %v3479_v21 = vld [vmem:[%s4774_s0 + $0x1a8] ss:$52 sps:$4 sm:$0xff]  }
  0x78   :  { %2206 = vmatpush1.bf16.msra.mxu0 %v3369_v23  ;;  %1904 = vmatprep.subr.bf16.mxu1 %v3376_v24  ;;  %v3471_v22 = vld [vmem:[%s4773_s1 + $0x294] ss:$8 sps:$4 sm:$0xff]   ;;  %v3477_v24 = vld [vmem:[%s4774_s0 + $0x22c] ss:$52 sps:$4 sm:$0xff]  }
  0x79   :  { %2207 = vmatprep.subr.bf16.mxu0 %v3380_v25  ;;  %v4293_v23 = vld [vmem:[%s4773_s1 + $0x594] ss:$8 sps:$4 sm:$0xff]  }
  0x7a   :  { %v3493_v25 = vld [vmem:[%s4774_s0 + $0x214] ss:$52 sps:$4 sm:$0xff]  }
  0x7b   :  { %1905 = vmatpush1.bf16.msra.mxu1 %v3374_v26  ;;  %v3469_v26 = vld [vmem:[%s4773_s1 + $0x290] ss:$8 sps:$4 sm:$0xff]  }
  0x7c   :  { %2208 = vmatpush1.bf16.msra.mxu0 %v3378_v27  ;;  %1906 = vmatprep.subr.bf16.mxu1 %v3384_v28  ;;  %v4307_v27 = vld [vmem:[%s4773_s1 + $0x590] ss:$8 sps:$4 sm:$0xff]   ;;  %v3482_v28 = vld [vmem:[%s4773_s1 + $0x2a4] ss:$8 sps:$4 sm:$0xff]  }
  0x7d   :  { %2209 = vmatprep.subr.bf16.mxu0 %v3387_v29  ;;  %v3483_v29 = vld [vmem:[%s4774_s0 + $0x228] ss:$52 sps:$4 sm:$0xff]  }
  0x7f   :  { %1907 = vmatpush1.bf16.msra.mxu1 %v3382_v30  ;;  %v4320_v30 = vld [vmem:[%s4773_s1 + $0x5a4] ss:$8 sps:$4 sm:$0xff]  }
  0x80   :  { %2210 = vmatpush1.bf16.msra.mxu0 %v3385_v31  ;;  %1977 = vmatprep.subr.bf16.mxu1 %v3396_v32  ;;  %v3480_v31 = vld [vmem:[%s4773_s1 + $0x2a0] ss:$8 sps:$4 sm:$0xff]  }
  0x81   :  { %2280 = vmatprep.subr.bf16.mxu0 %v4078_v33  ;;  %v4328_v32 = vld [vmem:[%s4773_s1 + $0x5a0] ss:$8 sps:$4 sm:$0xff]  }
  0x82   :  { %1909 = vmatmul.mubr.bf16.vlgmr.msra.gmra.mrb[0].mxu1 %v3391_v35  ;;  %v3496_v35 = vld [vmem:[%s4774_s0 + $0x210] ss:$52 sps:$4 sm:$0xff]  }
  0x83   :  { %2212 = vmatmul.mubr.bf16.vlgmr.msra.gmra.mrb[0].mxu0 %v3388_v34  ;;  %1978 = vmatpush1.bf16.msra.mxu1 %v3394_v36  ;;  %v103_v34 = vld [vmem:[%s4774_s0 + $0x290] sm:$0x11]  ;;  %v100_v36 = vld [vmem:[%s4774_s0 + $0x278] sm:$0x11] }
  0x84   :  { %2281 = vmatpush1.bf16.msra.mxu0 %v4092_v37  ;;  %1979 = vmatprep.subr.bf16.mxu1 %v3402_v38  ;;  %v3489_v38 = vld [vmem:[%s4773_s1 + $0x2b4] ss:$8 sps:$4 sm:$0xff]  }
  0x85   :  { %2282 = vmatprep.subr.bf16.mxu0 %v4101_v39  ;;  %2221 = vmatprep.mubr.bf16.mxu0 %v3406_v40  ;;  %v4347_v40 = vld [vmem:[%s4773_s1 + $0x5b4] ss:$8 sps:$4 sm:$0xff]  }
  0x86   :  { %1918 = vmatprep.mubr.bf16.mxu1 %v3421_v41  ;;  %v2698_v41 = vcombine.high %v103_v34, %v103_v34 }
  0x87   :  { %1980 = vmatpush1.bf16.msra.mxu1 %v3400_v42  ;;  %v2692_v42 = vcombine.high %v100_v36, %v100_v36 }
  0x88   :  { %2283 = vmatpush1.bf16.msra.mxu0 %v4116_v43  ;;  %1981 = vmatprep.subr.bf16.mxu1 %v3410_v44  ;;  %v3487_v44 = vld [vmem:[%s4773_s1 + $0x2b0] ss:$8 sps:$4 sm:$0xff]  }
  0x89   :  { %2284 = vmatprep.subr.bf16.mxu0 %v4125_v45 }
  0x8a   :  { %1919 = vmatmul.mubr.bf16.gmra.mrb[4].mxu1 %v3425_v48  ;;  %v4365_v48 = vld [vmem:[%s4773_s1 + $0x5c4] ss:$8 sps:$4 sm:$0xff]  }
  0x8b   :  { %2222 = vmatmul.mubr.bf16.gmra.mrb[4].mxu0 %v3411_v47  ;;  %1982 = vmatpush1.bf16.msra.mxu1 %v3408_v46  ;;  %v4355_v46 = vld [vmem:[%s4773_s1 + $0x5b0] ss:$8 sps:$4 sm:$0xff]   ;;  %v3499_v47 = vld [vmem:[%s4773_s1 + $0x2c4] ss:$8 sps:$4 sm:$0xff]  }
  0x8c   :  { %2285 = vmatpush1.bf16.msra.mxu0 %v4140_v49  ;;  %1983 = vmatprep.subr.bf16.mxu1 %v3417_v50  ;;  %v3497_v50 = vld [vmem:[%s4773_s1 + $0x2c0] ss:$8 sps:$4 sm:$0xff]  }
  0x8d   :  { %2286 = vmatprep.subr.bf16.mxu0 %v4149_v51  ;;  %2231 = vmatprep.mubr.bf16.mxu0 %v3423_v52  ;;  %v2697_v52 = vcombine.low %v103_v34, %v103_v34  ;;  %v3560_v34 = vld [vmem:[%s4774_s0 + $0x1b4] ss:$52 sps:$4 sm:$0xff]  }
  0x8e   :  { %1928 = vmatprep.mubr.bf16.mxu1 %v3439_v53  ;;  %v4373_v53 = vld [vmem:[%s4773_s1 + $0x5c0] ss:$8 sps:$4 sm:$0xff]  }
  0x8f   :  { %1984 = vmatpush1.bf16.msra.mxu1 %v3415_v54  ;;  %v2691_v54 = vcombine.low %v100_v36, %v100_v36  ;;  %v3576_v36 = vld [vmem:[%s4774_s0 + $0x234] ss:$52 sps:$4 sm:$0xff]  }
  0x90   :  { %2287 = vmatpush1.bf16.msra.mxu0 %v4164_v55  ;;  %1985 = vmatprep.subr.bf16.mxu1 %v3428_v56  ;;  %v3506_v56 = vld [vmem:[%s4773_s1 + $0x2d4] ss:$8 sps:$4 sm:$0xff]  }
  0x91   :  { %2288 = vmatprep.subr.bf16.mxu0 %v4173_v57 }
  0x92   :  { %1929 = vmatmul.mubr.bf16.gmra.mrb[8].mxu1 %v3443_v60  ;;  %v3529_v60 = vld [vmem:[%s4774_s0 + $0x2c] ss:$52 sps:$4 sm:$0xff]  }
  0x93   :  { %2232 = vmatmul.mubr.bf16.gmra.mrb[8].mxu0 %v3429_v59  ;;  %1986 = vmatpush1.bf16.msra.mxu1 %v3426_v58  ;;  %v4383_v58 = vld [vmem:[%s4773_s1 + $0x5d4] ss:$8 sps:$4 sm:$0xff]  }
  0x94   :  { %2289 = vmatpush1.bf16.msra.mxu0 %v4188_v61  ;;  %1987 = vmatprep.subr.bf16.mxu1 %v3435_v62  ;;  %v3526_v59 = vld [vmem:[%s4774_s0 + $0x14] ss:$52 sps:$4 sm:$0xff]   ;;  %v3504_v62 = vld [vmem:[%s4773_s1 + $0x2d0] ss:$8 sps:$4 sm:$0xff]  }
  0x95   :  { %2290 = vmatprep.subr.bf16.mxu0 %v4197_v63  ;;  %2241 = vmatprep.mubr.bf16.mxu0 %v3441_v0  ;;  %v4398_v0 = vld [vmem:[%s4773_s1 + $0x5d0] ss:$8 sps:$4 sm:$0xff]  }
  0x96   :  { %1938 = vmatprep.mubr.bf16.mxu1 %v3457_v1  ;;  %v3514_v1 = vld [vmem:[%s4773_s1 + $0x2e4] ss:$8 sps:$4 sm:$0xff]  }
  0x97   :  { %1988 = vmatpush1.bf16.msra.mxu1 %v3433_v2  ;;  %v4407_v2 = vld [vmem:[%s4773_s1 + $0x5e4] ss:$8 sps:$4 sm:$0xff]  }
  0x98   :  { %2291 = vmatpush1.bf16.msra.mxu0 %v4212_v3  ;;  %1989 = vmatprep.subr.bf16.mxu1 %v3446_v4  ;;  %v3512_v4 = vld [vmem:[%s4773_s1 + $0x2e0] ss:$8 sps:$4 sm:$0xff]  }
  0x99   :  { %2292 = vmatprep.subr.bf16.mxu0 %v4221_v5 }
  0x9a   :  { %1939 = vmatmul.mubr.bf16.gmra.mrb[12].mxu1 %v3461_v9  ;;  %v4425_v9 = vld [vmem:[%s4773_s1 + $0x5f4] ss:$8 sps:$4 sm:$0xff]  }
  0x9b   :  { %2242 = vmatmul.mubr.bf16.gmra.mrb[12].mxu0 %v3447_v7  ;;  %1990 = vmatpush1.bf16.msra.mxu1 %v3444_v6  ;;  %v4416_v6 = vld [vmem:[%s4773_s1 + $0x5e0] ss:$8 sps:$4 sm:$0xff]   ;;  %v3520_v7 = vld [vmem:[%s4773_s1 + $0x2f4] ss:$8 sps:$4 sm:$0xff]  }
  0x9c   :  { %2293 = vmatpush1.bf16.msra.mxu0 %v4232_v8  ;;  %1991 = vmatprep.subr.bf16.mxu1 %v3453_v10  ;;  %v3518_v10 = vld [vmem:[%s4773_s1 + $0x2f0] ss:$8 sps:$4 sm:$0xff]  }
  0x9d   :  { %2294 = vmatprep.subr.bf16.mxu0 %v4244_v11  ;;  %2251 = vmatprep.mubr.bf16.mxu0 %v3459_v12  ;;  %v4434_v12 = vld [vmem:[%s4773_s1 + $0x5f0] ss:$8 sps:$4 sm:$0xff]  }
  0x9e   :  { %1948 = vmatprep.mubr.bf16.mxu1 %v3475_v13  ;;  %v3532_v13 = vld [vmem:[%s4773_s1 + $0x604] ss:$8 sps:$4 sm:$0xff]  }
  0x9f   :  { %1992 = vmatpush1.bf16.msra.mxu1 %v3451_v14  ;;  %v3524_v14 = vld [vmem:[%s4774_s0 + $0x10] ss:$52 sps:$4 sm:$0xff]  }
  0xa0   :  { %2295 = vmatpush1.bf16.msra.mxu0 %v4259_v15  ;;  %1993 = vmatprep.subr.bf16.mxu1 %v3464_v16  ;;  %v3527_v16 = vld [vmem:[%s4774_s0 + $0x28] ss:$52 sps:$4 sm:$0xff]  }
  0xa1   :  { %2296 = vmatprep.subr.bf16.mxu0 %v4269_v17 }
  0xa2   :  { %1949 = vmatmul.mubr.bf16.gmra.mrb[16].mxu1 %v3479_v21  ;;  %v3535_v21 = vld [vmem:[%s4774_s0 + $0x94] ss:$52 sps:$4 sm:$0xff]  }
  0xa3   :  { %2252 = vmatmul.mubr.bf16.gmra.mrb[16].mxu0 %v3465_v19  ;;  %1994 = vmatpush1.bf16.msra.mxu1 %v3462_v18  ;;  %v3530_v18 = vld [vmem:[%s4773_s1 + $0x600] ss:$8 sps:$4 sm:$0xff]   ;;  %v3533_v19 = vld [vmem:[%s4774_s0 + $0x7c] ss:$52 sps:$4 sm:$0xff]  }
  0xa4   :  { %2297 = vmatpush1.bf16.msra.mxu0 %v4280_v20  ;;  %1995 = vmatprep.subr.bf16.mxu1 %v3471_v22  ;;  %v3541_v22 = vld [vmem:[%s4773_s1 + $0x614] ss:$8 sps:$4 sm:$0xff]  }
  0xa5   :  { %2298 = vmatprep.subr.bf16.mxu0 %v4293_v23  ;;  %2261 = vmatprep.mubr.bf16.mxu0 %v3477_v24  ;;  %v3550_v24 = vld [vmem:[%s4773_s1 + $0x624] ss:$8 sps:$4 sm:$0xff]  }
  0xa6   :  { %1958 = vmatprep.mubr.bf16.mxu1 %v3493_v25  ;;  %v3537_v25 = vld [vmem:[%s4774_s0 + $0x78] ss:$52 sps:$4 sm:$0xff]  }
  0xa7   :  { %1996 = vmatpush1.bf16.msra.mxu1 %v3469_v26  ;;  %v3544_v26 = vld [vmem:[%s4774_s0 + $0xfc] ss:$52 sps:$4 sm:$0xff]  }
  0xa8   :  { %2299 = vmatpush1.bf16.msra.mxu0 %v4307_v27  ;;  %1997 = vmatprep.subr.bf16.mxu1 %v3482_v28  ;;  %v3548_v28 = vld [vmem:[%s4773_s1 + $0x620] ss:$8 sps:$4 sm:$0xff]  }
  0xa9   :  { %2300 = vmatprep.subr.bf16.mxu0 %v4320_v30 }
  0xaa   :  { %1959 = vmatmul.mubr.bf16.gmra.mrb[20].mxu1 %v3496_v35  ;;  %v3575_v35 = vld [vmem:[%s4774_s0 + $0x1d0] ss:$52 sps:$4 sm:$0xff]  }
  0xab   :  { %2262 = vmatmul.mubr.bf16.gmra.mrb[20].mxu0 %v3483_v29  ;;  %1998 = vmatpush1.bf16.msra.mxu1 %v3480_v31  ;;  %v3546_v29 = vld [vmem:[%s4774_s0 + $0xe0] ss:$52 sps:$4 sm:$0xff]   ;;  %v3547_v31 = vld [vmem:[%s4774_s0 + $0xf8] ss:$52 sps:$4 sm:$0xff]  }
  0xac   :  { %2301 = vmatpush1.bf16.msra.mxu0 %v4328_v32  ;;  %1999 = vmatprep.subr.bf16.mxu1 %v3489_v38  ;;  %v104_v38 = vld [vmem:[%s4774_s0 + $0x298] sm:$0x11] }
  0xad   :  { %2302 = vmatprep.subr.bf16.mxu0 %v4347_v40  ;;  %2271 = vmatprep.mubr.bf16.mxu0 %v2698_v41  ;;  %v3579_v41 = vld [vmem:[%s4774_s0 + $0x238] ss:$52 sps:$4 sm:$0xff]  }
  0xae   :  { %1968 = vmatprep.mubr.bf16.mxu1 %v2692_v42  ;;  %v2700_v42 = vcombine.high %v104_v38, %v104_v38 }
  0xaf   :  { %2000 = vmatpush1.bf16.msra.mxu1 %v3487_v44  ;;  %v2699_v44 = vcombine.low %v104_v38, %v104_v38 }
  0xb0   :  { %2303 = vmatpush1.bf16.msra.mxu0 %v4355_v46  ;;  %2001 = vmatprep.subr.bf16.mxu1 %v3499_v47 }
  0xb1   :  { %2304 = vmatprep.subr.bf16.mxu0 %v4365_v48 }
  0xb2   :  { %1969 = vmatmul.mubr.bf16.gmra.mrb[24].mxu1 %v2691_v54 }
  0xb3   :  { %2272 = vmatmul.mubr.bf16.gmra.mrb[24].mxu0 %v2697_v52  ;;  %2002 = vmatpush1.bf16.msra.mxu1 %v3497_v50 }
  0xb4   :  { %2305 = vmatpush1.bf16.msra.mxu0 %v4373_v53  ;;  %2003 = vmatprep.subr.bf16.mxu1 %v3506_v56 }
  0xb5   :  { %2306 = vmatprep.subr.bf16.mxu0 %v4383_v58  ;;  %2009 = vmatprep.mubr.bf16.mxu1 %v3526_v59 }
  0xb6   :  { %2312 = vmatprep.mubr.bf16.mxu0 %v3529_v60 }
  0xb7   :  { %2004 = vmatpush1.bf16.msra.mxu1 %v3504_v62 }
  0xb8   :  { %2307 = vmatpush1.bf16.msra.mxu0 %v4398_v0  ;;  %2005 = vmatprep.subr.bf16.mxu1 %v3514_v1 }
  0xb9   :  { %2308 = vmatprep.subr.bf16.mxu0 %v4407_v2 }
  0xbb   :  { %2006 = vmatpush1.bf16.msra.mxu1 %v3512_v4 }
  0xbc   :  { %2309 = vmatpush1.bf16.msra.mxu0 %v4416_v6  ;;  %2007 = vmatprep.subr.bf16.mxu1 %v3520_v7 }
  0xbd   :  { %2310 = vmatprep.subr.bf16.mxu0 %v4425_v9 }
  0xbf   :  { %2008 = vmatpush1.bf16.msra.mxu1 %v3518_v10 }
  0xc0   :  { %2311 = vmatpush1.bf16.msra.mxu0 %v4434_v12  ;;  %2935 = vmatprep.subr.bf16.mxu1 %v4078_v33  ;;  %v3539_v33 = vld [vmem:[%s4773_s1 + $0x610] ss:$8 sps:$4 sm:$0xff]  }
  0xc1   :  { %2381 = vmatprep.subr.bf16.mxu0 %v3532_v13  ;;  %v308_v13 = vlaneseq }
  0xc2   :  { %2010 = vmatmul.mubr.bf16.vlgmr.msra.gmra.mrb[0].mxu1 %v3524_v14 }
  0xc3   :  { %2313 = vmatmul.mubr.bf16.vlgmr.msra.gmra.mrb[0].mxu0 %v3527_v16  ;;  %2951 = vmatpush1.bf16.msra.mxu1 %v4092_v37  ;;  %v3538_v37 = vld [vmem:[%s4774_s0 + $0x90] ss:$52 sps:$4 sm:$0xff]  }
  0xc4   :  { %2382 = vmatpush1.bf16.msra.mxu0 %v3530_v18  ;;  %2936 = vmatprep.subr.bf16.mxu1 %v4101_v39  ;;  %v3542_v39 = vld [vmem:[%s4774_s0 + $0xe4] ss:$52 sps:$4 sm:$0xff]  }
  0xc5   :  { %2019 = vmatprep.mubr.bf16.mxu1 %v3533_v19  ;;  %2322 = vmatprep.mubr.bf16.mxu0 %v3535_v21  ;;  %v309_v19 = vshrl.u32 %v308_v13, 7 }
  0xc6   :  { %2383 = vmatprep.subr.bf16.mxu0 %v3541_v22 }
  0xc7   :  { %2952 = vmatpush1.bf16.msra.mxu1 %v4116_v43  ;;  %v3559_v43 = vld [vmem:[%s4773_s1 + $0x634] ss:$8 sps:$4 sm:$0xff]   ;;  %v310_v22 = vsub.s32 0, %v309_v19 }
  0xc8   :  { %2384 = vmatpush1.bf16.msra.mxu0 %v3539_v33  ;;  %2937 = vmatprep.subr.bf16.mxu1 %v4125_v45  ;;  %v3557_v45 = vld [vmem:[%s4773_s1 + $0x630] ss:$8 sps:$4 sm:$0xff]   ;;  %v306_v33 = vld [vmem:[%s4775_s2] sm:$0x3] }
  0xc9   :  { %2385 = vmatprep.subr.bf16.mxu0 %v3550_v24  ;;  %v314_v24 = vsub.s32 1, %v309_v19 }
  0xca   :  { %2020 = vmatmul.mubr.bf16.gmra.mrb[4].mxu1 %v3537_v25 }
  0xcb   :  { %2323 = vmatmul.mubr.bf16.gmra.mrb[4].mxu0 %v3538_v37  ;;  %2953 = vmatpush1.bf16.msra.mxu1 %v4140_v49  ;;  %v3551_v49 = vld [vmem:[%s4774_s0 + $0x14c] ss:$52 sps:$4 sm:$0xff]  }
  0xcc   :  { %2029 = vmatprep.mubr.bf16.mxu1 %v3542_v39  ;;  %2938 = vmatprep.subr.bf16.mxu1 %v4149_v51  ;;  %v3553_v51 = vld [vmem:[%s4774_s0 + $0x164] ss:$52 sps:$4 sm:$0xff]  }
  0xcd   :  { %2332 = vmatprep.mubr.bf16.mxu0 %v3544_v26  ;;  %2386 = vmatpush1.bf16.msra.mxu0 %v3548_v28  ;;  %v4627_v26 = vrot.slane %v306_v33, %v310_v22 }
  0xce   :  { %2387 = vmatprep.subr.bf16.mxu0 %v3559_v43  ;;  %v4631_v43 = vrot.slane %v306_v33, %v314_v24 }
  0xcf   :  { %2954 = vmatpush1.bf16.msra.mxu1 %v4164_v55  ;;  %v3555_v55 = vld [vmem:[%s4774_s0 + $0x148] ss:$52 sps:$4 sm:$0xff]  }
  0xd0   :  { %2939 = vmatprep.subr.bf16.mxu1 %v4173_v57  ;;  %v3556_v57 = vld [vmem:[%s4774_s0 + $0x160] ss:$52 sps:$4 sm:$0xff]  }
  0xd1   :  { %2388 = vmatpush1.bf16.msra.mxu0 %v3557_v45 }
  0xd2   :  { %2030 = vmatmul.mubr.bf16.gmra.mrb[8].mxu1 %v3546_v29 }
  0xd3   :  { %2333 = vmatmul.mubr.bf16.gmra.mrb[8].mxu0 %v3547_v31  ;;  %2955 = vmatpush1.bf16.msra.mxu1 %v4188_v61  ;;  %v3583_v61 = vmov 0  }
  0xd4   :  { %2039 = vmatprep.mubr.bf16.mxu1 %v3551_v49  ;;  %2940 = vmatprep.subr.bf16.mxu1 %v4197_v63  ;;  %v3562_v63 = vld [vmem:[%s4774_s0 + $0x1b0] ss:$52 sps:$4 sm:$0xff]  }
  0xd5   :  { %2342 = vmatprep.mubr.bf16.mxu0 %v3553_v51 }
  0xd7   :  { %2956 = vmatpush1.bf16.msra.mxu1 %v4212_v3  ;;  %v3563_v3 = vld [vmem:[%s4774_s0 + $0x30] ss:$52 sps:$4 sm:$0xff]  }
  0xd8   :  { %2941 = vmatprep.subr.bf16.mxu1 %v4221_v5  ;;  %v3564_v5 = vld [vmem:[%s4774_s0 + $0x21c] ss:$52 sps:$4 sm:$0xff]  }
  0xda   :  { %2040 = vmatmul.mubr.bf16.gmra.mrb[12].mxu1 %v3555_v55 }
  0xdb   :  { %2343 = vmatmul.mubr.bf16.gmra.mrb[12].mxu0 %v3556_v57  ;;  %2957 = vmatpush1.bf16.msra.mxu1 %v4232_v8  ;;  %v101_v8 = vld [vmem:[%s4774_s0 + $0x280] sm:$0x11] }
  0xdc   :  { %2049 = vmatprep.mubr.bf16.mxu1 %v3560_v34  ;;  %2942 = vmatprep.subr.bf16.mxu1 %v4244_v11  ;;  %v3566_v11 = vld [vmem:[%s4774_s0 + $0x218] ss:$52 sps:$4 sm:$0xff]  }
  0xdd   :  { %2413 = vmatprep.mubr.bf16.mxu0 %v3583_v61 }
  0xdf   :  { %2958 = vmatpush1.bf16.msra.mxu1 %v4259_v15  ;;  %v3567_v15 = vld [vmem:[%s4774_s0 + $0x98] ss:$52 sps:$4 sm:$0xff]  }
  0xe0   :  { %2943 = vmatprep.subr.bf16.mxu1 %v4269_v17  ;;  %v2694_v17 = vcombine.high %v101_v8, %v101_v8 }
  0xe2   :  { %2050 = vmatmul.mubr.bf16.gmra.mrb[16].mxu1 %v3562_v63 }
  0xe3   :  { %2902 = vmatmul.mubr.msk.bf16.vlgmr.msra.gmra.mrb[0].mxu0 %vm1753_vm0, %v3563_v3  ;;  %2959 = vmatpush1.bf16.msra.mxu1 %v4280_v20  ;;  %v2693_v20 = vcombine.low %v101_v8, %v101_v8 }
  0xe4   :  { %2059 = vmatprep.mubr.bf16.mxu1 %v3564_v5  ;;  %2944 = vmatprep.subr.bf16.mxu1 %v4293_v23  ;;  %v3570_v23 = vld [vmem:[%s4774_s0 + $0x100] ss:$52 sps:$4 sm:$0xff]  }
  0xe5   :  { %2423 = vmatprep.mubr.bf16.mxu0 %v3583_v61 }
  0xe7   :  { %2960 = vmatpush1.bf16.msra.mxu1 %v4307_v27  ;;  %v3574_v27 = vld [vmem:[%s4774_s0 + $0x1cc] ss:$52 sps:$4 sm:$0xff]  }
  0xe8   :  { %2945 = vmatprep.subr.bf16.mxu1 %v4320_v30  ;;  %v3571_v30 = vld [vmem:[%s4774_s0 + $0x168] ss:$52 sps:$4 sm:$0xff]  }
  0xea   :  { %2060 = vmatmul.mubr.bf16.gmra.mrb[20].mxu1 %v3566_v11 }
  0xeb   :  { %2903 = vmatmul.mubr.msk.bf16.gmra.mrb[4].mxu0 %vm1753_vm0, %v3567_v15  ;;  %2961 = vmatpush1.bf16.msra.mxu1 %v4328_v32  ;;  %v3572_v32 = vld [vmem:[%s4774_s0 + $0x1c8] ss:$52 sps:$4 sm:$0xff]  }
  0xec   :  { %2069 = vmatprep.mubr.bf16.mxu1 %v2694_v17  ;;  %2946 = vmatprep.subr.bf16.mxu1 %v4347_v40  ;;  %v3578_v40 = vld [vmem:[%s4774_s0 + $0x230] ss:$52 sps:$4 sm:$0xff]  }
  0xed   :  { %2433 = vmatprep.mubr.bf16.mxu0 %v3583_v61 }
  0xef   :  { %2962 = vmatpush1.bf16.msra.mxu1 %v4355_v46  ;;  %v3582_v46 = vld [vmem:[%s4774_s0 + $0x2a0] ss:$0 sps:$4 sm:$0x11]  }
  0xf0   :  { %2947 = vmatprep.subr.bf16.mxu1 %v4365_v48 }
  0xf2   :  { %2070 = vmatmul.mubr.bf16.gmra.mrb[24].mxu1 %v2693_v20 }
  0xf3   :  { %2904 = vmatmul.mubr.msk.bf16.gmra.mrb[8].mxu0 %vm1753_vm0, %v3570_v23  ;;  %2963 = vmatpush1.bf16.msra.mxu1 %v4373_v53 }
  0xf4   :  { %2443 = vmatprep.mubr.bf16.mxu0 %v3583_v61  ;;  %2948 = vmatprep.subr.bf16.mxu1 %v4383_v58 }
  0xf5   :  { %2352 = vmatprep.mubr.bf16.mxu1 %v3574_v27 }
  0xf7   :  { %2964 = vmatpush1.bf16.msra.mxu1 %v4398_v0 }
  0xf8   :  { %2949 = vmatprep.subr.bf16.mxu1 %v4407_v2 }
  0xfb   :  { %2905 = vmatmul.mubr.msk.bf16.gmra.mrb[12].mxu0 %vm1753_vm0, %v3571_v30  ;;  %2965 = vmatpush1.bf16.msra.mxu1 %v4416_v6 }
  0xfc   :  { %2453 = vmatprep.mubr.bf16.mxu0 %v3583_v61  ;;  %2950 = vmatprep.subr.bf16.mxu1 %v4425_v9 }
  0xff   :  { %2966 = vmatpush1.bf16.msra.mxu1 %v4434_v12 }
 0x102   :  { %2353 = vmatmul.mubr.bf16.vlgmr.msra.gmra.mrb[28].mxu1 %v3572_v32 }
 0x103   :  { %2906 = vmatmul.mubr.msk.bf16.gmra.mrb[28].mxu0 %vm1753_vm0, %v3575_v35  ;;  %2362 = vmatprep.mubr.bf16.mxu1 %v3576_v36 }
 0x104   :  { %2463 = vmatprep.mubr.bf16.mxu0 %v3583_v61 }
 0x10a   :  { %2363 = vmatmul.mubr.bf16.gmra.mrb[32].mxu1 %v3578_v40 }
 0x10b   :  { %2907 = vmatmul.mubr.msk.bf16.gmra.mrb[32].mxu0 %vm1753_vm0, %v3579_v41  ;;  %2372 = vmatprep.mubr.bf16.mxu1 %v2700_v42 }
 0x10c   :  { %2473 = vmatprep.mubr.bf16.mxu0 %v3583_v61 }
 0x112   :  { %2373 = vmatmul.mubr.bf16.gmra.mrb[36].mxu1 %v2699_v44 }
 0x113   :  { %2908 = vmatmul.mubr.msk.bf16.gmra.mrb[36].mxu0 %vm1753_vm0, %v3582_v46 }
 0x176   :  { %v2253_v47 = vpop.f32.mrb[16].mxu0 }
 0x177   :  { %v2255_v48 = vpop.f32.mrb[17].mxu0 }
 0x178   :  { %v4594_v50 = vpop.f32.mrb[18].mxu0 }
 0x179   :  { %v4596_v52 = vpop.f32.mrb[19].mxu0 }
 0x17e   :  { %v4598_v53 = vpop.f32.mrb[20].mxu0 }
 0x17f   :  { %v4600_v54 = vpop.f32.mrb[21].mxu0 }
 0x180   :  { %v4602_v56 = vpop.f32.mrb[22].mxu0 }
 0x181   :  { %v4604_v58 = vpop.f32.mrb[23].mxu0 }
 0x186   :  { %v4606_v59 = vpop.f32.mrb[24].mxu0 }
 0x187   :  { %v4608_v60 = vpop.f32.mrb[25].mxu0 }
 0x188   :  { %v2277_v62 = vpop.f32.mrb[26].mxu0 }
 0x189   :  { %v2278_v0 = vpop.f32.mrb[27].mxu0 }
 0x195   :  { %v2011_v1 = vpop.f32.mrb[0].mxu1 }
 0x196   :  { %v2013_v2 = vpop.f32.mrb[1].mxu1  ;;  %v2967_v45 = vadd.f32 %v2011_v1, %v4627_v26 }
 0x197   :  { %v2015_v4 = vpop.f32.mrb[2].mxu1  ;;  %v2969_v29 = vadd.f32 %v2013_v2, %v4631_v43 }
 0x198   :  { %v2017_v6 = vpop.f32.mrb[3].mxu1  ;;  %v2971_v51 = vadd.f32 %v2015_v4, %v4627_v26 }
 0x199   :  { %v2973_v63 = vadd.f32 %v2017_v6, %v4631_v43 }
 0x19d   :  { %v2021_v7 = vpop.f32.mrb[4].mxu1 }
 0x19e   :  { %v2023_v9 = vpop.f32.mrb[5].mxu1  ;;  %v2975_v62 = vadd.f32 %v2021_v7, %v4627_v26 }
 0x19f   :  { %v2025_v10 = vpop.f32.mrb[6].mxu1  ;;  %v2977_v0 = vadd.f32 %v2023_v9, %v4631_v43 }
 0x1a0   :  { %v2027_v12 = vpop.f32.mrb[7].mxu1 }
 0x1a1   :  { %v2981_v7 = vadd.f32 %v2027_v12, %v4631_v43 }
 0x1a5   :  { %v4610_v14 = vpop.f32.mrb[8].mxu1 }
 0x1a6   :  { %v4612_v16 = vpop.f32.mrb[9].mxu1 }
 0x1a7   :  { %v4614_v18 = vpop.f32.mrb[10].mxu1 }
 0x1a8   :  { %v4616_v21 = vpop.f32.mrb[11].mxu1 }
 0x1ad   :  { %v4621_v25 = vpop.f32.mrb[12].mxu1 }
 0x1ae   :  { %v4623_v37 = vpop.f32.mrb[13].mxu1 }
 0x1af   :  { %v4625_v39 = vpop.f32.mrb[14].mxu1 }
 0x1b0   :  { %v4629_v28 = vpop.f32.mrb[15].mxu1 }
 0x1b5   :  { %v2051_v31 = vpop.f32.mrb[16].mxu1 }
 0x1b6   :  { %v2415_v49 = vpop.f32.mrb[0].mxu0  ;;  %v2999_v55 = vadd.f32 %v2051_v31, %v4627_v26  ;;  %v2053_v34 = vpop.f32.mrb[17].mxu1 }
 0x1b7   :  { %v2968_v57 = vadd.f32 %v2967_v45, %v2415_v49  ;;  %v2417_v61 = vpop.f32.mrb[1].mxu0  ;;  %v3003_v3 = vadd.f32 %v2053_v34, %v4631_v43  ;;  %v2055_v8 = vpop.f32.mrb[18].mxu1 }
 0x1b8   :  { %v2970_v5 = vadd.f32 %v2969_v29, %v2417_v61  ;;  %v2419_v11 = vpop.f32.mrb[2].mxu0  ;;  %v3007_v17 = vadd.f32 %v2055_v8, %v4627_v26  ;;  %v2057_v23 = vpop.f32.mrb[19].mxu1  ;;  %v4640_v30 = vadd.f32 %v2999_v55, %v2253_v47  ;;  %v2985_v8 = vadd.f32 %v4612_v16, %v4631_v43 }
 0x1b9   :  { %v2482_v15 = vmax.f32 %v2968_v57, 0.0  ;;  %v2972_v20 = vadd.f32 %v2971_v51, %v2419_v11  ;;  %v2421_v27 = vpop.f32.mrb[3].mxu0  ;;  %v3011_v35 = vadd.f32 %v2057_v23, %v4631_v43  ;;  %v4643_v38 = vadd.f32 %v3003_v3, %v2255_v48 }
 0x1ba   :  { %v2483_v32 = vmax.f32 %v2970_v5, 0.0  ;;  %v2974_v36 = vadd.f32 %v2973_v63, %v2421_v27  ;;  %v4651_v42 = vadd.f32 %v3007_v17, %v4594_v50  ;;  %v2979_v50 = vadd.f32 %v2025_v10, %v4627_v26 }
 0x1bb   :  { %v2484_v41 = vmax.f32 %v2972_v20, 0.0  ;;  %v4654_v47 = vadd.f32 %v3011_v35, %v4596_v52  ;;  %v2989_v16 = vadd.f32 %v4616_v21, %v4631_v43 }
 0x1bc   :  { %v2922_v44 = vpack.c.bf16 %v2483_v32, %v2482_v15  ;;  %v2485_v46 = vmax.f32 %v2974_v36, 0.0  ;;  %v2987_v15 = vadd.f32 %v4614_v18, %v4627_v26 }
 0x1bd   :  { %v2061_v1 = vpop.f32.mrb[20].mxu1 }
 0x1be   :  { %2591 = vst.msk [vmem:[%s4776_s3] sm:$0xff] %vm4646_vm3, %v2922_v44  ;;  %v2923_v48 = vpack.c.bf16 %v2485_v46, %v2484_v41  ;;  %v2425_v2 = vpop.f32.mrb[4].mxu0  ;;  %v3015_v4 = vadd.f32 %v2061_v1, %v4627_v26  ;;  %v2063_v52 = vpop.f32.mrb[21].mxu1 }
 0x1bf   :  { %v2976_v6 = vadd.f32 %v2975_v62, %v2425_v2  ;;  %v2427_v13 = vpop.f32.mrb[5].mxu0  ;;  %v3019_v9 = vadd.f32 %v2063_v52, %v4631_v43  ;;  %v2065_v22 = vpop.f32.mrb[22].mxu1 }
 0x1c0   :  { %2592 = vst.msk [vmem:[%s4776_s3 + $0x8] sm:$0xff] %vm4646_vm3, %v2923_v48  ;;  %v2978_v19 = vadd.f32 %v2977_v0, %v2427_v13  ;;  %v2429_v33 = vpop.f32.mrb[6].mxu0  ;;  %v3023_v10 = vadd.f32 %v2065_v22, %v4627_v26  ;;  %v2067_v29 = vpop.f32.mrb[23].mxu1  ;;  %v4674_v49 = vadd.f32 %v3015_v4, %v4598_v53  ;;  %v2983_v53 = vadd.f32 %v4610_v14, %v4627_v26 }
 0x1c1   :  { %v2486_v24 = vmax.f32 %v2976_v6, 0.0  ;;  %v2980_v45 = vadd.f32 %v2979_v50, %v2429_v33  ;;  %v2431_v31 = vpop.f32.mrb[7].mxu0  ;;  %v3027_v51 = vadd.f32 %v2067_v29, %v4631_v43  ;;  %v4678_v57 = vadd.f32 %v3019_v9, %v4600_v54 }
 0x1c2   :  { %v2487_v12 = vmax.f32 %v2978_v19, 0.0  ;;  %v2982_v55 = vadd.f32 %v2981_v7, %v2431_v31  ;;  %v4681_v61 = vadd.f32 %v3023_v10, %v4602_v56  ;;  %v2991_v50 = vadd.f32 %v4621_v25, %v4627_v26 }
 0x1c3   :  { %v2488_v34 = vmax.f32 %v2980_v45, 0.0  ;;  %v4684_v5 = vadd.f32 %v3027_v51, %v4604_v58  ;;  %v2993_v4 = vadd.f32 %v4623_v37, %v4631_v43  ;;  %v2997_v7 = vadd.f32 %v4629_v28, %v4631_v43 }
 0x1c4   :  { %v2924_v63 = vpack.c.bf16 %v2487_v12, %v2486_v24  ;;  %v2489_v3 = vmax.f32 %v2982_v55, 0.0 }
 0x1c5   :  { %v2071_v56 = vpop.f32.mrb[24].mxu1 }
 0x1c6   :  { %2593 = vst.msk [vmem:[%s4776_s3 + $0x10] sm:$0xff] %vm4646_vm3, %v2924_v63  ;;  %v2925_v54 = vpack.c.bf16 %v2489_v3, %v2488_v34  ;;  %v2435_v11 = vpop.f32.mrb[8].mxu0  ;;  %v3031_v58 = vadd.f32 %v2071_v56, %v4627_v26  ;;  %v2073_v20 = vpop.f32.mrb[25].mxu1 }
 0x1c7   :  { %v2984_v17 = vadd.f32 %v2983_v53, %v2435_v11  ;;  %v2437_v14 = vpop.f32.mrb[9].mxu0  ;;  %v3035_v23 = vadd.f32 %v2073_v20, %v4631_v43  ;;  %v2075_v32 = vpop.f32.mrb[26].mxu1 }
 0x1c8   :  { %2594 = vst.msk [vmem:[%s4776_s3 + $0x18] sm:$0xff] %vm4646_vm3, %v2925_v54  ;;  %v2986_v27 = vadd.f32 %v2985_v8, %v2437_v14  ;;  %v2439_v35 = vpop.f32.mrb[10].mxu0  ;;  %v2076_v41 = vpop.f32.mrb[27].mxu1  ;;  %v4707_v46 = vadd.f32 %v3031_v58, %v4606_v59 }
 0x1c9   :  { %v2490_v18 = vmax.f32 %v2984_v17, 0.0  ;;  %v2988_v36 = vadd.f32 %v2987_v15, %v2439_v35  ;;  %v2441_v44 = vpop.f32.mrb[11].mxu0  ;;  %v4710_v0 = vadd.f32 %v3035_v23, %v4608_v60  ;;  %v2995_v60 = vadd.f32 %v4625_v39, %v4627_v26 }
 0x1ca   :  { %v2491_v62 = vmax.f32 %v2986_v27, 0.0  ;;  %v2990_v21 = vadd.f32 %v2989_v16, %v2441_v44 }
 0x1cb   :  { %v2492_v48 = vmax.f32 %v2988_v36, 0.0 }
 0x1cc   :  { %v2926_v1 = vpack.c.bf16 %v2491_v62, %v2490_v18  ;;  %v2493_v2 = vmax.f32 %v2990_v21, 0.0 }
 0x1ce   :  { %2595 = vst.msk [vmem:[%s4776_s3 + $0x20] sm:$0xff] %vm4646_vm3, %v2926_v1  ;;  %v2927_v59 = vpack.c.bf16 %v2493_v2, %v2492_v48  ;;  %v2445_v6 = vpop.f32.mrb[12].mxu0 }
 0x1cf   :  { %v2992_v52 = vadd.f32 %v2991_v50, %v2445_v6  ;;  %v2447_v13 = vpop.f32.mrb[13].mxu0 }
 0x1d0   :  { %2596 = vst.msk [vmem:[%s4776_s3 + $0x28] sm:$0xff] %vm4646_vm3, %v2927_v59  ;;  %v2994_v25 = vadd.f32 %v2993_v4, %v2447_v13  ;;  %v2449_v37 = vpop.f32.mrb[14].mxu0 }
 0x1d1   :  { %v2494_v9 = vmax.f32 %v2992_v52, 0.0  ;;  %v2996_v19 = vadd.f32 %v2995_v60, %v2449_v37  ;;  %v2451_v22 = vpop.f32.mrb[15].mxu0 }
 0x1d2   :  { %v2495_v33 = vmax.f32 %v2994_v25, 0.0  ;;  %v2998_v24 = vadd.f32 %v2997_v7, %v2451_v22 }
 0x1d3   :  { %v2496_v10 = vmax.f32 %v2996_v19, 0.0 }
 0x1d4   :  { %v2928_v39 = vpack.c.bf16 %v2495_v33, %v2494_v9  ;;  %v2497_v26 = vmax.f32 %v2998_v24, 0.0 }
 0x1d5   :  { %v2354_v43 = vpop.f32.mrb[28].mxu1 }
 0x1d6   :  { %2597 = vst.msk [vmem:[%s4776_s3 + $0x30] sm:$0xff] %vm4646_vm3, %v2928_v39  ;;  %v2929_v28 = vpack.c.bf16 %v2497_v26, %v2496_v10  ;;  %v2455_v45 = vpop.f32.mrb[28].mxu0  ;;  %v3001_v29 = vadd.f32 %v4640_v30, %v2354_v43  ;;  %v2356_v31 = vpop.f32.mrb[29].mxu1 }
 0x1d7   :  { %v2457_v12 = vpop.f32.mrb[29].mxu0  ;;  %v3005_v51 = vadd.f32 %v4643_v38, %v2356_v31  ;;  %v2358_v55 = vpop.f32.mrb[30].mxu1 }
 0x1d8   :  { %2598 = vst.msk [vmem:[%s4776_s3 + $0x38] sm:$0xff] %vm4646_vm3, %v2929_v28  ;;  %v2459_v34 = vpop.f32.mrb[30].mxu0  ;;  %v3002_v63 = vadd.f32 %v3001_v29, %v2455_v45  ;;  %v3009_v3 = vadd.f32 %v4651_v42, %v2358_v55  ;;  %v2360_v53 = vpop.f32.mrb[31].mxu1 }
 0x1d9   :  { %v2461_v8 = vpop.f32.mrb[31].mxu0  ;;  %v3006_v54 = vadd.f32 %v3005_v51, %v2457_v12  ;;  %v3013_v30 = vadd.f32 %v4654_v47, %v2360_v53 }
 0x1da   :  { %v2498_v56 = vmax.f32 %v3002_v63, 0.0  ;;  %v3010_v11 = vadd.f32 %v3009_v3, %v2459_v34 }
 0x1db   :  { %v2499_v15 = vmax.f32 %v3006_v54, 0.0  ;;  %v3014_v58 = vadd.f32 %v3013_v30, %v2461_v8 }
 0x1dc   :  { %v2500_v17 = vmax.f32 %v3010_v11, 0.0 }
 0x1dd   :  { %v2930_v20 = vpack.c.bf16 %v2499_v15, %v2498_v56  ;;  %v2501_v14 = vmax.f32 %v3014_v58, 0.0  ;;  %v2364_v16 = vpop.f32.mrb[32].mxu1 }
 0x1de   :  { %v2465_v23 = vpop.f32.mrb[32].mxu0  ;;  %v3017_v38 = vadd.f32 %v4674_v49, %v2364_v16  ;;  %v2366_v27 = vpop.f32.mrb[33].mxu1 }
 0x1df   :  { %v2467_v32 = vpop.f32.mrb[33].mxu0  ;;  %2599 = vst.msk [vmem:[%s4776_s3 + $0x40] sm:$0xff] %vm4646_vm3, %v2930_v20  ;;  %v2931_v42 = vpack.c.bf16 %v2501_v14, %v2500_v17  ;;  %v3021_v47 = vadd.f32 %v4678_v57, %v2366_v27  ;;  %v2368_v35 = vpop.f32.mrb[34].mxu1 }
 0x1e0   :  { %v2469_v18 = vpop.f32.mrb[34].mxu0  ;;  %v3018_v36 = vadd.f32 %v3017_v38, %v2465_v23  ;;  %v3025_v41 = vadd.f32 %v4681_v61, %v2368_v35  ;;  %v2370_v44 = vpop.f32.mrb[35].mxu1 }
 0x1e1   :  { %v2471_v62 = vpop.f32.mrb[35].mxu0  ;;  %2600 = vst.msk [vmem:[%s4776_s3 + $0x48] sm:$0xff] %vm4646_vm3, %v2931_v42  ;;  %v3022_v49 = vadd.f32 %v3021_v47, %v2467_v32  ;;  %v3029_v21 = vadd.f32 %v4684_v5, %v2370_v44 }
 0x1e2   :  { %v2502_v48 = vmax.f32 %v3018_v36, 0.0  ;;  %v3026_v1 = vadd.f32 %v3025_v41, %v2469_v18 }
 0x1e3   :  { %v2503_v2 = vmax.f32 %v3022_v49, 0.0  ;;  %v3030_v57 = vadd.f32 %v3029_v21, %v2471_v62 }
 0x1e4   :  { %v2504_v50 = vmax.f32 %v3026_v1, 0.0 }
 0x1e5   :  { %v2932_v4 = vpack.c.bf16 %v2503_v2, %v2502_v48  ;;  %v2505_v59 = vmax.f32 %v3030_v57, 0.0  ;;  %v2374_v6 = vpop.f32.mrb[36].mxu1 }
 0x1e6   :  { %v2475_v61 = vpop.f32.mrb[36].mxu0  ;;  %v3033_v60 = vadd.f32 %v4707_v46, %v2374_v6  ;;  %v2376_v52 = vpop.f32.mrb[37].mxu1 }
 0x1e7   :  { %v2477_v13 = vpop.f32.mrb[37].mxu0  ;;  %2601 = vst.msk [vmem:[%s4776_s3 + $0x50] sm:$0xff] %vm4646_vm3, %v2932_v4  ;;  %v2933_v5 = vpack.c.bf16 %v2505_v59, %v2504_v50  ;;  %v3037_v7 = vadd.f32 %v4710_v0, %v2376_v52  ;;  %v2378_v25 = vpop.f32.mrb[38].mxu1 }
 0x1e8   :  { %v2479_v37 = vpop.f32.mrb[38].mxu0  ;;  %v3034_v9 = vadd.f32 %v3033_v60, %v2475_v61  ;;  %v2379_v19 = vpop.f32.mrb[39].mxu1 }
 0x1e9   :  { %v2480_v22 = vpop.f32.mrb[39].mxu0  ;;  %2602 = vst.msk [vmem:[%s4776_s3 + $0x58] sm:$0xff] %vm4646_vm3, %v2933_v5  ;;  %v3038_v46 = vadd.f32 %v3037_v7, %v2477_v13 }
 0x1ea   :  { %v2506_v33 = vmax.f32 %v3034_v9, 0.0 }
 0x1eb   :  { %v2507_v24 = vmax.f32 %v3038_v46, 0.0 }
 0x1ed   :  { %v2934_v10 = vpack.c.bf16 %v2507_v24, %v2506_v33 }
 0x1ef   :  { %2606 = vst.msk [vmem:[%s4776_s3 + $0x60] sm:$0x11] %vm2605_vm6, %v2934_v10 }

// kernel: finetuner_forward.7
= control target key start
LH: loop header
LB: loop body
LE: loop exit
PB: predicated region body
PF: predicated region fallthrough
CT: control target
= control target key end

     0   :  { %vm2330_vm0 = vcmask 523264   ;;  %s5359_s1 = inlined_call_operand.vmem [shape: bf16[1728,384], index: 1, kind: input, shape index: {}]   ;;  %s5360_s0 = inlined_call_operand.vmem [shape: bf16[18,1728], index: 0, kind: input, shape index: {}]   ;;  %s5361_s2 = inlined_call_operand.vmem [shape: f32[1,384], index: 2, kind: input, shape index: {}]   ;;  %s5362_s3 = inlined_call_operand.vmem [shape: bf16[18,384], index: 3, kind: output, shape index: {}]  }
   0x1   :  { %v3669_v0 = vld [vmem:[%s5359_s1 + $0x4] ss:$12 sps:$4 sm:$0xff]   ;;  %v3673_v2 = vld [vmem:[%s5359_s1] ss:$12 sps:$4 sm:$0xff]   ;;  %v3675_v4 = vld [vmem:[%s5359_s1 + $0x1c] ss:$12 sps:$4 sm:$0xff]  }
   0x2   :  { %v3671_v1 = vld [vmem:[%s5359_s1 + $0x184] ss:$12 sps:$4 sm:$0xff]   ;;  %2337 = vmatprep.subr.bf16.mxu1 %v3669_v0  ;;  %v3674_v3 = vld [vmem:[%s5359_s1 + $0x180] ss:$12 sps:$4 sm:$0xff]   ;;  %v3677_v5 = vld [vmem:[%s5359_s1 + $0x19c] ss:$12 sps:$4 sm:$0xff]  }
   0x3   :  { %2388 = vmatprep.subr.bf16.mxu0 %v3671_v1  ;;  %2338 = vmatpush1.bf16.msra.mxu1 %v3673_v2  ;;  %v3679_v6 = vld [vmem:[%s5359_s1 + $0x18] ss:$12 sps:$4 sm:$0xff]   ;;  %v3681_v8 = vld [vmem:[%s5359_s1 + $0x34] ss:$12 sps:$4 sm:$0xff]   ;;  %v3685_v10 = vld [vmem:[%s5359_s1 + $0x30] ss:$12 sps:$4 sm:$0xff]  }
   0x4   :  { %2389 = vmatpush1.bf16.msra.mxu0 %v3674_v3  ;;  %2339 = vmatprep.subr.bf16.mxu1 %v3675_v4  ;;  %v3680_v7 = vld [vmem:[%s5359_s1 + $0x198] ss:$12 sps:$4 sm:$0xff]   ;;  %v3683_v9 = vld [vmem:[%s5359_s1 + $0x1b4] ss:$12 sps:$4 sm:$0xff]   ;;  %v3686_v11 = vld [vmem:[%s5359_s1 + $0x1b0] ss:$12 sps:$4 sm:$0xff]  }
   0x5   :  { %2390 = vmatprep.subr.bf16.mxu0 %v3677_v5  ;;  %v3687_v12 = vld [vmem:[%s5359_s1 + $0x4c] ss:$12 sps:$4 sm:$0xff]   ;;  %v3691_v14 = vld [vmem:[%s5359_s1 + $0x48] ss:$12 sps:$4 sm:$0xff]   ;;  %v3693_v16 = vld [vmem:[%s5359_s1 + $0x64] ss:$12 sps:$4 sm:$0xff]  }
   0x6   :  { %v3689_v13 = vld [vmem:[%s5359_s1 + $0x1cc] ss:$12 sps:$4 sm:$0xff]   ;;  %v3692_v15 = vld [vmem:[%s5359_s1 + $0x1c8] ss:$12 sps:$4 sm:$0xff]   ;;  %v3695_v17 = vld [vmem:[%s5359_s1 + $0x1e4] ss:$12 sps:$4 sm:$0xff]  }
   0x7   :  { %2340 = vmatpush1.bf16.msra.mxu1 %v3679_v6  ;;  %v3697_v18 = vld [vmem:[%s5359_s1 + $0x60] ss:$12 sps:$4 sm:$0xff]   ;;  %v3699_v20 = vld [vmem:[%s5359_s1 + $0x7c] ss:$12 sps:$4 sm:$0xff]   ;;  %v3703_v22 = vld [vmem:[%s5359_s1 + $0x78] ss:$12 sps:$4 sm:$0xff]  }
   0x8   :  { %2391 = vmatpush1.bf16.msra.mxu0 %v3680_v7  ;;  %2341 = vmatprep.subr.bf16.mxu1 %v3681_v8  ;;  %v3698_v19 = vld [vmem:[%s5359_s1 + $0x1e0] ss:$12 sps:$4 sm:$0xff]   ;;  %v3701_v21 = vld [vmem:[%s5359_s1 + $0x1fc] ss:$12 sps:$4 sm:$0xff]   ;;  %v3704_v23 = vld [vmem:[%s5359_s1 + $0x1f8] ss:$12 sps:$4 sm:$0xff]  }
   0x9   :  { %2392 = vmatprep.subr.bf16.mxu0 %v3683_v9  ;;  %v3705_v24 = vld [vmem:[%s5359_s1 + $0x94] ss:$12 sps:$4 sm:$0xff]   ;;  %v3709_v26 = vld [vmem:[%s5359_s1 + $0x90] ss:$12 sps:$4 sm:$0xff]   ;;  %v3711_v28 = vld [vmem:[%s5359_s1 + $0xac] ss:$12 sps:$4 sm:$0xff]  }
   0xa   :  { %v3707_v25 = vld [vmem:[%s5359_s1 + $0x214] ss:$12 sps:$4 sm:$0xff]   ;;  %v3710_v27 = vld [vmem:[%s5359_s1 + $0x210] ss:$12 sps:$4 sm:$0xff]   ;;  %v3713_v29 = vld [vmem:[%s5359_s1 + $0x22c] ss:$12 sps:$4 sm:$0xff]  }
   0xb   :  { %2342 = vmatpush1.bf16.msra.mxu1 %v3685_v10  ;;  %v3715_v30 = vld [vmem:[%s5359_s1 + $0xa8] ss:$12 sps:$4 sm:$0xff]   ;;  %v3717_v32 = vld [vmem:[%s5359_s1 + $0xc4] ss:$12 sps:$4 sm:$0xff]   ;;  %v3721_v34 = vld [vmem:[%s5359_s1 + $0xc0] ss:$12 sps:$4 sm:$0xff]  }
   0xc   :  { %2393 = vmatpush1.bf16.msra.mxu0 %v3686_v11  ;;  %2343 = vmatprep.subr.bf16.mxu1 %v3687_v12  ;;  %v3716_v31 = vld [vmem:[%s5359_s1 + $0x228] ss:$12 sps:$4 sm:$0xff]   ;;  %v3719_v33 = vld [vmem:[%s5359_s1 + $0x244] ss:$12 sps:$4 sm:$0xff]   ;;  %v3722_v35 = vld [vmem:[%s5359_s1 + $0x240] ss:$12 sps:$4 sm:$0xff]  }
   0xd   :  { %2394 = vmatprep.subr.bf16.mxu0 %v3689_v13  ;;  %v3723_v36 = vld [vmem:[%s5359_s1 + $0xdc] ss:$12 sps:$4 sm:$0xff]   ;;  %v3727_v38 = vld [vmem:[%s5359_s1 + $0xd8] ss:$12 sps:$4 sm:$0xff]   ;;  %v3729_v40 = vld [vmem:[%s5359_s1 + $0xf4] ss:$12 sps:$4 sm:$0xff]  }
   0xe   :  { %v3725_v37 = vld [vmem:[%s5359_s1 + $0x25c] ss:$12 sps:$4 sm:$0xff]   ;;  %v3728_v39 = vld [vmem:[%s5359_s1 + $0x258] ss:$12 sps:$4 sm:$0xff]   ;;  %v3731_v41 = vld [vmem:[%s5359_s1 + $0x274] ss:$12 sps:$4 sm:$0xff]  }
   0xf   :  { %2344 = vmatpush1.bf16.msra.mxu1 %v3691_v14  ;;  %v3733_v42 = vld [vmem:[%s5359_s1 + $0xf0] ss:$12 sps:$4 sm:$0xff]   ;;  %v3735_v44 = vld [vmem:[%s5359_s1 + $0x10c] ss:$12 sps:$4 sm:$0xff]   ;;  %v3739_v46 = vld [vmem:[%s5359_s1 + $0x108] ss:$12 sps:$4 sm:$0xff]  }
  0x10   :  { %2395 = vmatpush1.bf16.msra.mxu0 %v3692_v15  ;;  %2345 = vmatprep.subr.bf16.mxu1 %v3693_v16  ;;  %v3734_v43 = vld [vmem:[%s5359_s1 + $0x270] ss:$12 sps:$4 sm:$0xff]   ;;  %v3737_v45 = vld [vmem:[%s5359_s1 + $0x28c] ss:$12 sps:$4 sm:$0xff]   ;;  %v3740_v47 = vld [vmem:[%s5359_s1 + $0x288] ss:$12 sps:$4 sm:$0xff]  }
  0x11   :  { %2396 = vmatprep.subr.bf16.mxu0 %v3695_v17  ;;  %v3741_v48 = vld [vmem:[%s5359_s1 + $0x124] ss:$12 sps:$4 sm:$0xff]   ;;  %v3745_v52 = vld [vmem:[%s5359_s1 + $0x120] ss:$12 sps:$4 sm:$0xff]   ;;  %v3747_v54 = vld [vmem:[%s5359_s1 + $0x13c] ss:$12 sps:$4 sm:$0xff]  }
  0x12   :  { %v4309_v49 = vld [vmem:[%s5360_s0 + $0x4] ss:$56 sps:$4 sm:$0xff]   ;;  %v3746_v53 = vld [vmem:[%s5359_s1 + $0x2a0] ss:$12 sps:$4 sm:$0xff]   ;;  %v3763_v0 = vld [vmem:[%s5359_s1 + $0x168] ss:$12 sps:$4 sm:$0xff]  }
  0x13   :  { %2346 = vmatpush1.bf16.msra.mxu1 %v3697_v18  ;;  %v3743_v50 = vld [vmem:[%s5359_s1 + $0x2a4] ss:$12 sps:$4 sm:$0xff]   ;;  %2369 = vmatprep.mubr.bf16.mxu1 %v4309_v49  ;;  %v3749_v55 = vld [vmem:[%s5359_s1 + $0x2bc] ss:$12 sps:$4 sm:$0xff]   ;;  %v3753_v58 = vld [vmem:[%s5359_s1 + $0x154] ss:$12 sps:$4 sm:$0xff]  }
  0x14   :  { %2397 = vmatpush1.bf16.msra.mxu0 %v3698_v19  ;;  %2347 = vmatprep.subr.bf16.mxu1 %v3699_v20  ;;  %v4317_v51 = vld [vmem:[%s5360_s0 + $0xc] ss:$56 sps:$4 sm:$0xff]   ;;  %v3755_v59 = vld [vmem:[%s5359_s1 + $0x2d4] ss:$12 sps:$4 sm:$0xff]   ;;  %v3757_v60 = vld [vmem:[%s5359_s1 + $0x150] ss:$12 sps:$4 sm:$0xff]  }
  0x15   :  { %2398 = vmatprep.subr.bf16.mxu0 %v3701_v21  ;;  %2420 = vmatprep.mubr.bf16.mxu0 %v4317_v51  ;;  %v3751_v56 = vld [vmem:[%s5359_s1 + $0x138] ss:$12 sps:$4 sm:$0xff]   ;;  %v3758_v61 = vld [vmem:[%s5359_s1 + $0x2d0] ss:$12 sps:$4 sm:$0xff]   ;;  %v3764_v1 = vld [vmem:[%s5359_s1 + $0x2e8] ss:$12 sps:$4 sm:$0xff]  }
  0x16   :  { %v3752_v57 = vld [vmem:[%s5359_s1 + $0x2b8] ss:$12 sps:$4 sm:$0xff]   ;;  %v4377_v5 = vld [vmem:[%s5360_s0 + $0x8] ss:$56 sps:$4 sm:$0xff]   ;;  %v3783_v14 = vld [vmem:[%s5359_s1 + $0x330] ss:$12 sps:$4 sm:$0xff]  }
  0x17   :  { %2348 = vmatpush1.bf16.msra.mxu1 %v3703_v22  ;;  %v3759_v62 = vld [vmem:[%s5359_s1 + $0x16c] ss:$12 sps:$4 sm:$0xff]   ;;  %v3773_v2 = vld [vmem:[%s5359_s1 + $0x304] ss:$12 sps:$4 sm:$0xff]   ;;  %v3779_v8 = vld [vmem:[%s5359_s1 + $0x31c] ss:$12 sps:$4 sm:$0xff]  }
  0x18   :  { %2399 = vmatpush1.bf16.msra.mxu0 %v3704_v23  ;;  %2349 = vmatprep.subr.bf16.mxu1 %v3705_v24  ;;  %v3761_v63 = vld [vmem:[%s5359_s1 + $0x2ec] ss:$12 sps:$4 sm:$0xff]   ;;  %v3776_v3 = vld [vmem:[%s5359_s1 + $0x904] ss:$12 sps:$4 sm:$0xff]   ;;  %v3782_v9 = vld [vmem:[%s5359_s1 + $0x91c] ss:$12 sps:$4 sm:$0xff]  }
  0x19   :  { %2400 = vmatprep.subr.bf16.mxu0 %v3707_v25  ;;  %v4372_v4 = vld [vmem:[%s5360_s0] ss:$56 sps:$4 sm:$0xff]   ;;  %v3786_v15 = vld [vmem:[%s5359_s1 + $0x930] ss:$12 sps:$4 sm:$0xff]   ;;  %v3789_v21 = vld [vmem:[%s5359_s1 + $0x348] ss:$12 sps:$4 sm:$0xff]  }
  0x1a   :  { %v3771_v6 = vld [vmem:[%s5359_s1 + $0x300] ss:$12 sps:$4 sm:$0xff]   ;;  %v3777_v10 = vld [vmem:[%s5359_s1 + $0x318] ss:$12 sps:$4 sm:$0xff]   ;;  %v29_v16 = vld [vmem:[%s5360_s0 + $0x70] sm:$0x11] }
  0x1b   :  { %2350 = vmatpush1.bf16.msra.mxu1 %v3709_v26  ;;  %v3774_v7 = vld [vmem:[%s5359_s1 + $0x900] ss:$12 sps:$4 sm:$0xff]   ;;  %v3780_v11 = vld [vmem:[%s5359_s1 + $0x918] ss:$12 sps:$4 sm:$0xff]   ;;  %v4420_v19 = vcombine.high %v29_v16, %v29_v16  ;;  %v4422_v20 = vcombine.low %v29_v16, %v29_v16  ;;  %v3792_v22 = vld [vmem:[%s5359_s1 + $0x948] ss:$12 sps:$4 sm:$0xff]  }
  0x1c   :  { %2401 = vmatpush1.bf16.msra.mxu0 %v3710_v27  ;;  %2351 = vmatprep.subr.bf16.mxu1 %v3711_v28  ;;  %v3785_v12 = vld [vmem:[%s5359_s1 + $0x334] ss:$12 sps:$4 sm:$0xff]   ;;  %v3791_v17 = vld [vmem:[%s5359_s1 + $0x34c] ss:$12 sps:$4 sm:$0xff]   ;;  %v3797_v23 = vld [vmem:[%s5359_s1 + $0x364] ss:$12 sps:$4 sm:$0xff]  }
  0x1d   :  { %2402 = vmatprep.subr.bf16.mxu0 %v3713_v29  ;;  %v3788_v13 = vld [vmem:[%s5359_s1 + $0x934] ss:$12 sps:$4 sm:$0xff]   ;;  %v3794_v18 = vld [vmem:[%s5359_s1 + $0x94c] ss:$12 sps:$4 sm:$0xff]   ;;  %v3800_v24 = vld [vmem:[%s5359_s1 + $0x964] ss:$12 sps:$4 sm:$0xff]  }
  0x1e   :  { %v3795_v25 = vld [vmem:[%s5359_s1 + $0x360] ss:$12 sps:$4 sm:$0xff]   ;;  %v3803_v28 = vld [vmem:[%s5359_s1 + $0x37c] ss:$12 sps:$4 sm:$0xff]  }
  0x1f   :  { %2352 = vmatpush1.bf16.msra.mxu1 %v3715_v30  ;;  %v3847_v26 = vld [vmem:[%s5360_s0 + $0x34] ss:$56 sps:$4 sm:$0xff]   ;;  %v3806_v29 = vld [vmem:[%s5359_s1 + $0x97c] ss:$12 sps:$4 sm:$0xff]   ;;  %v3801_v30 = vld [vmem:[%s5359_s1 + $0x378] ss:$12 sps:$4 sm:$0xff]  }
  0x20   :  { %2403 = vmatpush1.bf16.msra.mxu0 %v3716_v31  ;;  %2353 = vmatprep.subr.bf16.mxu1 %v3717_v32  ;;  %v3798_v27 = vld [vmem:[%s5359_s1 + $0x960] ss:$12 sps:$4 sm:$0xff]   ;;  %v3804_v31 = vld [vmem:[%s5359_s1 + $0x978] ss:$12 sps:$4 sm:$0xff]  }
  0x21   :  { %2404 = vmatprep.subr.bf16.mxu0 %v3719_v33  ;;  %v3809_v32 = vld [vmem:[%s5359_s1 + $0x394] ss:$12 sps:$4 sm:$0xff]   ;;  %v3867_v16 = vld [vmem:[%s5359_s1 + $0x46c] ss:$12 sps:$4 sm:$0xff]  }
  0x22   :  { %v3812_v33 = vld [vmem:[%s5359_s1 + $0x994] ss:$12 sps:$4 sm:$0xff]  }
  0x23   :  { %2354 = vmatpush1.bf16.msra.mxu1 %v3721_v34  ;;  %v30_v34 = vld [vmem:[%s5360_s0 + $0x78] sm:$0x11] }
  0x24   :  { %2405 = vmatpush1.bf16.msra.mxu0 %v3722_v35  ;;  %2355 = vmatprep.subr.bf16.mxu1 %v3723_v36  ;;  %v3807_v35 = vld [vmem:[%s5359_s1 + $0x390] ss:$12 sps:$4 sm:$0xff]   ;;  %v4472_v36 = vcombine.high %v30_v34, %v30_v34 }
  0x25   :  { %2406 = vmatprep.subr.bf16.mxu0 %v3725_v37  ;;  %v3810_v37 = vld [vmem:[%s5359_s1 + $0x990] ss:$12 sps:$4 sm:$0xff]  }
  0x27   :  { %2356 = vmatpush1.bf16.msra.mxu1 %v3727_v38  ;;  %v4477_v38 = vcombine.low %v30_v34, %v30_v34  ;;  %v3892_v34 = vld [vmem:[%s5359_s1 + $0x4cc] ss:$12 sps:$4 sm:$0xff]  }
  0x28   :  { %2407 = vmatpush1.bf16.msra.mxu0 %v3728_v39  ;;  %2357 = vmatprep.subr.bf16.mxu1 %v3729_v40  ;;  %v3815_v39 = vld [vmem:[%s5359_s1 + $0x3ac] ss:$12 sps:$4 sm:$0xff]  }
  0x29   :  { %2408 = vmatprep.subr.bf16.mxu0 %v3731_v41  ;;  %v3818_v40 = vld [vmem:[%s5359_s1 + $0x9ac] ss:$12 sps:$4 sm:$0xff]   ;;  %v3813_v41 = vld [vmem:[%s5359_s1 + $0x3a8] ss:$12 sps:$4 sm:$0xff]  }
  0x2b   :  { %2358 = vmatpush1.bf16.msra.mxu1 %v3733_v42  ;;  %v3816_v42 = vld [vmem:[%s5359_s1 + $0x9a8] ss:$12 sps:$4 sm:$0xff]  }
  0x2c   :  { %2409 = vmatpush1.bf16.msra.mxu0 %v3734_v43  ;;  %2359 = vmatprep.subr.bf16.mxu1 %v3735_v44  ;;  %v3821_v43 = vld [vmem:[%s5359_s1 + $0x3c4] ss:$12 sps:$4 sm:$0xff]  }
  0x2d   :  { %2410 = vmatprep.subr.bf16.mxu0 %v3737_v45  ;;  %v3824_v44 = vld [vmem:[%s5359_s1 + $0x9c4] ss:$12 sps:$4 sm:$0xff]   ;;  %v4502_v45 = vld [vmem:[%s5360_s0 + $0x14] ss:$56 sps:$4 sm:$0xff]  }
  0x2f   :  { %2360 = vmatpush1.bf16.msra.mxu1 %v3739_v46  ;;  %v3819_v46 = vld [vmem:[%s5359_s1 + $0x3c0] ss:$12 sps:$4 sm:$0xff]  }
  0x30   :  { %2411 = vmatpush1.bf16.msra.mxu0 %v3740_v47  ;;  %2361 = vmatprep.subr.bf16.mxu1 %v3741_v48  ;;  %v3822_v47 = vld [vmem:[%s5359_s1 + $0x9c0] ss:$12 sps:$4 sm:$0xff]   ;;  %v3827_v48 = vld [vmem:[%s5359_s1 + $0x3dc] ss:$12 sps:$4 sm:$0xff]  }
  0x31   :  { %2412 = vmatprep.subr.bf16.mxu0 %v3743_v50  ;;  %v3830_v50 = vld [vmem:[%s5359_s1 + $0x9dc] ss:$12 sps:$4 sm:$0xff]  }
  0x33   :  { %2362 = vmatpush1.bf16.msra.mxu1 %v3745_v52  ;;  %v3825_v52 = vld [vmem:[%s5359_s1 + $0x3d8] ss:$12 sps:$4 sm:$0xff]  }
  0x34   :  { %2413 = vmatpush1.bf16.msra.mxu0 %v3746_v53  ;;  %2363 = vmatprep.subr.bf16.mxu1 %v3747_v54  ;;  %v3828_v53 = vld [vmem:[%s5359_s1 + $0x9d8] ss:$12 sps:$4 sm:$0xff]   ;;  %v3835_v54 = vld [vmem:[%s5359_s1 + $0x3f4] ss:$12 sps:$4 sm:$0xff]  }
  0x35   :  { %2414 = vmatprep.subr.bf16.mxu0 %v3749_v55  ;;  %v3838_v55 = vld [vmem:[%s5359_s1 + $0x9f4] ss:$12 sps:$4 sm:$0xff]  }
  0x37   :  { %2364 = vmatpush1.bf16.msra.mxu1 %v3751_v56  ;;  %v3833_v56 = vld [vmem:[%s5359_s1 + $0x3f0] ss:$12 sps:$4 sm:$0xff]  }
  0x38   :  { %2415 = vmatpush1.bf16.msra.mxu0 %v3752_v57  ;;  %2365 = vmatprep.subr.bf16.mxu1 %v3753_v58  ;;  %v3836_v57 = vld [vmem:[%s5359_s1 + $0x9f0] ss:$12 sps:$4 sm:$0xff]   ;;  %v3841_v58 = vld [vmem:[%s5359_s1 + $0x40c] ss:$12 sps:$4 sm:$0xff]  }
  0x39   :  { %2416 = vmatprep.subr.bf16.mxu0 %v3755_v59  ;;  %v3844_v59 = vld [vmem:[%s5359_s1 + $0xa0c] ss:$12 sps:$4 sm:$0xff]  }
  0x3b   :  { %2366 = vmatpush1.bf16.msra.mxu1 %v3757_v60  ;;  %v3839_v60 = vld [vmem:[%s5359_s1 + $0x408] ss:$12 sps:$4 sm:$0xff]  }
  0x3c   :  { %2417 = vmatpush1.bf16.msra.mxu0 %v3758_v61  ;;  %2367 = vmatprep.subr.bf16.mxu1 %v3759_v62  ;;  %v3842_v61 = vld [vmem:[%s5359_s1 + $0xa08] ss:$12 sps:$4 sm:$0xff]   ;;  %v3850_v62 = vld [vmem:[%s5359_s1 + $0x424] ss:$12 sps:$4 sm:$0xff]  }
  0x3d   :  { %2418 = vmatprep.subr.bf16.mxu0 %v3761_v63  ;;  %v3845_v63 = vld [vmem:[%s5360_s0 + $0x30] ss:$56 sps:$4 sm:$0xff]  }
  0x3f   :  { %2368 = vmatpush1.bf16.msra.mxu1 %v3763_v0  ;;  %v3851_v0 = vld [vmem:[%s5359_s1 + $0xc8] ss:$12 sps:$4 sm:$0xff]  }
  0x40   :  { %2419 = vmatpush1.bf16.msra.mxu0 %v3764_v1  ;;  %2643 = vmatprep.subr.bf16.mxu1 %v3776_v3  ;;  %v3848_v1 = vld [vmem:[%s5359_s1 + $0x420] ss:$12 sps:$4 sm:$0xff]  }
  0x41   :  { %2439 = vmatprep.subr.bf16.mxu0 %v3773_v2  ;;  %v3852_v2 = vld [vmem:[%s5359_s1 + $0x8] ss:$12 sps:$4 sm:$0xff]   ;;  %v35_v3 = vld [vmem:[%s5360_s0 + $0xa0] sm:$0x11] }
  0x42   :  { %2370 = vmatmul.mubr.bf16.vlgmr.msra.gmra.mrb[0].mxu1 %v4372_v4 }
  0x43   :  { %2421 = vmatmul.mubr.bf16.vlgmr.msra.gmra.mrb[0].mxu0 %v4377_v5  ;;  %2644 = vmatpush1.bf16.msra.mxu1 %v3774_v7  ;;  %v3856_v7 = vld [vmem:[%s5359_s1 + $0xe0] ss:$12 sps:$4 sm:$0xff]  }
  0x44   :  { %2440 = vmatpush1.bf16.msra.mxu0 %v3771_v6  ;;  %2645 = vmatprep.subr.bf16.mxu1 %v3782_v9  ;;  %v3855_v6 = vld [vmem:[%s5359_s1 + $0x43c] ss:$12 sps:$4 sm:$0xff]   ;;  %v3853_v9 = vld [vmem:[%s5359_s1 + $0x438] ss:$12 sps:$4 sm:$0xff]  }
  0x45   :  { %2441 = vmatprep.subr.bf16.mxu0 %v3779_v8  ;;  %2379 = vmatprep.mubr.bf16.mxu1 %v4420_v19  ;;  %v4571_v8 = vcombine.high %v35_v3, %v35_v3 }
  0x46   :  { %2430 = vmatprep.mubr.bf16.mxu0 %v4472_v36 }
  0x47   :  { %2646 = vmatpush1.bf16.msra.mxu1 %v3780_v11  ;;  %v3861_v11 = vld [vmem:[%s5359_s1 + $0x454] ss:$12 sps:$4 sm:$0xff]  }
  0x48   :  { %2442 = vmatpush1.bf16.msra.mxu0 %v3777_v10  ;;  %2647 = vmatprep.subr.bf16.mxu1 %v3788_v13  ;;  %v3857_v10 = vld [vmem:[%s5359_s1 + $0x20] ss:$12 sps:$4 sm:$0xff]   ;;  %v3859_v13 = vld [vmem:[%s5359_s1 + $0x450] ss:$12 sps:$4 sm:$0xff]  }
  0x49   :  { %2443 = vmatprep.subr.bf16.mxu0 %v3785_v12  ;;  %v3862_v12 = vld [vmem:[%s5359_s1 + $0xf8] ss:$12 sps:$4 sm:$0xff]  }
  0x4a   :  { %2380 = vmatmul.mubr.bf16.gmra.mrb[4].mxu1 %v4422_v20 }
  0x4b   :  { %2648 = vmatpush1.bf16.msra.mxu1 %v3786_v15  ;;  %3434 = vmatprep.mubr.msk.bf16.mxu1 %vm2330_vm0, %v3847_v26  ;;  %v4593_v15 = vcombine.low %v35_v3, %v35_v3  ;;  %v3877_v26 = vld [vmem:[%s5359_s1 + $0x68] ss:$12 sps:$4 sm:$0xff]  }
  0x4c   :  { %2444 = vmatpush1.bf16.msra.mxu0 %v3783_v14  ;;  %2649 = vmatprep.subr.bf16.mxu1 %v3794_v18  ;;  %v3864_v14 = vld [vmem:[%s5359_s1 + $0x38] ss:$12 sps:$4 sm:$0xff]   ;;  %v3865_v18 = vld [vmem:[%s5359_s1 + $0x468] ss:$12 sps:$4 sm:$0xff]  }
  0x4d   :  { %2445 = vmatprep.subr.bf16.mxu0 %v3791_v17  ;;  %2431 = vmatmul.mubr.bf16.gmra.mrb[4].mxu0 %v4477_v38  ;;  %v3868_v17 = vld [vmem:[%s5359_s1 + $0x110] ss:$12 sps:$4 sm:$0xff]   ;;  %v3927_v3 = vld [vmem:[%s5359_s1 + $0x574] ss:$12 sps:$4 sm:$0xff]  }
  0x4e   :  { %2471 = vmatprep.mubr.bf16.mxu0 %v4502_v45 }
  0x4f   :  { %2650 = vmatpush1.bf16.msra.mxu1 %v3792_v22  ;;  %v3875_v22 = vld [vmem:[%s5359_s1 + $0x484] ss:$12 sps:$4 sm:$0xff]  }
  0x50   :  { %2446 = vmatpush1.bf16.msra.mxu0 %v3789_v21  ;;  %2651 = vmatprep.subr.bf16.mxu1 %v3800_v24  ;;  %v3869_v21 = vld [vmem:[%s5359_s1 + $0x50] ss:$12 sps:$4 sm:$0xff]  }
  0x51   :  { %2447 = vmatprep.subr.bf16.mxu0 %v3797_v23  ;;  %v3876_v23 = vld [vmem:[%s5359_s1 + $0x128] ss:$12 sps:$4 sm:$0xff]  }
  0x52   :  { %v4617_v24 = vld [vmem:[%s5360_s0 + $0x10] ss:$56 sps:$4 sm:$0xff]  }
  0x53   :  { %2652 = vmatpush1.bf16.msra.mxu1 %v3798_v27  ;;  %v3880_v27 = vld [vmem:[%s5359_s1 + $0x49c] ss:$12 sps:$4 sm:$0xff]  }
  0x54   :  { %2448 = vmatpush1.bf16.msra.mxu0 %v3795_v25  ;;  %2653 = vmatprep.subr.bf16.mxu1 %v3806_v29  ;;  %v3873_v25 = vld [vmem:[%s5359_s1 + $0x480] ss:$12 sps:$4 sm:$0xff]  }
  0x55   :  { %2449 = vmatprep.subr.bf16.mxu0 %v3803_v28  ;;  %v3878_v28 = vld [vmem:[%s5359_s1 + $0x498] ss:$12 sps:$4 sm:$0xff]   ;;  %v3883_v29 = vld [vmem:[%s5359_s1 + $0x80] ss:$12 sps:$4 sm:$0xff]  }
  0x57   :  { %2654 = vmatpush1.bf16.msra.mxu1 %v3804_v31  ;;  %v3888_v31 = vld [vmem:[%s5359_s1 + $0x158] ss:$12 sps:$4 sm:$0xff]  }
  0x58   :  { %2450 = vmatpush1.bf16.msra.mxu0 %v3801_v30  ;;  %2655 = vmatprep.subr.bf16.mxu1 %v3812_v33  ;;  %v3887_v30 = vld [vmem:[%s5359_s1 + $0x4b4] ss:$12 sps:$4 sm:$0xff]   ;;  %v3889_v33 = vld [vmem:[%s5359_s1 + $0x98] ss:$12 sps:$4 sm:$0xff]  }
  0x59   :  { %2451 = vmatprep.subr.bf16.mxu0 %v3809_v32  ;;  %v3885_v32 = vld [vmem:[%s5359_s1 + $0x4b0] ss:$12 sps:$4 sm:$0xff]  }
  0x5b   :  { %2656 = vmatpush1.bf16.msra.mxu1 %v3810_v37  ;;  %v3890_v37 = vld [vmem:[%s5359_s1 + $0x4c8] ss:$12 sps:$4 sm:$0xff]  }
  0x5c   :  { %2452 = vmatpush1.bf16.msra.mxu0 %v3807_v35  ;;  %2657 = vmatprep.subr.bf16.mxu1 %v3818_v40  ;;  %v3893_v35 = vld [vmem:[%s5359_s1 + $0x170] ss:$12 sps:$4 sm:$0xff]  }
  0x5d   :  { %2453 = vmatprep.subr.bf16.mxu0 %v3815_v39  ;;  %v3894_v39 = vld [vmem:[%s5359_s1 + $0xb0] ss:$12 sps:$4 sm:$0xff]  }
  0x5e   :  { %v3897_v40 = vld [vmem:[%s5359_s1 + $0x4e4] ss:$12 sps:$4 sm:$0xff]  }
  0x5f   :  { %2658 = vmatpush1.bf16.msra.mxu1 %v3816_v42  ;;  %v31_v42 = vld [vmem:[%s5360_s0 + $0x80] sm:$0x11] }
  0x60   :  { %2454 = vmatpush1.bf16.msra.mxu0 %v3813_v41  ;;  %2659 = vmatprep.subr.bf16.mxu1 %v3824_v44  ;;  %v3898_v41 = vld [vmem:[%s5359_s1 + $0x248] ss:$12 sps:$4 sm:$0xff]   ;;  %v3895_v44 = vld [vmem:[%s5359_s1 + $0x4e0] ss:$12 sps:$4 sm:$0xff]  }
  0x61   :  { %2455 = vmatprep.subr.bf16.mxu0 %v3821_v43  ;;  %v4672_v43 = vcombine.high %v31_v42, %v31_v42 }
  0x63   :  { %2660 = vmatpush1.bf16.msra.mxu1 %v3822_v47  ;;  %v3899_v47 = vld [vmem:[%s5359_s1 + $0x188] ss:$12 sps:$4 sm:$0xff]  }
  0x64   :  { %2456 = vmatpush1.bf16.msra.mxu0 %v3819_v46  ;;  %2661 = vmatprep.subr.bf16.mxu1 %v3830_v50  ;;  %v4677_v46 = vcombine.low %v31_v42, %v31_v42  ;;  %v3903_v50 = vld [vmem:[%s5359_s1 + $0x260] ss:$12 sps:$4 sm:$0xff]   ;;  %v3973_v42 = vld [vmem:[%s5359_s1 + $0x458] ss:$12 sps:$4 sm:$0xff]  }
  0x65   :  { %2457 = vmatprep.subr.bf16.mxu0 %v3827_v48  ;;  %v3902_v48 = vld [vmem:[%s5359_s1 + $0x4fc] ss:$12 sps:$4 sm:$0xff]  }
  0x67   :  { %2662 = vmatpush1.bf16.msra.mxu1 %v3828_v53  ;;  %v3904_v53 = vld [vmem:[%s5359_s1 + $0x1a0] ss:$12 sps:$4 sm:$0xff]  }
  0x68   :  { %2458 = vmatpush1.bf16.msra.mxu0 %v3825_v52  ;;  %2663 = vmatprep.subr.bf16.mxu1 %v3838_v55  ;;  %v3900_v52 = vld [vmem:[%s5359_s1 + $0x4f8] ss:$12 sps:$4 sm:$0xff]  }
  0x69   :  { %2459 = vmatprep.subr.bf16.mxu0 %v3835_v54  ;;  %v3907_v54 = vld [vmem:[%s5359_s1 + $0x514] ss:$12 sps:$4 sm:$0xff]   ;;  %v3908_v55 = vld [vmem:[%s5359_s1 + $0x278] ss:$12 sps:$4 sm:$0xff]  }
  0x6b   :  { %2664 = vmatpush1.bf16.msra.mxu1 %v3836_v57  ;;  %v3909_v57 = vld [vmem:[%s5359_s1 + $0x1b8] ss:$12 sps:$4 sm:$0xff]  }
  0x6c   :  { %2460 = vmatpush1.bf16.msra.mxu0 %v3833_v56  ;;  %2665 = vmatprep.subr.bf16.mxu1 %v3844_v59  ;;  %v4706_v56 = vld [vmem:[%s5360_s0 + $0x1c] ss:$56 sps:$4 sm:$0xff]  }
  0x6d   :  { %2461 = vmatprep.subr.bf16.mxu0 %v3841_v58  ;;  %v3912_v58 = vld [vmem:[%s5359_s1 + $0x52c] ss:$12 sps:$4 sm:$0xff]   ;;  %v3910_v59 = vld [vmem:[%s5359_s1 + $0x528] ss:$12 sps:$4 sm:$0xff]  }
  0x6f   :  { %2666 = vmatpush1.bf16.msra.mxu1 %v3842_v61  ;;  %v3917_v61 = vld [vmem:[%s5359_s1 + $0x544] ss:$12 sps:$4 sm:$0xff]  }
  0x70   :  { %2462 = vmatpush1.bf16.msra.mxu0 %v3839_v60  ;;  %3450 = vmatprep.subr.bf16.mxu1 %v3851_v0  ;;  %v3914_v60 = vld [vmem:[%s5359_s1 + $0x1d0] ss:$12 sps:$4 sm:$0xff]  }
  0x71   :  { %2463 = vmatprep.subr.bf16.mxu0 %v3850_v62  ;;  %v3918_v62 = vld [vmem:[%s5359_s1 + $0x2a8] ss:$12 sps:$4 sm:$0xff]  }
  0x72   :  { %2676 = vmatmul.mubr.bf16.vlgmr.msra.gmra.mrb[8].mxu1 %v3845_v63  ;;  %v3915_v63 = vld [vmem:[%s5359_s1 + $0x540] ss:$12 sps:$4 sm:$0xff]   ;;  %v3922_v0 = vld [vmem:[%s5359_s1 + $0x55c] ss:$12 sps:$4 sm:$0xff]  }
  0x73   :  { %3451 = vmatpush3.bf16.msra.mxu1 %v3852_v2  ;;  %3435 = vmatprep.mubr.msk.bf16.mxu1 %vm2330_vm0, %v4571_v8  ;;  %v3924_v2 = vld [vmem:[%s5359_s1 + $0x200] ss:$12 sps:$4 sm:$0xff]  }
  0x74   :  { %2464 = vmatpush1.bf16.msra.mxu0 %v3848_v1  ;;  %3452 = vmatprep.subr.bf16.mxu1 %v3856_v7  ;;  %v3920_v1 = vld [vmem:[%s5359_s1 + $0x558] ss:$12 sps:$4 sm:$0xff]   ;;  %v3925_v7 = vld [vmem:[%s5359_s1 + $0x570] ss:$12 sps:$4 sm:$0xff]  }
  0x75   :  { %2465 = vmatprep.subr.bf16.mxu0 %v3855_v6  ;;  %v3928_v6 = vld [vmem:[%s5359_s1 + $0x2d8] ss:$12 sps:$4 sm:$0xff]  }
  0x77   :  { %3453 = vmatpush3.bf16.msra.mxu1 %v3857_v10  ;;  %v3932_v10 = vld [vmem:[%s5359_s1 + $0x58c] ss:$12 sps:$4 sm:$0xff]  }
  0x78   :  { %2466 = vmatpush1.bf16.msra.mxu0 %v3853_v9  ;;  %3454 = vmatprep.subr.bf16.mxu1 %v3862_v12  ;;  %v3929_v9 = vld [vmem:[%s5359_s1 + $0x218] ss:$12 sps:$4 sm:$0xff]   ;;  %v3930_v12 = vld [vmem:[%s5359_s1 + $0x588] ss:$12 sps:$4 sm:$0xff]  }
  0x79   :  { %2467 = vmatprep.subr.bf16.mxu0 %v3861_v11  ;;  %v3933_v11 = vld [vmem:[%s5359_s1 + $0x2f0] ss:$12 sps:$4 sm:$0xff]  }
  0x7a   :  { %2686 = vmatmul.mubr.bf16.gmra.mrb[12].mxu1 %v4593_v15 }
  0x7b   :  { %3455 = vmatpush3.bf16.msra.mxu1 %v3864_v14  ;;  %2726 = vmatprep.mubr.bf16.mxu1 %v4309_v49  ;;  %v3881_v49 = vld [vmem:[%s5359_s1 + $0x140] ss:$12 sps:$4 sm:$0xff]   ;;  %v3937_v14 = vld [vmem:[%s5359_s1 + $0x5a4] ss:$12 sps:$4 sm:$0xff]  }
  0x7c   :  { %2468 = vmatpush1.bf16.msra.mxu0 %v3859_v13  ;;  %3456 = vmatprep.subr.bf16.mxu1 %v3868_v17  ;;  %v3934_v13 = vld [vmem:[%s5359_s1 + $0x230] ss:$12 sps:$4 sm:$0xff]   ;;  %v3935_v17 = vld [vmem:[%s5359_s1 + $0x5a0] ss:$12 sps:$4 sm:$0xff]  }
  0x7d   :  { %2469 = vmatprep.subr.bf16.mxu0 %v3867_v16  ;;  %v3938_v16 = vld [vmem:[%s5359_s1 + $0x3c8] ss:$12 sps:$4 sm:$0xff]  }
  0x7f   :  { %3457 = vmatpush3.bf16.msra.mxu1 %v3869_v21  ;;  %v3942_v21 = vld [vmem:[%s5359_s1 + $0x5bc] ss:$12 sps:$4 sm:$0xff]  }
  0x80   :  { %2470 = vmatpush1.bf16.msra.mxu0 %v3865_v18  ;;  %3458 = vmatprep.subr.bf16.mxu1 %v3876_v23  ;;  %v3939_v18 = vld [vmem:[%s5359_s1 + $0x308] ss:$12 sps:$4 sm:$0xff]   ;;  %v3940_v23 = vld [vmem:[%s5359_s1 + $0x5b8] ss:$12 sps:$4 sm:$0xff]  }
  0x81   :  { %2490 = vmatprep.subr.bf16.mxu0 %v3875_v22  ;;  %v3943_v22 = vld [vmem:[%s5359_s1 + $0x3e0] ss:$12 sps:$4 sm:$0xff]  }
  0x83   :  { %2472 = vmatmul.mubr.bf16.vlgmr.msra.gmra.mrb[0].mxu0 %v4617_v24  ;;  %3459 = vmatpush3.bf16.msra.mxu1 %v3877_v26  ;;  %v3948_v26 = vld [vmem:[%s5359_s1 + $0x5d4] ss:$12 sps:$4 sm:$0xff]  }
  0x84   :  { %2491 = vmatpush1.bf16.msra.mxu0 %v3873_v25  ;;  %3460 = vmatprep.subr.bf16.mxu1 %v3881_v49  ;;  %v3944_v25 = vld [vmem:[%s5359_s1 + $0x320] ss:$12 sps:$4 sm:$0xff]   ;;  %v3951_v49 = vld [vmem:[%s5359_s1 + $0x338] ss:$12 sps:$4 sm:$0xff]  }
  0x85   :  { %2492 = vmatprep.subr.bf16.mxu0 %v3880_v27  ;;  %2481 = vmatprep.mubr.bf16.mxu0 %v4672_v43  ;;  %v3946_v27 = vld [vmem:[%s5359_s1 + $0x5d0] ss:$12 sps:$4 sm:$0xff]  }
  0x87   :  { %3461 = vmatpush3.bf16.msra.mxu1 %v3883_v29  ;;  %v3952_v29 = vld [vmem:[%s5359_s1 + $0x5e8] ss:$12 sps:$4 sm:$0xff]  }
  0x88   :  { %2493 = vmatpush1.bf16.msra.mxu0 %v3878_v28  ;;  %3462 = vmatprep.subr.bf16.mxu1 %v3888_v31  ;;  %v3954_v28 = vld [vmem:[%s5359_s1 + $0x5ec] ss:$12 sps:$4 sm:$0xff]   ;;  %v3962_v31 = vld [vmem:[%s5359_s1 + $0x604] ss:$12 sps:$4 sm:$0xff]  }
  0x89   :  { %2494 = vmatprep.subr.bf16.mxu0 %v3887_v30  ;;  %v3956_v30 = vld [vmem:[%s5359_s1 + $0x350] ss:$12 sps:$4 sm:$0xff]  }
  0x8b   :  { %3463 = vmatpush3.bf16.msra.mxu1 %v3889_v33  ;;  %2482 = vmatmul.mubr.bf16.gmra.mrb[4].mxu0 %v4677_v46  ;;  %v3960_v33 = vld [vmem:[%s5359_s1 + $0x600] ss:$12 sps:$4 sm:$0xff]  }
  0x8c   :  { %2495 = vmatpush1.bf16.msra.mxu0 %v3885_v32  ;;  %3464 = vmatprep.subr.bf16.mxu1 %v3893_v35  ;;  %v3963_v32 = vld [vmem:[%s5359_s1 + $0x428] ss:$12 sps:$4 sm:$0xff]  }
  0x8d   :  { %2496 = vmatprep.subr.bf16.mxu0 %v3892_v34  ;;  %2522 = vmatprep.mubr.bf16.mxu0 %v4706_v56  ;;  %v3964_v34 = vld [vmem:[%s5359_s1 + $0x368] ss:$12 sps:$4 sm:$0xff]  }
  0x8e   :  { %v3967_v35 = vld [vmem:[%s5359_s1 + $0x61c] ss:$12 sps:$4 sm:$0xff]  }
  0x8f   :  { %3465 = vmatpush3.bf16.msra.mxu1 %v3894_v39  ;;  %v3969_v39 = vld [vmem:[%s5359_s1 + $0x380] ss:$12 sps:$4 sm:$0xff]  }
  0x90   :  { %2497 = vmatpush1.bf16.msra.mxu0 %v3890_v37  ;;  %3478 = vmatprep.subr.bf16.mxu1 %v3898_v41  ;;  %v3965_v37 = vld [vmem:[%s5359_s1 + $0x618] ss:$12 sps:$4 sm:$0xff]   ;;  %v3972_v41 = vld [vmem:[%s5359_s1 + $0x634] ss:$12 sps:$4 sm:$0xff]  }
  0x91   :  { %2498 = vmatprep.subr.bf16.mxu0 %v3897_v40  ;;  %v32_v40 = vld [vmem:[%s5360_s0 + $0x88] sm:$0x11] }
  0x92   :  { %2727 = vmatmul.mubr.bf16.vlgmr.msra.gmra.mrb[16].mxu1 %v4372_v4  ;;  %v3905_v4 = vld [vmem:[%s5359_s1 + $0x510] ss:$12 sps:$4 sm:$0xff]  }
  0x93   :  { %3479 = vmatpush3.bf16.msra.mxu1 %v3899_v47  ;;  %2734 = vmatprep.mubr.bf16.mxu1 %v4420_v19  ;;  %v3913_v19 = vld [vmem:[%s5359_s1 + $0x290] ss:$12 sps:$4 sm:$0xff]  }
  0x94   :  { %2499 = vmatpush1.bf16.msra.mxu0 %v3895_v44  ;;  %3480 = vmatprep.subr.bf16.mxu1 %v3903_v50  ;;  %v4869_v44 = vcombine.high %v32_v40, %v32_v40  ;;  %v3970_v47 = vld [vmem:[%s5359_s1 + $0x630] ss:$12 sps:$4 sm:$0xff]   ;;  %v3974_v50 = vld [vmem:[%s5359_s1 + $0x398] ss:$12 sps:$4 sm:$0xff]  }
  0x95   :  { %2500 = vmatprep.subr.bf16.mxu0 %v3902_v48  ;;  %v4875_v48 = vcombine.low %v32_v40, %v32_v40  ;;  %v4048_v40 = vld [vmem:[%s5359_s1 + $0x728] ss:$12 sps:$4 sm:$0xff]  }
  0x97   :  { %3481 = vmatpush3.bf16.msra.mxu1 %v3904_v53  ;;  %v3978_v53 = vld [vmem:[%s5359_s1 + $0x470] ss:$12 sps:$4 sm:$0xff]  }
  0x98   :  { %2501 = vmatpush1.bf16.msra.mxu0 %v3900_v52  ;;  %3482 = vmatprep.subr.bf16.mxu1 %v3908_v55  ;;  %v3977_v52 = vld [vmem:[%s5359_s1 + $0x64c] ss:$12 sps:$4 sm:$0xff]   ;;  %v3979_v55 = vld [vmem:[%s5359_s1 + $0x3b0] ss:$12 sps:$4 sm:$0xff]  }
  0x99   :  { %2502 = vmatprep.subr.bf16.mxu0 %v3907_v54  ;;  %v3975_v54 = vld [vmem:[%s5359_s1 + $0x648] ss:$12 sps:$4 sm:$0xff]  }
  0x9a   :  { %2735 = vmatmul.mubr.bf16.gmra.mrb[20].mxu1 %v4422_v20  ;;  %v3919_v20 = vld [vmem:[%s5359_s1 + $0x1e8] ss:$12 sps:$4 sm:$0xff]  }
  0x9b   :  { %3483 = vmatpush3.bf16.msra.mxu1 %v3909_v57  ;;  %2774 = vmatprep.mubr.bf16.mxu1 %v4317_v51  ;;  %v3923_v51 = vld [vmem:[%s5359_s1 + $0x2c0] ss:$12 sps:$4 sm:$0xff]   ;;  %v3982_v57 = vld [vmem:[%s5359_s1 + $0x664] ss:$12 sps:$4 sm:$0xff]  }
  0x9c   :  { %2503 = vmatpush1.bf16.msra.mxu0 %v3905_v4  ;;  %3484 = vmatprep.subr.bf16.mxu1 %v3913_v19  ;;  %v4896_v4 = vld [vmem:[%s5360_s0 + $0x24] ss:$56 sps:$4 sm:$0xff]   ;;  %v3980_v19 = vld [vmem:[%s5359_s1 + $0x660] ss:$12 sps:$4 sm:$0xff]  }
  0x9d   :  { %2504 = vmatprep.subr.bf16.mxu0 %v3912_v58  ;;  %v3983_v58 = vld [vmem:[%s5359_s1 + $0x548] ss:$12 sps:$4 sm:$0xff]  }
  0x9f   :  { %3485 = vmatpush3.bf16.msra.mxu1 %v3914_v60  ;;  %v3987_v60 = vld [vmem:[%s5359_s1 + $0x67c] ss:$12 sps:$4 sm:$0xff]  }
  0xa0   :  { %2505 = vmatpush1.bf16.msra.mxu0 %v3910_v59  ;;  %3486 = vmatprep.subr.bf16.mxu1 %v3918_v62  ;;  %v3984_v59 = vld [vmem:[%s5359_s1 + $0x488] ss:$12 sps:$4 sm:$0xff]   ;;  %v3985_v62 = vld [vmem:[%s5359_s1 + $0x678] ss:$12 sps:$4 sm:$0xff]  }
  0xa1   :  { %2506 = vmatprep.subr.bf16.mxu0 %v3917_v61  ;;  %v3988_v61 = vld [vmem:[%s5359_s1 + $0x560] ss:$12 sps:$4 sm:$0xff]  }
  0xa3   :  { %3487 = vmatpush3.bf16.msra.mxu1 %v3919_v20  ;;  %v3992_v20 = vld [vmem:[%s5359_s1 + $0x694] ss:$12 sps:$4 sm:$0xff]  }
  0xa4   :  { %2507 = vmatpush1.bf16.msra.mxu0 %v3915_v63  ;;  %3488 = vmatprep.subr.bf16.mxu1 %v3923_v51  ;;  %v3989_v63 = vld [vmem:[%s5359_s1 + $0x4a0] ss:$12 sps:$4 sm:$0xff]   ;;  %v3994_v51 = vld [vmem:[%s5359_s1 + $0x4b8] ss:$12 sps:$4 sm:$0xff]  }
  0xa5   :  { %2508 = vmatprep.subr.bf16.mxu0 %v3922_v0  ;;  %v3993_v0 = vld [vmem:[%s5359_s1 + $0x578] ss:$12 sps:$4 sm:$0xff]  }
  0xa7   :  { %3489 = vmatpush3.bf16.msra.mxu1 %v3924_v2  ;;  %v3995_v2 = vld [vmem:[%s5359_s1 + $0x6a8] ss:$12 sps:$4 sm:$0xff]  }
  0xa8   :  { %2509 = vmatpush1.bf16.msra.mxu0 %v3920_v1  ;;  %3490 = vmatprep.subr.bf16.mxu1 %v3928_v6  ;;  %v3997_v1 = vld [vmem:[%s5359_s1 + $0x6ac] ss:$12 sps:$4 sm:$0xff]   ;;  %v4002_v6 = vld [vmem:[%s5359_s1 + $0x6c4] ss:$12 sps:$4 sm:$0xff]  }
  0xa9   :  { %2510 = vmatprep.subr.bf16.mxu0 %v3927_v3  ;;  %v3999_v3 = vld [vmem:[%s5359_s1 + $0x4d0] ss:$12 sps:$4 sm:$0xff]  }
  0xab   :  { %3491 = vmatpush3.bf16.msra.mxu1 %v3929_v9  ;;  %v4004_v9 = vld [vmem:[%s5359_s1 + $0x4e8] ss:$12 sps:$4 sm:$0xff]  }
  0xac   :  { %2511 = vmatpush1.bf16.msra.mxu0 %v3925_v7  ;;  %3492 = vmatprep.subr.bf16.mxu1 %v3933_v11  ;;  %v4003_v7 = vld [vmem:[%s5359_s1 + $0x5a8] ss:$12 sps:$4 sm:$0xff]   ;;  %v4005_v11 = vld [vmem:[%s5359_s1 + $0x6d8] ss:$12 sps:$4 sm:$0xff]  }
  0xad   :  { %2512 = vmatprep.subr.bf16.mxu0 %v3932_v10  ;;  %v4007_v10 = vld [vmem:[%s5359_s1 + $0x6dc] ss:$12 sps:$4 sm:$0xff]  }
  0xaf   :  { %3493 = vmatpush3.bf16.msra.mxu1 %v3934_v13  ;;  %v4012_v13 = vld [vmem:[%s5359_s1 + $0x6f4] ss:$12 sps:$4 sm:$0xff]  }
  0xb0   :  { %2513 = vmatpush1.bf16.msra.mxu0 %v3930_v12  ;;  %3506 = vmatprep.subr.bf16.mxu1 %v3938_v16  ;;  %v4009_v12 = vld [vmem:[%s5359_s1 + $0x500] ss:$12 sps:$4 sm:$0xff]   ;;  %v4010_v16 = vld [vmem:[%s5359_s1 + $0x6f0] ss:$12 sps:$4 sm:$0xff]  }
  0xb1   :  { %2514 = vmatprep.subr.bf16.mxu0 %v3937_v14  ;;  %v4013_v14 = vld [vmem:[%s5359_s1 + $0x5d8] ss:$12 sps:$4 sm:$0xff]  }
  0xb2   :  { %2775 = vmatmul.mubr.bf16.vlgmr.msra.gmra.mrb[24].mxu1 %v4377_v5  ;;  %v3949_v5 = vld [vmem:[%s5359_s1 + $0x3f8] ss:$12 sps:$4 sm:$0xff]  }
  0xb3   :  { %3507 = vmatpush3.bf16.msra.mxu1 %v3939_v18  ;;  %2782 = vmatprep.mubr.bf16.mxu1 %v4472_v36  ;;  %v3955_v36 = vld [vmem:[%s5359_s1 + $0x410] ss:$12 sps:$4 sm:$0xff]   ;;  %v4017_v18 = vld [vmem:[%s5359_s1 + $0x70c] ss:$12 sps:$4 sm:$0xff]  }
  0xb4   :  { %2515 = vmatpush1.bf16.msra.mxu0 %v3935_v17  ;;  %3508 = vmatprep.subr.bf16.mxu1 %v3943_v22  ;;  %v4014_v17 = vld [vmem:[%s5359_s1 + $0x518] ss:$12 sps:$4 sm:$0xff]   ;;  %v4015_v22 = vld [vmem:[%s5359_s1 + $0x708] ss:$12 sps:$4 sm:$0xff]  }
  0xb5   :  { %2516 = vmatprep.subr.bf16.mxu0 %v3942_v21  ;;  %v4018_v21 = vld [vmem:[%s5359_s1 + $0x5f0] ss:$12 sps:$4 sm:$0xff]  }
  0xb7   :  { %3509 = vmatpush3.bf16.msra.mxu1 %v3944_v25  ;;  %v4022_v25 = vld [vmem:[%s5359_s1 + $0x724] ss:$12 sps:$4 sm:$0xff]  }
  0xb8   :  { %2517 = vmatpush1.bf16.msra.mxu0 %v3940_v23  ;;  %3510 = vmatprep.subr.bf16.mxu1 %v3949_v5  ;;  %v4019_v23 = vld [vmem:[%s5359_s1 + $0x530] ss:$12 sps:$4 sm:$0xff]   ;;  %v4020_v5 = vld [vmem:[%s5359_s1 + $0x720] ss:$12 sps:$4 sm:$0xff]  }
  0xb9   :  { %2518 = vmatprep.subr.bf16.mxu0 %v3948_v26  ;;  %v4023_v26 = vld [vmem:[%s5359_s1 + $0x6c8] ss:$12 sps:$4 sm:$0xff]  }
  0xba   :  { %2783 = vmatmul.mubr.bf16.gmra.mrb[28].mxu1 %v4477_v38  ;;  %v4838_v38 = vld [vmem:[%s5360_s0 + $0x18] ss:$56 sps:$4 sm:$0xff]  }
  0xbb   :  { %3511 = vmatpush3.bf16.msra.mxu1 %v3951_v49  ;;  %2822 = vmatprep.mubr.bf16.mxu1 %v4502_v45  ;;  %v3968_v45 = vld [vmem:[%s5359_s1 + $0x440] ss:$12 sps:$4 sm:$0xff]   ;;  %v4027_v49 = vld [vmem:[%s5359_s1 + $0x73c] ss:$12 sps:$4 sm:$0xff]  }
  0xbc   :  { %2519 = vmatpush1.bf16.msra.mxu0 %v3946_v27  ;;  %3512 = vmatprep.subr.bf16.mxu1 %v3955_v36  ;;  %v4024_v27 = vld [vmem:[%s5359_s1 + $0x608] ss:$12 sps:$4 sm:$0xff]   ;;  %v4025_v36 = vld [vmem:[%s5359_s1 + $0x738] ss:$12 sps:$4 sm:$0xff]  }
  0xbd   :  { %2520 = vmatprep.subr.bf16.mxu0 %v3954_v28  ;;  %v4028_v28 = vld [vmem:[%s5359_s1 + $0x6e0] ss:$12 sps:$4 sm:$0xff]  }
  0xbf   :  { %3513 = vmatpush3.bf16.msra.mxu1 %v3956_v30  ;;  %v4033_v30 = vld [vmem:[%s5359_s1 + $0x754] ss:$12 sps:$4 sm:$0xff]  }
  0xc0   :  { %2521 = vmatpush1.bf16.msra.mxu0 %v3952_v29  ;;  %3514 = vmatprep.subr.bf16.mxu1 %v3963_v32  ;;  %v4029_v29 = vld [vmem:[%s5359_s1 + $0x620] ss:$12 sps:$4 sm:$0xff]   ;;  %v4031_v32 = vld [vmem:[%s5359_s1 + $0x750] ss:$12 sps:$4 sm:$0xff]  }
  0xc1   :  { %2541 = vmatprep.subr.bf16.mxu0 %v3962_v31  ;;  %v4035_v31 = vld [vmem:[%s5359_s1 + $0x6f8] ss:$12 sps:$4 sm:$0xff]  }
  0xc3   :  { %2523 = vmatmul.mubr.bf16.vlgmr.msra.gmra.mrb[0].mxu0 %v4838_v38  ;;  %3515 = vmatpush3.bf16.msra.mxu1 %v3964_v34  ;;  %v4040_v34 = vld [vmem:[%s5359_s1 + $0x710] ss:$12 sps:$4 sm:$0xff]  }
  0xc4   :  { %2542 = vmatpush1.bf16.msra.mxu0 %v3960_v33  ;;  %3516 = vmatprep.subr.bf16.mxu1 %v3968_v45  ;;  %v4039_v33 = vld [vmem:[%s5359_s1 + $0x76c] ss:$12 sps:$4 sm:$0xff]   ;;  %v4041_v45 = vld [vmem:[%s5359_s1 + $0x650] ss:$12 sps:$4 sm:$0xff]  }
  0xc5   :  { %2543 = vmatprep.subr.bf16.mxu0 %v3967_v35  ;;  %2532 = vmatprep.mubr.bf16.mxu0 %v4869_v44  ;;  %v4037_v35 = vld [vmem:[%s5359_s1 + $0x768] ss:$12 sps:$4 sm:$0xff]  }
  0xc7   :  { %3517 = vmatpush3.bf16.msra.mxu1 %v3969_v39  ;;  %v4042_v39 = vld [vmem:[%s5360_s0 + $0x20] ss:$56 sps:$4 sm:$0xff]  }
  0xc8   :  { %2544 = vmatpush1.bf16.msra.mxu0 %v3965_v37  ;;  %3518 = vmatprep.subr.bf16.mxu1 %v3973_v42  ;;  %v4047_v37 = vld [vmem:[%s5359_s1 + $0x784] ss:$12 sps:$4 sm:$0xff]   ;;  %v4049_v42 = vld [vmem:[%s5359_s1 + $0x668] ss:$12 sps:$4 sm:$0xff]  }
  0xc9   :  { %2545 = vmatprep.subr.bf16.mxu0 %v3972_v41  ;;  %v4045_v41 = vld [vmem:[%s5359_s1 + $0x780] ss:$12 sps:$4 sm:$0xff]  }
  0xcb   :  { %2533 = vmatmul.mubr.bf16.gmra.mrb[4].mxu0 %v4875_v48  ;;  %3519 = vmatpush3.bf16.msra.mxu1 %v3974_v50  ;;  %v4050_v50 = vld [vmem:[%s5359_s1 + $0x798] ss:$12 sps:$4 sm:$0xff]  }
  0xcc   :  { %2546 = vmatpush1.bf16.msra.mxu0 %v3970_v47  ;;  %3520 = vmatprep.subr.bf16.mxu1 %v3978_v53  ;;  %v4053_v47 = vld [vmem:[%s5359_s1 + $0x740] ss:$12 sps:$4 sm:$0xff]  }
  0xcd   :  { %2547 = vmatprep.subr.bf16.mxu0 %v3977_v52  ;;  %2573 = vmatprep.mubr.bf16.mxu0 %v4896_v4  ;;  %v4054_v52 = vld [vmem:[%s5359_s1 + $0x680] ss:$12 sps:$4 sm:$0xff]  }
  0xce   :  { %v4057_v53 = vld [vmem:[%s5359_s1 + $0x7b4] ss:$12 sps:$4 sm:$0xff]  }
  0xcf   :  { %3521 = vmatpush3.bf16.msra.mxu1 %v3979_v55  ;;  %v4058_v55 = vld [vmem:[%s5359_s1 + $0x758] ss:$12 sps:$4 sm:$0xff]  }
  0xd0   :  { %2548 = vmatpush1.bf16.msra.mxu0 %v3975_v54  ;;  %3534 = vmatprep.subr.bf16.mxu1 %v3983_v58  ;;  %v4062_v58 = vld [vmem:[%s5359_s1 + $0x7cc] ss:$12 sps:$4 sm:$0xff]  }
  0xd1   :  { %2549 = vmatprep.subr.bf16.mxu0 %v3982_v57  ;;  %v4059_v57 = vld [vmem:[%s5359_s1 + $0x698] ss:$12 sps:$4 sm:$0xff]  }
  0xd2   :  { %2823 = vmatmul.mubr.bf16.vlgmr.msra.gmra.mrb[32].mxu1 %v4617_v24  ;;  %v3990_v24 = vld [vmem:[%s5359_s1 + $0x690] ss:$12 sps:$4 sm:$0xff]  }
  0xd3   :  { %3535 = vmatpush3.bf16.msra.mxu1 %v3984_v59  ;;  %2830 = vmatprep.mubr.bf16.mxu1 %v4672_v43  ;;  %v3998_v43 = vld [vmem:[%s5359_s1 + $0x590] ss:$12 sps:$4 sm:$0xff]  }
  0xd4   :  { %2550 = vmatpush1.bf16.msra.mxu0 %v3980_v19  ;;  %3536 = vmatprep.subr.bf16.mxu1 %v3988_v61  ;;  %v4063_v19 = vld [vmem:[%s5359_s1 + $0x770] ss:$12 sps:$4 sm:$0xff]  }
  0xd5   :  { %2551 = vmatprep.subr.bf16.mxu0 %v3987_v60  ;;  %v4060_v60 = vld [vmem:[%s5359_s1 + $0x7c8] ss:$12 sps:$4 sm:$0xff]   ;;  %v4064_v61 = vld [vmem:[%s5359_s1 + $0x6b0] ss:$12 sps:$4 sm:$0xff]  }
  0xd7   :  { %3537 = vmatpush3.bf16.msra.mxu1 %v3989_v63  ;;  %v4067_v63 = vld [vmem:[%s5359_s1 + $0x7e4] ss:$12 sps:$4 sm:$0xff]  }
  0xd8   :  { %2552 = vmatpush1.bf16.msra.mxu0 %v3985_v62  ;;  %3538 = vmatprep.subr.bf16.mxu1 %v3993_v0  ;;  %v4109_v62 = vld [vmem:[%s5360_s0 + $0x2c] ss:$56 sps:$4 sm:$0xff]  }
  0xd9   :  { %2553 = vmatprep.subr.bf16.mxu0 %v3992_v20  ;;  %v4068_v20 = vld [vmem:[%s5359_s1 + $0x848] ss:$12 sps:$4 sm:$0xff]   ;;  %v4065_v0 = vld [vmem:[%s5359_s1 + $0x7e0] ss:$12 sps:$4 sm:$0xff]  }
  0xda   :  { %2831 = vmatmul.mubr.bf16.gmra.mrb[36].mxu1 %v4677_v46  ;;  %v4000_v46 = vld [vmem:[%s5359_s1 + $0x6c0] ss:$12 sps:$4 sm:$0xff]  }
  0xdb   :  { %3539 = vmatpush3.bf16.msra.mxu1 %v3994_v51  ;;  %2870 = vmatprep.mubr.bf16.mxu1 %v4706_v56  ;;  %v4008_v56 = vld [vmem:[%s5359_s1 + $0x5c0] ss:$12 sps:$4 sm:$0xff]   ;;  %v4072_v51 = vld [vmem:[%s5359_s1 + $0x7fc] ss:$12 sps:$4 sm:$0xff]  }
  0xdc   :  { %2554 = vmatpush1.bf16.msra.mxu0 %v3990_v24  ;;  %3540 = vmatprep.subr.bf16.mxu1 %v3998_v43  ;;  %v4069_v24 = vld [vmem:[%s5359_s1 + $0x788] ss:$12 sps:$4 sm:$0xff]   ;;  %v4070_v43 = vld [vmem:[%s5359_s1 + $0x7f8] ss:$12 sps:$4 sm:$0xff]  }
  0xdd   :  { %2555 = vmatprep.subr.bf16.mxu0 %v3997_v1  ;;  %v4073_v1 = vld [vmem:[%s5359_s1 + $0x860] ss:$12 sps:$4 sm:$0xff]  }
  0xdf   :  { %3541 = vmatpush3.bf16.msra.mxu1 %v3999_v3  ;;  %v4078_v3 = vld [vmem:[%s5359_s1 + $0x814] ss:$12 sps:$4 sm:$0xff]  }
  0xe0   :  { %2556 = vmatpush1.bf16.msra.mxu0 %v3995_v2  ;;  %3542 = vmatprep.subr.bf16.mxu1 %v4003_v7  ;;  %v4074_v2 = vld [vmem:[%s5359_s1 + $0x7a0] ss:$12 sps:$4 sm:$0xff]  }
  0xe1   :  { %2557 = vmatprep.subr.bf16.mxu0 %v4002_v6  ;;  %v4080_v6 = vld [vmem:[%s5359_s1 + $0x878] ss:$12 sps:$4 sm:$0xff]  }
  0xe3   :  { %3543 = vmatpush3.bf16.msra.mxu1 %v4004_v9 }
  0xe4   :  { %2558 = vmatpush1.bf16.msra.mxu0 %v4000_v46  ;;  %3544 = vmatprep.subr.bf16.mxu1 %v4008_v56  ;;  %v4081_v56 = vld [vmem:[%s5359_s1 + $0x7b8] ss:$12 sps:$4 sm:$0xff]  }
  0xe5   :  { %2559 = vmatprep.subr.bf16.mxu0 %v4007_v10  ;;  %v4076_v10 = vld [vmem:[%s5359_s1 + $0x810] ss:$12 sps:$4 sm:$0xff]  }
  0xe7   :  { %3545 = vmatpush3.bf16.msra.mxu1 %v4009_v12  ;;  %v4084_v12 = vld [vmem:[%s5359_s1 + $0x82c] ss:$12 sps:$4 sm:$0xff]  }
  0xe8   :  { %2560 = vmatpush1.bf16.msra.mxu0 %v4005_v11  ;;  %3546 = vmatprep.subr.bf16.mxu1 %v4013_v14  ;;  %v4082_v14 = vld [vmem:[%s5359_s1 + $0x828] ss:$12 sps:$4 sm:$0xff]  }
  0xe9   :  { %2561 = vmatprep.subr.bf16.mxu0 %v4012_v13  ;;  %v4085_v13 = vld [vmem:[%s5359_s1 + $0x890] ss:$12 sps:$4 sm:$0xff]  }
  0xeb   :  { %3547 = vmatpush3.bf16.msra.mxu1 %v4014_v17  ;;  %v4089_v17 = vld [vmem:[%s5359_s1 + $0x844] ss:$12 sps:$4 sm:$0xff]  }
  0xec   :  { %2562 = vmatpush1.bf16.msra.mxu0 %v4010_v16  ;;  %3548 = vmatprep.subr.bf16.mxu1 %v4018_v21  ;;  %v4086_v16 = vld [vmem:[%s5359_s1 + $0x7d0] ss:$12 sps:$4 sm:$0xff]   ;;  %v4087_v21 = vld [vmem:[%s5359_s1 + $0x840] ss:$12 sps:$4 sm:$0xff]  }
  0xed   :  { %2563 = vmatprep.subr.bf16.mxu0 %v4017_v18  ;;  %v4090_v18 = vld [vmem:[%s5359_s1 + $0x8a8] ss:$12 sps:$4 sm:$0xff]  }
  0xef   :  { %3549 = vmatpush3.bf16.msra.mxu1 %v4019_v23  ;;  %v4094_v23 = vld [vmem:[%s5359_s1 + $0x85c] ss:$12 sps:$4 sm:$0xff]  }
  0xf0   :  { %2564 = vmatpush1.bf16.msra.mxu0 %v4015_v22  ;;  %3562 = vmatprep.subr.bf16.mxu1 %v4023_v26  ;;  %v4091_v22 = vld [vmem:[%s5359_s1 + $0x7e8] ss:$12 sps:$4 sm:$0xff]  }
  0xf1   :  { %2565 = vmatprep.subr.bf16.mxu0 %v4022_v25  ;;  %v4095_v25 = vld [vmem:[%s5359_s1 + $0x8c0] ss:$12 sps:$4 sm:$0xff]  }
  0xf2   :  { %2871 = vmatmul.mubr.bf16.vlgmr.msra.gmra.mrb[40].mxu1 %v4838_v38  ;;  %v4036_v38 = vld [vmem:[%s5359_s1 + $0x638] ss:$12 sps:$4 sm:$0xff]  }
  0xf3   :  { %3563 = vmatpush3.bf16.msra.mxu1 %v4024_v27  ;;  %2878 = vmatprep.mubr.bf16.mxu1 %v4869_v44  ;;  %v4052_v44 = vld [vmem:[%s5359_s1 + $0x79c] ss:$12 sps:$4 sm:$0xff]  }
  0xf4   :  { %2566 = vmatpush1.bf16.msra.mxu0 %v4020_v5  ;;  %3564 = vmatprep.subr.bf16.mxu1 %v4028_v28  ;;  %v4096_v28 = vld [vmem:[%s5359_s1 + $0x800] ss:$12 sps:$4 sm:$0xff]  }
  0xf5   :  { %2567 = vmatprep.subr.bf16.mxu0 %v4027_v49  ;;  %v4092_v49 = vld [vmem:[%s5359_s1 + $0x858] ss:$12 sps:$4 sm:$0xff]  }
  0xf7   :  { %3565 = vmatpush3.bf16.msra.mxu1 %v4029_v29  ;;  %v4099_v29 = vld [vmem:[%s5359_s1 + $0x874] ss:$12 sps:$4 sm:$0xff]  }
  0xf8   :  { %2568 = vmatpush1.bf16.msra.mxu0 %v4025_v36  ;;  %3566 = vmatprep.subr.bf16.mxu1 %v4035_v31  ;;  %v4097_v31 = vld [vmem:[%s5359_s1 + $0x870] ss:$12 sps:$4 sm:$0xff]  }
  0xf9   :  { %2569 = vmatprep.subr.bf16.mxu0 %v4033_v30  ;;  %v4100_v30 = vld [vmem:[%s5359_s1 + $0x8d8] ss:$12 sps:$4 sm:$0xff]  }
  0xfa   :  { %2879 = vmatmul.mubr.bf16.gmra.mrb[44].mxu1 %v4875_v48  ;;  %v33_v48 = vld [vmem:[%s5360_s0 + $0x90] sm:$0x11] }
  0xfb   :  { %3567 = vmatpush3.bf16.msra.mxu1 %v4036_v38  ;;  %2918 = vmatprep.mubr.bf16.mxu1 %v4896_v4  ;;  %v3105_v54 = vcombine.high %v33_v48, %v33_v48  ;;  %v4055_v4 = vld [vmem:[%s5359_s1 + $0x7b0] ss:$12 sps:$4 sm:$0xff]   ;;  %v3104_v59 = vcombine.low %v33_v48, %v33_v48  ;;  %v4104_v38 = vld [vmem:[%s5359_s1 + $0x88c] ss:$12 sps:$4 sm:$0xff]  }
  0xfc   :  { %2570 = vmatpush1.bf16.msra.mxu0 %v4031_v32  ;;  %3568 = vmatprep.subr.bf16.mxu1 %v4040_v34  ;;  %v4101_v32 = vld [vmem:[%s5359_s1 + $0x818] ss:$12 sps:$4 sm:$0xff]   ;;  %v4102_v34 = vld [vmem:[%s5359_s1 + $0x888] ss:$12 sps:$4 sm:$0xff]  }
  0xfd   :  { %2571 = vmatprep.subr.bf16.mxu0 %v4039_v33  ;;  %v4105_v33 = vld [vmem:[%s5359_s1 + $0x8f0] ss:$12 sps:$4 sm:$0xff]   ;;  %v4114_v48 = vld [vmem:[%s5359_s1 + $0x8b8] ss:$12 sps:$4 sm:$0xff]  }
  0xff   :  { %3569 = vmatpush3.bf16.msra.mxu1 %v4041_v45  ;;  %v4112_v45 = vld [vmem:[%s5359_s1 + $0x8a4] ss:$12 sps:$4 sm:$0xff]  }
 0x100   :  { %2572 = vmatpush1.bf16.msra.mxu0 %v4037_v35  ;;  %3570 = vmatprep.subr.bf16.mxu1 %v4048_v40  ;;  %v4106_v35 = vld [vmem:[%s5359_s1 + $0x830] ss:$12 sps:$4 sm:$0xff]   ;;  %v4110_v40 = vld [vmem:[%s5359_s1 + $0x8a0] ss:$12 sps:$4 sm:$0xff]  }
 0x101   :  { %2592 = vmatprep.subr.bf16.mxu0 %v4047_v37  ;;  %v4107_v37 = vld [vmem:[%s5360_s0 + $0x28] ss:$56 sps:$4 sm:$0xff]  }
 0x103   :  { %2574 = vmatmul.mubr.bf16.vlgmr.msra.gmra.mrb[0].mxu0 %v4042_v39  ;;  %3571 = vmatpush3.bf16.msra.mxu1 %v4049_v42  ;;  %v4138_v42 = vmov 0  }
 0x104   :  { %2593 = vmatpush1.bf16.msra.mxu0 %v4045_v41  ;;  %3572 = vmatprep.subr.bf16.mxu1 %v4053_v47  ;;  %v4113_v41 = vld [vmem:[%s5359_s1 + $0x908] ss:$12 sps:$4 sm:$0xff]  }
 0x105   :  { %2594 = vmatprep.subr.bf16.mxu0 %v4052_v44  ;;  %2583 = vmatprep.mubr.bf16.mxu0 %v3105_v54  ;;  %v4116_v44 = vld [vmem:[%s5359_s1 + $0x8bc] ss:$12 sps:$4 sm:$0xff]  }
 0x107   :  { %3573 = vmatpush3.bf16.msra.mxu1 %v4054_v52  ;;  %v4121_v52 = vld [vmem:[%s5359_s1 + $0x8d4] ss:$12 sps:$4 sm:$0xff]  }
 0x108   :  { %2595 = vmatpush1.bf16.msra.mxu0 %v4050_v50  ;;  %3574 = vmatprep.subr.bf16.mxu1 %v4058_v55  ;;  %v4117_v50 = vld [vmem:[%s5359_s1 + $0x920] ss:$12 sps:$4 sm:$0xff]   ;;  %v4123_v55 = vld [vmem:[%s5359_s1 + $0x938] ss:$12 sps:$4 sm:$0xff]  }
 0x109   :  { %2596 = vmatprep.subr.bf16.mxu0 %v4057_v53 }
 0x10b   :  { %2584 = vmatmul.mubr.bf16.gmra.mrb[4].mxu0 %v3104_v59  ;;  %3575 = vmatpush3.bf16.msra.mxu1 %v4059_v57  ;;  %v4124_v57 = vld [vmem:[%s5359_s1 + $0x8e8] ss:$12 sps:$4 sm:$0xff]  }
 0x10c   :  { %2597 = vmatpush1.bf16.msra.mxu0 %v4055_v4  ;;  %3576 = vmatprep.subr.bf16.mxu1 %v4063_v19  ;;  %v4126_v4 = vld [vmem:[%s5359_s1 + $0x8ec] ss:$12 sps:$4 sm:$0xff]  }
 0x10d   :  { %2598 = vmatprep.subr.bf16.mxu0 %v4062_v58  ;;  %2624 = vmatprep.mubr.bf16.mxu0 %v4109_v62  ;;  %v4127_v58 = vld [vmem:[%s5359_s1 + $0x950] ss:$12 sps:$4 sm:$0xff]   ;;  %v4136_v19 = vld [vmem:[%s5360_s0 + $0x34] ss:$56 sps:$4 sm:$0xff]  }
 0x10f   :  { %3577 = vmatpush3.bf16.msra.mxu1 %v4064_v61 }
 0x110   :  { %2599 = vmatpush1.bf16.msra.mxu0 %v4060_v60  ;;  %3590 = vmatprep.subr.bf16.mxu1 %v4068_v20  ;;  %v4129_v60 = vld [vmem:[%s5359_s1 + $0x980] ss:$12 sps:$4 sm:$0xff]   ;;  %v4130_v20 = vld [vmem:[%s5359_s1 + $0x998] ss:$12 sps:$4 sm:$0xff]  }
 0x111   :  { %2600 = vmatprep.subr.bf16.mxu0 %v4067_v63 }
 0x112   :  { %2919 = vmatmul.mubr.bf16.vlgmr.msra.gmra.mrb[48].mxu1 %v4042_v39  ;;  %v34_v39 = vld [vmem:[%s5360_s0 + $0x98] sm:$0x11] }
 0x113   :  { %3591 = vmatpush3.bf16.msra.mxu1 %v4069_v24  ;;  %2926 = vmatprep.mubr.bf16.mxu1 %v3105_v54  ;;  %v3107_v47 = vcombine.high %v34_v39, %v34_v39  ;;  %v3106_v53 = vcombine.low %v34_v39, %v34_v39  ;;  %v4119_v54 = vld [vmem:[%s5359_s1 + $0x8d0] ss:$12 sps:$4 sm:$0xff]  }
 0x114   :  { %2601 = vmatpush1.bf16.msra.mxu0 %v4065_v0  ;;  %3592 = vmatprep.subr.bf16.mxu1 %v4073_v1  ;;  %v4131_v24 = vld [vmem:[%s5359_s1 + $0x9b0] ss:$12 sps:$4 sm:$0xff]  }
 0x115   :  { %2602 = vmatprep.subr.bf16.mxu0 %v4072_v51  ;;  %v5138_v7 = vpop.f32.mrb[0].mxu1 }
 0x116   :  { %v5140_v46 = vpop.f32.mrb[1].mxu1 }
 0x117   :  { %v5142_v9 = vpop.f32.mrb[2].mxu1  ;;  %3593 = vmatpush3.bf16.msra.mxu1 %v4074_v2 }
 0x118   :  { %2603 = vmatpush1.bf16.msra.mxu0 %v4070_v43  ;;  %v5150_v11 = vpop.f32.mrb[3].mxu1  ;;  %3594 = vmatprep.subr.bf16.mxu1 %v4080_v6  ;;  %v4132_v43 = vld [vmem:[%s5359_s1 + $0x9c8] ss:$12 sps:$4 sm:$0xff]   ;;  %v4133_v6 = vld [vmem:[%s5359_s1 + $0x9e0] ss:$12 sps:$4 sm:$0xff]  }
 0x119   :  { %2604 = vmatprep.subr.bf16.mxu0 %v4078_v3 }
 0x11a   :  { %2927 = vmatmul.mubr.bf16.gmra.mrb[52].mxu1 %v3104_v59  ;;  %v4128_v59 = vld [vmem:[%s5359_s1 + $0x968] ss:$12 sps:$4 sm:$0xff]  }
 0x11b   :  { %3595 = vmatpush3.bf16.msra.mxu1 %v4081_v56  ;;  %2966 = vmatprep.mubr.bf16.mxu1 %v4109_v62  ;;  %v4135_v56 = vld [vmem:[%s5359_s1 + $0xa10] ss:$12 sps:$4 sm:$0xff]  }
 0x11c   :  { %2605 = vmatpush1.bf16.msra.mxu0 %v4076_v10  ;;  %3596 = vmatprep.subr.bf16.mxu1 %v4085_v13  ;;  %v4134_v10 = vld [vmem:[%s5359_s1 + $0x9f8] ss:$12 sps:$4 sm:$0xff]  }
 0x11d   :  { %2606 = vmatprep.subr.bf16.mxu0 %v4084_v12  ;;  %v5182_v26 = vpop.f32.mrb[4].mxu1  ;;  %v4137_v12 = vld [vmem:[%s5360_s0 + $0x30] ss:$56 sps:$4 sm:$0xff]  }
 0x11e   :  { %v5184_v5 = vpop.f32.mrb[5].mxu1 }
 0x11f   :  { %3597 = vmatpush3.bf16.msra.mxu1 %v4086_v16  ;;  %v2385_v27 = vpop.f32.mrb[6].mxu1 }
 0x120   :  { %2607 = vmatpush1.bf16.msra.mxu0 %v4082_v14  ;;  %3598 = vmatprep.subr.bf16.mxu1 %v4090_v18  ;;  %v2386_v36 = vpop.f32.mrb[7].mxu1 }
 0x121   :  { %2608 = vmatprep.subr.bf16.mxu0 %v4089_v17 }
 0x123   :  { %3599 = vmatpush3.bf16.msra.mxu1 %v4091_v22 }
 0x124   :  { %2609 = vmatpush1.bf16.msra.mxu0 %v4087_v21  ;;  %3600 = vmatprep.subr.bf16.mxu1 %v4095_v25 }
 0x125   :  { %2610 = vmatprep.subr.bf16.mxu0 %v4094_v23 }
 0x127   :  { %3601 = vmatpush3.bf16.msra.mxu1 %v4096_v28  ;;  %v470_v28 = vlaneseq }
 0x128   :  { %2611 = vmatpush1.bf16.msra.mxu0 %v4092_v49  ;;  %3602 = vmatprep.subr.bf16.mxu1 %v4100_v30 }
 0x129   :  { %2612 = vmatprep.subr.bf16.mxu0 %v4099_v29  ;;  %v5316_v36 = vshrl.u32 %v470_v28, 7 }
 0x12b   :  { %3603 = vmatpush3.bf16.msra.mxu1 %v4101_v32  ;;  %v480_v29 = vsub.s32 2, %v5316_v36 }
 0x12c   :  { %2613 = vmatpush1.bf16.msra.mxu0 %v4097_v31  ;;  %3604 = vmatprep.subr.bf16.mxu1 %v4105_v33 }
 0x12d   :  { %2614 = vmatprep.subr.bf16.mxu0 %v4104_v38 }
 0x12f   :  { %3605 = vmatpush3.bf16.msra.mxu1 %v4106_v35 }
 0x130   :  { %2615 = vmatpush1.bf16.msra.mxu0 %v4102_v34  ;;  %2982 = vmatprep.subr.bf16.mxu1 %v4138_v42 }
 0x131   :  { %2616 = vmatprep.subr.bf16.mxu0 %v4112_v45 }
 0x132   :  { %2967 = vmatmul.mubr.bf16.vlgmr.msra.gmra.mrb[56].mxu1 %v4107_v37 }
 0x133   :  { %2983 = vmatpush1.bf16.msra.mxu1 %v4113_v41  ;;  %2974 = vmatprep.mubr.bf16.mxu1 %v3107_v47 }
 0x134   :  { %2617 = vmatpush1.bf16.msra.mxu0 %v4110_v40  ;;  %2984 = vmatprep.subr.bf16.mxu1 %v4138_v42 }
 0x135   :  { %2618 = vmatprep.subr.bf16.mxu0 %v4116_v44 }
 0x137   :  { %2985 = vmatpush1.bf16.msra.mxu1 %v4117_v50 }
 0x138   :  { %2619 = vmatpush1.bf16.msra.mxu0 %v4114_v48  ;;  %2986 = vmatprep.subr.bf16.mxu1 %v4138_v42 }
 0x139   :  { %2620 = vmatprep.subr.bf16.mxu0 %v4121_v52 }
 0x13a   :  { %2975 = vmatmul.mubr.bf16.gmra.mrb[60].mxu1 %v3106_v53 }
 0x13b   :  { %2987 = vmatpush1.bf16.msra.mxu1 %v4123_v55  ;;  %3436 = vmatprep.mubr.msk.bf16.mxu1 %vm2330_vm0, %v4136_v19 }
 0x13c   :  { %2621 = vmatpush1.bf16.msra.mxu0 %v4119_v54  ;;  %2988 = vmatprep.subr.bf16.mxu1 %v4138_v42 }
 0x13d   :  { %2622 = vmatprep.subr.bf16.mxu0 %v4126_v4 }
 0x13f   :  { %2989 = vmatpush1.bf16.msra.mxu1 %v4127_v58 }
 0x140   :  { %2623 = vmatpush1.bf16.msra.mxu0 %v4124_v57  ;;  %2990 = vmatprep.subr.bf16.mxu1 %v4138_v42 }
 0x143   :  { %2625 = vmatmul.mubr.bf16.vlgmr.msra.gmra.mrb[0].mxu0 %v4107_v37  ;;  %2991 = vmatpush1.bf16.msra.mxu1 %v4128_v59 }
 0x144   :  { %2634 = vmatprep.mubr.bf16.mxu0 %v3107_v47  ;;  %2992 = vmatprep.subr.bf16.mxu1 %v4138_v42 }
 0x145   :  { %v5274_v61 = vpop.f32.mrb[8].mxu1 }
 0x146   :  { %v5276_v62 = vpop.f32.mrb[9].mxu1 }
 0x147   :  { %v5278_v63 = vpop.f32.mrb[10].mxu1  ;;  %2993 = vmatpush1.bf16.msra.mxu1 %v4129_v60 }
 0x148   :  { %v5283_v0 = vpop.f32.mrb[11].mxu1  ;;  %2994 = vmatprep.subr.bf16.mxu1 %v4138_v42 }
 0x14b   :  { %2635 = vmatmul.mubr.bf16.gmra.mrb[4].mxu0 %v3106_v53  ;;  %2995 = vmatpush1.bf16.msra.mxu1 %v4130_v20 }
 0x14c   :  { %2996 = vmatprep.subr.bf16.mxu1 %v4138_v42 }
 0x14d   :  { %v5290_v51 = vpop.f32.mrb[12].mxu1 }
 0x14e   :  { %v5292_v1 = vpop.f32.mrb[13].mxu1 }
 0x14f   :  { %2997 = vmatpush1.bf16.msra.mxu1 %v4131_v24  ;;  %v2691_v2 = vpop.f32.mrb[14].mxu1 }
 0x150   :  { %2998 = vmatprep.subr.bf16.mxu1 %v4138_v42  ;;  %v2692_v3 = vpop.f32.mrb[15].mxu1 }
 0x153   :  { %2999 = vmatpush1.bf16.msra.mxu1 %v4132_v43 }
 0x154   :  { %3000 = vmatprep.subr.bf16.mxu1 %v4138_v42 }
 0x157   :  { %3001 = vmatpush1.bf16.msra.mxu1 %v4133_v6 }
 0x158   :  { %3002 = vmatprep.subr.bf16.mxu1 %v4138_v42 }
 0x15b   :  { %3003 = vmatpush1.bf16.msra.mxu1 %v4134_v10 }
 0x15c   :  { %3004 = vmatprep.subr.bf16.mxu1 %v4138_v42 }
 0x15f   :  { %3005 = vmatpush1.bf16.msra.mxu1 %v4135_v56 }
 0x162   :  { %3015 = vmatmul.mubr.bf16.vlgmr.msra.gmra.mrb[64].mxu1 %v4137_v12 }
 0x163   :  { %3437 = vmatprep.mubr.msk.bf16.mxu1 %vm2330_vm0, %v4571_v8  ;;  %v5322_v8 = vld [vmem:[%s5361_s2] sm:$0x7] }
 0x164   :  { %v481_v30 = vrot.slane %v5322_v8, %v480_v29 }
 0x165   :  { %v3466_v13 = vpop.f32.mrb[16].mxu1 }
 0x166   :  { %v3467_v14 = vpop.f32.mrb[17].mxu1 }
 0x167   :  { %v3468_v16 = vadd.f32 %v3467_v14, %v3466_v13  ;;  %v3469_v17 = vpop.f32.mrb[18].mxu1 }
 0x168   :  { %v3470_v18 = vpop.f32.mrb[19].mxu1 }
 0x169   :  { %v3471_v21 = vadd.f32 %v3470_v18, %v3469_v17 }
 0x16a   :  { %3023 = vmatmul.mubr.bf16.gmra.mrb[68].mxu1 %v4593_v15  ;;  %v2729_v15 = vadd.f32 %v3468_v16, %v481_v30 }
 0x16b   :  { %v2732_v35 = vadd.f32 %v3471_v21, %v481_v30 }
 0x16d   :  { %v3472_v22 = vpop.f32.mrb[20].mxu1 }
 0x16e   :  { %v3473_v23 = vpop.f32.mrb[21].mxu1 }
 0x16f   :  { %v3474_v25 = vadd.f32 %v3473_v23, %v3472_v22  ;;  %v3475_v27 = vpop.f32.mrb[22].mxu1 }
 0x170   :  { %v3476_v49 = vpop.f32.mrb[23].mxu1 }
 0x171   :  { %v2737_v42 = vadd.f32 %v3474_v25, %v481_v30 }
 0x185   :  { %v3494_v31 = vpop.f32.mrb[24].mxu1 }
 0x186   :  { %v3495_v32 = vpop.f32.mrb[25].mxu1 }
 0x187   :  { %v3496_v38 = vadd.f32 %v3495_v32, %v3494_v31  ;;  %v3497_v33 = vpop.f32.mrb[26].mxu1 }
 0x188   :  { %v3498_v34 = vpop.f32.mrb[27].mxu1 }
 0x189   :  { %v2777_v45 = vadd.f32 %v3496_v38, %v2729_v15  ;;  %v3499_v37 = vadd.f32 %v3498_v34, %v3497_v33 }
 0x18b   :  { %v2780_v39 = vadd.f32 %v3499_v37, %v2732_v35 }
 0x18d   :  { %v3500_v40 = vpop.f32.mrb[28].mxu1 }
 0x18e   :  { %v3501_v41 = vpop.f32.mrb[29].mxu1 }
 0x18f   :  { %v3502_v44 = vadd.f32 %v3501_v41, %v3500_v40  ;;  %v3503_v47 = vpop.f32.mrb[30].mxu1 }
 0x190   :  { %v3504_v48 = vpop.f32.mrb[31].mxu1 }
 0x191   :  { %v2785_v50 = vadd.f32 %v3502_v44, %v2737_v42 }
 0x1a5   :  { %v3522_v52 = vpop.f32.mrb[32].mxu1 }
 0x1a6   :  { %v3523_v53 = vpop.f32.mrb[33].mxu1 }
 0x1a7   :  { %v3524_v54 = vadd.f32 %v3523_v53, %v3522_v52  ;;  %v3525_v55 = vpop.f32.mrb[34].mxu1  ;;  %v472_v52 = vsub.s32 0, %v5316_v36  ;;  %v476_v53 = vsub.s32 1, %v5316_v36 }
 0x1a8   :  { %v3526_v4 = vpop.f32.mrb[35].mxu1 }
 0x1a9   :  { %v2825_v57 = vadd.f32 %v3524_v54, %v2777_v45  ;;  %v3527_v58 = vadd.f32 %v3526_v4, %v3525_v55 }
 0x1ab   :  { %v2828_v19 = vadd.f32 %v3527_v58, %v2780_v39  ;;  %v473_v58 = vrot.slane %v5322_v8, %v472_v52 }
 0x1ad   :  { %v3528_v59 = vpop.f32.mrb[36].mxu1 }
 0x1ae   :  { %v3529_v60 = vpop.f32.mrb[37].mxu1 }
 0x1af   :  { %v3530_v20 = vadd.f32 %v3529_v60, %v3528_v59  ;;  %v3531_v24 = vpop.f32.mrb[38].mxu1  ;;  %v477_v59 = vrot.slane %v5322_v8, %v476_v53 }
 0x1b0   :  { %v3532_v43 = vpop.f32.mrb[39].mxu1 }
 0x1b1   :  { %v2833_v2 = vadd.f32 %v3530_v20, %v2785_v50  ;;  %v2372_v20 = vadd.f32 %v5138_v7, %v473_v58  ;;  %v2374_v24 = vadd.f32 %v5140_v46, %v477_v59  ;;  %v2378_v36 = vadd.f32 %v5150_v11, %v477_v59 }
 0x1b2   :  { %v2384_v11 = vadd.f32 %v5184_v5, %v477_v59 }
 0x1c5   :  { %v3550_v3 = vpop.f32.mrb[40].mxu1 }
 0x1c6   :  { %v3551_v6 = vpop.f32.mrb[41].mxu1 }
 0x1c7   :  { %v3552_v10 = vadd.f32 %v3551_v6, %v3550_v3  ;;  %v3553_v56 = vpop.f32.mrb[42].mxu1 }
 0x1c8   :  { %v3554_v12 = vpop.f32.mrb[43].mxu1 }
 0x1c9   :  { %v2873_v13 = vadd.f32 %v3552_v10, %v2825_v57  ;;  %v3555_v14 = vadd.f32 %v3554_v12, %v3553_v56 }
 0x1cb   :  { %v2876_v16 = vadd.f32 %v3555_v14, %v2828_v19 }
 0x1cd   :  { %v3556_v17 = vpop.f32.mrb[44].mxu1 }
 0x1ce   :  { %v3557_v18 = vpop.f32.mrb[45].mxu1 }
 0x1cf   :  { %v3558_v21 = vadd.f32 %v3557_v18, %v3556_v17  ;;  %v3559_v22 = vpop.f32.mrb[46].mxu1 }
 0x1d0   :  { %v3560_v23 = vpop.f32.mrb[47].mxu1 }
 0x1d1   :  { %v2881_v25 = vadd.f32 %v3558_v21, %v2833_v2  ;;  %v2376_v2 = vadd.f32 %v5142_v9, %v473_v58  ;;  %v2382_v9 = vadd.f32 %v5182_v26, %v473_v58 }
 0x1e5   :  { %v3578_v27 = vpop.f32.mrb[48].mxu1 }
 0x1e6   :  { %v3579_v49 = vpop.f32.mrb[49].mxu1 }
 0x1e7   :  { %v3580_v28 = vadd.f32 %v3579_v49, %v3578_v27  ;;  %v3581_v29 = vpop.f32.mrb[50].mxu1 }
 0x1e8   :  { %v3582_v30 = vpop.f32.mrb[51].mxu1 }
 0x1e9   :  { %v2921_v31 = vadd.f32 %v3580_v28, %v2873_v13  ;;  %v3583_v32 = vadd.f32 %v3582_v30, %v3581_v29 }
 0x1eb   :  { %v2924_v15 = vadd.f32 %v3583_v32, %v2876_v16 }
 0x1ed   :  { %v3584_v38 = vpop.f32.mrb[52].mxu1 }
 0x1ee   :  { %v3585_v33 = vpop.f32.mrb[53].mxu1 }
 0x1ef   :  { %v3586_v34 = vadd.f32 %v3585_v33, %v3584_v38  ;;  %v3587_v35 = vpop.f32.mrb[54].mxu1 }
 0x1f0   :  { %v3588_v45 = vpop.f32.mrb[55].mxu1 }
 0x1f1   :  { %v2929_v37 = vadd.f32 %v3586_v34, %v2881_v25 }
 0x205   :  { %v3606_v39 = vpop.f32.mrb[56].mxu1 }
 0x206   :  { %v3607_v40 = vpop.f32.mrb[57].mxu1 }
 0x207   :  { %v3608_v41 = vadd.f32 %v3607_v40, %v3606_v39  ;;  %v3609_v42 = vpop.f32.mrb[58].mxu1 }
 0x208   :  { %v3610_v44 = vpop.f32.mrb[59].mxu1 }
 0x209   :  { %v3611_v47 = vadd.f32 %v3610_v44, %v3609_v42  ;;  %v2969_v48 = vadd.f32 %v3608_v41, %v2921_v31 }
 0x20b   :  { %v2972_v50 = vadd.f32 %v3611_v47, %v2924_v15 }
 0x20d   :  { %v3612_v54 = vpop.f32.mrb[60].mxu1 }
 0x20e   :  { %v3613_v55 = vpop.f32.mrb[61].mxu1 }
 0x20f   :  { %v3614_v4 = vadd.f32 %v3613_v55, %v3612_v54  ;;  %v3615_v57 = vpop.f32.mrb[62].mxu1 }
 0x210   :  { %v3616_v19 = vpop.f32.mrb[63].mxu1 }
 0x211   :  { %v2977_v60 = vadd.f32 %v3614_v4, %v2929_v37 }
 0x216   :  { %v2626_v43 = vpop.f32.mrb[0].mxu0 }
 0x217   :  { %v3619_v3 = vadd.f32 %v2626_v43, %v2372_v20  ;;  %v2628_v6 = vpop.f32.mrb[1].mxu0 }
 0x218   :  { %v3622_v10 = vadd.f32 %v2628_v6, %v2374_v24  ;;  %v2630_v56 = vpop.f32.mrb[2].mxu0 }
 0x219   :  { %v3620_v12 = vadd.f32 %v3619_v3, %v5274_v61  ;;  %v3625_v13 = vadd.f32 %v2630_v56, %v2376_v2  ;;  %v2632_v14 = vpop.f32.mrb[3].mxu0 }
 0x21a   :  { %v3623_v8 = vadd.f32 %v3622_v10, %v5276_v62  ;;  %v3628_v16 = vadd.f32 %v2632_v14, %v2378_v36 }
 0x21b   :  { %v3030_v17 = vmax.f32 %v3620_v12, 0.0  ;;  %v3626_v7 = vadd.f32 %v3625_v13, %v5278_v63 }
 0x21c   :  { %v3031_v46 = vmax.f32 %v3623_v8, 0.0  ;;  %v3629_v18 = vadd.f32 %v3628_v16, %v5283_v0 }
 0x21d   :  { %v3033_v21 = vmax.f32 %v3626_v7, 0.0 }
 0x21e   :  { %v3444_v22 = vpack.c.bf16 %v3031_v46, %v3030_v17  ;;  %v3034_v23 = vmax.f32 %v3629_v18, 0.0  ;;  %v2636_v25 = vpop.f32.mrb[4].mxu0 }
 0x21f   :  { %v3631_v61 = vadd.f32 %v2636_v25, %v2382_v9  ;;  %v2638_v27 = vpop.f32.mrb[5].mxu0 }
 0x220   :  { %3072 = vst [vmem:[%s5362_s3] sm:$0xff] %v3444_v22  ;;  %v3446_v62 = vpack.c.bf16 %v3034_v23, %v3033_v21  ;;  %v3634_v49 = vadd.f32 %v2638_v27, %v2384_v11  ;;  %v2640_v63 = vpop.f32.mrb[6].mxu0 }
 0x221   :  { %v3632_v28 = vadd.f32 %v3631_v61, %v5290_v51  ;;  %v2641_v0 = vpop.f32.mrb[7].mxu0 }
 0x222   :  { %3074 = vst [vmem:[%s5362_s3 + $0xc] sm:$0xff] %v3446_v62  ;;  %v3635_v26 = vadd.f32 %v3634_v49, %v5292_v1 }
 0x223   :  { %v3036_v5 = vmax.f32 %v3632_v28, 0.0 }
 0x224   :  { %v3037_v29 = vmax.f32 %v3635_v26, 0.0 }
 0x226   :  { %v3448_v30 = vpack.c.bf16 %v3037_v29, %v3036_v5 }
 0x228   :  { %3076 = vst [vmem:[%s5362_s3 + $0x18] sm:$0x11] %v3448_v30 }
 0x235   :  { %v3016_v31 = vpop.f32.mrb[64].mxu1 }
 0x236   :  { %v3017_v32 = vadd.f32 %v3016_v31, %v2969_v48  ;;  %v3018_v15 = vpop.f32.mrb[65].mxu1 }
 0x237   :  { %v3019_v38 = vpop.f32.mrb[66].mxu1 }
 0x238   :  { %v3032_v33 = vmax.f32 %v3017_v32, 0.0  ;;  %v3020_v51 = vadd.f32 %v3019_v38, %v2972_v50  ;;  %v3021_v34 = vpop.f32.mrb[67].mxu1 }
 0x23a   :  { %v3445_v35 = vpack.c.bf16 %v3032_v33, %v3032_v33  ;;  %v3035_v45 = vmax.f32 %v3020_v51, 0.0 }
 0x23c   :  { %3073 = vst [vmem:[%s5362_s3 + $0x8] sm:$0xf] %v3445_v35  ;;  %v3447_v1 = vpack.c.bf16 %v3035_v45, %v3035_v45 }
 0x23d   :  { %v3024_v37 = vpop.f32.mrb[68].mxu1 }
 0x23e   :  { %3075 = vst [vmem:[%s5362_s3 + $0x14] sm:$0xf] %v3447_v1  ;;  %v3025_v39 = vadd.f32 %v3024_v37, %v2977_v60  ;;  %v3026_v40 = vpop.f32.mrb[69].mxu1 }
 0x23f   :  { %v3027_v41 = vpop.f32.mrb[70].mxu1 }
 0x240   :  { %v3038_v42 = vmax.f32 %v3025_v39, 0.0  ;;  %v3028_v44 = vpop.f32.mrb[71].mxu1 }
 0x242   :  { %v3449_v47 = vpack.c.bf16 %v3038_v42, %v3038_v42 }
 0x244   :  { %3077 = vst [vmem:[%s5362_s3 + $0x20] sm:$0x1] %v3449_v47 }

// kernel: finetuner_forward.8
= control target key start
LH: loop header
LB: loop body
LE: loop exit
PB: predicated region body
PF: predicated region fallthrough
CT: control target
= control target key end

     0   :  { %s6407_s1 = inlined_call_operand.vmem [shape: bf16[3456,256], index: 1, kind: input, shape index: {}]   ;;  %s6408_s0 = inlined_call_operand.vmem [shape: bf16[18,3456], index: 0, kind: input, shape index: {}]   ;;  %s6409_s2 = inlined_call_operand.vmem [shape: f32[1,256], index: 2, kind: input, shape index: {}]   ;;  %s6410_s3 = inlined_call_operand.vmem [shape: bf16[18,256], index: 3, kind: output, shape index: {}]  }
   0x1   :  { %v4240_v0 = vld [vmem:[%s6407_s1 + $0x4] ss:$8 sps:$4 sm:$0xff]   ;;  %v4244_v2 = vld [vmem:[%s6407_s1] ss:$8 sps:$4 sm:$0xff]   ;;  %v4246_v4 = vld [vmem:[%s6407_s1 + $0x14] ss:$8 sps:$4 sm:$0xff]  }
   0x2   :  { %v4242_v1 = vld [vmem:[%s6407_s1 + $0x704] ss:$8 sps:$4 sm:$0xff]   ;;  %2892 = vmatprep.subr.bf16.mxu1 %v4240_v0  ;;  %v4245_v3 = vld [vmem:[%s6407_s1 + $0x700] ss:$8 sps:$4 sm:$0xff]   ;;  %v4248_v5 = vld [vmem:[%s6407_s1 + $0x714] ss:$8 sps:$4 sm:$0xff]  }
   0x3   :  { %3249 = vmatprep.subr.bf16.mxu0 %v4242_v1  ;;  %2893 = vmatpush1.bf16.msra.mxu1 %v4244_v2  ;;  %v4250_v6 = vld [vmem:[%s6407_s1 + $0x10] ss:$8 sps:$4 sm:$0xff]   ;;  %v4252_v8 = vld [vmem:[%s6407_s1 + $0x24] ss:$8 sps:$4 sm:$0xff]   ;;  %v4256_v10 = vld [vmem:[%s6407_s1 + $0x20] ss:$8 sps:$4 sm:$0xff]  }
   0x4   :  { %3250 = vmatpush1.bf16.msra.mxu0 %v4245_v3  ;;  %2894 = vmatprep.subr.bf16.mxu1 %v4246_v4  ;;  %v4251_v7 = vld [vmem:[%s6407_s1 + $0x710] ss:$8 sps:$4 sm:$0xff]   ;;  %v4254_v9 = vld [vmem:[%s6407_s1 + $0x724] ss:$8 sps:$4 sm:$0xff]   ;;  %v4257_v11 = vld [vmem:[%s6407_s1 + $0x720] ss:$8 sps:$4 sm:$0xff]  }
   0x5   :  { %3251 = vmatprep.subr.bf16.mxu0 %v4248_v5  ;;  %v4258_v12 = vld [vmem:[%s6407_s1 + $0x34] ss:$8 sps:$4 sm:$0xff]   ;;  %v4262_v14 = vld [vmem:[%s6407_s1 + $0x30] ss:$8 sps:$4 sm:$0xff]   ;;  %v4264_v16 = vld [vmem:[%s6407_s1 + $0x44] ss:$8 sps:$4 sm:$0xff]  }
   0x6   :  { %v4260_v13 = vld [vmem:[%s6407_s1 + $0x734] ss:$8 sps:$4 sm:$0xff]   ;;  %v4263_v15 = vld [vmem:[%s6407_s1 + $0x730] ss:$8 sps:$4 sm:$0xff]   ;;  %v4266_v17 = vld [vmem:[%s6407_s1 + $0x744] ss:$8 sps:$4 sm:$0xff]  }
   0x7   :  { %2895 = vmatpush1.bf16.msra.mxu1 %v4250_v6  ;;  %v4268_v18 = vld [vmem:[%s6407_s1 + $0x40] ss:$8 sps:$4 sm:$0xff]   ;;  %v4270_v20 = vld [vmem:[%s6407_s1 + $0x54] ss:$8 sps:$4 sm:$0xff]   ;;  %v4274_v22 = vld [vmem:[%s6407_s1 + $0x50] ss:$8 sps:$4 sm:$0xff]  }
   0x8   :  { %3252 = vmatpush1.bf16.msra.mxu0 %v4251_v7  ;;  %2896 = vmatprep.subr.bf16.mxu1 %v4252_v8  ;;  %v4269_v19 = vld [vmem:[%s6407_s1 + $0x740] ss:$8 sps:$4 sm:$0xff]   ;;  %v4272_v21 = vld [vmem:[%s6407_s1 + $0x754] ss:$8 sps:$4 sm:$0xff]   ;;  %v4275_v23 = vld [vmem:[%s6407_s1 + $0x750] ss:$8 sps:$4 sm:$0xff]  }
   0x9   :  { %3253 = vmatprep.subr.bf16.mxu0 %v4254_v9  ;;  %v4276_v24 = vld [vmem:[%s6407_s1 + $0x64] ss:$8 sps:$4 sm:$0xff]   ;;  %v4280_v26 = vld [vmem:[%s6407_s1 + $0x60] ss:$8 sps:$4 sm:$0xff]   ;;  %v4282_v28 = vld [vmem:[%s6407_s1 + $0x74] ss:$8 sps:$4 sm:$0xff]  }
   0xa   :  { %v4278_v25 = vld [vmem:[%s6407_s1 + $0x764] ss:$8 sps:$4 sm:$0xff]   ;;  %v4281_v27 = vld [vmem:[%s6407_s1 + $0x760] ss:$8 sps:$4 sm:$0xff]   ;;  %v4284_v29 = vld [vmem:[%s6407_s1 + $0x774] ss:$8 sps:$4 sm:$0xff]  }
   0xb   :  { %2897 = vmatpush1.bf16.msra.mxu1 %v4256_v10  ;;  %v4286_v30 = vld [vmem:[%s6407_s1 + $0x70] ss:$8 sps:$4 sm:$0xff]   ;;  %v4288_v32 = vld [vmem:[%s6407_s1 + $0x84] ss:$8 sps:$4 sm:$0xff]   ;;  %v4292_v34 = vld [vmem:[%s6407_s1 + $0x80] ss:$8 sps:$4 sm:$0xff]  }
   0xc   :  { %3254 = vmatpush1.bf16.msra.mxu0 %v4257_v11  ;;  %2898 = vmatprep.subr.bf16.mxu1 %v4258_v12  ;;  %v4287_v31 = vld [vmem:[%s6407_s1 + $0x770] ss:$8 sps:$4 sm:$0xff]   ;;  %v4290_v33 = vld [vmem:[%s6407_s1 + $0x784] ss:$8 sps:$4 sm:$0xff]   ;;  %v4293_v35 = vld [vmem:[%s6407_s1 + $0x780] ss:$8 sps:$4 sm:$0xff]  }
   0xd   :  { %3255 = vmatprep.subr.bf16.mxu0 %v4260_v13  ;;  %v4294_v36 = vld [vmem:[%s6407_s1 + $0x94] ss:$8 sps:$4 sm:$0xff]   ;;  %v4298_v38 = vld [vmem:[%s6407_s1 + $0x90] ss:$8 sps:$4 sm:$0xff]   ;;  %v4300_v40 = vld [vmem:[%s6407_s1 + $0xa4] ss:$8 sps:$4 sm:$0xff]  }
   0xe   :  { %v4296_v37 = vld [vmem:[%s6407_s1 + $0x794] ss:$8 sps:$4 sm:$0xff]   ;;  %v4299_v39 = vld [vmem:[%s6407_s1 + $0x790] ss:$8 sps:$4 sm:$0xff]   ;;  %v4302_v41 = vld [vmem:[%s6407_s1 + $0x7a4] ss:$8 sps:$4 sm:$0xff]  }
   0xf   :  { %2899 = vmatpush1.bf16.msra.mxu1 %v4262_v14  ;;  %v4304_v42 = vld [vmem:[%s6407_s1 + $0xa0] ss:$8 sps:$4 sm:$0xff]   ;;  %v4306_v44 = vld [vmem:[%s6407_s1 + $0xb4] ss:$8 sps:$4 sm:$0xff]   ;;  %v4310_v46 = vld [vmem:[%s6407_s1 + $0xb0] ss:$8 sps:$4 sm:$0xff]  }
  0x10   :  { %3256 = vmatpush1.bf16.msra.mxu0 %v4263_v15  ;;  %2900 = vmatprep.subr.bf16.mxu1 %v4264_v16  ;;  %v4305_v43 = vld [vmem:[%s6407_s1 + $0x7a0] ss:$8 sps:$4 sm:$0xff]   ;;  %v4308_v45 = vld [vmem:[%s6407_s1 + $0x7b4] ss:$8 sps:$4 sm:$0xff]   ;;  %v4311_v47 = vld [vmem:[%s6407_s1 + $0x7b0] ss:$8 sps:$4 sm:$0xff]  }
  0x11   :  { %3257 = vmatprep.subr.bf16.mxu0 %v4266_v17  ;;  %v4338_v48 = vld [vmem:[%s6408_s0 + $0x4] ss:$108 sps:$4 sm:$0xff]   ;;  %v4344_v51 = vld [vmem:[%s6408_s0 + $0x3c] ss:$108 sps:$4 sm:$0xff]   ;;  %v4336_v4 = vld [vmem:[%s6408_s0] ss:$108 sps:$4 sm:$0xff]  }
  0x12   :  { %v4312_v49 = vld [vmem:[%s6407_s1 + $0xc4] ss:$8 sps:$4 sm:$0xff]   ;;  %2924 = vmatprep.mubr.bf16.mxu1 %v4338_v48  ;;  %v4316_v52 = vld [vmem:[%s6407_s1 + $0xc0] ss:$8 sps:$4 sm:$0xff]   ;;  %v4318_v54 = vld [vmem:[%s6407_s1 + $0xd4] ss:$8 sps:$4 sm:$0xff]   ;;  %3281 = vmatprep.mubr.bf16.mxu0 %v4344_v51 }
  0x13   :  { %2901 = vmatpush1.bf16.msra.mxu1 %v4268_v18  ;;  %v4314_v50 = vld [vmem:[%s6407_s1 + $0x7c4] ss:$8 sps:$4 sm:$0xff]   ;;  %v4317_v53 = vld [vmem:[%s6407_s1 + $0x7c0] ss:$8 sps:$4 sm:$0xff]   ;;  %v4320_v55 = vld [vmem:[%s6407_s1 + $0x7d4] ss:$8 sps:$4 sm:$0xff]  }
  0x14   :  { %3258 = vmatpush1.bf16.msra.mxu0 %v4269_v19  ;;  %2902 = vmatprep.subr.bf16.mxu1 %v4270_v20  ;;  %v4322_v56 = vld [vmem:[%s6407_s1 + $0xd0] ss:$8 sps:$4 sm:$0xff]   ;;  %v4324_v58 = vld [vmem:[%s6407_s1 + $0xe4] ss:$8 sps:$4 sm:$0xff]   ;;  %v4328_v60 = vld [vmem:[%s6407_s1 + $0xe0] ss:$8 sps:$4 sm:$0xff]  }
  0x15   :  { %3259 = vmatprep.subr.bf16.mxu0 %v4272_v21  ;;  %v4323_v57 = vld [vmem:[%s6407_s1 + $0x7d0] ss:$8 sps:$4 sm:$0xff]   ;;  %v4326_v59 = vld [vmem:[%s6407_s1 + $0x7e4] ss:$8 sps:$4 sm:$0xff]   ;;  %v4329_v61 = vld [vmem:[%s6407_s1 + $0x7e0] ss:$8 sps:$4 sm:$0xff]  }
  0x16   :  { %v4330_v62 = vld [vmem:[%s6407_s1 + $0xf4] ss:$8 sps:$4 sm:$0xff]   ;;  %v4334_v0 = vld [vmem:[%s6407_s1 + $0xf0] ss:$8 sps:$4 sm:$0xff]   ;;  %v4341_v2 = vld [vmem:[%s6407_s1 + $0x104] ss:$8 sps:$4 sm:$0xff]  }
  0x17   :  { %2903 = vmatpush1.bf16.msra.mxu1 %v4274_v22  ;;  %v4332_v63 = vld [vmem:[%s6407_s1 + $0x7f4] ss:$8 sps:$4 sm:$0xff]   ;;  %v4335_v1 = vld [vmem:[%s6407_s1 + $0x7f0] ss:$8 sps:$4 sm:$0xff]   ;;  %v4347_v3 = vld [vmem:[%s6407_s1 + $0x804] ss:$8 sps:$4 sm:$0xff]  }
  0x18   :  { %3260 = vmatpush1.bf16.msra.mxu0 %v4275_v23  ;;  %2904 = vmatprep.subr.bf16.mxu1 %v4276_v24  ;;  %v4339_v5 = vld [vmem:[%s6407_s1 + $0x100] ss:$8 sps:$4 sm:$0xff]   ;;  %v4342_v6 = vld [vmem:[%s6408_s0 + $0x38] ss:$108 sps:$4 sm:$0xff]   ;;  %v4350_v8 = vld [vmem:[%s6407_s1 + $0x114] ss:$8 sps:$4 sm:$0xff]  }
  0x19   :  { %3261 = vmatprep.subr.bf16.mxu0 %v4278_v25  ;;  %v4345_v7 = vld [vmem:[%s6407_s1 + $0x800] ss:$8 sps:$4 sm:$0xff]   ;;  %v4353_v9 = vld [vmem:[%s6407_s1 + $0x814] ss:$8 sps:$4 sm:$0xff]   ;;  %v4348_v10 = vld [vmem:[%s6407_s1 + $0x110] ss:$8 sps:$4 sm:$0xff]  }
  0x1a   :  { %v4351_v11 = vld [vmem:[%s6407_s1 + $0x810] ss:$8 sps:$4 sm:$0xff]   ;;  %v4356_v12 = vld [vmem:[%s6407_s1 + $0x124] ss:$8 sps:$4 sm:$0xff]   ;;  %v4354_v14 = vld [vmem:[%s6407_s1 + $0x120] ss:$8 sps:$4 sm:$0xff]  }
  0x1b   :  { %2905 = vmatpush1.bf16.msra.mxu1 %v4280_v26  ;;  %v4359_v13 = vld [vmem:[%s6407_s1 + $0x824] ss:$8 sps:$4 sm:$0xff]   ;;  %v4357_v15 = vld [vmem:[%s6407_s1 + $0x820] ss:$8 sps:$4 sm:$0xff]   ;;  %v4362_v16 = vld [vmem:[%s6407_s1 + $0x134] ss:$8 sps:$4 sm:$0xff]  }
  0x1c   :  { %3262 = vmatpush1.bf16.msra.mxu0 %v4281_v27  ;;  %2906 = vmatprep.subr.bf16.mxu1 %v4282_v28  ;;  %v4365_v17 = vld [vmem:[%s6407_s1 + $0x834] ss:$8 sps:$4 sm:$0xff]   ;;  %v4360_v18 = vld [vmem:[%s6407_s1 + $0x130] ss:$8 sps:$4 sm:$0xff]   ;;  %v4368_v20 = vld [vmem:[%s6407_s1 + $0x144] ss:$8 sps:$4 sm:$0xff]  }
  0x1d   :  { %3263 = vmatprep.subr.bf16.mxu0 %v4284_v29  ;;  %v4363_v19 = vld [vmem:[%s6407_s1 + $0x830] ss:$8 sps:$4 sm:$0xff]   ;;  %v4371_v21 = vld [vmem:[%s6407_s1 + $0x844] ss:$8 sps:$4 sm:$0xff]   ;;  %v4366_v22 = vld [vmem:[%s6407_s1 + $0x140] ss:$8 sps:$4 sm:$0xff]  }
  0x1e   :  { %v4369_v23 = vld [vmem:[%s6407_s1 + $0x840] ss:$8 sps:$4 sm:$0xff]   ;;  %v4374_v24 = vld [vmem:[%s6407_s1 + $0x154] ss:$8 sps:$4 sm:$0xff]   ;;  %v4372_v27 = vld [vmem:[%s6407_s1 + $0x150] ss:$8 sps:$4 sm:$0xff]  }
  0x1f   :  { %2907 = vmatpush1.bf16.msra.mxu1 %v4286_v30  ;;  %v4377_v25 = vld [vmem:[%s6407_s1 + $0x854] ss:$8 sps:$4 sm:$0xff]   ;;  %v4375_v30 = vld [vmem:[%s6407_s1 + $0x850] ss:$8 sps:$4 sm:$0xff]  }
  0x20   :  { %3264 = vmatpush1.bf16.msra.mxu0 %v4287_v31  ;;  %2908 = vmatprep.subr.bf16.mxu1 %v4288_v32  ;;  %v43_v26 = vld [vmem:[%s6408_s0 + $0xd8] sm:$0x11]  ;;  %v50_v31 = vld [vmem:[%s6408_s0 + $0x110] sm:$0x11]  ;;  %v4380_v32 = vld [vmem:[%s6407_s1 + $0x164] ss:$8 sps:$4 sm:$0xff]  }
  0x21   :  { %3265 = vmatprep.subr.bf16.mxu0 %v4290_v33  ;;  %v3667_v28 = vcombine.high %v43_v26, %v43_v26  ;;  %v3666_v29 = vcombine.low %v43_v26, %v43_v26  ;;  %v4383_v33 = vld [vmem:[%s6407_s1 + $0x864] ss:$8 sps:$4 sm:$0xff]   ;;  %v4398_v48 = vld [vmem:[%s6407_s1 + $0x194] ss:$8 sps:$4 sm:$0xff]   ;;  %v4399_v51 = vld [vmem:[%s6407_s1 + $0x890] ss:$8 sps:$4 sm:$0xff]  }
  0x22   :  { %v4462_v26 = vld [vmem:[%s6407_s1 + $0x224] ss:$8 sps:$4 sm:$0xff]  }
  0x23   :  { %2909 = vmatpush1.bf16.msra.mxu1 %v4292_v34  ;;  %v3681_v34 = vcombine.high %v50_v31, %v50_v31 }
  0x24   :  { %3266 = vmatpush1.bf16.msra.mxu0 %v4293_v35  ;;  %2910 = vmatprep.subr.bf16.mxu1 %v4294_v36  ;;  %v3680_v35 = vcombine.low %v50_v31, %v50_v31  ;;  %v4378_v36 = vld [vmem:[%s6407_s1 + $0x160] ss:$8 sps:$4 sm:$0xff]  }
  0x25   :  { %3267 = vmatprep.subr.bf16.mxu0 %v4296_v37  ;;  %v4381_v37 = vld [vmem:[%s6407_s1 + $0x860] ss:$8 sps:$4 sm:$0xff]  }
  0x27   :  { %2911 = vmatpush1.bf16.msra.mxu1 %v4298_v38  ;;  %v4386_v38 = vld [vmem:[%s6407_s1 + $0x174] ss:$8 sps:$4 sm:$0xff]  }
  0x28   :  { %3268 = vmatpush1.bf16.msra.mxu0 %v4299_v39  ;;  %2912 = vmatprep.subr.bf16.mxu1 %v4300_v40  ;;  %v4389_v39 = vld [vmem:[%s6407_s1 + $0x874] ss:$8 sps:$4 sm:$0xff]   ;;  %v4444_v40 = vld [vmem:[%s6408_s0 + $0xc] ss:$108 sps:$4 sm:$0xff]  }
  0x29   :  { %3269 = vmatprep.subr.bf16.mxu0 %v4302_v41  ;;  %v4384_v41 = vld [vmem:[%s6407_s1 + $0x170] ss:$8 sps:$4 sm:$0xff]  }
  0x2b   :  { %2913 = vmatpush1.bf16.msra.mxu1 %v4304_v42  ;;  %v4387_v42 = vld [vmem:[%s6407_s1 + $0x870] ss:$8 sps:$4 sm:$0xff]  }
  0x2c   :  { %3270 = vmatpush1.bf16.msra.mxu0 %v4305_v43  ;;  %2914 = vmatprep.subr.bf16.mxu1 %v4306_v44  ;;  %v4450_v43 = vld [vmem:[%s6408_s0 + $0x44] ss:$108 sps:$4 sm:$0xff]  }
  0x2d   :  { %3271 = vmatprep.subr.bf16.mxu0 %v4308_v45  ;;  %v4392_v44 = vld [vmem:[%s6407_s1 + $0x184] ss:$8 sps:$4 sm:$0xff]  }
  0x2e   :  { %v4395_v45 = vld [vmem:[%s6407_s1 + $0x884] ss:$8 sps:$4 sm:$0xff]  }
  0x2f   :  { %2915 = vmatpush1.bf16.msra.mxu1 %v4310_v46  ;;  %v4390_v46 = vld [vmem:[%s6407_s1 + $0x180] ss:$8 sps:$4 sm:$0xff]  }
  0x30   :  { %3272 = vmatpush1.bf16.msra.mxu0 %v4311_v47  ;;  %2916 = vmatprep.subr.bf16.mxu1 %v4312_v49  ;;  %v4393_v47 = vld [vmem:[%s6407_s1 + $0x880] ss:$8 sps:$4 sm:$0xff]   ;;  %v4401_v49 = vld [vmem:[%s6407_s1 + $0x894] ss:$8 sps:$4 sm:$0xff]  }
  0x31   :  { %3273 = vmatprep.subr.bf16.mxu0 %v4314_v50  ;;  %v4396_v50 = vld [vmem:[%s6407_s1 + $0x190] ss:$8 sps:$4 sm:$0xff]  }
  0x33   :  { %2917 = vmatpush1.bf16.msra.mxu1 %v4316_v52  ;;  %v4404_v52 = vld [vmem:[%s6407_s1 + $0x1a4] ss:$8 sps:$4 sm:$0xff]  }
  0x34   :  { %3274 = vmatpush1.bf16.msra.mxu0 %v4317_v53  ;;  %2918 = vmatprep.subr.bf16.mxu1 %v4318_v54  ;;  %v4407_v53 = vld [vmem:[%s6407_s1 + $0x8a4] ss:$8 sps:$4 sm:$0xff]   ;;  %v4402_v54 = vld [vmem:[%s6407_s1 + $0x1a0] ss:$8 sps:$4 sm:$0xff]  }
  0x35   :  { %3275 = vmatprep.subr.bf16.mxu0 %v4320_v55  ;;  %v4405_v55 = vld [vmem:[%s6407_s1 + $0x8a0] ss:$8 sps:$4 sm:$0xff]  }
  0x37   :  { %2919 = vmatpush1.bf16.msra.mxu1 %v4322_v56  ;;  %v4410_v56 = vld [vmem:[%s6407_s1 + $0x1b4] ss:$8 sps:$4 sm:$0xff]  }
  0x38   :  { %3276 = vmatpush1.bf16.msra.mxu0 %v4323_v57  ;;  %2920 = vmatprep.subr.bf16.mxu1 %v4324_v58  ;;  %v4413_v57 = vld [vmem:[%s6407_s1 + $0x8b4] ss:$8 sps:$4 sm:$0xff]   ;;  %v4408_v58 = vld [vmem:[%s6407_s1 + $0x1b0] ss:$8 sps:$4 sm:$0xff]  }
  0x39   :  { %3277 = vmatprep.subr.bf16.mxu0 %v4326_v59  ;;  %v4411_v59 = vld [vmem:[%s6407_s1 + $0x8b0] ss:$8 sps:$4 sm:$0xff]  }
  0x3b   :  { %2921 = vmatpush1.bf16.msra.mxu1 %v4328_v60  ;;  %v4416_v60 = vld [vmem:[%s6407_s1 + $0x1c4] ss:$8 sps:$4 sm:$0xff]  }
  0x3c   :  { %3278 = vmatpush1.bf16.msra.mxu0 %v4329_v61  ;;  %2922 = vmatprep.subr.bf16.mxu1 %v4330_v62  ;;  %v4419_v61 = vld [vmem:[%s6407_s1 + $0x8c4] ss:$8 sps:$4 sm:$0xff]   ;;  %v4414_v62 = vld [vmem:[%s6407_s1 + $0x1c0] ss:$8 sps:$4 sm:$0xff]  }
  0x3d   :  { %3279 = vmatprep.subr.bf16.mxu0 %v4332_v63  ;;  %v4417_v63 = vld [vmem:[%s6407_s1 + $0x8c0] ss:$8 sps:$4 sm:$0xff]  }
  0x3f   :  { %2923 = vmatpush1.bf16.msra.mxu1 %v4334_v0  ;;  %v4422_v0 = vld [vmem:[%s6407_s1 + $0x1d4] ss:$8 sps:$4 sm:$0xff]  }
  0x40   :  { %3280 = vmatpush1.bf16.msra.mxu0 %v4335_v1  ;;  %2943 = vmatprep.subr.bf16.mxu1 %v4341_v2  ;;  %v4425_v1 = vld [vmem:[%s6407_s1 + $0x8d4] ss:$8 sps:$4 sm:$0xff]   ;;  %v4420_v2 = vld [vmem:[%s6407_s1 + $0x1d0] ss:$8 sps:$4 sm:$0xff]  }
  0x41   :  { %3300 = vmatprep.subr.bf16.mxu0 %v4347_v3  ;;  %v4423_v3 = vld [vmem:[%s6407_s1 + $0x8d0] ss:$8 sps:$4 sm:$0xff]  }
  0x42   :  { %2925 = vmatmul.mubr.bf16.vlgmr.msra.gmra.mrb[0].mxu1 %v4336_v4  ;;  %v4429_v4 = vld [vmem:[%s6407_s1 + $0x1e4] ss:$8 sps:$4 sm:$0xff]  }
  0x43   :  { %3282 = vmatmul.mubr.bf16.vlgmr.msra.gmra.mrb[0].mxu0 %v4342_v6  ;;  %2944 = vmatpush1.bf16.msra.mxu1 %v4339_v5  ;;  %v4433_v5 = vld [vmem:[%s6407_s1 + $0x8e4] ss:$8 sps:$4 sm:$0xff]   ;;  %v4427_v6 = vld [vmem:[%s6407_s1 + $0x1e0] ss:$8 sps:$4 sm:$0xff]  }
  0x44   :  { %3301 = vmatpush1.bf16.msra.mxu0 %v4345_v7  ;;  %2945 = vmatprep.subr.bf16.mxu1 %v4350_v8  ;;  %v4431_v7 = vld [vmem:[%s6407_s1 + $0x8e0] ss:$8 sps:$4 sm:$0xff]   ;;  %v4438_v8 = vld [vmem:[%s6407_s1 + $0x1f4] ss:$8 sps:$4 sm:$0xff]  }
  0x45   :  { %3302 = vmatprep.subr.bf16.mxu0 %v4353_v9  ;;  %2934 = vmatprep.mubr.bf16.mxu1 %v3667_v28  ;;  %v4441_v9 = vld [vmem:[%s6407_s1 + $0x8f4] ss:$8 sps:$4 sm:$0xff]   ;;  %v4460_v28 = vld [vmem:[%s6407_s1 + $0x220] ss:$8 sps:$4 sm:$0xff]  }
  0x46   :  { %3291 = vmatprep.mubr.bf16.mxu0 %v3681_v34  ;;  %v4550_v34 = vld [vmem:[%s6408_s0 + $0x14] ss:$108 sps:$4 sm:$0xff]  }
  0x47   :  { %2946 = vmatpush1.bf16.msra.mxu1 %v4348_v10  ;;  %v4436_v10 = vld [vmem:[%s6407_s1 + $0x1f0] ss:$8 sps:$4 sm:$0xff]  }
  0x48   :  { %3303 = vmatpush1.bf16.msra.mxu0 %v4351_v11  ;;  %2947 = vmatprep.subr.bf16.mxu1 %v4356_v12  ;;  %v4439_v11 = vld [vmem:[%s6407_s1 + $0x8f0] ss:$8 sps:$4 sm:$0xff]   ;;  %v4442_v12 = vld [vmem:[%s6408_s0 + $0x8] ss:$108 sps:$4 sm:$0xff]  }
  0x49   :  { %3304 = vmatprep.subr.bf16.mxu0 %v4359_v13  ;;  %v4447_v13 = vld [vmem:[%s6407_s1 + $0x204] ss:$8 sps:$4 sm:$0xff]  }
  0x4a   :  { %2935 = vmatmul.mubr.bf16.gmra.mrb[4].mxu1 %v3666_v29  ;;  %v4463_v29 = vld [vmem:[%s6407_s1 + $0x920] ss:$8 sps:$4 sm:$0xff]  }
  0x4b   :  { %2948 = vmatpush1.bf16.msra.mxu1 %v4354_v14  ;;  %3292 = vmatmul.mubr.bf16.gmra.mrb[4].mxu0 %v3680_v35  ;;  %v4453_v14 = vld [vmem:[%s6407_s1 + $0x904] ss:$8 sps:$4 sm:$0xff]  }
  0x4c   :  { %3305 = vmatpush1.bf16.msra.mxu0 %v4357_v15  ;;  %2949 = vmatprep.subr.bf16.mxu1 %v4362_v16  ;;  %v4445_v15 = vld [vmem:[%s6407_s1 + $0x200] ss:$8 sps:$4 sm:$0xff]   ;;  %v4556_v35 = vld [vmem:[%s6408_s0 + $0x4c] ss:$108 sps:$4 sm:$0xff]  }
  0x4d   :  { %3306 = vmatprep.subr.bf16.mxu0 %v4365_v17  ;;  %2975 = vmatprep.mubr.bf16.mxu1 %v4444_v40  ;;  %v4448_v16 = vld [vmem:[%s6408_s0 + $0x40] ss:$108 sps:$4 sm:$0xff]  }
  0x4e   :  { %3332 = vmatprep.mubr.bf16.mxu0 %v4450_v43  ;;  %v4451_v17 = vld [vmem:[%s6407_s1 + $0x900] ss:$8 sps:$4 sm:$0xff]   ;;  %v4483_v43 = vld [vmem:[%s6407_s1 + $0x954] ss:$8 sps:$4 sm:$0xff]  }
  0x4f   :  { %2950 = vmatpush1.bf16.msra.mxu1 %v4360_v18  ;;  %v4456_v18 = vld [vmem:[%s6407_s1 + $0x214] ss:$8 sps:$4 sm:$0xff]   ;;  %v4472_v40 = vld [vmem:[%s6407_s1 + $0x240] ss:$8 sps:$4 sm:$0xff]  }
  0x50   :  { %3307 = vmatpush1.bf16.msra.mxu0 %v4363_v19  ;;  %2951 = vmatprep.subr.bf16.mxu1 %v4368_v20  ;;  %v44_v19 = vld [vmem:[%s6408_s0 + $0xe0] sm:$0x11]  ;;  %v4459_v20 = vld [vmem:[%s6407_s1 + $0x914] ss:$8 sps:$4 sm:$0xff]  }
  0x51   :  { %3308 = vmatprep.subr.bf16.mxu0 %v4371_v21  ;;  %v3669_v21 = vcombine.high %v44_v19, %v44_v19 }
  0x53   :  { %2952 = vmatpush1.bf16.msra.mxu1 %v4366_v22  ;;  %v51_v22 = vld [vmem:[%s6408_s0 + $0x118] sm:$0x11] }
  0x54   :  { %3309 = vmatpush1.bf16.msra.mxu0 %v4369_v23  ;;  %2953 = vmatprep.subr.bf16.mxu1 %v4374_v24  ;;  %v4454_v23 = vld [vmem:[%s6407_s1 + $0x210] ss:$8 sps:$4 sm:$0xff]   ;;  %v3682_v31 = vcombine.low %v51_v22, %v51_v22 }
  0x55   :  { %3310 = vmatprep.subr.bf16.mxu0 %v4377_v25  ;;  %v4457_v24 = vld [vmem:[%s6407_s1 + $0x910] ss:$8 sps:$4 sm:$0xff]   ;;  %v3683_v25 = vcombine.high %v51_v22, %v51_v22  ;;  %v4553_v22 = vld [vmem:[%s6407_s1 + $0x304] ss:$8 sps:$4 sm:$0xff]  }
  0x57   :  { %2954 = vmatpush1.bf16.msra.mxu1 %v4372_v27  ;;  %v4465_v27 = vld [vmem:[%s6407_s1 + $0x924] ss:$8 sps:$4 sm:$0xff]  }
  0x58   :  { %3311 = vmatpush1.bf16.msra.mxu0 %v4375_v30  ;;  %2955 = vmatprep.subr.bf16.mxu1 %v4380_v32  ;;  %v3668_v30 = vcombine.low %v44_v19, %v44_v19  ;;  %v4468_v32 = vld [vmem:[%s6407_s1 + $0x234] ss:$8 sps:$4 sm:$0xff]  }
  0x59   :  { %3312 = vmatprep.subr.bf16.mxu0 %v4383_v33  ;;  %v4471_v33 = vld [vmem:[%s6407_s1 + $0x934] ss:$8 sps:$4 sm:$0xff]  }
  0x5a   :  { %v4547_v19 = vld [vmem:[%s6407_s1 + $0x9f4] ss:$8 sps:$4 sm:$0xff]  }
  0x5b   :  { %2956 = vmatpush1.bf16.msra.mxu1 %v4378_v36  ;;  %v4466_v36 = vld [vmem:[%s6407_s1 + $0x230] ss:$8 sps:$4 sm:$0xff]  }
  0x5c   :  { %3313 = vmatpush1.bf16.msra.mxu0 %v4381_v37  ;;  %2957 = vmatprep.subr.bf16.mxu1 %v4386_v38  ;;  %v4469_v37 = vld [vmem:[%s6407_s1 + $0x930] ss:$8 sps:$4 sm:$0xff]   ;;  %v4474_v38 = vld [vmem:[%s6407_s1 + $0x244] ss:$8 sps:$4 sm:$0xff]  }
  0x5d   :  { %3314 = vmatprep.subr.bf16.mxu0 %v4389_v39  ;;  %v4477_v39 = vld [vmem:[%s6407_s1 + $0x944] ss:$8 sps:$4 sm:$0xff]  }
  0x5f   :  { %2958 = vmatpush1.bf16.msra.mxu1 %v4384_v41  ;;  %v4475_v41 = vld [vmem:[%s6407_s1 + $0x940] ss:$8 sps:$4 sm:$0xff]  }
  0x60   :  { %3315 = vmatpush1.bf16.msra.mxu0 %v4387_v42  ;;  %2959 = vmatprep.subr.bf16.mxu1 %v4392_v44  ;;  %v4480_v42 = vld [vmem:[%s6407_s1 + $0x254] ss:$8 sps:$4 sm:$0xff]   ;;  %v4478_v44 = vld [vmem:[%s6407_s1 + $0x250] ss:$8 sps:$4 sm:$0xff]  }
  0x61   :  { %3316 = vmatprep.subr.bf16.mxu0 %v4395_v45  ;;  %v4481_v45 = vld [vmem:[%s6407_s1 + $0x950] ss:$8 sps:$4 sm:$0xff]  }
  0x63   :  { %2960 = vmatpush1.bf16.msra.mxu1 %v4390_v46  ;;  %v4486_v46 = vld [vmem:[%s6407_s1 + $0x264] ss:$8 sps:$4 sm:$0xff]  }
  0x64   :  { %3317 = vmatpush1.bf16.msra.mxu0 %v4393_v47  ;;  %2961 = vmatprep.subr.bf16.mxu1 %v4398_v48  ;;  %v4489_v47 = vld [vmem:[%s6407_s1 + $0x964] ss:$8 sps:$4 sm:$0xff]   ;;  %v4484_v48 = vld [vmem:[%s6407_s1 + $0x260] ss:$8 sps:$4 sm:$0xff]  }
  0x65   :  { %3318 = vmatprep.subr.bf16.mxu0 %v4401_v49  ;;  %v4487_v49 = vld [vmem:[%s6407_s1 + $0x960] ss:$8 sps:$4 sm:$0xff]  }
  0x67   :  { %2962 = vmatpush1.bf16.msra.mxu1 %v4396_v50  ;;  %v4492_v50 = vld [vmem:[%s6407_s1 + $0x274] ss:$8 sps:$4 sm:$0xff]  }
  0x68   :  { %3319 = vmatpush1.bf16.msra.mxu0 %v4399_v51  ;;  %2963 = vmatprep.subr.bf16.mxu1 %v4404_v52  ;;  %v4495_v51 = vld [vmem:[%s6407_s1 + $0x974] ss:$8 sps:$4 sm:$0xff]   ;;  %v4490_v52 = vld [vmem:[%s6407_s1 + $0x270] ss:$8 sps:$4 sm:$0xff]  }
  0x69   :  { %3320 = vmatprep.subr.bf16.mxu0 %v4407_v53  ;;  %v4493_v53 = vld [vmem:[%s6407_s1 + $0x970] ss:$8 sps:$4 sm:$0xff]  }
  0x6b   :  { %2964 = vmatpush1.bf16.msra.mxu1 %v4402_v54  ;;  %v4498_v54 = vld [vmem:[%s6407_s1 + $0x284] ss:$8 sps:$4 sm:$0xff]  }
  0x6c   :  { %3321 = vmatpush1.bf16.msra.mxu0 %v4405_v55  ;;  %2965 = vmatprep.subr.bf16.mxu1 %v4410_v56  ;;  %v4501_v55 = vld [vmem:[%s6407_s1 + $0x984] ss:$8 sps:$4 sm:$0xff]   ;;  %v4496_v56 = vld [vmem:[%s6407_s1 + $0x280] ss:$8 sps:$4 sm:$0xff]  }
  0x6d   :  { %3322 = vmatprep.subr.bf16.mxu0 %v4413_v57  ;;  %v4499_v57 = vld [vmem:[%s6407_s1 + $0x980] ss:$8 sps:$4 sm:$0xff]  }
  0x6f   :  { %2966 = vmatpush1.bf16.msra.mxu1 %v4408_v58  ;;  %v4504_v58 = vld [vmem:[%s6407_s1 + $0x294] ss:$8 sps:$4 sm:$0xff]  }
  0x70   :  { %3323 = vmatpush1.bf16.msra.mxu0 %v4411_v59  ;;  %2967 = vmatprep.subr.bf16.mxu1 %v4416_v60  ;;  %v4507_v59 = vld [vmem:[%s6407_s1 + $0x994] ss:$8 sps:$4 sm:$0xff]   ;;  %v4502_v60 = vld [vmem:[%s6407_s1 + $0x290] ss:$8 sps:$4 sm:$0xff]  }
  0x71   :  { %3324 = vmatprep.subr.bf16.mxu0 %v4419_v61  ;;  %v4505_v61 = vld [vmem:[%s6407_s1 + $0x990] ss:$8 sps:$4 sm:$0xff]  }
  0x73   :  { %2968 = vmatpush1.bf16.msra.mxu1 %v4414_v62  ;;  %v4510_v62 = vld [vmem:[%s6407_s1 + $0x2a4] ss:$8 sps:$4 sm:$0xff]  }
  0x74   :  { %3325 = vmatpush1.bf16.msra.mxu0 %v4417_v63  ;;  %2969 = vmatprep.subr.bf16.mxu1 %v4422_v0  ;;  %v4513_v63 = vld [vmem:[%s6407_s1 + $0x9a4] ss:$8 sps:$4 sm:$0xff]   ;;  %v4508_v0 = vld [vmem:[%s6407_s1 + $0x2a0] ss:$8 sps:$4 sm:$0xff]  }
  0x75   :  { %3326 = vmatprep.subr.bf16.mxu0 %v4425_v1  ;;  %v4511_v1 = vld [vmem:[%s6407_s1 + $0x9a0] ss:$8 sps:$4 sm:$0xff]  }
  0x77   :  { %2970 = vmatpush1.bf16.msra.mxu1 %v4420_v2  ;;  %v4516_v2 = vld [vmem:[%s6407_s1 + $0x2b4] ss:$8 sps:$4 sm:$0xff]  }
  0x78   :  { %3327 = vmatpush1.bf16.msra.mxu0 %v4423_v3  ;;  %2971 = vmatprep.subr.bf16.mxu1 %v4429_v4  ;;  %v4519_v3 = vld [vmem:[%s6407_s1 + $0x9b4] ss:$8 sps:$4 sm:$0xff]   ;;  %v4514_v4 = vld [vmem:[%s6407_s1 + $0x2b0] ss:$8 sps:$4 sm:$0xff]  }
  0x79   :  { %3328 = vmatprep.subr.bf16.mxu0 %v4433_v5  ;;  %v4517_v5 = vld [vmem:[%s6407_s1 + $0x9b0] ss:$8 sps:$4 sm:$0xff]  }
  0x7b   :  { %2972 = vmatpush1.bf16.msra.mxu1 %v4427_v6  ;;  %v4522_v6 = vld [vmem:[%s6407_s1 + $0x2c4] ss:$8 sps:$4 sm:$0xff]  }
  0x7c   :  { %3329 = vmatpush1.bf16.msra.mxu0 %v4431_v7  ;;  %2973 = vmatprep.subr.bf16.mxu1 %v4438_v8  ;;  %v4525_v7 = vld [vmem:[%s6407_s1 + $0x9c4] ss:$8 sps:$4 sm:$0xff]   ;;  %v4520_v8 = vld [vmem:[%s6407_s1 + $0x2c0] ss:$8 sps:$4 sm:$0xff]  }
  0x7d   :  { %3330 = vmatprep.subr.bf16.mxu0 %v4441_v9  ;;  %v4523_v9 = vld [vmem:[%s6407_s1 + $0x9c0] ss:$8 sps:$4 sm:$0xff]  }
  0x7f   :  { %2974 = vmatpush1.bf16.msra.mxu1 %v4436_v10  ;;  %v4528_v10 = vld [vmem:[%s6407_s1 + $0x2d4] ss:$8 sps:$4 sm:$0xff]  }
  0x80   :  { %3331 = vmatpush1.bf16.msra.mxu0 %v4439_v11  ;;  %2994 = vmatprep.subr.bf16.mxu1 %v4447_v13  ;;  %v4531_v11 = vld [vmem:[%s6407_s1 + $0x9d4] ss:$8 sps:$4 sm:$0xff]   ;;  %v4529_v13 = vld [vmem:[%s6407_s1 + $0x9d0] ss:$8 sps:$4 sm:$0xff]  }
  0x81   :  { %3351 = vmatprep.subr.bf16.mxu0 %v4453_v14  ;;  %v4535_v14 = vld [vmem:[%s6407_s1 + $0x2e4] ss:$8 sps:$4 sm:$0xff]  }
  0x82   :  { %2976 = vmatmul.mubr.bf16.vlgmr.msra.gmra.mrb[0].mxu1 %v4442_v12  ;;  %v4526_v12 = vld [vmem:[%s6407_s1 + $0x2d0] ss:$8 sps:$4 sm:$0xff]  }
  0x83   :  { %3333 = vmatmul.mubr.bf16.vlgmr.msra.gmra.mrb[0].mxu0 %v4448_v16  ;;  %2995 = vmatpush1.bf16.msra.mxu1 %v4445_v15  ;;  %v4539_v15 = vld [vmem:[%s6407_s1 + $0x9e4] ss:$8 sps:$4 sm:$0xff]   ;;  %v4533_v16 = vld [vmem:[%s6407_s1 + $0x2e0] ss:$8 sps:$4 sm:$0xff]  }
  0x84   :  { %3352 = vmatpush1.bf16.msra.mxu0 %v4451_v17  ;;  %2996 = vmatprep.subr.bf16.mxu1 %v4456_v18  ;;  %v4537_v17 = vld [vmem:[%s6407_s1 + $0x9e0] ss:$8 sps:$4 sm:$0xff]   ;;  %v4544_v18 = vld [vmem:[%s6407_s1 + $0x2f4] ss:$8 sps:$4 sm:$0xff]  }
  0x85   :  { %3353 = vmatprep.subr.bf16.mxu0 %v4459_v20  ;;  %2985 = vmatprep.mubr.bf16.mxu1 %v3669_v21  ;;  %v4542_v20 = vld [vmem:[%s6407_s1 + $0x2f0] ss:$8 sps:$4 sm:$0xff]  }
  0x86   :  { %3342 = vmatprep.mubr.bf16.mxu0 %v3683_v25  ;;  %v4545_v21 = vld [vmem:[%s6407_s1 + $0x9f0] ss:$8 sps:$4 sm:$0xff]   ;;  %v4559_v25 = vld [vmem:[%s6407_s1 + $0xa04] ss:$8 sps:$4 sm:$0xff]  }
  0x87   :  { %2997 = vmatpush1.bf16.msra.mxu1 %v4454_v23  ;;  %v4548_v23 = vld [vmem:[%s6408_s0 + $0x10] ss:$108 sps:$4 sm:$0xff]  }
  0x88   :  { %3354 = vmatpush1.bf16.msra.mxu0 %v4457_v24  ;;  %2998 = vmatprep.subr.bf16.mxu1 %v4462_v26  ;;  %v4554_v24 = vld [vmem:[%s6408_s0 + $0x48] ss:$108 sps:$4 sm:$0xff]  }
  0x89   :  { %3355 = vmatprep.subr.bf16.mxu0 %v4465_v27  ;;  %v45_v26 = vld [vmem:[%s6408_s0 + $0xe8] sm:$0x11]  ;;  %v52_v27 = vld [vmem:[%s6408_s0 + $0x120] sm:$0x11] }
  0x8a   :  { %2986 = vmatmul.mubr.bf16.gmra.mrb[4].mxu1 %v3668_v30  ;;  %v4562_v30 = vld [vmem:[%s6407_s1 + $0x314] ss:$8 sps:$4 sm:$0xff]  }
  0x8b   :  { %3343 = vmatmul.mubr.bf16.gmra.mrb[4].mxu0 %v3682_v31  ;;  %2999 = vmatpush1.bf16.msra.mxu1 %v4460_v28  ;;  %v4551_v28 = vld [vmem:[%s6407_s1 + $0x300] ss:$8 sps:$4 sm:$0xff]   ;;  %v4565_v31 = vld [vmem:[%s6407_s1 + $0xa14] ss:$8 sps:$4 sm:$0xff]  }
  0x8c   :  { %3356 = vmatpush1.bf16.msra.mxu0 %v4463_v29  ;;  %3000 = vmatprep.subr.bf16.mxu1 %v4468_v32  ;;  %v4557_v29 = vld [vmem:[%s6407_s1 + $0xa00] ss:$8 sps:$4 sm:$0xff]   ;;  %v3671_v32 = vcombine.high %v45_v26, %v45_v26 }
  0x8d   :  { %3357 = vmatprep.subr.bf16.mxu0 %v4471_v33  ;;  %3026 = vmatprep.mubr.bf16.mxu1 %v4550_v34  ;;  %v3685_v33 = vcombine.high %v52_v27, %v52_v27  ;;  %v4560_v34 = vld [vmem:[%s6407_s1 + $0x310] ss:$8 sps:$4 sm:$0xff]  }
  0x8e   :  { %3383 = vmatprep.mubr.bf16.mxu0 %v4556_v35  ;;  %v4563_v35 = vld [vmem:[%s6407_s1 + $0xa10] ss:$8 sps:$4 sm:$0xff]  }
  0x8f   :  { %3001 = vmatpush1.bf16.msra.mxu1 %v4466_v36  ;;  %v4568_v36 = vld [vmem:[%s6407_s1 + $0x324] ss:$8 sps:$4 sm:$0xff]  }
  0x90   :  { %3358 = vmatpush1.bf16.msra.mxu0 %v4469_v37  ;;  %3002 = vmatprep.subr.bf16.mxu1 %v4474_v38  ;;  %v4571_v37 = vld [vmem:[%s6407_s1 + $0xa24] ss:$8 sps:$4 sm:$0xff]   ;;  %v4566_v38 = vld [vmem:[%s6407_s1 + $0x320] ss:$8 sps:$4 sm:$0xff]  }
  0x91   :  { %3359 = vmatprep.subr.bf16.mxu0 %v4477_v39  ;;  %v3670_v39 = vcombine.low %v45_v26, %v45_v26  ;;  %v4639_v26 = vld [vmem:[%s6407_s1 + $0x3e0] ss:$8 sps:$4 sm:$0xff]  }
  0x93   :  { %3003 = vmatpush1.bf16.msra.mxu1 %v4472_v40  ;;  %v3684_v40 = vcombine.low %v52_v27, %v52_v27  ;;  %v4643_v27 = vld [vmem:[%s6407_s1 + $0xae0] ss:$8 sps:$4 sm:$0xff]  }
  0x94   :  { %3360 = vmatpush1.bf16.msra.mxu0 %v4475_v41  ;;  %3004 = vmatprep.subr.bf16.mxu1 %v4480_v42  ;;  %v4569_v41 = vld [vmem:[%s6407_s1 + $0xa20] ss:$8 sps:$4 sm:$0xff]   ;;  %v4574_v42 = vld [vmem:[%s6407_s1 + $0x334] ss:$8 sps:$4 sm:$0xff]  }
  0x95   :  { %3361 = vmatprep.subr.bf16.mxu0 %v4483_v43  ;;  %v4577_v43 = vld [vmem:[%s6407_s1 + $0xa34] ss:$8 sps:$4 sm:$0xff]  }
  0x97   :  { %3005 = vmatpush1.bf16.msra.mxu1 %v4478_v44  ;;  %v4656_v44 = vld [vmem:[%s6408_s0 + $0x1c] ss:$108 sps:$4 sm:$0xff]  }
  0x98   :  { %3362 = vmatpush1.bf16.msra.mxu0 %v4481_v45  ;;  %3006 = vmatprep.subr.bf16.mxu1 %v4486_v46  ;;  %v4662_v45 = vld [vmem:[%s6408_s0 + $0x54] ss:$108 sps:$4 sm:$0xff]   ;;  %v4572_v46 = vld [vmem:[%s6407_s1 + $0x330] ss:$8 sps:$4 sm:$0xff]  }
  0x99   :  { %3363 = vmatprep.subr.bf16.mxu0 %v4489_v47  ;;  %v4575_v47 = vld [vmem:[%s6407_s1 + $0xa30] ss:$8 sps:$4 sm:$0xff]  }
  0x9b   :  { %3007 = vmatpush1.bf16.msra.mxu1 %v4484_v48  ;;  %v4580_v48 = vld [vmem:[%s6407_s1 + $0x344] ss:$8 sps:$4 sm:$0xff]  }
  0x9c   :  { %3364 = vmatpush1.bf16.msra.mxu0 %v4487_v49  ;;  %3008 = vmatprep.subr.bf16.mxu1 %v4492_v50  ;;  %v4583_v49 = vld [vmem:[%s6407_s1 + $0xa44] ss:$8 sps:$4 sm:$0xff]   ;;  %v4578_v50 = vld [vmem:[%s6407_s1 + $0x340] ss:$8 sps:$4 sm:$0xff]  }
  0x9d   :  { %3365 = vmatprep.subr.bf16.mxu0 %v4495_v51  ;;  %v4581_v51 = vld [vmem:[%s6407_s1 + $0xa40] ss:$8 sps:$4 sm:$0xff]  }
  0x9f   :  { %3009 = vmatpush1.bf16.msra.mxu1 %v4490_v52  ;;  %v4586_v52 = vld [vmem:[%s6407_s1 + $0x354] ss:$8 sps:$4 sm:$0xff]  }
  0xa0   :  { %3366 = vmatpush1.bf16.msra.mxu0 %v4493_v53  ;;  %3010 = vmatprep.subr.bf16.mxu1 %v4498_v54  ;;  %v4589_v53 = vld [vmem:[%s6407_s1 + $0xa54] ss:$8 sps:$4 sm:$0xff]   ;;  %v4584_v54 = vld [vmem:[%s6407_s1 + $0x350] ss:$8 sps:$4 sm:$0xff]  }
  0xa1   :  { %3367 = vmatprep.subr.bf16.mxu0 %v4501_v55  ;;  %v4587_v55 = vld [vmem:[%s6407_s1 + $0xa50] ss:$8 sps:$4 sm:$0xff]  }
  0xa3   :  { %3011 = vmatpush1.bf16.msra.mxu1 %v4496_v56  ;;  %v4592_v56 = vld [vmem:[%s6407_s1 + $0x364] ss:$8 sps:$4 sm:$0xff]  }
  0xa4   :  { %3368 = vmatpush1.bf16.msra.mxu0 %v4499_v57  ;;  %3012 = vmatprep.subr.bf16.mxu1 %v4504_v58  ;;  %v4595_v57 = vld [vmem:[%s6407_s1 + $0xa64] ss:$8 sps:$4 sm:$0xff]   ;;  %v4590_v58 = vld [vmem:[%s6407_s1 + $0x360] ss:$8 sps:$4 sm:$0xff]  }
  0xa5   :  { %3369 = vmatprep.subr.bf16.mxu0 %v4507_v59  ;;  %v4593_v59 = vld [vmem:[%s6407_s1 + $0xa60] ss:$8 sps:$4 sm:$0xff]  }
  0xa7   :  { %3013 = vmatpush1.bf16.msra.mxu1 %v4502_v60  ;;  %v4598_v60 = vld [vmem:[%s6407_s1 + $0x374] ss:$8 sps:$4 sm:$0xff]  }
  0xa8   :  { %3370 = vmatpush1.bf16.msra.mxu0 %v4505_v61  ;;  %3014 = vmatprep.subr.bf16.mxu1 %v4510_v62  ;;  %v4601_v61 = vld [vmem:[%s6407_s1 + $0xa74] ss:$8 sps:$4 sm:$0xff]   ;;  %v4596_v62 = vld [vmem:[%s6407_s1 + $0x370] ss:$8 sps:$4 sm:$0xff]  }
  0xa9   :  { %3371 = vmatprep.subr.bf16.mxu0 %v4513_v63  ;;  %v4599_v63 = vld [vmem:[%s6407_s1 + $0xa70] ss:$8 sps:$4 sm:$0xff]  }
  0xab   :  { %3015 = vmatpush1.bf16.msra.mxu1 %v4508_v0  ;;  %v4604_v0 = vld [vmem:[%s6407_s1 + $0x384] ss:$8 sps:$4 sm:$0xff]  }
  0xac   :  { %3372 = vmatpush1.bf16.msra.mxu0 %v4511_v1  ;;  %3016 = vmatprep.subr.bf16.mxu1 %v4516_v2  ;;  %v4607_v1 = vld [vmem:[%s6407_s1 + $0xa84] ss:$8 sps:$4 sm:$0xff]   ;;  %v4602_v2 = vld [vmem:[%s6407_s1 + $0x380] ss:$8 sps:$4 sm:$0xff]  }
  0xad   :  { %3373 = vmatprep.subr.bf16.mxu0 %v4519_v3  ;;  %v4605_v3 = vld [vmem:[%s6407_s1 + $0xa80] ss:$8 sps:$4 sm:$0xff]  }
  0xaf   :  { %3017 = vmatpush1.bf16.msra.mxu1 %v4514_v4  ;;  %v4610_v4 = vld [vmem:[%s6407_s1 + $0x394] ss:$8 sps:$4 sm:$0xff]  }
  0xb0   :  { %3374 = vmatpush1.bf16.msra.mxu0 %v4517_v5  ;;  %3018 = vmatprep.subr.bf16.mxu1 %v4522_v6  ;;  %v4613_v5 = vld [vmem:[%s6407_s1 + $0xa94] ss:$8 sps:$4 sm:$0xff]   ;;  %v4608_v6 = vld [vmem:[%s6407_s1 + $0x390] ss:$8 sps:$4 sm:$0xff]  }
  0xb1   :  { %3375 = vmatprep.subr.bf16.mxu0 %v4525_v7  ;;  %v4611_v7 = vld [vmem:[%s6407_s1 + $0xa90] ss:$8 sps:$4 sm:$0xff]  }
  0xb3   :  { %3019 = vmatpush1.bf16.msra.mxu1 %v4520_v8  ;;  %v4616_v8 = vld [vmem:[%s6407_s1 + $0x3a4] ss:$8 sps:$4 sm:$0xff]  }
  0xb4   :  { %3376 = vmatpush1.bf16.msra.mxu0 %v4523_v9  ;;  %3020 = vmatprep.subr.bf16.mxu1 %v4528_v10  ;;  %v4619_v9 = vld [vmem:[%s6407_s1 + $0xaa4] ss:$8 sps:$4 sm:$0xff]   ;;  %v4614_v10 = vld [vmem:[%s6407_s1 + $0x3a0] ss:$8 sps:$4 sm:$0xff]  }
  0xb5   :  { %3377 = vmatprep.subr.bf16.mxu0 %v4531_v11  ;;  %v4617_v11 = vld [vmem:[%s6407_s1 + $0xaa0] ss:$8 sps:$4 sm:$0xff]  }
  0xb7   :  { %3021 = vmatpush1.bf16.msra.mxu1 %v4526_v12  ;;  %v4622_v12 = vld [vmem:[%s6407_s1 + $0x3b4] ss:$8 sps:$4 sm:$0xff]  }
  0xb8   :  { %3378 = vmatpush1.bf16.msra.mxu0 %v4529_v13  ;;  %3022 = vmatprep.subr.bf16.mxu1 %v4535_v14  ;;  %v4625_v13 = vld [vmem:[%s6407_s1 + $0xab4] ss:$8 sps:$4 sm:$0xff]   ;;  %v4620_v14 = vld [vmem:[%s6407_s1 + $0x3b0] ss:$8 sps:$4 sm:$0xff]  }
  0xb9   :  { %3379 = vmatprep.subr.bf16.mxu0 %v4539_v15  ;;  %v4623_v15 = vld [vmem:[%s6407_s1 + $0xab0] ss:$8 sps:$4 sm:$0xff]  }
  0xbb   :  { %3023 = vmatpush1.bf16.msra.mxu1 %v4533_v16  ;;  %v4628_v16 = vld [vmem:[%s6407_s1 + $0x3c4] ss:$8 sps:$4 sm:$0xff]  }
  0xbc   :  { %3380 = vmatpush1.bf16.msra.mxu0 %v4537_v17  ;;  %3024 = vmatprep.subr.bf16.mxu1 %v4544_v18  ;;  %v4631_v17 = vld [vmem:[%s6407_s1 + $0xac4] ss:$8 sps:$4 sm:$0xff]   ;;  %v4626_v18 = vld [vmem:[%s6407_s1 + $0x3c0] ss:$8 sps:$4 sm:$0xff]  }
  0xbd   :  { %3381 = vmatprep.subr.bf16.mxu0 %v4547_v19  ;;  %v4629_v19 = vld [vmem:[%s6407_s1 + $0xac0] ss:$8 sps:$4 sm:$0xff]  }
  0xbf   :  { %3025 = vmatpush1.bf16.msra.mxu1 %v4542_v20  ;;  %v4634_v20 = vld [vmem:[%s6407_s1 + $0x3d4] ss:$8 sps:$4 sm:$0xff]  }
  0xc0   :  { %3382 = vmatpush1.bf16.msra.mxu0 %v4545_v21  ;;  %3045 = vmatprep.subr.bf16.mxu1 %v4553_v22  ;;  %v4637_v21 = vld [vmem:[%s6407_s1 + $0xad4] ss:$8 sps:$4 sm:$0xff]   ;;  %v4632_v22 = vld [vmem:[%s6407_s1 + $0x3d0] ss:$8 sps:$4 sm:$0xff]  }
  0xc1   :  { %3402 = vmatprep.subr.bf16.mxu0 %v4559_v25  ;;  %v4645_v25 = vld [vmem:[%s6407_s1 + $0xae4] ss:$8 sps:$4 sm:$0xff]  }
  0xc2   :  { %3027 = vmatmul.mubr.bf16.vlgmr.msra.gmra.mrb[0].mxu1 %v4548_v23  ;;  %v4635_v23 = vld [vmem:[%s6407_s1 + $0xad0] ss:$8 sps:$4 sm:$0xff]  }
  0xc3   :  { %3384 = vmatmul.mubr.bf16.vlgmr.msra.gmra.mrb[0].mxu0 %v4554_v24  ;;  %3046 = vmatpush1.bf16.msra.mxu1 %v4551_v28  ;;  %v4641_v24 = vld [vmem:[%s6407_s1 + $0x3e4] ss:$8 sps:$4 sm:$0xff]   ;;  %v4650_v28 = vld [vmem:[%s6407_s1 + $0x3f4] ss:$8 sps:$4 sm:$0xff]  }
  0xc4   :  { %3403 = vmatpush1.bf16.msra.mxu0 %v4557_v29  ;;  %3047 = vmatprep.subr.bf16.mxu1 %v4562_v30  ;;  %v4653_v29 = vld [vmem:[%s6407_s1 + $0xaf4] ss:$8 sps:$4 sm:$0xff]   ;;  %v4648_v30 = vld [vmem:[%s6407_s1 + $0x3f0] ss:$8 sps:$4 sm:$0xff]  }
  0xc5   :  { %3404 = vmatprep.subr.bf16.mxu0 %v4565_v31  ;;  %3036 = vmatprep.mubr.bf16.mxu1 %v3671_v32  ;;  %v4651_v31 = vld [vmem:[%s6407_s1 + $0xaf0] ss:$8 sps:$4 sm:$0xff]   ;;  %v4659_v32 = vld [vmem:[%s6407_s1 + $0x404] ss:$8 sps:$4 sm:$0xff]  }
  0xc6   :  { %3393 = vmatprep.mubr.bf16.mxu0 %v3685_v33  ;;  %v4654_v33 = vld [vmem:[%s6408_s0 + $0x18] ss:$108 sps:$4 sm:$0xff]  }
  0xc7   :  { %3048 = vmatpush1.bf16.msra.mxu1 %v4560_v34  ;;  %v4665_v34 = vld [vmem:[%s6407_s1 + $0xb04] ss:$8 sps:$4 sm:$0xff]  }
  0xc8   :  { %3405 = vmatpush1.bf16.msra.mxu0 %v4563_v35  ;;  %3049 = vmatprep.subr.bf16.mxu1 %v4568_v36  ;;  %v4657_v35 = vld [vmem:[%s6407_s1 + $0x400] ss:$8 sps:$4 sm:$0xff]   ;;  %v4660_v36 = vld [vmem:[%s6408_s0 + $0x50] ss:$108 sps:$4 sm:$0xff]  }
  0xc9   :  { %3406 = vmatprep.subr.bf16.mxu0 %v4571_v37  ;;  %v4663_v37 = vld [vmem:[%s6407_s1 + $0xb00] ss:$8 sps:$4 sm:$0xff]  }
  0xca   :  { %3037 = vmatmul.mubr.bf16.gmra.mrb[4].mxu1 %v3670_v39  ;;  %v53_v39 = vld [vmem:[%s6408_s0 + $0x128] sm:$0x11] }
  0xcb   :  { %3394 = vmatmul.mubr.bf16.gmra.mrb[4].mxu0 %v3684_v40  ;;  %3050 = vmatpush1.bf16.msra.mxu1 %v4566_v38  ;;  %v46_v38 = vld [vmem:[%s6408_s0 + $0xf0] sm:$0x11] }
  0xcc   :  { %3407 = vmatpush1.bf16.msra.mxu0 %v4569_v41  ;;  %3051 = vmatprep.subr.bf16.mxu1 %v4574_v42  ;;  %v4668_v40 = vld [vmem:[%s6407_s1 + $0x414] ss:$8 sps:$4 sm:$0xff]   ;;  %v3673_v42 = vcombine.high %v46_v38, %v46_v38 }
  0xcd   :  { %3408 = vmatprep.subr.bf16.mxu0 %v4577_v43  ;;  %3077 = vmatprep.mubr.bf16.mxu1 %v4656_v44  ;;  %v4671_v41 = vld [vmem:[%s6407_s1 + $0xb14] ss:$8 sps:$4 sm:$0xff]   ;;  %v3687_v43 = vcombine.high %v53_v39, %v53_v39  ;;  %v4666_v44 = vld [vmem:[%s6407_s1 + $0x410] ss:$8 sps:$4 sm:$0xff]  }
  0xce   :  { %3434 = vmatprep.mubr.bf16.mxu0 %v4662_v45  ;;  %v4669_v45 = vld [vmem:[%s6407_s1 + $0xb10] ss:$8 sps:$4 sm:$0xff]  }
  0xcf   :  { %3052 = vmatpush1.bf16.msra.mxu1 %v4572_v46  ;;  %v4674_v46 = vld [vmem:[%s6407_s1 + $0x424] ss:$8 sps:$4 sm:$0xff]  }
  0xd0   :  { %3409 = vmatpush1.bf16.msra.mxu0 %v4575_v47  ;;  %3053 = vmatprep.subr.bf16.mxu1 %v4580_v48  ;;  %v4677_v47 = vld [vmem:[%s6407_s1 + $0xb24] ss:$8 sps:$4 sm:$0xff]   ;;  %v4672_v48 = vld [vmem:[%s6407_s1 + $0x420] ss:$8 sps:$4 sm:$0xff]  }
  0xd1   :  { %3410 = vmatprep.subr.bf16.mxu0 %v4583_v49  ;;  %v4675_v49 = vld [vmem:[%s6407_s1 + $0xb20] ss:$8 sps:$4 sm:$0xff]  }
  0xd3   :  { %3054 = vmatpush1.bf16.msra.mxu1 %v4578_v50  ;;  %v3672_v50 = vcombine.low %v46_v38, %v46_v38  ;;  %v4756_v38 = vld [vmem:[%s6407_s1 + $0x4f4] ss:$8 sps:$4 sm:$0xff]  }
  0xd4   :  { %3411 = vmatpush1.bf16.msra.mxu0 %v4581_v51  ;;  %3055 = vmatprep.subr.bf16.mxu1 %v4586_v52  ;;  %v3686_v51 = vcombine.low %v53_v39, %v53_v39  ;;  %v4680_v52 = vld [vmem:[%s6407_s1 + $0x434] ss:$8 sps:$4 sm:$0xff]  }
  0xd5   :  { %3412 = vmatprep.subr.bf16.mxu0 %v4589_v53  ;;  %v4683_v53 = vld [vmem:[%s6407_s1 + $0xb34] ss:$8 sps:$4 sm:$0xff]  }
  0xd6   :  { %v4759_v39 = vld [vmem:[%s6407_s1 + $0xbf4] ss:$8 sps:$4 sm:$0xff]  }
  0xd7   :  { %3056 = vmatpush1.bf16.msra.mxu1 %v4584_v54  ;;  %v4762_v54 = vld [vmem:[%s6408_s0 + $0x24] ss:$108 sps:$4 sm:$0xff]  }
  0xd8   :  { %3413 = vmatpush1.bf16.msra.mxu0 %v4587_v55  ;;  %3057 = vmatprep.subr.bf16.mxu1 %v4592_v56  ;;  %v4768_v55 = vld [vmem:[%s6408_s0 + $0x5c] ss:$108 sps:$4 sm:$0xff]   ;;  %v4678_v56 = vld [vmem:[%s6407_s1 + $0x430] ss:$8 sps:$4 sm:$0xff]  }
  0xd9   :  { %3414 = vmatprep.subr.bf16.mxu0 %v4595_v57  ;;  %v4681_v57 = vld [vmem:[%s6407_s1 + $0xb30] ss:$8 sps:$4 sm:$0xff]  }
  0xdb   :  { %3058 = vmatpush1.bf16.msra.mxu1 %v4590_v58  ;;  %v4686_v58 = vld [vmem:[%s6407_s1 + $0x444] ss:$8 sps:$4 sm:$0xff]  }
  0xdc   :  { %3415 = vmatpush1.bf16.msra.mxu0 %v4593_v59  ;;  %3059 = vmatprep.subr.bf16.mxu1 %v4598_v60  ;;  %v4689_v59 = vld [vmem:[%s6407_s1 + $0xb44] ss:$8 sps:$4 sm:$0xff]   ;;  %v4684_v60 = vld [vmem:[%s6407_s1 + $0x440] ss:$8 sps:$4 sm:$0xff]  }
  0xdd   :  { %3416 = vmatprep.subr.bf16.mxu0 %v4601_v61  ;;  %v4687_v61 = vld [vmem:[%s6407_s1 + $0xb40] ss:$8 sps:$4 sm:$0xff]  }
  0xdf   :  { %3060 = vmatpush1.bf16.msra.mxu1 %v4596_v62  ;;  %v4692_v62 = vld [vmem:[%s6407_s1 + $0x454] ss:$8 sps:$4 sm:$0xff]  }
  0xe0   :  { %3417 = vmatpush1.bf16.msra.mxu0 %v4599_v63  ;;  %3061 = vmatprep.subr.bf16.mxu1 %v4604_v0  ;;  %v4695_v63 = vld [vmem:[%s6407_s1 + $0xb54] ss:$8 sps:$4 sm:$0xff]   ;;  %v4690_v0 = vld [vmem:[%s6407_s1 + $0x450] ss:$8 sps:$4 sm:$0xff]  }
  0xe1   :  { %3418 = vmatprep.subr.bf16.mxu0 %v4607_v1  ;;  %v4693_v1 = vld [vmem:[%s6407_s1 + $0xb50] ss:$8 sps:$4 sm:$0xff]  }
  0xe3   :  { %3062 = vmatpush1.bf16.msra.mxu1 %v4602_v2  ;;  %v4698_v2 = vld [vmem:[%s6407_s1 + $0x464] ss:$8 sps:$4 sm:$0xff]  }
  0xe4   :  { %3419 = vmatpush1.bf16.msra.mxu0 %v4605_v3  ;;  %3063 = vmatprep.subr.bf16.mxu1 %v4610_v4  ;;  %v4701_v3 = vld [vmem:[%s6407_s1 + $0xb64] ss:$8 sps:$4 sm:$0xff]   ;;  %v4696_v4 = vld [vmem:[%s6407_s1 + $0x460] ss:$8 sps:$4 sm:$0xff]  }
  0xe5   :  { %3420 = vmatprep.subr.bf16.mxu0 %v4613_v5  ;;  %v4699_v5 = vld [vmem:[%s6407_s1 + $0xb60] ss:$8 sps:$4 sm:$0xff]  }
  0xe7   :  { %3064 = vmatpush1.bf16.msra.mxu1 %v4608_v6  ;;  %v4704_v6 = vld [vmem:[%s6407_s1 + $0x474] ss:$8 sps:$4 sm:$0xff]  }
  0xe8   :  { %3421 = vmatpush1.bf16.msra.mxu0 %v4611_v7  ;;  %3065 = vmatprep.subr.bf16.mxu1 %v4616_v8  ;;  %v4707_v7 = vld [vmem:[%s6407_s1 + $0xb74] ss:$8 sps:$4 sm:$0xff]   ;;  %v4702_v8 = vld [vmem:[%s6407_s1 + $0x470] ss:$8 sps:$4 sm:$0xff]  }
  0xe9   :  { %3422 = vmatprep.subr.bf16.mxu0 %v4619_v9  ;;  %v4705_v9 = vld [vmem:[%s6407_s1 + $0xb70] ss:$8 sps:$4 sm:$0xff]  }
  0xeb   :  { %3066 = vmatpush1.bf16.msra.mxu1 %v4614_v10  ;;  %v4710_v10 = vld [vmem:[%s6407_s1 + $0x484] ss:$8 sps:$4 sm:$0xff]  }
  0xec   :  { %3423 = vmatpush1.bf16.msra.mxu0 %v4617_v11  ;;  %3067 = vmatprep.subr.bf16.mxu1 %v4622_v12  ;;  %v4713_v11 = vld [vmem:[%s6407_s1 + $0xb84] ss:$8 sps:$4 sm:$0xff]   ;;  %v4708_v12 = vld [vmem:[%s6407_s1 + $0x480] ss:$8 sps:$4 sm:$0xff]  }
  0xed   :  { %3424 = vmatprep.subr.bf16.mxu0 %v4625_v13  ;;  %v4711_v13 = vld [vmem:[%s6407_s1 + $0xb80] ss:$8 sps:$4 sm:$0xff]  }
  0xef   :  { %3068 = vmatpush1.bf16.msra.mxu1 %v4620_v14  ;;  %v4716_v14 = vld [vmem:[%s6407_s1 + $0x494] ss:$8 sps:$4 sm:$0xff]  }
  0xf0   :  { %3425 = vmatpush1.bf16.msra.mxu0 %v4623_v15  ;;  %3069 = vmatprep.subr.bf16.mxu1 %v4628_v16  ;;  %v4719_v15 = vld [vmem:[%s6407_s1 + $0xb94] ss:$8 sps:$4 sm:$0xff]   ;;  %v4714_v16 = vld [vmem:[%s6407_s1 + $0x490] ss:$8 sps:$4 sm:$0xff]  }
  0xf1   :  { %3426 = vmatprep.subr.bf16.mxu0 %v4631_v17  ;;  %v4717_v17 = vld [vmem:[%s6407_s1 + $0xb90] ss:$8 sps:$4 sm:$0xff]  }
  0xf3   :  { %3070 = vmatpush1.bf16.msra.mxu1 %v4626_v18  ;;  %v4722_v18 = vld [vmem:[%s6407_s1 + $0x4a4] ss:$8 sps:$4 sm:$0xff]  }
  0xf4   :  { %3427 = vmatpush1.bf16.msra.mxu0 %v4629_v19  ;;  %3071 = vmatprep.subr.bf16.mxu1 %v4634_v20  ;;  %v4725_v19 = vld [vmem:[%s6407_s1 + $0xba4] ss:$8 sps:$4 sm:$0xff]   ;;  %v4720_v20 = vld [vmem:[%s6407_s1 + $0x4a0] ss:$8 sps:$4 sm:$0xff]  }
  0xf5   :  { %3428 = vmatprep.subr.bf16.mxu0 %v4637_v21  ;;  %v4723_v21 = vld [vmem:[%s6407_s1 + $0xba0] ss:$8 sps:$4 sm:$0xff]  }
  0xf7   :  { %3072 = vmatpush1.bf16.msra.mxu1 %v4632_v22  ;;  %v4728_v22 = vld [vmem:[%s6407_s1 + $0x4b4] ss:$8 sps:$4 sm:$0xff]  }
  0xf8   :  { %3429 = vmatpush1.bf16.msra.mxu0 %v4635_v23  ;;  %3073 = vmatprep.subr.bf16.mxu1 %v4641_v24  ;;  %v4731_v23 = vld [vmem:[%s6407_s1 + $0xbb4] ss:$8 sps:$4 sm:$0xff]   ;;  %v4726_v24 = vld [vmem:[%s6407_s1 + $0x4b0] ss:$8 sps:$4 sm:$0xff]  }
  0xf9   :  { %3430 = vmatprep.subr.bf16.mxu0 %v4645_v25  ;;  %v4729_v25 = vld [vmem:[%s6407_s1 + $0xbb0] ss:$8 sps:$4 sm:$0xff]  }
  0xfb   :  { %3074 = vmatpush1.bf16.msra.mxu1 %v4639_v26  ;;  %v4734_v26 = vld [vmem:[%s6407_s1 + $0x4c4] ss:$8 sps:$4 sm:$0xff]  }
  0xfc   :  { %3431 = vmatpush1.bf16.msra.mxu0 %v4643_v27  ;;  %3075 = vmatprep.subr.bf16.mxu1 %v4650_v28  ;;  %v4737_v27 = vld [vmem:[%s6407_s1 + $0xbc4] ss:$8 sps:$4 sm:$0xff]   ;;  %v4732_v28 = vld [vmem:[%s6407_s1 + $0x4c0] ss:$8 sps:$4 sm:$0xff]  }
  0xfd   :  { %3432 = vmatprep.subr.bf16.mxu0 %v4653_v29  ;;  %v4735_v29 = vld [vmem:[%s6407_s1 + $0xbc0] ss:$8 sps:$4 sm:$0xff]  }
  0xff   :  { %3076 = vmatpush1.bf16.msra.mxu1 %v4648_v30  ;;  %v4740_v30 = vld [vmem:[%s6407_s1 + $0x4d4] ss:$8 sps:$4 sm:$0xff]  }
 0x100   :  { %3433 = vmatpush1.bf16.msra.mxu0 %v4651_v31  ;;  %3096 = vmatprep.subr.bf16.mxu1 %v4659_v32  ;;  %v4743_v31 = vld [vmem:[%s6407_s1 + $0xbd4] ss:$8 sps:$4 sm:$0xff]   ;;  %v4738_v32 = vld [vmem:[%s6407_s1 + $0x4d0] ss:$8 sps:$4 sm:$0xff]  }
 0x101   :  { %3453 = vmatprep.subr.bf16.mxu0 %v4665_v34  ;;  %v4747_v34 = vld [vmem:[%s6407_s1 + $0x4e4] ss:$8 sps:$4 sm:$0xff]  }
 0x102   :  { %3078 = vmatmul.mubr.bf16.vlgmr.msra.gmra.mrb[0].mxu1 %v4654_v33  ;;  %v4741_v33 = vld [vmem:[%s6407_s1 + $0xbd0] ss:$8 sps:$4 sm:$0xff]  }
 0x103   :  { %3435 = vmatmul.mubr.bf16.vlgmr.msra.gmra.mrb[0].mxu0 %v4660_v36  ;;  %3097 = vmatpush1.bf16.msra.mxu1 %v4657_v35  ;;  %v4751_v35 = vld [vmem:[%s6407_s1 + $0xbe4] ss:$8 sps:$4 sm:$0xff]   ;;  %v4745_v36 = vld [vmem:[%s6407_s1 + $0x4e0] ss:$8 sps:$4 sm:$0xff]  }
 0x104   :  { %3454 = vmatpush1.bf16.msra.mxu0 %v4663_v37  ;;  %3098 = vmatprep.subr.bf16.mxu1 %v4668_v40  ;;  %v4749_v37 = vld [vmem:[%s6407_s1 + $0xbe0] ss:$8 sps:$4 sm:$0xff]   ;;  %v4754_v40 = vld [vmem:[%s6407_s1 + $0x4f0] ss:$8 sps:$4 sm:$0xff]  }
 0x105   :  { %3455 = vmatprep.subr.bf16.mxu0 %v4671_v41  ;;  %3087 = vmatprep.mubr.bf16.mxu1 %v3673_v42  ;;  %v4757_v41 = vld [vmem:[%s6407_s1 + $0xbf0] ss:$8 sps:$4 sm:$0xff]   ;;  %v4765_v42 = vld [vmem:[%s6407_s1 + $0x504] ss:$8 sps:$4 sm:$0xff]  }
 0x106   :  { %3444 = vmatprep.mubr.bf16.mxu0 %v3687_v43  ;;  %v4771_v43 = vld [vmem:[%s6407_s1 + $0xc04] ss:$8 sps:$4 sm:$0xff]  }
 0x107   :  { %3099 = vmatpush1.bf16.msra.mxu1 %v4666_v44  ;;  %v4760_v44 = vld [vmem:[%s6408_s0 + $0x20] ss:$108 sps:$4 sm:$0xff]  }
 0x108   :  { %3456 = vmatpush1.bf16.msra.mxu0 %v4669_v45  ;;  %3100 = vmatprep.subr.bf16.mxu1 %v4674_v46  ;;  %v4766_v45 = vld [vmem:[%s6408_s0 + $0x58] ss:$108 sps:$4 sm:$0xff]  }
 0x109   :  { %3457 = vmatprep.subr.bf16.mxu0 %v4677_v47  ;;  %v47_v46 = vld [vmem:[%s6408_s0 + $0xf8] sm:$0x11]  ;;  %v54_v47 = vld [vmem:[%s6408_s0 + $0x130] sm:$0x11] }
 0x10a   :  { %3088 = vmatmul.mubr.bf16.gmra.mrb[4].mxu1 %v3672_v50  ;;  %v4774_v50 = vld [vmem:[%s6407_s1 + $0x514] ss:$8 sps:$4 sm:$0xff]  }
 0x10b   :  { %3445 = vmatmul.mubr.bf16.gmra.mrb[4].mxu0 %v3686_v51  ;;  %3101 = vmatpush1.bf16.msra.mxu1 %v4672_v48  ;;  %v4763_v48 = vld [vmem:[%s6407_s1 + $0x500] ss:$8 sps:$4 sm:$0xff]   ;;  %v4777_v51 = vld [vmem:[%s6407_s1 + $0xc14] ss:$8 sps:$4 sm:$0xff]  }
 0x10c   :  { %3458 = vmatpush1.bf16.msra.mxu0 %v4675_v49  ;;  %3102 = vmatprep.subr.bf16.mxu1 %v4680_v52  ;;  %v4769_v49 = vld [vmem:[%s6407_s1 + $0xc00] ss:$8 sps:$4 sm:$0xff]   ;;  %v3675_v52 = vcombine.high %v47_v46, %v47_v46 }
 0x10d   :  { %3459 = vmatprep.subr.bf16.mxu0 %v4683_v53  ;;  %3128 = vmatprep.mubr.bf16.mxu1 %v4762_v54  ;;  %v3689_v53 = vcombine.high %v54_v47, %v54_v47  ;;  %v4772_v54 = vld [vmem:[%s6407_s1 + $0x510] ss:$8 sps:$4 sm:$0xff]  }
 0x10e   :  { %3485 = vmatprep.mubr.bf16.mxu0 %v4768_v55  ;;  %v4775_v55 = vld [vmem:[%s6407_s1 + $0xc10] ss:$8 sps:$4 sm:$0xff]  }
 0x10f   :  { %3103 = vmatpush1.bf16.msra.mxu1 %v4678_v56  ;;  %v4780_v56 = vld [vmem:[%s6407_s1 + $0x524] ss:$8 sps:$4 sm:$0xff]  }
 0x110   :  { %3460 = vmatpush1.bf16.msra.mxu0 %v4681_v57  ;;  %3104 = vmatprep.subr.bf16.mxu1 %v4686_v58  ;;  %v4783_v57 = vld [vmem:[%s6407_s1 + $0xc24] ss:$8 sps:$4 sm:$0xff]   ;;  %v3674_v58 = vcombine.low %v47_v46, %v47_v46  ;;  %v4851_v46 = vld [vmem:[%s6407_s1 + $0x5e0] ss:$8 sps:$4 sm:$0xff]  }
 0x111   :  { %3461 = vmatprep.subr.bf16.mxu0 %v4689_v59  ;;  %v3688_v59 = vcombine.low %v54_v47, %v54_v47  ;;  %v4855_v47 = vld [vmem:[%s6407_s1 + $0xce0] ss:$8 sps:$4 sm:$0xff]  }
 0x113   :  { %3105 = vmatpush1.bf16.msra.mxu1 %v4684_v60  ;;  %v4778_v60 = vld [vmem:[%s6407_s1 + $0x520] ss:$8 sps:$4 sm:$0xff]  }
 0x114   :  { %3462 = vmatpush1.bf16.msra.mxu0 %v4687_v61  ;;  %3106 = vmatprep.subr.bf16.mxu1 %v4692_v62  ;;  %v4781_v61 = vld [vmem:[%s6407_s1 + $0xc20] ss:$8 sps:$4 sm:$0xff]   ;;  %v4786_v62 = vld [vmem:[%s6407_s1 + $0x534] ss:$8 sps:$4 sm:$0xff]  }
 0x115   :  { %3463 = vmatprep.subr.bf16.mxu0 %v4695_v63  ;;  %v4789_v63 = vld [vmem:[%s6407_s1 + $0xc34] ss:$8 sps:$4 sm:$0xff]  }
 0x117   :  { %3107 = vmatpush1.bf16.msra.mxu1 %v4690_v0  ;;  %v4868_v0 = vld [vmem:[%s6408_s0 + $0x2c] ss:$108 sps:$4 sm:$0xff]  }
 0x118   :  { %3464 = vmatpush1.bf16.msra.mxu0 %v4693_v1  ;;  %3108 = vmatprep.subr.bf16.mxu1 %v4698_v2  ;;  %v4874_v1 = vld [vmem:[%s6408_s0 + $0x64] ss:$108 sps:$4 sm:$0xff]  }
 0x119   :  { %3465 = vmatprep.subr.bf16.mxu0 %v4701_v3  ;;  %v4784_v2 = vld [vmem:[%s6407_s1 + $0x530] ss:$8 sps:$4 sm:$0xff]  }
 0x11a   :  { %v4787_v3 = vld [vmem:[%s6407_s1 + $0xc30] ss:$8 sps:$4 sm:$0xff]  }
 0x11b   :  { %3109 = vmatpush1.bf16.msra.mxu1 %v4696_v4  ;;  %v4792_v4 = vld [vmem:[%s6407_s1 + $0x544] ss:$8 sps:$4 sm:$0xff]  }
 0x11c   :  { %3466 = vmatpush1.bf16.msra.mxu0 %v4699_v5  ;;  %3110 = vmatprep.subr.bf16.mxu1 %v4704_v6  ;;  %v4795_v5 = vld [vmem:[%s6407_s1 + $0xc44] ss:$8 sps:$4 sm:$0xff]   ;;  %v4790_v6 = vld [vmem:[%s6407_s1 + $0x540] ss:$8 sps:$4 sm:$0xff]  }
 0x11d   :  { %3467 = vmatprep.subr.bf16.mxu0 %v4707_v7  ;;  %v4793_v7 = vld [vmem:[%s6407_s1 + $0xc40] ss:$8 sps:$4 sm:$0xff]  }
 0x11f   :  { %3111 = vmatpush1.bf16.msra.mxu1 %v4702_v8  ;;  %v4798_v8 = vld [vmem:[%s6407_s1 + $0x554] ss:$8 sps:$4 sm:$0xff]  }
 0x120   :  { %3468 = vmatpush1.bf16.msra.mxu0 %v4705_v9  ;;  %3112 = vmatprep.subr.bf16.mxu1 %v4710_v10  ;;  %v4801_v9 = vld [vmem:[%s6407_s1 + $0xc54] ss:$8 sps:$4 sm:$0xff]   ;;  %v4796_v10 = vld [vmem:[%s6407_s1 + $0x550] ss:$8 sps:$4 sm:$0xff]  }
 0x121   :  { %3469 = vmatprep.subr.bf16.mxu0 %v4713_v11  ;;  %v4799_v11 = vld [vmem:[%s6407_s1 + $0xc50] ss:$8 sps:$4 sm:$0xff]  }
 0x123   :  { %3113 = vmatpush1.bf16.msra.mxu1 %v4708_v12  ;;  %v4804_v12 = vld [vmem:[%s6407_s1 + $0x564] ss:$8 sps:$4 sm:$0xff]  }
 0x124   :  { %3470 = vmatpush1.bf16.msra.mxu0 %v4711_v13  ;;  %3114 = vmatprep.subr.bf16.mxu1 %v4716_v14  ;;  %v4807_v13 = vld [vmem:[%s6407_s1 + $0xc64] ss:$8 sps:$4 sm:$0xff]   ;;  %v4802_v14 = vld [vmem:[%s6407_s1 + $0x560] ss:$8 sps:$4 sm:$0xff]  }
 0x125   :  { %3471 = vmatprep.subr.bf16.mxu0 %v4719_v15  ;;  %v4805_v15 = vld [vmem:[%s6407_s1 + $0xc60] ss:$8 sps:$4 sm:$0xff]  }
 0x127   :  { %3115 = vmatpush1.bf16.msra.mxu1 %v4714_v16  ;;  %v4810_v16 = vld [vmem:[%s6407_s1 + $0x574] ss:$8 sps:$4 sm:$0xff]  }
 0x128   :  { %3472 = vmatpush1.bf16.msra.mxu0 %v4717_v17  ;;  %3116 = vmatprep.subr.bf16.mxu1 %v4722_v18  ;;  %v4813_v17 = vld [vmem:[%s6407_s1 + $0xc74] ss:$8 sps:$4 sm:$0xff]   ;;  %v4808_v18 = vld [vmem:[%s6407_s1 + $0x570] ss:$8 sps:$4 sm:$0xff]  }
 0x129   :  { %3473 = vmatprep.subr.bf16.mxu0 %v4725_v19  ;;  %v4811_v19 = vld [vmem:[%s6407_s1 + $0xc70] ss:$8 sps:$4 sm:$0xff]  }
 0x12b   :  { %3117 = vmatpush1.bf16.msra.mxu1 %v4720_v20  ;;  %v4816_v20 = vld [vmem:[%s6407_s1 + $0x584] ss:$8 sps:$4 sm:$0xff]  }
 0x12c   :  { %3474 = vmatpush1.bf16.msra.mxu0 %v4723_v21  ;;  %3118 = vmatprep.subr.bf16.mxu1 %v4728_v22  ;;  %v4819_v21 = vld [vmem:[%s6407_s1 + $0xc84] ss:$8 sps:$4 sm:$0xff]   ;;  %v4814_v22 = vld [vmem:[%s6407_s1 + $0x580] ss:$8 sps:$4 sm:$0xff]  }
 0x12d   :  { %3475 = vmatprep.subr.bf16.mxu0 %v4731_v23  ;;  %v4817_v23 = vld [vmem:[%s6407_s1 + $0xc80] ss:$8 sps:$4 sm:$0xff]  }
 0x12f   :  { %3119 = vmatpush1.bf16.msra.mxu1 %v4726_v24  ;;  %v4822_v24 = vld [vmem:[%s6407_s1 + $0x594] ss:$8 sps:$4 sm:$0xff]  }
 0x130   :  { %3476 = vmatpush1.bf16.msra.mxu0 %v4729_v25  ;;  %3120 = vmatprep.subr.bf16.mxu1 %v4734_v26  ;;  %v4825_v25 = vld [vmem:[%s6407_s1 + $0xc94] ss:$8 sps:$4 sm:$0xff]   ;;  %v4820_v26 = vld [vmem:[%s6407_s1 + $0x590] ss:$8 sps:$4 sm:$0xff]  }
 0x131   :  { %3477 = vmatprep.subr.bf16.mxu0 %v4737_v27  ;;  %v4823_v27 = vld [vmem:[%s6407_s1 + $0xc90] ss:$8 sps:$4 sm:$0xff]  }
 0x133   :  { %3121 = vmatpush1.bf16.msra.mxu1 %v4732_v28  ;;  %v4828_v28 = vld [vmem:[%s6407_s1 + $0x5a4] ss:$8 sps:$4 sm:$0xff]  }
 0x134   :  { %3478 = vmatpush1.bf16.msra.mxu0 %v4735_v29  ;;  %3122 = vmatprep.subr.bf16.mxu1 %v4740_v30  ;;  %v4831_v29 = vld [vmem:[%s6407_s1 + $0xca4] ss:$8 sps:$4 sm:$0xff]   ;;  %v4826_v30 = vld [vmem:[%s6407_s1 + $0x5a0] ss:$8 sps:$4 sm:$0xff]  }
 0x135   :  { %3479 = vmatprep.subr.bf16.mxu0 %v4743_v31  ;;  %v4829_v31 = vld [vmem:[%s6407_s1 + $0xca0] ss:$8 sps:$4 sm:$0xff]  }
 0x137   :  { %3123 = vmatpush1.bf16.msra.mxu1 %v4738_v32  ;;  %v4834_v32 = vld [vmem:[%s6407_s1 + $0x5b4] ss:$8 sps:$4 sm:$0xff]  }
 0x138   :  { %3480 = vmatpush1.bf16.msra.mxu0 %v4741_v33  ;;  %3124 = vmatprep.subr.bf16.mxu1 %v4747_v34  ;;  %v4837_v33 = vld [vmem:[%s6407_s1 + $0xcb4] ss:$8 sps:$4 sm:$0xff]   ;;  %v4832_v34 = vld [vmem:[%s6407_s1 + $0x5b0] ss:$8 sps:$4 sm:$0xff]  }
 0x139   :  { %3481 = vmatprep.subr.bf16.mxu0 %v4751_v35  ;;  %v4835_v35 = vld [vmem:[%s6407_s1 + $0xcb0] ss:$8 sps:$4 sm:$0xff]  }
 0x13b   :  { %3125 = vmatpush1.bf16.msra.mxu1 %v4745_v36  ;;  %v4840_v36 = vld [vmem:[%s6407_s1 + $0x5c4] ss:$8 sps:$4 sm:$0xff]  }
 0x13c   :  { %3482 = vmatpush1.bf16.msra.mxu0 %v4749_v37  ;;  %3126 = vmatprep.subr.bf16.mxu1 %v4756_v38  ;;  %v4843_v37 = vld [vmem:[%s6407_s1 + $0xcc4] ss:$8 sps:$4 sm:$0xff]   ;;  %v4838_v38 = vld [vmem:[%s6407_s1 + $0x5c0] ss:$8 sps:$4 sm:$0xff]  }
 0x13d   :  { %3483 = vmatprep.subr.bf16.mxu0 %v4759_v39  ;;  %v4841_v39 = vld [vmem:[%s6407_s1 + $0xcc0] ss:$8 sps:$4 sm:$0xff]  }
 0x13f   :  { %3127 = vmatpush1.bf16.msra.mxu1 %v4754_v40  ;;  %v4846_v40 = vld [vmem:[%s6407_s1 + $0x5d4] ss:$8 sps:$4 sm:$0xff]  }
 0x140   :  { %3484 = vmatpush1.bf16.msra.mxu0 %v4757_v41  ;;  %3147 = vmatprep.subr.bf16.mxu1 %v4765_v42  ;;  %v4849_v41 = vld [vmem:[%s6407_s1 + $0xcd4] ss:$8 sps:$4 sm:$0xff]   ;;  %v4844_v42 = vld [vmem:[%s6407_s1 + $0x5d0] ss:$8 sps:$4 sm:$0xff]  }
 0x141   :  { %3504 = vmatprep.subr.bf16.mxu0 %v4771_v43  ;;  %v4847_v43 = vld [vmem:[%s6407_s1 + $0xcd0] ss:$8 sps:$4 sm:$0xff]  }
 0x142   :  { %3129 = vmatmul.mubr.bf16.vlgmr.msra.gmra.mrb[0].mxu1 %v4760_v44  ;;  %v4853_v44 = vld [vmem:[%s6407_s1 + $0x5e4] ss:$8 sps:$4 sm:$0xff]  }
 0x143   :  { %3486 = vmatmul.mubr.bf16.vlgmr.msra.gmra.mrb[0].mxu0 %v4766_v45  ;;  %3148 = vmatpush1.bf16.msra.mxu1 %v4763_v48  ;;  %v4857_v45 = vld [vmem:[%s6407_s1 + $0xce4] ss:$8 sps:$4 sm:$0xff]   ;;  %v4862_v48 = vld [vmem:[%s6407_s1 + $0x5f4] ss:$8 sps:$4 sm:$0xff]  }
 0x144   :  { %3505 = vmatpush1.bf16.msra.mxu0 %v4769_v49  ;;  %3149 = vmatprep.subr.bf16.mxu1 %v4774_v50  ;;  %v4865_v49 = vld [vmem:[%s6407_s1 + $0xcf4] ss:$8 sps:$4 sm:$0xff]   ;;  %v4860_v50 = vld [vmem:[%s6407_s1 + $0x5f0] ss:$8 sps:$4 sm:$0xff]  }
 0x145   :  { %3506 = vmatprep.subr.bf16.mxu0 %v4777_v51  ;;  %3138 = vmatprep.mubr.bf16.mxu1 %v3675_v52  ;;  %v4863_v51 = vld [vmem:[%s6407_s1 + $0xcf0] ss:$8 sps:$4 sm:$0xff]   ;;  %v4871_v52 = vld [vmem:[%s6407_s1 + $0x604] ss:$8 sps:$4 sm:$0xff]  }
 0x146   :  { %3495 = vmatprep.mubr.bf16.mxu0 %v3689_v53  ;;  %v4877_v53 = vld [vmem:[%s6407_s1 + $0xd04] ss:$8 sps:$4 sm:$0xff]  }
 0x147   :  { %3150 = vmatpush1.bf16.msra.mxu1 %v4772_v54  ;;  %v4866_v54 = vld [vmem:[%s6408_s0 + $0x28] ss:$108 sps:$4 sm:$0xff]  }
 0x148   :  { %3507 = vmatpush1.bf16.msra.mxu0 %v4775_v55  ;;  %3151 = vmatprep.subr.bf16.mxu1 %v4780_v56  ;;  %v4872_v55 = vld [vmem:[%s6408_s0 + $0x60] ss:$108 sps:$4 sm:$0xff]   ;;  %v55_v56 = vld [vmem:[%s6408_s0 + $0x138] sm:$0x11] }
 0x149   :  { %3508 = vmatprep.subr.bf16.mxu0 %v4783_v57  ;;  %v48_v57 = vld [vmem:[%s6408_s0 + $0x100] sm:$0x11] }
 0x14a   :  { %3139 = vmatmul.mubr.bf16.gmra.mrb[4].mxu1 %v3674_v58  ;;  %v4869_v58 = vld [vmem:[%s6407_s1 + $0x600] ss:$8 sps:$4 sm:$0xff]  }
 0x14b   :  { %3496 = vmatmul.mubr.bf16.gmra.mrb[4].mxu0 %v3688_v59  ;;  %3152 = vmatpush1.bf16.msra.mxu1 %v4778_v60  ;;  %v4875_v59 = vld [vmem:[%s6407_s1 + $0xd00] ss:$8 sps:$4 sm:$0xff]   ;;  %v4880_v60 = vld [vmem:[%s6407_s1 + $0x614] ss:$8 sps:$4 sm:$0xff]  }
 0x14c   :  { %3509 = vmatpush1.bf16.msra.mxu0 %v4781_v61  ;;  %3153 = vmatprep.subr.bf16.mxu1 %v4786_v62  ;;  %v4883_v61 = vld [vmem:[%s6407_s1 + $0xd14] ss:$8 sps:$4 sm:$0xff]   ;;  %v3691_v62 = vcombine.high %v55_v56, %v55_v56 }
 0x14d   :  { %3510 = vmatprep.subr.bf16.mxu0 %v4789_v63  ;;  %3179 = vmatprep.mubr.bf16.mxu1 %v4868_v0  ;;  %v3677_v63 = vcombine.high %v48_v57, %v48_v57  ;;  %v4878_v0 = vld [vmem:[%s6407_s1 + $0x610] ss:$8 sps:$4 sm:$0xff]  }
 0x14e   :  { %3536 = vmatprep.mubr.bf16.mxu0 %v4874_v1  ;;  %v4881_v1 = vld [vmem:[%s6407_s1 + $0xd10] ss:$8 sps:$4 sm:$0xff]  }
 0x14f   :  { %3154 = vmatpush1.bf16.msra.mxu1 %v4784_v2  ;;  %v4886_v2 = vld [vmem:[%s6407_s1 + $0x624] ss:$8 sps:$4 sm:$0xff]  }
 0x150   :  { %3511 = vmatpush1.bf16.msra.mxu0 %v4787_v3  ;;  %3155 = vmatprep.subr.bf16.mxu1 %v4792_v4  ;;  %v4889_v3 = vld [vmem:[%s6407_s1 + $0xd24] ss:$8 sps:$4 sm:$0xff]   ;;  %v3690_v4 = vcombine.low %v55_v56, %v55_v56 }
 0x151   :  { %3512 = vmatprep.subr.bf16.mxu0 %v4795_v5  ;;  %v3676_v5 = vcombine.low %v48_v57, %v48_v57 }
 0x153   :  { %3156 = vmatpush1.bf16.msra.mxu1 %v4790_v6  ;;  %v4884_v6 = vld [vmem:[%s6407_s1 + $0x620] ss:$8 sps:$4 sm:$0xff]  }
 0x154   :  { %3513 = vmatpush1.bf16.msra.mxu0 %v4793_v7  ;;  %3157 = vmatprep.subr.bf16.mxu1 %v4798_v8  ;;  %v4887_v7 = vld [vmem:[%s6407_s1 + $0xd20] ss:$8 sps:$4 sm:$0xff]   ;;  %v4892_v8 = vld [vmem:[%s6407_s1 + $0x634] ss:$8 sps:$4 sm:$0xff]  }
 0x155   :  { %3514 = vmatprep.subr.bf16.mxu0 %v4801_v9  ;;  %v4895_v9 = vld [vmem:[%s6407_s1 + $0xd34] ss:$8 sps:$4 sm:$0xff]  }
 0x157   :  { %3158 = vmatpush1.bf16.msra.mxu1 %v4796_v10  ;;  %v4952_v10 = vld [vmem:[%s6408_s0 + $0x34] ss:$108 sps:$4 sm:$0xff]  }
 0x158   :  { %3515 = vmatpush1.bf16.msra.mxu0 %v4799_v11  ;;  %3159 = vmatprep.subr.bf16.mxu1 %v4804_v12  ;;  %v4890_v11 = vld [vmem:[%s6407_s1 + $0x630] ss:$8 sps:$4 sm:$0xff]  }
 0x159   :  { %3516 = vmatprep.subr.bf16.mxu0 %v4807_v13  ;;  %v4893_v12 = vld [vmem:[%s6407_s1 + $0xd30] ss:$8 sps:$4 sm:$0xff]   ;;  %v4898_v13 = vld [vmem:[%s6407_s1 + $0x644] ss:$8 sps:$4 sm:$0xff]  }
 0x15b   :  { %3160 = vmatpush1.bf16.msra.mxu1 %v4802_v14  ;;  %v4901_v14 = vld [vmem:[%s6407_s1 + $0xd44] ss:$8 sps:$4 sm:$0xff]  }
 0x15c   :  { %3517 = vmatpush1.bf16.msra.mxu0 %v4805_v15  ;;  %3161 = vmatprep.subr.bf16.mxu1 %v4810_v16  ;;  %v4955_v15 = vmov 0   ;;  %v4896_v16 = vld [vmem:[%s6407_s1 + $0x640] ss:$8 sps:$4 sm:$0xff]  }
 0x15d   :  { %3518 = vmatprep.subr.bf16.mxu0 %v4813_v17  ;;  %v4899_v17 = vld [vmem:[%s6407_s1 + $0xd40] ss:$8 sps:$4 sm:$0xff]  }
 0x15f   :  { %3162 = vmatpush1.bf16.msra.mxu1 %v4808_v18  ;;  %v4904_v18 = vld [vmem:[%s6407_s1 + $0x654] ss:$8 sps:$4 sm:$0xff]  }
 0x160   :  { %3519 = vmatpush1.bf16.msra.mxu0 %v4811_v19  ;;  %3163 = vmatprep.subr.bf16.mxu1 %v4816_v20  ;;  %v4907_v19 = vld [vmem:[%s6407_s1 + $0xd54] ss:$8 sps:$4 sm:$0xff]   ;;  %v4902_v20 = vld [vmem:[%s6407_s1 + $0x650] ss:$8 sps:$4 sm:$0xff]  }
 0x161   :  { %3520 = vmatprep.subr.bf16.mxu0 %v4819_v21  ;;  %v4905_v21 = vld [vmem:[%s6407_s1 + $0xd50] ss:$8 sps:$4 sm:$0xff]  }
 0x163   :  { %3164 = vmatpush1.bf16.msra.mxu1 %v4814_v22  ;;  %v4911_v22 = vld [vmem:[%s6407_s1 + $0x664] ss:$8 sps:$4 sm:$0xff]  }
 0x164   :  { %3521 = vmatpush1.bf16.msra.mxu0 %v4817_v23  ;;  %3165 = vmatprep.subr.bf16.mxu1 %v4822_v24  ;;  %v4915_v23 = vld [vmem:[%s6407_s1 + $0xd64] ss:$8 sps:$4 sm:$0xff]   ;;  %v4909_v24 = vld [vmem:[%s6407_s1 + $0x660] ss:$8 sps:$4 sm:$0xff]  }
 0x165   :  { %3522 = vmatprep.subr.bf16.mxu0 %v4825_v25  ;;  %v4913_v25 = vld [vmem:[%s6407_s1 + $0xd60] ss:$8 sps:$4 sm:$0xff]  }
 0x167   :  { %3166 = vmatpush1.bf16.msra.mxu1 %v4820_v26  ;;  %v4918_v26 = vld [vmem:[%s6407_s1 + $0x674] ss:$8 sps:$4 sm:$0xff]  }
 0x168   :  { %3523 = vmatpush1.bf16.msra.mxu0 %v4823_v27  ;;  %3167 = vmatprep.subr.bf16.mxu1 %v4828_v28  ;;  %v4921_v27 = vld [vmem:[%s6407_s1 + $0xd74] ss:$8 sps:$4 sm:$0xff]   ;;  %v4916_v28 = vld [vmem:[%s6407_s1 + $0x670] ss:$8 sps:$4 sm:$0xff]  }
 0x169   :  { %3524 = vmatprep.subr.bf16.mxu0 %v4831_v29  ;;  %v4919_v29 = vld [vmem:[%s6407_s1 + $0xd70] ss:$8 sps:$4 sm:$0xff]  }
 0x16b   :  { %3168 = vmatpush1.bf16.msra.mxu1 %v4826_v30  ;;  %v4924_v30 = vld [vmem:[%s6407_s1 + $0x684] ss:$8 sps:$4 sm:$0xff]  }
 0x16c   :  { %3525 = vmatpush1.bf16.msra.mxu0 %v4829_v31  ;;  %3169 = vmatprep.subr.bf16.mxu1 %v4834_v32  ;;  %v4925_v31 = vld [vmem:[%s6408_s0 + $0x68] ss:$108 sps:$4 sm:$0xff]  }
 0x16d   :  { %3526 = vmatprep.subr.bf16.mxu0 %v4837_v33  ;;  %v4922_v32 = vld [vmem:[%s6407_s1 + $0x680] ss:$8 sps:$4 sm:$0xff]   ;;  %v4928_v33 = vld [vmem:[%s6407_s1 + $0x694] ss:$8 sps:$4 sm:$0xff]  }
 0x16f   :  { %3170 = vmatpush1.bf16.msra.mxu1 %v4832_v34  ;;  %v4926_v34 = vld [vmem:[%s6407_s1 + $0x690] ss:$8 sps:$4 sm:$0xff]  }
 0x170   :  { %3527 = vmatpush1.bf16.msra.mxu0 %v4835_v35  ;;  %3171 = vmatprep.subr.bf16.mxu1 %v4840_v36  ;;  %v4931_v35 = vld [vmem:[%s6407_s1 + $0x6a4] ss:$8 sps:$4 sm:$0xff]   ;;  %v4932_v36 = vld [vmem:[%s6408_s0 + $0x140] ss:$0 sps:$4 sm:$0x11]  }
 0x171   :  { %3528 = vmatprep.subr.bf16.mxu0 %v4843_v37  ;;  %v4929_v37 = vld [vmem:[%s6407_s1 + $0x6a0] ss:$8 sps:$4 sm:$0xff]  }
 0x173   :  { %3172 = vmatpush1.bf16.msra.mxu1 %v4838_v38  ;;  %v4935_v38 = vld [vmem:[%s6407_s1 + $0x6b4] ss:$8 sps:$4 sm:$0xff]  }
 0x174   :  { %3529 = vmatpush1.bf16.msra.mxu0 %v4841_v39  ;;  %3173 = vmatprep.subr.bf16.mxu1 %v4846_v40  ;;  %v4933_v39 = vld [vmem:[%s6407_s1 + $0x6b0] ss:$8 sps:$4 sm:$0xff]   ;;  %v4938_v40 = vld [vmem:[%s6407_s1 + $0x6c4] ss:$8 sps:$4 sm:$0xff]  }
 0x175   :  { %3530 = vmatprep.subr.bf16.mxu0 %v4849_v41  ;;  %v4936_v41 = vld [vmem:[%s6407_s1 + $0x6c0] ss:$8 sps:$4 sm:$0xff]  }
 0x177   :  { %3174 = vmatpush1.bf16.msra.mxu1 %v4844_v42  ;;  %v4941_v42 = vld [vmem:[%s6407_s1 + $0x6d4] ss:$8 sps:$4 sm:$0xff]  }
 0x178   :  { %3531 = vmatpush1.bf16.msra.mxu0 %v4847_v43  ;;  %3175 = vmatprep.subr.bf16.mxu1 %v4853_v44  ;;  %v4939_v43 = vld [vmem:[%s6407_s1 + $0x6d0] ss:$8 sps:$4 sm:$0xff]   ;;  %v4946_v44 = vld [vmem:[%s6407_s1 + $0x6e4] ss:$8 sps:$4 sm:$0xff]  }
 0x179   :  { %3532 = vmatprep.subr.bf16.mxu0 %v4857_v45  ;;  %v4944_v45 = vld [vmem:[%s6407_s1 + $0x6e0] ss:$8 sps:$4 sm:$0xff]  }
 0x17b   :  { %3176 = vmatpush1.bf16.msra.mxu1 %v4851_v46  ;;  %v4949_v46 = vld [vmem:[%s6407_s1 + $0x6f4] ss:$8 sps:$4 sm:$0xff]  }
 0x17c   :  { %3533 = vmatpush1.bf16.msra.mxu0 %v4855_v47  ;;  %3177 = vmatprep.subr.bf16.mxu1 %v4862_v48  ;;  %v4947_v47 = vld [vmem:[%s6407_s1 + $0x6f0] ss:$8 sps:$4 sm:$0xff]   ;;  %v49_v48 = vld [vmem:[%s6408_s0 + $0x108] sm:$0x11] }
 0x17d   :  { %3534 = vmatprep.subr.bf16.mxu0 %v4865_v49  ;;  %v4950_v49 = vld [vmem:[%s6408_s0 + $0x30] ss:$108 sps:$4 sm:$0xff]  }
 0x17f   :  { %3178 = vmatpush1.bf16.msra.mxu1 %v4860_v50  ;;  %v3679_v50 = vcombine.high %v49_v48, %v49_v48 }
 0x180   :  { %3535 = vmatpush1.bf16.msra.mxu0 %v4863_v51  ;;  %3198 = vmatprep.subr.bf16.mxu1 %v4871_v52  ;;  %v3678_v51 = vcombine.low %v49_v48, %v49_v48 }
 0x181   :  { %3555 = vmatprep.subr.bf16.mxu0 %v4877_v53 }
 0x182   :  { %3180 = vmatmul.mubr.bf16.vlgmr.msra.gmra.mrb[0].mxu1 %v4866_v54 }
 0x183   :  { %3537 = vmatmul.mubr.bf16.vlgmr.msra.gmra.mrb[0].mxu0 %v4872_v55  ;;  %3199 = vmatpush1.bf16.msra.mxu1 %v4869_v58 }
 0x184   :  { %3556 = vmatpush1.bf16.msra.mxu0 %v4875_v59  ;;  %3200 = vmatprep.subr.bf16.mxu1 %v4880_v60  ;;  %v491_v60 = vlaneseq }
 0x185   :  { %3557 = vmatprep.subr.bf16.mxu0 %v4883_v61  ;;  %3546 = vmatprep.mubr.bf16.mxu0 %v3691_v62 }
 0x186   :  { %3189 = vmatprep.mubr.bf16.mxu1 %v3677_v63  ;;  %v492_v61 = vshrl.u32 %v491_v60, 7  ;;  %v489_v63 = vld [vmem:[%s6409_s2] sm:$0x3] }
 0x187   :  { %3201 = vmatpush1.bf16.msra.mxu1 %v4878_v0 }
 0x188   :  { %3558 = vmatpush1.bf16.msra.mxu0 %v4881_v1  ;;  %3202 = vmatprep.subr.bf16.mxu1 %v4886_v2  ;;  %v493_v62 = vsub.s32 0, %v492_v61  ;;  %v497_v0 = vsub.s32 1, %v492_v61 }
 0x189   :  { %3559 = vmatprep.subr.bf16.mxu0 %v4889_v3 }
 0x18a   :  { %3190 = vmatmul.mubr.bf16.gmra.mrb[4].mxu1 %v3676_v5  ;;  %v494_v1 = vrot.slane %v489_v63, %v493_v62  ;;  %v498_v2 = vrot.slane %v489_v63, %v497_v0 }
 0x18b   :  { %3547 = vmatmul.mubr.bf16.gmra.mrb[4].mxu0 %v3690_v4  ;;  %3203 = vmatpush1.bf16.msra.mxu1 %v4884_v6 }
 0x18c   :  { %3560 = vmatpush1.bf16.msra.mxu0 %v4887_v7  ;;  %3204 = vmatprep.subr.bf16.mxu1 %v4892_v8 }
 0x18d   :  { %3561 = vmatprep.subr.bf16.mxu0 %v4895_v9  ;;  %3587 = vmatprep.mubr.bf16.mxu0 %v4955_v15 }
 0x18e   :  { %3230 = vmatprep.mubr.bf16.mxu1 %v4952_v10 }
 0x18f   :  { %3205 = vmatpush1.bf16.msra.mxu1 %v4890_v11 }
 0x190   :  { %3562 = vmatpush1.bf16.msra.mxu0 %v4893_v12  ;;  %3206 = vmatprep.subr.bf16.mxu1 %v4898_v13 }
 0x191   :  { %3563 = vmatprep.subr.bf16.mxu0 %v4901_v14 }
 0x193   :  { %3207 = vmatpush1.bf16.msra.mxu1 %v4896_v16 }
 0x194   :  { %3564 = vmatpush1.bf16.msra.mxu0 %v4899_v17  ;;  %3208 = vmatprep.subr.bf16.mxu1 %v4904_v18 }
 0x195   :  { %3565 = vmatprep.subr.bf16.mxu0 %v4907_v19 }
 0x197   :  { %3209 = vmatpush1.bf16.msra.mxu1 %v4902_v20 }
 0x198   :  { %3566 = vmatpush1.bf16.msra.mxu0 %v4905_v21  ;;  %3210 = vmatprep.subr.bf16.mxu1 %v4911_v22 }
 0x199   :  { %3567 = vmatprep.subr.bf16.mxu0 %v4915_v23 }
 0x19b   :  { %3211 = vmatpush1.bf16.msra.mxu1 %v4909_v24 }
 0x19c   :  { %3568 = vmatpush1.bf16.msra.mxu0 %v4913_v25  ;;  %3212 = vmatprep.subr.bf16.mxu1 %v4918_v26 }
 0x19d   :  { %3569 = vmatprep.subr.bf16.mxu0 %v4921_v27 }
 0x19f   :  { %3213 = vmatpush1.bf16.msra.mxu1 %v4916_v28 }
 0x1a0   :  { %3570 = vmatpush1.bf16.msra.mxu0 %v4919_v29  ;;  %3214 = vmatprep.subr.bf16.mxu1 %v4924_v30 }
 0x1a3   :  { %3588 = vmatmul.mubr.bf16.vlgmr.msra.gmra.mrb[0].mxu0 %v4925_v31  ;;  %3215 = vmatpush1.bf16.msra.mxu1 %v4922_v32 }
 0x1a4   :  { %3597 = vmatprep.mubr.bf16.mxu0 %v4955_v15  ;;  %3216 = vmatprep.subr.bf16.mxu1 %v4928_v33 }
 0x1a7   :  { %3217 = vmatpush1.bf16.msra.mxu1 %v4926_v34 }
 0x1a8   :  { %3218 = vmatprep.subr.bf16.mxu1 %v4931_v35 }
 0x1ab   :  { %3598 = vmatmul.mubr.bf16.gmra.mrb[4].mxu0 %v4932_v36  ;;  %3219 = vmatpush1.bf16.msra.mxu1 %v4929_v37 }
 0x1ac   :  { %3220 = vmatprep.subr.bf16.mxu1 %v4935_v38 }
 0x1af   :  { %3221 = vmatpush1.bf16.msra.mxu1 %v4933_v39 }
 0x1b0   :  { %3222 = vmatprep.subr.bf16.mxu1 %v4938_v40 }
 0x1b3   :  { %3223 = vmatpush1.bf16.msra.mxu1 %v4936_v41 }
 0x1b4   :  { %3224 = vmatprep.subr.bf16.mxu1 %v4941_v42 }
 0x1b7   :  { %3225 = vmatpush1.bf16.msra.mxu1 %v4939_v43 }
 0x1b8   :  { %3226 = vmatprep.subr.bf16.mxu1 %v4946_v44 }
 0x1bb   :  { %3227 = vmatpush1.bf16.msra.mxu1 %v4944_v45 }
 0x1bc   :  { %3228 = vmatprep.subr.bf16.mxu1 %v4949_v46 }
 0x1bf   :  { %3229 = vmatpush1.bf16.msra.mxu1 %v4947_v47 }
 0x1c2   :  { %3231 = vmatmul.mubr.bf16.vlgmr.msra.gmra.mrb[0].mxu1 %v4950_v49 }
 0x1c3   :  { %3240 = vmatprep.mubr.bf16.mxu1 %v3679_v50 }
 0x1ca   :  { %3241 = vmatmul.mubr.bf16.gmra.mrb[4].mxu1 %v3678_v51 }
 0x276   :  { %v3589_v52 = vpop.f32.mrb[0].mxu0 }
 0x277   :  { %v3591_v53 = vpop.f32.mrb[1].mxu0 }
 0x278   :  { %v3593_v54 = vpop.f32.mrb[2].mxu0 }
 0x279   :  { %v3595_v55 = vpop.f32.mrb[3].mxu0 }
 0x27e   :  { %v3599_v56 = vpop.f32.mrb[4].mxu0 }
 0x27f   :  { %v3601_v57 = vpop.f32.mrb[5].mxu0 }
 0x280   :  { %v3603_v58 = vpop.f32.mrb[6].mxu0 }
 0x281   :  { %v3604_v59 = vpop.f32.mrb[7].mxu0 }
 0x295   :  { %v3232_v3 = vpop.f32.mrb[0].mxu1 }
 0x296   :  { %v4131_v4 = vadd.f32 %v3232_v3, %v494_v1  ;;  %v3234_v5 = vpop.f32.mrb[1].mxu1 }
 0x297   :  { %v4133_v6 = vadd.f32 %v3234_v5, %v498_v2  ;;  %v3236_v7 = vpop.f32.mrb[2].mxu1 }
 0x298   :  { %v4132_v8 = vadd.f32 %v4131_v4, %v3589_v52  ;;  %v4135_v9 = vadd.f32 %v3236_v7, %v494_v1  ;;  %v3238_v10 = vpop.f32.mrb[3].mxu1 }
 0x299   :  { %v4134_v11 = vadd.f32 %v4133_v6, %v3591_v53  ;;  %v4137_v12 = vadd.f32 %v3238_v10, %v498_v2 }
 0x29a   :  { %v3606_v13 = vmax.f32 %v4132_v8, 0.0  ;;  %v4136_v14 = vadd.f32 %v4135_v9, %v3593_v54 }
 0x29b   :  { %v3607_v15 = vmax.f32 %v4134_v11, 0.0  ;;  %v4138_v16 = vadd.f32 %v4137_v12, %v3595_v55 }
 0x29c   :  { %v3608_v17 = vmax.f32 %v4136_v14, 0.0 }
 0x29d   :  { %v4128_v18 = vpack.c.bf16 %v3607_v15, %v3606_v13  ;;  %v3609_v19 = vmax.f32 %v4138_v16, 0.0  ;;  %v3242_v20 = vpop.f32.mrb[4].mxu1 }
 0x29e   :  { %v4139_v21 = vadd.f32 %v3242_v20, %v494_v1  ;;  %v3244_v22 = vpop.f32.mrb[5].mxu1 }
 0x29f   :  { %3632 = vst [vmem:[%s6410_s3] sm:$0xff] %v4128_v18  ;;  %v4129_v23 = vpack.c.bf16 %v3609_v19, %v3608_v17  ;;  %v4141_v24 = vadd.f32 %v3244_v22, %v498_v2  ;;  %v3246_v25 = vpop.f32.mrb[6].mxu1 }
 0x2a0   :  { %v4140_v26 = vadd.f32 %v4139_v21, %v3599_v56  ;;  %v3247_v27 = vpop.f32.mrb[7].mxu1 }
 0x2a1   :  { %3633 = vst [vmem:[%s6410_s3 + $0x8] sm:$0xff] %v4129_v23  ;;  %v4142_v28 = vadd.f32 %v4141_v24, %v3601_v57 }
 0x2a2   :  { %v3610_v29 = vmax.f32 %v4140_v26, 0.0 }
 0x2a3   :  { %v3611_v30 = vmax.f32 %v4142_v28, 0.0 }
 0x2a5   :  { %v4130_v31 = vpack.c.bf16 %v3611_v30, %v3610_v29 }
 0x2a7   :  { %3634 = vst [vmem:[%s6410_s3 + $0x10] sm:$0x11] %v4130_v31 }

// kernel: finetuner_forward.9
= control target key start
LH: loop header
LB: loop body
LE: loop exit
PB: predicated region body
PF: predicated region fallthrough
CT: control target
= control target key end

     0   :  { %s4314_s1 = inlined_call_operand.vmem [shape: bf16[2304,256], index: 1, kind: input, shape index: {}]   ;;  %s4315_s0 = inlined_call_operand.vmem [shape: bf16[18,2304], index: 0, kind: input, shape index: {}]   ;;  %s4316_s2 = inlined_call_operand.vmem [shape: f32[1,256], index: 2, kind: input, shape index: {}]   ;;  %s4317_s3 = inlined_call_operand.vmem [shape: bf16[18,256], index: 3, kind: output, shape index: {}]  }
   0x1   :  { %v2854_v0 = vld [vmem:[%s4314_s1 + $0x4] ss:$8 sps:$4 sm:$0xff]   ;;  %v2858_v2 = vld [vmem:[%s4314_s1] ss:$8 sps:$4 sm:$0xff]   ;;  %v2860_v4 = vld [vmem:[%s4314_s1 + $0x14] ss:$8 sps:$4 sm:$0xff]  }
   0x2   :  { %v2856_v1 = vld [vmem:[%s4314_s1 + $0x404] ss:$8 sps:$4 sm:$0xff]   ;;  %1934 = vmatprep.subr.bf16.mxu1 %v2854_v0  ;;  %v2859_v3 = vld [vmem:[%s4314_s1 + $0x400] ss:$8 sps:$4 sm:$0xff]   ;;  %v2862_v5 = vld [vmem:[%s4314_s1 + $0x414] ss:$8 sps:$4 sm:$0xff]  }
   0x3   :  { %2138 = vmatprep.subr.bf16.mxu0 %v2856_v1  ;;  %1935 = vmatpush1.bf16.msra.mxu1 %v2858_v2  ;;  %v2864_v6 = vld [vmem:[%s4314_s1 + $0x10] ss:$8 sps:$4 sm:$0xff]   ;;  %v2866_v8 = vld [vmem:[%s4314_s1 + $0x24] ss:$8 sps:$4 sm:$0xff]   ;;  %v2870_v10 = vld [vmem:[%s4314_s1 + $0x20] ss:$8 sps:$4 sm:$0xff]  }
   0x4   :  { %2139 = vmatpush1.bf16.msra.mxu0 %v2859_v3  ;;  %1936 = vmatprep.subr.bf16.mxu1 %v2860_v4  ;;  %v2865_v7 = vld [vmem:[%s4314_s1 + $0x410] ss:$8 sps:$4 sm:$0xff]   ;;  %v2868_v9 = vld [vmem:[%s4314_s1 + $0x424] ss:$8 sps:$4 sm:$0xff]   ;;  %v2871_v11 = vld [vmem:[%s4314_s1 + $0x420] ss:$8 sps:$4 sm:$0xff]  }
   0x5   :  { %2140 = vmatprep.subr.bf16.mxu0 %v2862_v5  ;;  %v2872_v12 = vld [vmem:[%s4314_s1 + $0x34] ss:$8 sps:$4 sm:$0xff]   ;;  %v2876_v14 = vld [vmem:[%s4314_s1 + $0x30] ss:$8 sps:$4 sm:$0xff]   ;;  %v2878_v16 = vld [vmem:[%s4314_s1 + $0x44] ss:$8 sps:$4 sm:$0xff]  }
   0x6   :  { %v2874_v13 = vld [vmem:[%s4314_s1 + $0x434] ss:$8 sps:$4 sm:$0xff]   ;;  %v2877_v15 = vld [vmem:[%s4314_s1 + $0x430] ss:$8 sps:$4 sm:$0xff]   ;;  %v2880_v17 = vld [vmem:[%s4314_s1 + $0x444] ss:$8 sps:$4 sm:$0xff]  }
   0x7   :  { %1937 = vmatpush1.bf16.msra.mxu1 %v2864_v6  ;;  %v2882_v18 = vld [vmem:[%s4314_s1 + $0x40] ss:$8 sps:$4 sm:$0xff]   ;;  %v2884_v20 = vld [vmem:[%s4314_s1 + $0x54] ss:$8 sps:$4 sm:$0xff]   ;;  %v2888_v22 = vld [vmem:[%s4314_s1 + $0x50] ss:$8 sps:$4 sm:$0xff]  }
   0x8   :  { %2141 = vmatpush1.bf16.msra.mxu0 %v2865_v7  ;;  %1938 = vmatprep.subr.bf16.mxu1 %v2866_v8  ;;  %v2883_v19 = vld [vmem:[%s4314_s1 + $0x440] ss:$8 sps:$4 sm:$0xff]   ;;  %v2886_v21 = vld [vmem:[%s4314_s1 + $0x454] ss:$8 sps:$4 sm:$0xff]   ;;  %v2889_v23 = vld [vmem:[%s4314_s1 + $0x450] ss:$8 sps:$4 sm:$0xff]  }
   0x9   :  { %2142 = vmatprep.subr.bf16.mxu0 %v2868_v9  ;;  %v2890_v24 = vld [vmem:[%s4314_s1 + $0x64] ss:$8 sps:$4 sm:$0xff]   ;;  %v2894_v26 = vld [vmem:[%s4314_s1 + $0x60] ss:$8 sps:$4 sm:$0xff]   ;;  %v2896_v28 = vld [vmem:[%s4314_s1 + $0x74] ss:$8 sps:$4 sm:$0xff]  }
   0xa   :  { %v2892_v25 = vld [vmem:[%s4314_s1 + $0x464] ss:$8 sps:$4 sm:$0xff]   ;;  %v2895_v27 = vld [vmem:[%s4314_s1 + $0x460] ss:$8 sps:$4 sm:$0xff]   ;;  %v2898_v29 = vld [vmem:[%s4314_s1 + $0x474] ss:$8 sps:$4 sm:$0xff]  }
   0xb   :  { %1939 = vmatpush1.bf16.msra.mxu1 %v2870_v10  ;;  %v2900_v30 = vld [vmem:[%s4314_s1 + $0x70] ss:$8 sps:$4 sm:$0xff]   ;;  %v2902_v32 = vld [vmem:[%s4314_s1 + $0x84] ss:$8 sps:$4 sm:$0xff]   ;;  %v2906_v34 = vld [vmem:[%s4314_s1 + $0x80] ss:$8 sps:$4 sm:$0xff]  }
   0xc   :  { %2143 = vmatpush1.bf16.msra.mxu0 %v2871_v11  ;;  %1940 = vmatprep.subr.bf16.mxu1 %v2872_v12  ;;  %v2901_v31 = vld [vmem:[%s4314_s1 + $0x470] ss:$8 sps:$4 sm:$0xff]   ;;  %v2904_v33 = vld [vmem:[%s4314_s1 + $0x484] ss:$8 sps:$4 sm:$0xff]   ;;  %v2907_v35 = vld [vmem:[%s4314_s1 + $0x480] ss:$8 sps:$4 sm:$0xff]  }
   0xd   :  { %2144 = vmatprep.subr.bf16.mxu0 %v2874_v13  ;;  %v2908_v36 = vld [vmem:[%s4314_s1 + $0x94] ss:$8 sps:$4 sm:$0xff]   ;;  %v2912_v38 = vld [vmem:[%s4314_s1 + $0x90] ss:$8 sps:$4 sm:$0xff]   ;;  %v2914_v40 = vld [vmem:[%s4314_s1 + $0xa4] ss:$8 sps:$4 sm:$0xff]  }
   0xe   :  { %v2910_v37 = vld [vmem:[%s4314_s1 + $0x494] ss:$8 sps:$4 sm:$0xff]   ;;  %v2913_v39 = vld [vmem:[%s4314_s1 + $0x490] ss:$8 sps:$4 sm:$0xff]   ;;  %v2916_v41 = vld [vmem:[%s4314_s1 + $0x4a4] ss:$8 sps:$4 sm:$0xff]  }
   0xf   :  { %1941 = vmatpush1.bf16.msra.mxu1 %v2876_v14  ;;  %v2918_v42 = vld [vmem:[%s4314_s1 + $0xa0] ss:$8 sps:$4 sm:$0xff]   ;;  %v2920_v44 = vld [vmem:[%s4314_s1 + $0xb4] ss:$8 sps:$4 sm:$0xff]   ;;  %v2924_v46 = vld [vmem:[%s4314_s1 + $0xb0] ss:$8 sps:$4 sm:$0xff]  }
  0x10   :  { %2145 = vmatpush1.bf16.msra.mxu0 %v2877_v15  ;;  %1942 = vmatprep.subr.bf16.mxu1 %v2878_v16  ;;  %v2919_v43 = vld [vmem:[%s4314_s1 + $0x4a0] ss:$8 sps:$4 sm:$0xff]   ;;  %v2922_v45 = vld [vmem:[%s4314_s1 + $0x4b4] ss:$8 sps:$4 sm:$0xff]   ;;  %v2925_v47 = vld [vmem:[%s4314_s1 + $0x4b0] ss:$8 sps:$4 sm:$0xff]  }
  0x11   :  { %2146 = vmatprep.subr.bf16.mxu0 %v2880_v17  ;;  %v2952_v48 = vld [vmem:[%s4315_s0 + $0x4] ss:$72 sps:$4 sm:$0xff]   ;;  %v2930_v52 = vld [vmem:[%s4314_s1 + $0xc0] ss:$8 sps:$4 sm:$0xff]   ;;  %v2932_v54 = vld [vmem:[%s4314_s1 + $0xd4] ss:$8 sps:$4 sm:$0xff]  }
  0x12   :  { %v2926_v49 = vld [vmem:[%s4314_s1 + $0xc4] ss:$8 sps:$4 sm:$0xff]   ;;  %1966 = vmatprep.mubr.bf16.mxu1 %v2952_v48  ;;  %v2931_v53 = vld [vmem:[%s4314_s1 + $0x4c0] ss:$8 sps:$4 sm:$0xff]   ;;  %v2934_v55 = vld [vmem:[%s4314_s1 + $0x4d4] ss:$8 sps:$4 sm:$0xff]  }
  0x13   :  { %1943 = vmatpush1.bf16.msra.mxu1 %v2882_v18  ;;  %v2928_v50 = vld [vmem:[%s4314_s1 + $0x4c4] ss:$8 sps:$4 sm:$0xff]   ;;  %v2936_v56 = vld [vmem:[%s4314_s1 + $0xd0] ss:$8 sps:$4 sm:$0xff]   ;;  %v2942_v60 = vld [vmem:[%s4314_s1 + $0xe0] ss:$8 sps:$4 sm:$0xff]  }
  0x14   :  { %2147 = vmatpush1.bf16.msra.mxu0 %v2883_v19  ;;  %1944 = vmatprep.subr.bf16.mxu1 %v2884_v20  ;;  %v2958_v51 = vld [vmem:[%s4315_s0 + $0x24] ss:$72 sps:$4 sm:$0xff]   ;;  %v2937_v57 = vld [vmem:[%s4314_s1 + $0x4d0] ss:$8 sps:$4 sm:$0xff]   ;;  %v2943_v61 = vld [vmem:[%s4314_s1 + $0x4e0] ss:$8 sps:$4 sm:$0xff]  }
  0x15   :  { %2148 = vmatprep.subr.bf16.mxu0 %v2886_v21  ;;  %2170 = vmatprep.mubr.bf16.mxu0 %v2958_v51  ;;  %v2938_v58 = vld [vmem:[%s4314_s1 + $0xe4] ss:$8 sps:$4 sm:$0xff]   ;;  %v2944_v62 = vld [vmem:[%s4314_s1 + $0xf4] ss:$8 sps:$4 sm:$0xff]   ;;  %v2948_v0 = vld [vmem:[%s4314_s1 + $0xf0] ss:$8 sps:$4 sm:$0xff]  }
  0x16   :  { %v2940_v59 = vld [vmem:[%s4314_s1 + $0x4e4] ss:$8 sps:$4 sm:$0xff]   ;;  %v2946_v63 = vld [vmem:[%s4314_s1 + $0x4f4] ss:$8 sps:$4 sm:$0xff]   ;;  %v2949_v1 = vld [vmem:[%s4314_s1 + $0x4f0] ss:$8 sps:$4 sm:$0xff]  }
  0x17   :  { %1945 = vmatpush1.bf16.msra.mxu1 %v2888_v22  ;;  %v2955_v2 = vld [vmem:[%s4314_s1 + $0x104] ss:$8 sps:$4 sm:$0xff]   ;;  %v2950_v4 = vld [vmem:[%s4315_s0] ss:$72 sps:$4 sm:$0xff]   ;;  %v2964_v8 = vld [vmem:[%s4314_s1 + $0x114] ss:$8 sps:$4 sm:$0xff]  }
  0x18   :  { %2149 = vmatpush1.bf16.msra.mxu0 %v2889_v23  ;;  %1946 = vmatprep.subr.bf16.mxu1 %v2890_v24  ;;  %v2961_v3 = vld [vmem:[%s4314_s1 + $0x504] ss:$8 sps:$4 sm:$0xff]   ;;  %v2953_v5 = vld [vmem:[%s4314_s1 + $0x100] ss:$8 sps:$4 sm:$0xff]   ;;  %v2967_v9 = vld [vmem:[%s4314_s1 + $0x514] ss:$8 sps:$4 sm:$0xff]  }
  0x19   :  { %2150 = vmatprep.subr.bf16.mxu0 %v2892_v25  ;;  %v2956_v6 = vld [vmem:[%s4315_s0 + $0x20] ss:$72 sps:$4 sm:$0xff]   ;;  %v2962_v10 = vld [vmem:[%s4314_s1 + $0x110] ss:$8 sps:$4 sm:$0xff]   ;;  %v2970_v12 = vld [vmem:[%s4314_s1 + $0x124] ss:$8 sps:$4 sm:$0xff]  }
  0x1a   :  { %v2959_v7 = vld [vmem:[%s4314_s1 + $0x500] ss:$8 sps:$4 sm:$0xff]   ;;  %v2965_v11 = vld [vmem:[%s4314_s1 + $0x510] ss:$8 sps:$4 sm:$0xff]   ;;  %v2973_v13 = vld [vmem:[%s4314_s1 + $0x524] ss:$8 sps:$4 sm:$0xff]  }
  0x1b   :  { %1947 = vmatpush1.bf16.msra.mxu1 %v2894_v26  ;;  %v2968_v14 = vld [vmem:[%s4314_s1 + $0x120] ss:$8 sps:$4 sm:$0xff]   ;;  %v2976_v16 = vld [vmem:[%s4314_s1 + $0x134] ss:$8 sps:$4 sm:$0xff]   ;;  %v2974_v18 = vld [vmem:[%s4314_s1 + $0x130] ss:$8 sps:$4 sm:$0xff]  }
  0x1c   :  { %2151 = vmatpush1.bf16.msra.mxu0 %v2895_v27  ;;  %1948 = vmatprep.subr.bf16.mxu1 %v2896_v28  ;;  %v2971_v15 = vld [vmem:[%s4314_s1 + $0x520] ss:$8 sps:$4 sm:$0xff]   ;;  %v2979_v17 = vld [vmem:[%s4314_s1 + $0x534] ss:$8 sps:$4 sm:$0xff]   ;;  %v2977_v19 = vld [vmem:[%s4314_s1 + $0x530] ss:$8 sps:$4 sm:$0xff]  }
  0x1d   :  { %2152 = vmatprep.subr.bf16.mxu0 %v2898_v29  ;;  %v2982_v20 = vld [vmem:[%s4314_s1 + $0x144] ss:$8 sps:$4 sm:$0xff]   ;;  %v2980_v22 = vld [vmem:[%s4314_s1 + $0x140] ss:$8 sps:$4 sm:$0xff]   ;;  %v2988_v24 = vld [vmem:[%s4314_s1 + $0x154] ss:$8 sps:$4 sm:$0xff]  }
  0x1e   :  { %v2985_v21 = vld [vmem:[%s4314_s1 + $0x544] ss:$8 sps:$4 sm:$0xff]   ;;  %v2983_v23 = vld [vmem:[%s4314_s1 + $0x540] ss:$8 sps:$4 sm:$0xff]   ;;  %v2991_v25 = vld [vmem:[%s4314_s1 + $0x554] ss:$8 sps:$4 sm:$0xff]  }
  0x1f   :  { %1949 = vmatpush1.bf16.msra.mxu1 %v2900_v30  ;;  %v32_v26 = vld [vmem:[%s4315_s0 + $0x90] sm:$0x11] }
  0x20   :  { %2153 = vmatpush1.bf16.msra.mxu0 %v2901_v31  ;;  %1950 = vmatprep.subr.bf16.mxu1 %v2902_v32  ;;  %v2986_v27 = vld [vmem:[%s4314_s1 + $0x150] ss:$8 sps:$4 sm:$0xff]   ;;  %v2445_v28 = vcombine.high %v32_v26, %v32_v26  ;;  %v2444_v29 = vcombine.low %v32_v26, %v32_v26  ;;  %v2994_v32 = vld [vmem:[%s4314_s1 + $0x164] ss:$8 sps:$4 sm:$0xff]   ;;  %v3012_v48 = vld [vmem:[%s4314_s1 + $0x194] ss:$8 sps:$4 sm:$0xff]  }
  0x21   :  { %2154 = vmatprep.subr.bf16.mxu0 %v2904_v33  ;;  %v2989_v30 = vld [vmem:[%s4314_s1 + $0x550] ss:$8 sps:$4 sm:$0xff]   ;;  %v2997_v33 = vld [vmem:[%s4314_s1 + $0x564] ss:$8 sps:$4 sm:$0xff]  }
  0x22   :  { %v36_v31 = vld [vmem:[%s4315_s0 + $0xb0] sm:$0x11]  ;;  %v3076_v26 = vld [vmem:[%s4314_s1 + $0x224] ss:$8 sps:$4 sm:$0xff]  }
  0x23   :  { %1951 = vmatpush1.bf16.msra.mxu1 %v2906_v34  ;;  %v2453_v34 = vcombine.high %v36_v31, %v36_v31  ;;  %v3013_v51 = vld [vmem:[%s4314_s1 + $0x590] ss:$8 sps:$4 sm:$0xff]  }
  0x24   :  { %2155 = vmatpush1.bf16.msra.mxu0 %v2907_v35  ;;  %1952 = vmatprep.subr.bf16.mxu1 %v2908_v36  ;;  %v2452_v35 = vcombine.low %v36_v31, %v36_v31  ;;  %v2992_v36 = vld [vmem:[%s4314_s1 + $0x160] ss:$8 sps:$4 sm:$0xff]  }
  0x25   :  { %2156 = vmatprep.subr.bf16.mxu0 %v2910_v37  ;;  %v2995_v37 = vld [vmem:[%s4314_s1 + $0x560] ss:$8 sps:$4 sm:$0xff]  }
  0x27   :  { %1953 = vmatpush1.bf16.msra.mxu1 %v2912_v38  ;;  %v3000_v38 = vld [vmem:[%s4314_s1 + $0x174] ss:$8 sps:$4 sm:$0xff]  }
  0x28   :  { %2157 = vmatpush1.bf16.msra.mxu0 %v2913_v39  ;;  %1954 = vmatprep.subr.bf16.mxu1 %v2914_v40  ;;  %v3003_v39 = vld [vmem:[%s4314_s1 + $0x574] ss:$8 sps:$4 sm:$0xff]  }
  0x29   :  { %2158 = vmatprep.subr.bf16.mxu0 %v2916_v41  ;;  %v3058_v40 = vld [vmem:[%s4315_s0 + $0xc] ss:$72 sps:$4 sm:$0xff]   ;;  %v2998_v41 = vld [vmem:[%s4314_s1 + $0x170] ss:$8 sps:$4 sm:$0xff]  }
  0x2b   :  { %1955 = vmatpush1.bf16.msra.mxu1 %v2918_v42  ;;  %v3001_v42 = vld [vmem:[%s4314_s1 + $0x570] ss:$8 sps:$4 sm:$0xff]  }
  0x2c   :  { %2159 = vmatpush1.bf16.msra.mxu0 %v2919_v43  ;;  %1956 = vmatprep.subr.bf16.mxu1 %v2920_v44  ;;  %v3064_v43 = vld [vmem:[%s4315_s0 + $0x2c] ss:$72 sps:$4 sm:$0xff]  }
  0x2d   :  { %2160 = vmatprep.subr.bf16.mxu0 %v2922_v45  ;;  %v3006_v44 = vld [vmem:[%s4314_s1 + $0x184] ss:$8 sps:$4 sm:$0xff]  }
  0x2e   :  { %v3009_v45 = vld [vmem:[%s4314_s1 + $0x584] ss:$8 sps:$4 sm:$0xff]  }
  0x2f   :  { %1957 = vmatpush1.bf16.msra.mxu1 %v2924_v46  ;;  %v3004_v46 = vld [vmem:[%s4314_s1 + $0x180] ss:$8 sps:$4 sm:$0xff]  }
  0x30   :  { %2161 = vmatpush1.bf16.msra.mxu0 %v2925_v47  ;;  %1958 = vmatprep.subr.bf16.mxu1 %v2926_v49  ;;  %v3007_v47 = vld [vmem:[%s4314_s1 + $0x580] ss:$8 sps:$4 sm:$0xff]   ;;  %v3015_v49 = vld [vmem:[%s4314_s1 + $0x594] ss:$8 sps:$4 sm:$0xff]  }
  0x31   :  { %2162 = vmatprep.subr.bf16.mxu0 %v2928_v50  ;;  %v3010_v50 = vld [vmem:[%s4314_s1 + $0x190] ss:$8 sps:$4 sm:$0xff]  }
  0x33   :  { %1959 = vmatpush1.bf16.msra.mxu1 %v2930_v52  ;;  %v3018_v52 = vld [vmem:[%s4314_s1 + $0x1a4] ss:$8 sps:$4 sm:$0xff]  }
  0x34   :  { %2163 = vmatpush1.bf16.msra.mxu0 %v2931_v53  ;;  %1960 = vmatprep.subr.bf16.mxu1 %v2932_v54  ;;  %v3021_v53 = vld [vmem:[%s4314_s1 + $0x5a4] ss:$8 sps:$4 sm:$0xff]   ;;  %v3016_v54 = vld [vmem:[%s4314_s1 + $0x1a0] ss:$8 sps:$4 sm:$0xff]  }
  0x35   :  { %2164 = vmatprep.subr.bf16.mxu0 %v2934_v55  ;;  %v3019_v55 = vld [vmem:[%s4314_s1 + $0x5a0] ss:$8 sps:$4 sm:$0xff]  }
  0x37   :  { %1961 = vmatpush1.bf16.msra.mxu1 %v2936_v56  ;;  %v3024_v56 = vld [vmem:[%s4314_s1 + $0x1b4] ss:$8 sps:$4 sm:$0xff]  }
  0x38   :  { %2165 = vmatpush1.bf16.msra.mxu0 %v2937_v57  ;;  %1962 = vmatprep.subr.bf16.mxu1 %v2938_v58  ;;  %v3027_v57 = vld [vmem:[%s4314_s1 + $0x5b4] ss:$8 sps:$4 sm:$0xff]   ;;  %v3022_v58 = vld [vmem:[%s4314_s1 + $0x1b0] ss:$8 sps:$4 sm:$0xff]  }
  0x39   :  { %2166 = vmatprep.subr.bf16.mxu0 %v2940_v59  ;;  %v3025_v59 = vld [vmem:[%s4314_s1 + $0x5b0] ss:$8 sps:$4 sm:$0xff]  }
  0x3b   :  { %1963 = vmatpush1.bf16.msra.mxu1 %v2942_v60  ;;  %v3030_v60 = vld [vmem:[%s4314_s1 + $0x1c4] ss:$8 sps:$4 sm:$0xff]  }
  0x3c   :  { %2167 = vmatpush1.bf16.msra.mxu0 %v2943_v61  ;;  %1964 = vmatprep.subr.bf16.mxu1 %v2944_v62  ;;  %v3033_v61 = vld [vmem:[%s4314_s1 + $0x5c4] ss:$8 sps:$4 sm:$0xff]   ;;  %v3028_v62 = vld [vmem:[%s4314_s1 + $0x1c0] ss:$8 sps:$4 sm:$0xff]  }
  0x3d   :  { %2168 = vmatprep.subr.bf16.mxu0 %v2946_v63  ;;  %v3031_v63 = vld [vmem:[%s4314_s1 + $0x5c0] ss:$8 sps:$4 sm:$0xff]  }
  0x3f   :  { %1965 = vmatpush1.bf16.msra.mxu1 %v2948_v0  ;;  %v3036_v0 = vld [vmem:[%s4314_s1 + $0x1d4] ss:$8 sps:$4 sm:$0xff]  }
  0x40   :  { %2169 = vmatpush1.bf16.msra.mxu0 %v2949_v1  ;;  %1985 = vmatprep.subr.bf16.mxu1 %v2955_v2  ;;  %v3039_v1 = vld [vmem:[%s4314_s1 + $0x5d4] ss:$8 sps:$4 sm:$0xff]   ;;  %v3034_v2 = vld [vmem:[%s4314_s1 + $0x1d0] ss:$8 sps:$4 sm:$0xff]  }
  0x41   :  { %2189 = vmatprep.subr.bf16.mxu0 %v2961_v3  ;;  %v3037_v3 = vld [vmem:[%s4314_s1 + $0x5d0] ss:$8 sps:$4 sm:$0xff]  }
  0x42   :  { %1967 = vmatmul.mubr.bf16.vlgmr.msra.gmra.mrb[0].mxu1 %v2950_v4  ;;  %v3043_v4 = vld [vmem:[%s4314_s1 + $0x1e4] ss:$8 sps:$4 sm:$0xff]  }
  0x43   :  { %2171 = vmatmul.mubr.bf16.vlgmr.msra.gmra.mrb[0].mxu0 %v2956_v6  ;;  %1986 = vmatpush1.bf16.msra.mxu1 %v2953_v5  ;;  %v3047_v5 = vld [vmem:[%s4314_s1 + $0x5e4] ss:$8 sps:$4 sm:$0xff]   ;;  %v3041_v6 = vld [vmem:[%s4314_s1 + $0x1e0] ss:$8 sps:$4 sm:$0xff]  }
  0x44   :  { %2190 = vmatpush1.bf16.msra.mxu0 %v2959_v7  ;;  %1987 = vmatprep.subr.bf16.mxu1 %v2964_v8  ;;  %v3045_v7 = vld [vmem:[%s4314_s1 + $0x5e0] ss:$8 sps:$4 sm:$0xff]   ;;  %v3052_v8 = vld [vmem:[%s4314_s1 + $0x1f4] ss:$8 sps:$4 sm:$0xff]  }
  0x45   :  { %2191 = vmatprep.subr.bf16.mxu0 %v2967_v9  ;;  %1976 = vmatprep.mubr.bf16.mxu1 %v2445_v28  ;;  %v3055_v9 = vld [vmem:[%s4314_s1 + $0x5f4] ss:$8 sps:$4 sm:$0xff]   ;;  %v3074_v28 = vld [vmem:[%s4314_s1 + $0x220] ss:$8 sps:$4 sm:$0xff]  }
  0x46   :  { %2180 = vmatprep.mubr.bf16.mxu0 %v2453_v34  ;;  %v3164_v34 = vld [vmem:[%s4315_s0 + $0x14] ss:$72 sps:$4 sm:$0xff]  }
  0x47   :  { %1988 = vmatpush1.bf16.msra.mxu1 %v2962_v10  ;;  %v3050_v10 = vld [vmem:[%s4314_s1 + $0x1f0] ss:$8 sps:$4 sm:$0xff]  }
  0x48   :  { %2192 = vmatpush1.bf16.msra.mxu0 %v2965_v11  ;;  %1989 = vmatprep.subr.bf16.mxu1 %v2970_v12  ;;  %v3053_v11 = vld [vmem:[%s4314_s1 + $0x5f0] ss:$8 sps:$4 sm:$0xff]  }
  0x49   :  { %2193 = vmatprep.subr.bf16.mxu0 %v2973_v13  ;;  %v3056_v12 = vld [vmem:[%s4315_s0 + $0x8] ss:$72 sps:$4 sm:$0xff]   ;;  %v3061_v13 = vld [vmem:[%s4314_s1 + $0x204] ss:$8 sps:$4 sm:$0xff]  }
  0x4a   :  { %1977 = vmatmul.mubr.bf16.gmra.mrb[4].mxu1 %v2444_v29  ;;  %v3077_v29 = vld [vmem:[%s4314_s1 + $0x620] ss:$8 sps:$4 sm:$0xff]  }
  0x4b   :  { %1990 = vmatpush1.bf16.msra.mxu1 %v2968_v14  ;;  %2181 = vmatmul.mubr.bf16.gmra.mrb[4].mxu0 %v2452_v35  ;;  %v3067_v14 = vld [vmem:[%s4314_s1 + $0x604] ss:$8 sps:$4 sm:$0xff]   ;;  %v3170_v35 = vld [vmem:[%s4315_s0 + $0x34] ss:$72 sps:$4 sm:$0xff]  }
  0x4c   :  { %2194 = vmatpush1.bf16.msra.mxu0 %v2971_v15  ;;  %1991 = vmatprep.subr.bf16.mxu1 %v2976_v16  ;;  %v3059_v15 = vld [vmem:[%s4314_s1 + $0x200] ss:$8 sps:$4 sm:$0xff]  }
  0x4d   :  { %2195 = vmatprep.subr.bf16.mxu0 %v2979_v17  ;;  %2017 = vmatprep.mubr.bf16.mxu1 %v3058_v40  ;;  %v3062_v16 = vld [vmem:[%s4315_s0 + $0x28] ss:$72 sps:$4 sm:$0xff]  }
  0x4e   :  { %2221 = vmatprep.mubr.bf16.mxu0 %v3064_v43  ;;  %v3065_v17 = vld [vmem:[%s4314_s1 + $0x600] ss:$8 sps:$4 sm:$0xff]   ;;  %v3097_v43 = vld [vmem:[%s4314_s1 + $0x654] ss:$8 sps:$4 sm:$0xff]  }
  0x4f   :  { %1992 = vmatpush1.bf16.msra.mxu1 %v2974_v18  ;;  %v3070_v18 = vld [vmem:[%s4314_s1 + $0x214] ss:$8 sps:$4 sm:$0xff]   ;;  %v3086_v40 = vld [vmem:[%s4314_s1 + $0x240] ss:$8 sps:$4 sm:$0xff]  }
  0x50   :  { %2196 = vmatpush1.bf16.msra.mxu0 %v2977_v19  ;;  %1993 = vmatprep.subr.bf16.mxu1 %v2982_v20  ;;  %v33_v19 = vld [vmem:[%s4315_s0 + $0x98] sm:$0x11] }
  0x51   :  { %2197 = vmatprep.subr.bf16.mxu0 %v2985_v21  ;;  %v3073_v20 = vld [vmem:[%s4314_s1 + $0x614] ss:$8 sps:$4 sm:$0xff]   ;;  %v2447_v21 = vcombine.high %v33_v19, %v33_v19 }
  0x53   :  { %1994 = vmatpush1.bf16.msra.mxu1 %v2980_v22  ;;  %v37_v22 = vld [vmem:[%s4315_s0 + $0xb8] sm:$0x11] }
  0x54   :  { %2198 = vmatpush1.bf16.msra.mxu0 %v2983_v23  ;;  %1995 = vmatprep.subr.bf16.mxu1 %v2988_v24  ;;  %v3068_v23 = vld [vmem:[%s4314_s1 + $0x210] ss:$8 sps:$4 sm:$0xff]   ;;  %v2454_v31 = vcombine.low %v37_v22, %v37_v22 }
  0x55   :  { %2199 = vmatprep.subr.bf16.mxu0 %v2991_v25  ;;  %v3071_v24 = vld [vmem:[%s4314_s1 + $0x610] ss:$8 sps:$4 sm:$0xff]   ;;  %v2455_v25 = vcombine.high %v37_v22, %v37_v22  ;;  %v3167_v22 = vld [vmem:[%s4314_s1 + $0x304] ss:$8 sps:$4 sm:$0xff]  }
  0x57   :  { %1996 = vmatpush1.bf16.msra.mxu1 %v2986_v27  ;;  %v3079_v27 = vld [vmem:[%s4314_s1 + $0x624] ss:$8 sps:$4 sm:$0xff]  }
  0x58   :  { %2200 = vmatpush1.bf16.msra.mxu0 %v2989_v30  ;;  %1997 = vmatprep.subr.bf16.mxu1 %v2994_v32  ;;  %v2446_v30 = vcombine.low %v33_v19, %v33_v19  ;;  %v3082_v32 = vld [vmem:[%s4314_s1 + $0x234] ss:$8 sps:$4 sm:$0xff]  }
  0x59   :  { %2201 = vmatprep.subr.bf16.mxu0 %v2997_v33  ;;  %v3085_v33 = vld [vmem:[%s4314_s1 + $0x634] ss:$8 sps:$4 sm:$0xff]  }
  0x5a   :  { %v3161_v19 = vld [vmem:[%s4314_s1 + $0x6f4] ss:$8 sps:$4 sm:$0xff]  }
  0x5b   :  { %1998 = vmatpush1.bf16.msra.mxu1 %v2992_v36  ;;  %v3080_v36 = vld [vmem:[%s4314_s1 + $0x230] ss:$8 sps:$4 sm:$0xff]  }
  0x5c   :  { %2202 = vmatpush1.bf16.msra.mxu0 %v2995_v37  ;;  %1999 = vmatprep.subr.bf16.mxu1 %v3000_v38  ;;  %v3083_v37 = vld [vmem:[%s4314_s1 + $0x630] ss:$8 sps:$4 sm:$0xff]   ;;  %v3088_v38 = vld [vmem:[%s4314_s1 + $0x244] ss:$8 sps:$4 sm:$0xff]  }
  0x5d   :  { %2203 = vmatprep.subr.bf16.mxu0 %v3003_v39  ;;  %v3091_v39 = vld [vmem:[%s4314_s1 + $0x644] ss:$8 sps:$4 sm:$0xff]  }
  0x5f   :  { %2000 = vmatpush1.bf16.msra.mxu1 %v2998_v41  ;;  %v3089_v41 = vld [vmem:[%s4314_s1 + $0x640] ss:$8 sps:$4 sm:$0xff]  }
  0x60   :  { %2204 = vmatpush1.bf16.msra.mxu0 %v3001_v42  ;;  %2001 = vmatprep.subr.bf16.mxu1 %v3006_v44  ;;  %v3094_v42 = vld [vmem:[%s4314_s1 + $0x254] ss:$8 sps:$4 sm:$0xff]   ;;  %v3092_v44 = vld [vmem:[%s4314_s1 + $0x250] ss:$8 sps:$4 sm:$0xff]  }
  0x61   :  { %2205 = vmatprep.subr.bf16.mxu0 %v3009_v45  ;;  %v3095_v45 = vld [vmem:[%s4314_s1 + $0x650] ss:$8 sps:$4 sm:$0xff]  }
  0x63   :  { %2002 = vmatpush1.bf16.msra.mxu1 %v3004_v46  ;;  %v3100_v46 = vld [vmem:[%s4314_s1 + $0x264] ss:$8 sps:$4 sm:$0xff]  }
  0x64   :  { %2206 = vmatpush1.bf16.msra.mxu0 %v3007_v47  ;;  %2003 = vmatprep.subr.bf16.mxu1 %v3012_v48  ;;  %v3103_v47 = vld [vmem:[%s4314_s1 + $0x664] ss:$8 sps:$4 sm:$0xff]   ;;  %v3098_v48 = vld [vmem:[%s4314_s1 + $0x260] ss:$8 sps:$4 sm:$0xff]  }
  0x65   :  { %2207 = vmatprep.subr.bf16.mxu0 %v3015_v49  ;;  %v3101_v49 = vld [vmem:[%s4314_s1 + $0x660] ss:$8 sps:$4 sm:$0xff]  }
  0x67   :  { %2004 = vmatpush1.bf16.msra.mxu1 %v3010_v50  ;;  %v3106_v50 = vld [vmem:[%s4314_s1 + $0x274] ss:$8 sps:$4 sm:$0xff]  }
  0x68   :  { %2208 = vmatpush1.bf16.msra.mxu0 %v3013_v51  ;;  %2005 = vmatprep.subr.bf16.mxu1 %v3018_v52  ;;  %v3109_v51 = vld [vmem:[%s4314_s1 + $0x674] ss:$8 sps:$4 sm:$0xff]   ;;  %v3104_v52 = vld [vmem:[%s4314_s1 + $0x270] ss:$8 sps:$4 sm:$0xff]  }
  0x69   :  { %2209 = vmatprep.subr.bf16.mxu0 %v3021_v53  ;;  %v3107_v53 = vld [vmem:[%s4314_s1 + $0x670] ss:$8 sps:$4 sm:$0xff]  }
  0x6b   :  { %2006 = vmatpush1.bf16.msra.mxu1 %v3016_v54  ;;  %v3112_v54 = vld [vmem:[%s4314_s1 + $0x284] ss:$8 sps:$4 sm:$0xff]  }
  0x6c   :  { %2210 = vmatpush1.bf16.msra.mxu0 %v3019_v55  ;;  %2007 = vmatprep.subr.bf16.mxu1 %v3024_v56  ;;  %v3115_v55 = vld [vmem:[%s4314_s1 + $0x684] ss:$8 sps:$4 sm:$0xff]   ;;  %v3110_v56 = vld [vmem:[%s4314_s1 + $0x280] ss:$8 sps:$4 sm:$0xff]  }
  0x6d   :  { %2211 = vmatprep.subr.bf16.mxu0 %v3027_v57  ;;  %v3113_v57 = vld [vmem:[%s4314_s1 + $0x680] ss:$8 sps:$4 sm:$0xff]  }
  0x6f   :  { %2008 = vmatpush1.bf16.msra.mxu1 %v3022_v58  ;;  %v3118_v58 = vld [vmem:[%s4314_s1 + $0x294] ss:$8 sps:$4 sm:$0xff]  }
  0x70   :  { %2212 = vmatpush1.bf16.msra.mxu0 %v3025_v59  ;;  %2009 = vmatprep.subr.bf16.mxu1 %v3030_v60  ;;  %v3121_v59 = vld [vmem:[%s4314_s1 + $0x694] ss:$8 sps:$4 sm:$0xff]   ;;  %v3116_v60 = vld [vmem:[%s4314_s1 + $0x290] ss:$8 sps:$4 sm:$0xff]  }
  0x71   :  { %2213 = vmatprep.subr.bf16.mxu0 %v3033_v61  ;;  %v3119_v61 = vld [vmem:[%s4314_s1 + $0x690] ss:$8 sps:$4 sm:$0xff]  }
  0x73   :  { %2010 = vmatpush1.bf16.msra.mxu1 %v3028_v62  ;;  %v3124_v62 = vld [vmem:[%s4314_s1 + $0x2a4] ss:$8 sps:$4 sm:$0xff]  }
  0x74   :  { %2214 = vmatpush1.bf16.msra.mxu0 %v3031_v63  ;;  %2011 = vmatprep.subr.bf16.mxu1 %v3036_v0  ;;  %v3127_v63 = vld [vmem:[%s4314_s1 + $0x6a4] ss:$8 sps:$4 sm:$0xff]   ;;  %v3122_v0 = vld [vmem:[%s4314_s1 + $0x2a0] ss:$8 sps:$4 sm:$0xff]  }
  0x75   :  { %2215 = vmatprep.subr.bf16.mxu0 %v3039_v1  ;;  %v3125_v1 = vld [vmem:[%s4314_s1 + $0x6a0] ss:$8 sps:$4 sm:$0xff]  }
  0x77   :  { %2012 = vmatpush1.bf16.msra.mxu1 %v3034_v2  ;;  %v3130_v2 = vld [vmem:[%s4314_s1 + $0x2b4] ss:$8 sps:$4 sm:$0xff]  }
  0x78   :  { %2216 = vmatpush1.bf16.msra.mxu0 %v3037_v3  ;;  %2013 = vmatprep.subr.bf16.mxu1 %v3043_v4  ;;  %v3133_v3 = vld [vmem:[%s4314_s1 + $0x6b4] ss:$8 sps:$4 sm:$0xff]   ;;  %v3128_v4 = vld [vmem:[%s4314_s1 + $0x2b0] ss:$8 sps:$4 sm:$0xff]  }
  0x79   :  { %2217 = vmatprep.subr.bf16.mxu0 %v3047_v5  ;;  %v3131_v5 = vld [vmem:[%s4314_s1 + $0x6b0] ss:$8 sps:$4 sm:$0xff]  }
  0x7b   :  { %2014 = vmatpush1.bf16.msra.mxu1 %v3041_v6  ;;  %v3136_v6 = vld [vmem:[%s4314_s1 + $0x2c4] ss:$8 sps:$4 sm:$0xff]  }
  0x7c   :  { %2218 = vmatpush1.bf16.msra.mxu0 %v3045_v7  ;;  %2015 = vmatprep.subr.bf16.mxu1 %v3052_v8  ;;  %v3139_v7 = vld [vmem:[%s4314_s1 + $0x6c4] ss:$8 sps:$4 sm:$0xff]   ;;  %v3134_v8 = vld [vmem:[%s4314_s1 + $0x2c0] ss:$8 sps:$4 sm:$0xff]  }
  0x7d   :  { %2219 = vmatprep.subr.bf16.mxu0 %v3055_v9  ;;  %v3137_v9 = vld [vmem:[%s4314_s1 + $0x6c0] ss:$8 sps:$4 sm:$0xff]  }
  0x7f   :  { %2016 = vmatpush1.bf16.msra.mxu1 %v3050_v10  ;;  %v3142_v10 = vld [vmem:[%s4314_s1 + $0x2d4] ss:$8 sps:$4 sm:$0xff]  }
  0x80   :  { %2220 = vmatpush1.bf16.msra.mxu0 %v3053_v11  ;;  %2036 = vmatprep.subr.bf16.mxu1 %v3061_v13  ;;  %v3145_v11 = vld [vmem:[%s4314_s1 + $0x6d4] ss:$8 sps:$4 sm:$0xff]   ;;  %v3143_v13 = vld [vmem:[%s4314_s1 + $0x6d0] ss:$8 sps:$4 sm:$0xff]  }
  0x81   :  { %2240 = vmatprep.subr.bf16.mxu0 %v3067_v14  ;;  %v3149_v14 = vld [vmem:[%s4314_s1 + $0x2e4] ss:$8 sps:$4 sm:$0xff]  }
  0x82   :  { %2018 = vmatmul.mubr.bf16.vlgmr.msra.gmra.mrb[0].mxu1 %v3056_v12  ;;  %v3140_v12 = vld [vmem:[%s4314_s1 + $0x2d0] ss:$8 sps:$4 sm:$0xff]  }
  0x83   :  { %2222 = vmatmul.mubr.bf16.vlgmr.msra.gmra.mrb[0].mxu0 %v3062_v16  ;;  %2037 = vmatpush1.bf16.msra.mxu1 %v3059_v15  ;;  %v3153_v15 = vld [vmem:[%s4314_s1 + $0x6e4] ss:$8 sps:$4 sm:$0xff]   ;;  %v3147_v16 = vld [vmem:[%s4314_s1 + $0x2e0] ss:$8 sps:$4 sm:$0xff]  }
  0x84   :  { %2241 = vmatpush1.bf16.msra.mxu0 %v3065_v17  ;;  %2038 = vmatprep.subr.bf16.mxu1 %v3070_v18  ;;  %v3151_v17 = vld [vmem:[%s4314_s1 + $0x6e0] ss:$8 sps:$4 sm:$0xff]   ;;  %v3158_v18 = vld [vmem:[%s4314_s1 + $0x2f4] ss:$8 sps:$4 sm:$0xff]  }
  0x85   :  { %2242 = vmatprep.subr.bf16.mxu0 %v3073_v20  ;;  %2027 = vmatprep.mubr.bf16.mxu1 %v2447_v21  ;;  %v3156_v20 = vld [vmem:[%s4314_s1 + $0x2f0] ss:$8 sps:$4 sm:$0xff]  }
  0x86   :  { %2231 = vmatprep.mubr.bf16.mxu0 %v2455_v25  ;;  %v3159_v21 = vld [vmem:[%s4314_s1 + $0x6f0] ss:$8 sps:$4 sm:$0xff]   ;;  %v3165_v25 = vld [vmem:[%s4314_s1 + $0x300] ss:$8 sps:$4 sm:$0xff]  }
  0x87   :  { %2039 = vmatpush1.bf16.msra.mxu1 %v3068_v23  ;;  %v3162_v23 = vld [vmem:[%s4315_s0 + $0x10] ss:$72 sps:$4 sm:$0xff]  }
  0x88   :  { %2243 = vmatpush1.bf16.msra.mxu0 %v3071_v24  ;;  %2040 = vmatprep.subr.bf16.mxu1 %v3076_v26  ;;  %v3173_v24 = vld [vmem:[%s4314_s1 + $0x704] ss:$8 sps:$4 sm:$0xff]   ;;  %v3168_v26 = vld [vmem:[%s4315_s0 + $0x30] ss:$72 sps:$4 sm:$0xff]  }
  0x89   :  { %2244 = vmatprep.subr.bf16.mxu0 %v3079_v27  ;;  %v3171_v27 = vld [vmem:[%s4314_s1 + $0x700] ss:$8 sps:$4 sm:$0xff]  }
  0x8a   :  { %2028 = vmatmul.mubr.bf16.gmra.mrb[4].mxu1 %v2446_v30  ;;  %v3176_v30 = vld [vmem:[%s4314_s1 + $0x314] ss:$8 sps:$4 sm:$0xff]  }
  0x8b   :  { %2232 = vmatmul.mubr.bf16.gmra.mrb[4].mxu0 %v2454_v31  ;;  %2041 = vmatpush1.bf16.msra.mxu1 %v3074_v28  ;;  %v34_v28 = vld [vmem:[%s4315_s0 + $0xa0] sm:$0x11]  ;;  %v3179_v31 = vld [vmem:[%s4314_s1 + $0x714] ss:$8 sps:$4 sm:$0xff]  }
  0x8c   :  { %2245 = vmatpush1.bf16.msra.mxu0 %v3077_v29  ;;  %2042 = vmatprep.subr.bf16.mxu1 %v3082_v32  ;;  %v38_v29 = vld [vmem:[%s4315_s0 + $0xc0] sm:$0x11]  ;;  %v2449_v32 = vcombine.high %v34_v28, %v34_v28 }
  0x8d   :  { %2246 = vmatprep.subr.bf16.mxu0 %v3085_v33  ;;  %2068 = vmatprep.mubr.bf16.mxu1 %v3164_v34  ;;  %v2457_v33 = vcombine.high %v38_v29, %v38_v29  ;;  %v3174_v34 = vld [vmem:[%s4314_s1 + $0x310] ss:$8 sps:$4 sm:$0xff]  }
  0x8e   :  { %2272 = vmatprep.mubr.bf16.mxu0 %v3170_v35  ;;  %v3177_v35 = vld [vmem:[%s4314_s1 + $0x710] ss:$8 sps:$4 sm:$0xff]  }
  0x8f   :  { %2043 = vmatpush1.bf16.msra.mxu1 %v3080_v36  ;;  %v3182_v36 = vld [vmem:[%s4314_s1 + $0x324] ss:$8 sps:$4 sm:$0xff]  }
  0x90   :  { %2247 = vmatpush1.bf16.msra.mxu0 %v3083_v37  ;;  %2044 = vmatprep.subr.bf16.mxu1 %v3088_v38  ;;  %v3185_v37 = vld [vmem:[%s4314_s1 + $0x724] ss:$8 sps:$4 sm:$0xff]   ;;  %v3180_v38 = vld [vmem:[%s4314_s1 + $0x320] ss:$8 sps:$4 sm:$0xff]  }
  0x91   :  { %2248 = vmatprep.subr.bf16.mxu0 %v3091_v39  ;;  %v3183_v39 = vld [vmem:[%s4314_s1 + $0x720] ss:$8 sps:$4 sm:$0xff]  }
  0x93   :  { %2045 = vmatpush1.bf16.msra.mxu1 %v3086_v40  ;;  %v2448_v40 = vcombine.low %v34_v28, %v34_v28  ;;  %v3264_v28 = vld [vmem:[%s4314_s1 + $0x3f4] ss:$8 sps:$4 sm:$0xff]  }
  0x94   :  { %2249 = vmatpush1.bf16.msra.mxu0 %v3089_v41  ;;  %2046 = vmatprep.subr.bf16.mxu1 %v3094_v42  ;;  %v2456_v41 = vcombine.low %v38_v29, %v38_v29  ;;  %v3188_v42 = vld [vmem:[%s4314_s1 + $0x334] ss:$8 sps:$4 sm:$0xff]  }
  0x95   :  { %2250 = vmatprep.subr.bf16.mxu0 %v3097_v43  ;;  %v3191_v43 = vld [vmem:[%s4314_s1 + $0x734] ss:$8 sps:$4 sm:$0xff]  }
  0x96   :  { %v3267_v29 = vld [vmem:[%s4314_s1 + $0x7f4] ss:$8 sps:$4 sm:$0xff]  }
  0x97   :  { %2047 = vmatpush1.bf16.msra.mxu1 %v3092_v44  ;;  %v3270_v44 = vld [vmem:[%s4315_s0 + $0x1c] ss:$72 sps:$4 sm:$0xff]  }
  0x98   :  { %2251 = vmatpush1.bf16.msra.mxu0 %v3095_v45  ;;  %2048 = vmatprep.subr.bf16.mxu1 %v3100_v46  ;;  %v3273_v45 = vld [vmem:[%s4315_s0 + $0x3c] ss:$72 sps:$4 sm:$0xff]   ;;  %v3186_v46 = vld [vmem:[%s4314_s1 + $0x330] ss:$8 sps:$4 sm:$0xff]  }
  0x99   :  { %2252 = vmatprep.subr.bf16.mxu0 %v3103_v47  ;;  %v3189_v47 = vld [vmem:[%s4314_s1 + $0x730] ss:$8 sps:$4 sm:$0xff]  }
  0x9b   :  { %2049 = vmatpush1.bf16.msra.mxu1 %v3098_v48  ;;  %v3194_v48 = vld [vmem:[%s4314_s1 + $0x344] ss:$8 sps:$4 sm:$0xff]  }
  0x9c   :  { %2253 = vmatpush1.bf16.msra.mxu0 %v3101_v49  ;;  %2050 = vmatprep.subr.bf16.mxu1 %v3106_v50  ;;  %v3197_v49 = vld [vmem:[%s4314_s1 + $0x744] ss:$8 sps:$4 sm:$0xff]   ;;  %v3192_v50 = vld [vmem:[%s4314_s1 + $0x340] ss:$8 sps:$4 sm:$0xff]  }
  0x9d   :  { %2254 = vmatprep.subr.bf16.mxu0 %v3109_v51  ;;  %v3195_v51 = vld [vmem:[%s4314_s1 + $0x740] ss:$8 sps:$4 sm:$0xff]  }
  0x9f   :  { %2051 = vmatpush1.bf16.msra.mxu1 %v3104_v52  ;;  %v3200_v52 = vld [vmem:[%s4314_s1 + $0x354] ss:$8 sps:$4 sm:$0xff]  }
  0xa0   :  { %2255 = vmatpush1.bf16.msra.mxu0 %v3107_v53  ;;  %2052 = vmatprep.subr.bf16.mxu1 %v3112_v54  ;;  %v3203_v53 = vld [vmem:[%s4314_s1 + $0x754] ss:$8 sps:$4 sm:$0xff]   ;;  %v3198_v54 = vld [vmem:[%s4314_s1 + $0x350] ss:$8 sps:$4 sm:$0xff]  }
  0xa1   :  { %2256 = vmatprep.subr.bf16.mxu0 %v3115_v55  ;;  %v3201_v55 = vld [vmem:[%s4314_s1 + $0x750] ss:$8 sps:$4 sm:$0xff]  }
  0xa3   :  { %2053 = vmatpush1.bf16.msra.mxu1 %v3110_v56  ;;  %v3206_v56 = vld [vmem:[%s4314_s1 + $0x364] ss:$8 sps:$4 sm:$0xff]  }
  0xa4   :  { %2257 = vmatpush1.bf16.msra.mxu0 %v3113_v57  ;;  %2054 = vmatprep.subr.bf16.mxu1 %v3118_v58  ;;  %v3209_v57 = vld [vmem:[%s4314_s1 + $0x764] ss:$8 sps:$4 sm:$0xff]   ;;  %v3204_v58 = vld [vmem:[%s4314_s1 + $0x360] ss:$8 sps:$4 sm:$0xff]  }
  0xa5   :  { %2258 = vmatprep.subr.bf16.mxu0 %v3121_v59  ;;  %v3207_v59 = vld [vmem:[%s4314_s1 + $0x760] ss:$8 sps:$4 sm:$0xff]  }
  0xa7   :  { %2055 = vmatpush1.bf16.msra.mxu1 %v3116_v60  ;;  %v3212_v60 = vld [vmem:[%s4314_s1 + $0x374] ss:$8 sps:$4 sm:$0xff]  }
  0xa8   :  { %2259 = vmatpush1.bf16.msra.mxu0 %v3119_v61  ;;  %2056 = vmatprep.subr.bf16.mxu1 %v3124_v62  ;;  %v3215_v61 = vld [vmem:[%s4314_s1 + $0x774] ss:$8 sps:$4 sm:$0xff]   ;;  %v3210_v62 = vld [vmem:[%s4314_s1 + $0x370] ss:$8 sps:$4 sm:$0xff]  }
  0xa9   :  { %2260 = vmatprep.subr.bf16.mxu0 %v3127_v63  ;;  %v3213_v63 = vld [vmem:[%s4314_s1 + $0x770] ss:$8 sps:$4 sm:$0xff]  }
  0xab   :  { %2057 = vmatpush1.bf16.msra.mxu1 %v3122_v0  ;;  %v3218_v0 = vld [vmem:[%s4314_s1 + $0x384] ss:$8 sps:$4 sm:$0xff]  }
  0xac   :  { %2261 = vmatpush1.bf16.msra.mxu0 %v3125_v1  ;;  %2058 = vmatprep.subr.bf16.mxu1 %v3130_v2  ;;  %v3221_v1 = vld [vmem:[%s4314_s1 + $0x784] ss:$8 sps:$4 sm:$0xff]   ;;  %v3216_v2 = vld [vmem:[%s4314_s1 + $0x380] ss:$8 sps:$4 sm:$0xff]  }
  0xad   :  { %2262 = vmatprep.subr.bf16.mxu0 %v3133_v3  ;;  %v3219_v3 = vld [vmem:[%s4314_s1 + $0x780] ss:$8 sps:$4 sm:$0xff]  }
  0xaf   :  { %2059 = vmatpush1.bf16.msra.mxu1 %v3128_v4  ;;  %v3224_v4 = vld [vmem:[%s4314_s1 + $0x394] ss:$8 sps:$4 sm:$0xff]  }
  0xb0   :  { %2263 = vmatpush1.bf16.msra.mxu0 %v3131_v5  ;;  %2060 = vmatprep.subr.bf16.mxu1 %v3136_v6  ;;  %v3227_v5 = vld [vmem:[%s4314_s1 + $0x794] ss:$8 sps:$4 sm:$0xff]   ;;  %v3222_v6 = vld [vmem:[%s4314_s1 + $0x390] ss:$8 sps:$4 sm:$0xff]  }
  0xb1   :  { %2264 = vmatprep.subr.bf16.mxu0 %v3139_v7  ;;  %v3225_v7 = vld [vmem:[%s4314_s1 + $0x790] ss:$8 sps:$4 sm:$0xff]  }
  0xb3   :  { %2061 = vmatpush1.bf16.msra.mxu1 %v3134_v8  ;;  %v3230_v8 = vld [vmem:[%s4314_s1 + $0x3a4] ss:$8 sps:$4 sm:$0xff]  }
  0xb4   :  { %2265 = vmatpush1.bf16.msra.mxu0 %v3137_v9  ;;  %2062 = vmatprep.subr.bf16.mxu1 %v3142_v10  ;;  %v3233_v9 = vld [vmem:[%s4314_s1 + $0x7a4] ss:$8 sps:$4 sm:$0xff]   ;;  %v3228_v10 = vld [vmem:[%s4314_s1 + $0x3a0] ss:$8 sps:$4 sm:$0xff]  }
  0xb5   :  { %2266 = vmatprep.subr.bf16.mxu0 %v3145_v11  ;;  %v3231_v11 = vld [vmem:[%s4314_s1 + $0x7a0] ss:$8 sps:$4 sm:$0xff]  }
  0xb7   :  { %2063 = vmatpush1.bf16.msra.mxu1 %v3140_v12  ;;  %v3236_v12 = vld [vmem:[%s4314_s1 + $0x3b4] ss:$8 sps:$4 sm:$0xff]  }
  0xb8   :  { %2267 = vmatpush1.bf16.msra.mxu0 %v3143_v13  ;;  %2064 = vmatprep.subr.bf16.mxu1 %v3149_v14  ;;  %v3239_v13 = vld [vmem:[%s4314_s1 + $0x7b4] ss:$8 sps:$4 sm:$0xff]   ;;  %v3234_v14 = vld [vmem:[%s4314_s1 + $0x3b0] ss:$8 sps:$4 sm:$0xff]  }
  0xb9   :  { %2268 = vmatprep.subr.bf16.mxu0 %v3153_v15  ;;  %v3237_v15 = vld [vmem:[%s4314_s1 + $0x7b0] ss:$8 sps:$4 sm:$0xff]  }
  0xbb   :  { %2065 = vmatpush1.bf16.msra.mxu1 %v3147_v16  ;;  %v3242_v16 = vld [vmem:[%s4314_s1 + $0x3c4] ss:$8 sps:$4 sm:$0xff]  }
  0xbc   :  { %2269 = vmatpush1.bf16.msra.mxu0 %v3151_v17  ;;  %2066 = vmatprep.subr.bf16.mxu1 %v3158_v18  ;;  %v3245_v17 = vld [vmem:[%s4314_s1 + $0x7c4] ss:$8 sps:$4 sm:$0xff]   ;;  %v3240_v18 = vld [vmem:[%s4314_s1 + $0x3c0] ss:$8 sps:$4 sm:$0xff]  }
  0xbd   :  { %2270 = vmatprep.subr.bf16.mxu0 %v3161_v19  ;;  %v3243_v19 = vld [vmem:[%s4314_s1 + $0x7c0] ss:$8 sps:$4 sm:$0xff]  }
  0xbf   :  { %2067 = vmatpush1.bf16.msra.mxu1 %v3156_v20  ;;  %v3248_v20 = vld [vmem:[%s4314_s1 + $0x3d4] ss:$8 sps:$4 sm:$0xff]  }
  0xc0   :  { %2271 = vmatpush1.bf16.msra.mxu0 %v3159_v21  ;;  %2087 = vmatprep.subr.bf16.mxu1 %v3167_v22  ;;  %v3251_v21 = vld [vmem:[%s4314_s1 + $0x7d4] ss:$8 sps:$4 sm:$0xff]   ;;  %v3246_v22 = vld [vmem:[%s4314_s1 + $0x3d0] ss:$8 sps:$4 sm:$0xff]  }
  0xc1   :  { %2291 = vmatprep.subr.bf16.mxu0 %v3173_v24  ;;  %v3257_v24 = vld [vmem:[%s4314_s1 + $0x3e4] ss:$8 sps:$4 sm:$0xff]  }
  0xc2   :  { %2069 = vmatmul.mubr.bf16.vlgmr.msra.gmra.mrb[0].mxu1 %v3162_v23  ;;  %v3249_v23 = vld [vmem:[%s4314_s1 + $0x7d0] ss:$8 sps:$4 sm:$0xff]  }
  0xc3   :  { %2273 = vmatmul.mubr.bf16.vlgmr.msra.gmra.mrb[0].mxu0 %v3168_v26  ;;  %2088 = vmatpush1.bf16.msra.mxu1 %v3165_v25  ;;  %v3261_v25 = vld [vmem:[%s4314_s1 + $0x7e4] ss:$8 sps:$4 sm:$0xff]   ;;  %v3255_v26 = vld [vmem:[%s4314_s1 + $0x3e0] ss:$8 sps:$4 sm:$0xff]  }
  0xc4   :  { %2292 = vmatpush1.bf16.msra.mxu0 %v3171_v27  ;;  %2089 = vmatprep.subr.bf16.mxu1 %v3176_v30  ;;  %v3259_v27 = vld [vmem:[%s4314_s1 + $0x7e0] ss:$8 sps:$4 sm:$0xff]   ;;  %v3262_v30 = vld [vmem:[%s4314_s1 + $0x3f0] ss:$8 sps:$4 sm:$0xff]  }
  0xc5   :  { %2293 = vmatprep.subr.bf16.mxu0 %v3179_v31  ;;  %2078 = vmatprep.mubr.bf16.mxu1 %v2449_v32  ;;  %v3265_v31 = vld [vmem:[%s4314_s1 + $0x7f0] ss:$8 sps:$4 sm:$0xff]   ;;  %v3276_v32 = vld [vmem:[%s4314_s1 + $0x804] ss:$8 sps:$4 sm:$0xff]  }
  0xc6   :  { %2282 = vmatprep.mubr.bf16.mxu0 %v2457_v33  ;;  %v3268_v33 = vld [vmem:[%s4315_s0 + $0x18] ss:$72 sps:$4 sm:$0xff]  }
  0xc7   :  { %2090 = vmatpush1.bf16.msra.mxu1 %v3174_v34  ;;  %v3271_v34 = vld [vmem:[%s4315_s0 + $0x38] ss:$72 sps:$4 sm:$0xff]  }
  0xc8   :  { %2294 = vmatpush1.bf16.msra.mxu0 %v3177_v35  ;;  %2091 = vmatprep.subr.bf16.mxu1 %v3182_v36  ;;  %v35_v35 = vld [vmem:[%s4315_s0 + $0xa8] sm:$0x11] }
  0xc9   :  { %2295 = vmatprep.subr.bf16.mxu0 %v3185_v37  ;;  %v39_v36 = vld [vmem:[%s4315_s0 + $0xc8] sm:$0x11] }
  0xca   :  { %2079 = vmatmul.mubr.bf16.gmra.mrb[4].mxu1 %v2448_v40  ;;  %v3274_v37 = vld [vmem:[%s4314_s1 + $0x800] ss:$8 sps:$4 sm:$0xff]   ;;  %v2459_v40 = vcombine.high %v39_v36, %v39_v36 }
  0xcb   :  { %2283 = vmatmul.mubr.bf16.gmra.mrb[4].mxu0 %v2456_v41  ;;  %2092 = vmatpush1.bf16.msra.mxu1 %v3180_v38  ;;  %v3279_v38 = vld [vmem:[%s4314_s1 + $0x814] ss:$8 sps:$4 sm:$0xff]   ;;  %v3277_v41 = vld [vmem:[%s4314_s1 + $0x810] ss:$8 sps:$4 sm:$0xff]  }
  0xcc   :  { %2296 = vmatpush1.bf16.msra.mxu0 %v3183_v39  ;;  %2093 = vmatprep.subr.bf16.mxu1 %v3188_v42  ;;  %v2451_v39 = vcombine.high %v35_v35, %v35_v35  ;;  %v3286_v42 = vld [vmem:[%s4314_s1 + $0x824] ss:$8 sps:$4 sm:$0xff]  }
  0xcd   :  { %2297 = vmatprep.subr.bf16.mxu0 %v3191_v43  ;;  %2119 = vmatprep.mubr.bf16.mxu1 %v3270_v44  ;;  %v2450_v43 = vcombine.low %v35_v35, %v35_v35  ;;  %v2458_v44 = vcombine.low %v39_v36, %v39_v36 }
  0xce   :  { %2323 = vmatprep.mubr.bf16.mxu0 %v3273_v45  ;;  %v4209_v45 = vld [vmem:[%s4315_s0 + $0xd0] sm:$0x11] }
  0xcf   :  { %2094 = vmatpush1.bf16.msra.mxu1 %v3186_v46  ;;  %v3284_v46 = vld [vmem:[%s4314_s1 + $0x820] ss:$8 sps:$4 sm:$0xff]  }
  0xd0   :  { %2298 = vmatpush1.bf16.msra.mxu0 %v3189_v47  ;;  %2095 = vmatprep.subr.bf16.mxu1 %v3194_v48  ;;  %v3289_v47 = vld [vmem:[%s4314_s1 + $0x834] ss:$8 sps:$4 sm:$0xff]   ;;  %v3328_v48 = vld [vmem:[%s4315_s0 + $0x44] ss:$72 sps:$4 sm:$0xff]  }
  0xd1   :  { %2299 = vmatprep.subr.bf16.mxu0 %v3197_v49  ;;  %v2461_v49 = vcombine.high %v4209_v45, %v4209_v45 }
  0xd3   :  { %2096 = vmatpush1.bf16.msra.mxu1 %v3192_v50  ;;  %v3287_v50 = vld [vmem:[%s4314_s1 + $0x830] ss:$8 sps:$4 sm:$0xff]  }
  0xd4   :  { %2300 = vmatpush1.bf16.msra.mxu0 %v3195_v51  ;;  %2097 = vmatprep.subr.bf16.mxu1 %v3200_v52  ;;  %v3292_v51 = vld [vmem:[%s4314_s1 + $0x844] ss:$8 sps:$4 sm:$0xff]   ;;  %v3290_v52 = vld [vmem:[%s4314_s1 + $0x840] ss:$8 sps:$4 sm:$0xff]  }
  0xd5   :  { %2301 = vmatprep.subr.bf16.mxu0 %v3203_v53  ;;  %v3295_v53 = vld [vmem:[%s4314_s1 + $0x854] ss:$8 sps:$4 sm:$0xff]  }
  0xd7   :  { %2098 = vmatpush1.bf16.msra.mxu1 %v3198_v54  ;;  %v3293_v54 = vld [vmem:[%s4314_s1 + $0x850] ss:$8 sps:$4 sm:$0xff]  }
  0xd8   :  { %2302 = vmatpush1.bf16.msra.mxu0 %v3201_v55  ;;  %2099 = vmatprep.subr.bf16.mxu1 %v3206_v56  ;;  %v3298_v55 = vld [vmem:[%s4314_s1 + $0x864] ss:$8 sps:$4 sm:$0xff]   ;;  %v3296_v56 = vld [vmem:[%s4314_s1 + $0x860] ss:$8 sps:$4 sm:$0xff]  }
  0xd9   :  { %2303 = vmatprep.subr.bf16.mxu0 %v3209_v57  ;;  %v3301_v57 = vld [vmem:[%s4314_s1 + $0x874] ss:$8 sps:$4 sm:$0xff]  }
  0xdb   :  { %2100 = vmatpush1.bf16.msra.mxu1 %v3204_v58  ;;  %v3299_v58 = vld [vmem:[%s4314_s1 + $0x870] ss:$8 sps:$4 sm:$0xff]  }
  0xdc   :  { %2304 = vmatpush1.bf16.msra.mxu0 %v3207_v59  ;;  %2101 = vmatprep.subr.bf16.mxu1 %v3212_v60  ;;  %v3304_v59 = vld [vmem:[%s4314_s1 + $0x884] ss:$8 sps:$4 sm:$0xff]   ;;  %v3302_v60 = vld [vmem:[%s4314_s1 + $0x880] ss:$8 sps:$4 sm:$0xff]  }
  0xdd   :  { %2305 = vmatprep.subr.bf16.mxu0 %v3215_v61  ;;  %v3307_v61 = vld [vmem:[%s4314_s1 + $0x894] ss:$8 sps:$4 sm:$0xff]  }
  0xdf   :  { %2102 = vmatpush1.bf16.msra.mxu1 %v3210_v62  ;;  %v3305_v62 = vld [vmem:[%s4314_s1 + $0x890] ss:$8 sps:$4 sm:$0xff]  }
  0xe0   :  { %2306 = vmatpush1.bf16.msra.mxu0 %v3213_v63  ;;  %2103 = vmatprep.subr.bf16.mxu1 %v3218_v0  ;;  %v3310_v63 = vld [vmem:[%s4314_s1 + $0x8a4] ss:$8 sps:$4 sm:$0xff]   ;;  %v3308_v0 = vld [vmem:[%s4314_s1 + $0x8a0] ss:$8 sps:$4 sm:$0xff]  }
  0xe1   :  { %2307 = vmatprep.subr.bf16.mxu0 %v3221_v1  ;;  %v3313_v1 = vld [vmem:[%s4314_s1 + $0x8b4] ss:$8 sps:$4 sm:$0xff]  }
  0xe3   :  { %2104 = vmatpush1.bf16.msra.mxu1 %v3216_v2  ;;  %v3311_v2 = vld [vmem:[%s4314_s1 + $0x8b0] ss:$8 sps:$4 sm:$0xff]  }
  0xe4   :  { %2308 = vmatpush1.bf16.msra.mxu0 %v3219_v3  ;;  %2105 = vmatprep.subr.bf16.mxu1 %v3224_v4  ;;  %v3316_v3 = vld [vmem:[%s4314_s1 + $0x8c4] ss:$8 sps:$4 sm:$0xff]   ;;  %v3314_v4 = vld [vmem:[%s4314_s1 + $0x8c0] ss:$8 sps:$4 sm:$0xff]  }
  0xe5   :  { %2309 = vmatprep.subr.bf16.mxu0 %v3227_v5  ;;  %v3319_v5 = vld [vmem:[%s4314_s1 + $0x8d4] ss:$8 sps:$4 sm:$0xff]  }
  0xe7   :  { %2106 = vmatpush1.bf16.msra.mxu1 %v3222_v6  ;;  %v3317_v6 = vld [vmem:[%s4314_s1 + $0x8d0] ss:$8 sps:$4 sm:$0xff]  }
  0xe8   :  { %2310 = vmatpush1.bf16.msra.mxu0 %v3225_v7  ;;  %2107 = vmatprep.subr.bf16.mxu1 %v3230_v8  ;;  %v3322_v7 = vld [vmem:[%s4314_s1 + $0x8e4] ss:$8 sps:$4 sm:$0xff]   ;;  %v3320_v8 = vld [vmem:[%s4314_s1 + $0x8e0] ss:$8 sps:$4 sm:$0xff]  }
  0xe9   :  { %2311 = vmatprep.subr.bf16.mxu0 %v3233_v9  ;;  %v3325_v9 = vld [vmem:[%s4314_s1 + $0x8f4] ss:$8 sps:$4 sm:$0xff]  }
  0xeb   :  { %2108 = vmatpush1.bf16.msra.mxu1 %v3228_v10  ;;  %v3323_v10 = vld [vmem:[%s4314_s1 + $0x8f0] ss:$8 sps:$4 sm:$0xff]  }
  0xec   :  { %2312 = vmatpush1.bf16.msra.mxu0 %v3231_v11  ;;  %2109 = vmatprep.subr.bf16.mxu1 %v3236_v12  ;;  %v3326_v11 = vld [vmem:[%s4315_s0 + $0x40] ss:$72 sps:$4 sm:$0xff]   ;;  %v2460_v12 = vcombine.low %v4209_v45, %v4209_v45 }
  0xed   :  { %2313 = vmatprep.subr.bf16.mxu0 %v3239_v13  ;;  %v331_v13 = vlaneseq }
  0xef   :  { %2110 = vmatpush1.bf16.msra.mxu1 %v3234_v14  ;;  %v332_v14 = vshrl.u32 %v331_v13, 7 }
  0xf0   :  { %2314 = vmatpush1.bf16.msra.mxu0 %v3237_v15  ;;  %2111 = vmatprep.subr.bf16.mxu1 %v3242_v16 }
  0xf1   :  { %2315 = vmatprep.subr.bf16.mxu0 %v3245_v17 }
  0xf3   :  { %2112 = vmatpush1.bf16.msra.mxu1 %v3240_v18  ;;  %v333_v18 = vsub.s32 0, %v332_v14 }
  0xf4   :  { %2316 = vmatpush1.bf16.msra.mxu0 %v3243_v19  ;;  %2113 = vmatprep.subr.bf16.mxu1 %v3248_v20  ;;  %v329_v20 = vld [vmem:[%s4316_s2] sm:$0x3] }
  0xf5   :  { %2317 = vmatprep.subr.bf16.mxu0 %v3251_v21  ;;  %v337_v21 = vsub.s32 1, %v332_v14 }
  0xf7   :  { %2114 = vmatpush1.bf16.msra.mxu1 %v3246_v22  ;;  %v334_v22 = vrot.slane %v329_v20, %v333_v18 }
  0xf8   :  { %2318 = vmatpush1.bf16.msra.mxu0 %v3249_v23  ;;  %2115 = vmatprep.subr.bf16.mxu1 %v3257_v24  ;;  %v338_v23 = vrot.slane %v329_v20, %v337_v21 }
  0xf9   :  { %2319 = vmatprep.subr.bf16.mxu0 %v3261_v25 }
  0xfb   :  { %2116 = vmatpush1.bf16.msra.mxu1 %v3255_v26 }
  0xfc   :  { %2320 = vmatpush1.bf16.msra.mxu0 %v3259_v27  ;;  %2117 = vmatprep.subr.bf16.mxu1 %v3264_v28 }
  0xfd   :  { %2321 = vmatprep.subr.bf16.mxu0 %v3267_v29 }
  0xff   :  { %2118 = vmatpush1.bf16.msra.mxu1 %v3262_v30 }
 0x100   :  { %2322 = vmatpush1.bf16.msra.mxu0 %v3265_v31  ;;  %2756 = vmatprep.subr.bf16.mxu1 %v3276_v32 }
 0x101   :  { %2342 = vmatprep.subr.bf16.mxu0 %v3276_v32 }
 0x102   :  { %2120 = vmatmul.mubr.bf16.vlgmr.msra.gmra.mrb[0].mxu1 %v3268_v33 }
 0x103   :  { %2324 = vmatmul.mubr.bf16.vlgmr.msra.gmra.mrb[0].mxu0 %v3271_v34  ;;  %2772 = vmatpush1.bf16.msra.mxu1 %v3274_v37 }
 0x104   :  { %2343 = vmatpush1.bf16.msra.mxu0 %v3274_v37  ;;  %2757 = vmatprep.subr.bf16.mxu1 %v3279_v38 }
 0x105   :  { %2344 = vmatprep.subr.bf16.mxu0 %v3279_v38  ;;  %2129 = vmatprep.mubr.bf16.mxu1 %v2451_v39 }
 0x106   :  { %2333 = vmatprep.mubr.bf16.mxu0 %v2459_v40 }
 0x107   :  { %2773 = vmatpush1.bf16.msra.mxu1 %v3277_v41 }
 0x108   :  { %2345 = vmatpush1.bf16.msra.mxu0 %v3277_v41  ;;  %2758 = vmatprep.subr.bf16.mxu1 %v3286_v42 }
 0x109   :  { %2346 = vmatprep.subr.bf16.mxu0 %v3286_v42 }
 0x10a   :  { %2130 = vmatmul.mubr.bf16.gmra.mrb[4].mxu1 %v2450_v43 }
 0x10b   :  { %2334 = vmatmul.mubr.bf16.gmra.mrb[4].mxu0 %v2458_v44  ;;  %2774 = vmatpush1.bf16.msra.mxu1 %v3284_v46 }
 0x10c   :  { %2347 = vmatpush1.bf16.msra.mxu0 %v3284_v46  ;;  %2759 = vmatprep.subr.bf16.mxu1 %v3289_v47 }
 0x10d   :  { %2348 = vmatprep.subr.bf16.mxu0 %v3289_v47  ;;  %2374 = vmatprep.mubr.bf16.mxu0 %v3328_v48 }
 0x10e   :  { %2384 = vmatprep.mubr.bf16.mxu1 %v2461_v49 }
 0x10f   :  { %2775 = vmatpush1.bf16.msra.mxu1 %v3287_v50 }
 0x110   :  { %2349 = vmatpush1.bf16.msra.mxu0 %v3287_v50  ;;  %2760 = vmatprep.subr.bf16.mxu1 %v3292_v51 }
 0x111   :  { %2350 = vmatprep.subr.bf16.mxu0 %v3292_v51 }
 0x113   :  { %2776 = vmatpush1.bf16.msra.mxu1 %v3290_v52 }
 0x114   :  { %2351 = vmatpush1.bf16.msra.mxu0 %v3290_v52  ;;  %2761 = vmatprep.subr.bf16.mxu1 %v3295_v53 }
 0x115   :  { %2352 = vmatprep.subr.bf16.mxu0 %v3295_v53 }
 0x117   :  { %2777 = vmatpush1.bf16.msra.mxu1 %v3293_v54 }
 0x118   :  { %2353 = vmatpush1.bf16.msra.mxu0 %v3293_v54  ;;  %2762 = vmatprep.subr.bf16.mxu1 %v3298_v55 }
 0x119   :  { %2354 = vmatprep.subr.bf16.mxu0 %v3298_v55 }
 0x11b   :  { %2778 = vmatpush1.bf16.msra.mxu1 %v3296_v56 }
 0x11c   :  { %2355 = vmatpush1.bf16.msra.mxu0 %v3296_v56  ;;  %2763 = vmatprep.subr.bf16.mxu1 %v3301_v57 }
 0x11d   :  { %2356 = vmatprep.subr.bf16.mxu0 %v3301_v57 }
 0x11f   :  { %2779 = vmatpush1.bf16.msra.mxu1 %v3299_v58 }
 0x120   :  { %2357 = vmatpush1.bf16.msra.mxu0 %v3299_v58  ;;  %2764 = vmatprep.subr.bf16.mxu1 %v3304_v59 }
 0x121   :  { %2358 = vmatprep.subr.bf16.mxu0 %v3304_v59 }
 0x123   :  { %2780 = vmatpush1.bf16.msra.mxu1 %v3302_v60 }
 0x124   :  { %2359 = vmatpush1.bf16.msra.mxu0 %v3302_v60  ;;  %2765 = vmatprep.subr.bf16.mxu1 %v3307_v61 }
 0x125   :  { %2360 = vmatprep.subr.bf16.mxu0 %v3307_v61 }
 0x127   :  { %2781 = vmatpush1.bf16.msra.mxu1 %v3305_v62 }
 0x128   :  { %2361 = vmatpush1.bf16.msra.mxu0 %v3305_v62  ;;  %2766 = vmatprep.subr.bf16.mxu1 %v3310_v63 }
 0x129   :  { %2362 = vmatprep.subr.bf16.mxu0 %v3310_v63 }
 0x12b   :  { %2782 = vmatpush1.bf16.msra.mxu1 %v3308_v0 }
 0x12c   :  { %2363 = vmatpush1.bf16.msra.mxu0 %v3308_v0  ;;  %2767 = vmatprep.subr.bf16.mxu1 %v3313_v1 }
 0x12d   :  { %2364 = vmatprep.subr.bf16.mxu0 %v3313_v1 }
 0x12f   :  { %2783 = vmatpush1.bf16.msra.mxu1 %v3311_v2 }
 0x130   :  { %2365 = vmatpush1.bf16.msra.mxu0 %v3311_v2  ;;  %2768 = vmatprep.subr.bf16.mxu1 %v3316_v3 }
 0x131   :  { %2366 = vmatprep.subr.bf16.mxu0 %v3316_v3 }
 0x133   :  { %2784 = vmatpush1.bf16.msra.mxu1 %v3314_v4 }
 0x134   :  { %2367 = vmatpush1.bf16.msra.mxu0 %v3314_v4  ;;  %2769 = vmatprep.subr.bf16.mxu1 %v3319_v5 }
 0x135   :  { %2368 = vmatprep.subr.bf16.mxu0 %v3319_v5 }
 0x137   :  { %2785 = vmatpush1.bf16.msra.mxu1 %v3317_v6 }
 0x138   :  { %2369 = vmatpush1.bf16.msra.mxu0 %v3317_v6  ;;  %2770 = vmatprep.subr.bf16.mxu1 %v3322_v7 }
 0x139   :  { %2370 = vmatprep.subr.bf16.mxu0 %v3322_v7 }
 0x13b   :  { %2786 = vmatpush1.bf16.msra.mxu1 %v3320_v8 }
 0x13c   :  { %2371 = vmatpush1.bf16.msra.mxu0 %v3320_v8  ;;  %2771 = vmatprep.subr.bf16.mxu1 %v3325_v9 }
 0x13d   :  { %2372 = vmatprep.subr.bf16.mxu0 %v3325_v9 }
 0x13f   :  { %2787 = vmatpush1.bf16.msra.mxu1 %v3323_v10 }
 0x140   :  { %2373 = vmatpush1.bf16.msra.mxu0 %v3323_v10 }
 0x142   :  { %2385 = vmatmul.mubr.bf16.vlgmr.msra.gmra.mrb[8].mxu1 %v2460_v12 }
 0x143   :  { %2375 = vmatmul.mubr.bf16.vlgmr.msra.gmra.mrb[0].mxu0 %v3326_v11 }
 0x1d5   :  { %v2121_v15 = vpop.f32.mrb[0].mxu1 }
 0x1d6   :  { %v2123_v16 = vpop.f32.mrb[1].mxu1  ;;  %v2788_v36 = vadd.f32 %v2121_v15, %v334_v22 }
 0x1d7   :  { %v2125_v17 = vpop.f32.mrb[2].mxu1  ;;  %v2790_v37 = vadd.f32 %v2123_v16, %v338_v23 }
 0x1d8   :  { %v2127_v19 = vpop.f32.mrb[3].mxu1  ;;  %v2792_v40 = vadd.f32 %v2125_v17, %v334_v22 }
 0x1d9   :  { %v2794_v45 = vadd.f32 %v2127_v19, %v338_v23 }
 0x1dd   :  { %v2131_v24 = vpop.f32.mrb[4].mxu1 }
 0x1de   :  { %v2335_v25 = vpop.f32.mrb[4].mxu0  ;;  %v2796_v26 = vadd.f32 %v2131_v24, %v334_v22  ;;  %v2133_v27 = vpop.f32.mrb[5].mxu1 }
 0x1df   :  { %v2337_v28 = vpop.f32.mrb[5].mxu0  ;;  %v2799_v29 = vadd.f32 %v2133_v27, %v338_v23  ;;  %v2135_v30 = vpop.f32.mrb[6].mxu1 }
 0x1e0   :  { %v2339_v31 = vpop.f32.mrb[6].mxu0  ;;  %v2797_v32 = vadd.f32 %v2796_v26, %v2335_v25  ;;  %v2136_v33 = vpop.f32.mrb[7].mxu1 }
 0x1e1   :  { %v2340_v34 = vpop.f32.mrb[7].mxu0  ;;  %v2800_v35 = vadd.f32 %v2799_v29, %v2337_v28 }
 0x215   :  { %v2386_v39 = vpop.f32.mrb[8].mxu1 }
 0x216   :  { %v2376_v38 = vpop.f32.mrb[0].mxu0  ;;  %v2798_v42 = vadd.f32 %v2797_v32, %v2386_v39  ;;  %v2388_v44 = vpop.f32.mrb[9].mxu1 }
 0x217   :  { %v2789_v41 = vadd.f32 %v2788_v36, %v2376_v38  ;;  %v2378_v43 = vpop.f32.mrb[1].mxu0  ;;  %v2801_v47 = vadd.f32 %v2800_v35, %v2388_v44  ;;  %v2390_v49 = vpop.f32.mrb[10].mxu1 }
 0x218   :  { %v2791_v46 = vadd.f32 %v2790_v37, %v2378_v43  ;;  %v2380_v48 = vpop.f32.mrb[2].mxu0  ;;  %v2397_v51 = vmax.f32 %v2798_v42, 0.0  ;;  %v2391_v54 = vpop.f32.mrb[11].mxu1 }
 0x219   :  { %v2393_v50 = vmax.f32 %v2789_v41, 0.0  ;;  %v2793_v52 = vadd.f32 %v2792_v40, %v2380_v48  ;;  %v2382_v53 = vpop.f32.mrb[3].mxu0  ;;  %v2398_v56 = vmax.f32 %v2801_v47, 0.0 }
 0x21a   :  { %v2394_v55 = vmax.f32 %v2791_v46, 0.0  ;;  %v2795_v57 = vadd.f32 %v2794_v45, %v2382_v53 }
 0x21b   :  { %v2395_v58 = vmax.f32 %v2793_v52, 0.0  ;;  %v2755_v60 = vpack.c.bf16 %v2398_v56, %v2397_v51 }
 0x21c   :  { %v2753_v59 = vpack.c.bf16 %v2394_v55, %v2393_v50  ;;  %v2396_v61 = vmax.f32 %v2795_v57, 0.0 }
 0x21d   :  { %2421 = vst [vmem:[%s4317_s3 + $0x10] sm:$0x11] %v2755_v60 }
 0x21e   :  { %2419 = vst [vmem:[%s4317_s3] sm:$0xff] %v2753_v59  ;;  %v2754_v62 = vpack.c.bf16 %v2396_v61, %v2395_v58 }
 0x220   :  { %2420 = vst [vmem:[%s4317_s3 + $0x8] sm:$0xff] %v2754_v62 }

// kernel: finetuner_forward.10
= control target key start
LH: loop header
LB: loop body
LE: loop exit
PB: predicated region body
PF: predicated region fallthrough
CT: control target
= control target key end

     0   :  { %s3370_s12 = smov 0   ;;  %s3372_s13 = smov 0   ;;  %s4295_s0 = inlined_call_operand.vmem [shape: bf16[2,256], index: 0, kind: input, shape index: {}]   ;;  %s4296_s1 = inlined_call_operand.vmem [shape: bf16[256,4096], index: 1, kind: input, shape index: {}]   ;;  %s4297_s2 = inlined_call_operand.vmem [shape: f32[1,4096], index: 2, kind: input, shape index: {}]   ;;  %s4298_s3 = inlined_call_operand.vmem [shape: bf16[2,4096], index: 3, kind: output, shape index: {}]  }
   0x1   :  { %s3374_s14 = smov 0   ;;  %s3376_s15 = smov 0  }
   0x2   :  { %s3378_s16 = smov 0  }
   0x3 LB: > { %s22_s17 = sadd.s32 1, %s3343_s15  ;;  %p65_p1 = scmp.ne.s32.totalorder %s3335_s13, %s3331_s12  ;;  %s3347_s16 = sphi %s3378_s16, %s13_s16   ;;  %s3343_s15 = sphi %s3376_s15, %s4302_s15   ;;  %s3339_s14 = sphi %s3374_s14, %s4301_s14   ;;  %s3335_s13 = sphi %s3372_s13, %s4300_s13   ;;  %s3331_s12 = sphi %s3370_s12, %s4299_s12  }
   0x4   : > { %p23_p0 = scmp.ge.s32.totalorder %s22_s17, 2  ;;  %p66_p2 = scmp.eq.s32.totalorder %s3347_s16, 0 }
   0x5   : > { %s58_s19 = sadd.s32 1, %s3335_s13  ;;  %p2992_p5 = scmp.ge.s32.totalorder %s3347_s16, 2 }
   0x6   : > { %s4304_s17 = smov (%p23_p0, %s22_s17), 0  ;;  %p67_p3 = por %p66_p2, %p65_p1 }
   0x7   : > { %s55_s18 = ssub.s32 %s3343_s15, %s4304_s17  ;;  %152 = sbr.rel (%p2992_p5) target bundleno = 146 (0x92), region = 20 }
   0x8   : > { %p56_p4 = scmp.eq.s32.totalorder %s55_s18, 0 }
   0xa   : > { %s3405_s20 = scalar_select %p56_p4, %s3335_s13, %s58_s19  }
   0xe   : > { %155 = sbr.rel (!%p67_p3) target bundleno = 146 (0x92), region = 24  ;;  %s157_s21 = sand.u32 (%p67_p3), 1, %s3335_s13  }
   0xf   : > { %s3267_s22 = sshll.u32 (%p67_p3), %s3343_s15, 6  ;;  %s2993_s23 = sshll.u32 (%p67_p3), %s157_s21, 11 }
  0x10   : > { %s3413_s26 = scalar_lea.vmem (%p67_p3), %s4296_s1, %s3267_s22  ;;  %s3418_s27 = scalar_lea.vmem (%p67_p3), [#allocation2], %s2993_s23 }
  0x11   : > { %v175_v0 = vld [vmem:[%s3413_s26] sm:$0xff] (%p67_p3)  ;;  %v177_v1 = vld [vmem:[%s3413_s26 + $0x8] sm:$0xff] (%p67_p3)  ;;  %v179_v2 = vld [vmem:[%s3413_s26 + $0x10] sm:$0xff] (%p67_p3) }
  0x12   : > { %176 = vst [vmem:[%s3418_s27] sm:$0xff] (%p67_p3), %v175_v0  ;;  %178 = vst [vmem:[%s3418_s27 + $0x8] sm:$0xff] (%p67_p3), %v177_v1  ;;  %v181_v3 = vld [vmem:[%s3413_s26 + $0x18] sm:$0xff] (%p67_p3)  ;;  %v183_v4 = vld [vmem:[%s3413_s26 + $0x20] sm:$0xff] (%p67_p3) }
  0x13   : > { %180 = vst [vmem:[%s3418_s27 + $0x10] sm:$0xff] (%p67_p3), %v179_v2  ;;  %v185_v5 = vld [vmem:[%s3413_s26 + $0x28] sm:$0xff] (%p67_p3)  ;;  %182 = vst [vmem:[%s3418_s27 + $0x18] sm:$0xff] (%p67_p3), %v181_v3  ;;  %v187_v6 = vld [vmem:[%s3413_s26 + $0x30] sm:$0xff] (%p67_p3) }
  0x14   : > { %184 = vst [vmem:[%s3418_s27 + $0x20] sm:$0xff] (%p67_p3), %v183_v4  ;;  %186 = vst [vmem:[%s3418_s27 + $0x28] sm:$0xff] (%p67_p3), %v185_v5  ;;  %v189_v7 = vld [vmem:[%s3413_s26 + $0x38] sm:$0xff] (%p67_p3)  ;;  %v191_v8 = vld [vmem:[%s3413_s26 + $0x80] sm:$0xff] (%p67_p3) }
  0x15   : > { %188 = vst [vmem:[%s3418_s27 + $0x30] sm:$0xff] %v187_v6  ;;  %190 = vst [vmem:[%s3418_s27 + $0x38] sm:$0xff] %v189_v7  ;;  %v193_v9 = vld [vmem:[%s3413_s26 + $0x88] sm:$0xff]  ;;  %v195_v10 = vld [vmem:[%s3413_s26 + $0x90] sm:$0xff] }
  0x16   : > { %192 = vst [vmem:[%s3418_s27 + $0x40] sm:$0xff] %v191_v8  ;;  %v197_v11 = vld [vmem:[%s3413_s26 + $0x98] sm:$0xff]  ;;  %194 = vst [vmem:[%s3418_s27 + $0x48] sm:$0xff] %v193_v9  ;;  %v199_v12 = vld [vmem:[%s3413_s26 + $0xa0] sm:$0xff] }
  0x17   : > { %196 = vst [vmem:[%s3418_s27 + $0x50] sm:$0xff] %v195_v10  ;;  %198 = vst [vmem:[%s3418_s27 + $0x58] sm:$0xff] %v197_v11  ;;  %v201_v13 = vld [vmem:[%s3413_s26 + $0xa8] sm:$0xff]  ;;  %v203_v14 = vld [vmem:[%s3413_s26 + $0xb0] sm:$0xff] }
  0x18   : > { %200 = vst [vmem:[%s3418_s27 + $0x60] sm:$0xff] %v199_v12  ;;  %202 = vst [vmem:[%s3418_s27 + $0x68] sm:$0xff] %v201_v13  ;;  %v205_v15 = vld [vmem:[%s3413_s26 + $0xb8] sm:$0xff]  ;;  %v207_v16 = vld [vmem:[%s3413_s26 + $0x100] sm:$0xff] }
  0x19   : > { %204 = vst [vmem:[%s3418_s27 + $0x70] sm:$0xff] %v203_v14  ;;  %v209_v17 = vld [vmem:[%s3413_s26 + $0x108] sm:$0xff]  ;;  %206 = vst [vmem:[%s3418_s27 + $0x78] sm:$0xff] %v205_v15  ;;  %v211_v18 = vld [vmem:[%s3413_s26 + $0x110] sm:$0xff] }
  0x1a   : > { %208 = vst [vmem:[%s3418_s27 + $0x80] sm:$0xff] %v207_v16  ;;  %210 = vst [vmem:[%s3418_s27 + $0x88] sm:$0xff] %v209_v17  ;;  %v213_v19 = vld [vmem:[%s3413_s26 + $0x118] sm:$0xff]  ;;  %v215_v20 = vld [vmem:[%s3413_s26 + $0x120] sm:$0xff] }
  0x1b   : > { %212 = vst [vmem:[%s3418_s27 + $0x90] sm:$0xff] %v211_v18  ;;  %214 = vst [vmem:[%s3418_s27 + $0x98] sm:$0xff] %v213_v19  ;;  %v217_v21 = vld [vmem:[%s3413_s26 + $0x128] sm:$0xff]  ;;  %v219_v22 = vld [vmem:[%s3413_s26 + $0x130] sm:$0xff] }
  0x1c   : > { %216 = vst [vmem:[%s3418_s27 + $0xa0] sm:$0xff] %v215_v20  ;;  %v221_v23 = vld [vmem:[%s3413_s26 + $0x138] sm:$0xff]  ;;  %218 = vst [vmem:[%s3418_s27 + $0xa8] sm:$0xff] %v217_v21  ;;  %v223_v24 = vld [vmem:[%s3413_s26 + $0x180] sm:$0xff] }
  0x1d   : > { %220 = vst [vmem:[%s3418_s27 + $0xb0] sm:$0xff] %v219_v22  ;;  %222 = vst [vmem:[%s3418_s27 + $0xb8] sm:$0xff] %v221_v23  ;;  %v225_v25 = vld [vmem:[%s3413_s26 + $0x188] sm:$0xff]  ;;  %v227_v26 = vld [vmem:[%s3413_s26 + $0x190] sm:$0xff] }
  0x1e   : > { %224 = vst [vmem:[%s3418_s27 + $0xc0] sm:$0xff] %v223_v24  ;;  %226 = vst [vmem:[%s3418_s27 + $0xc8] sm:$0xff] %v225_v25  ;;  %v229_v27 = vld [vmem:[%s3413_s26 + $0x198] sm:$0xff]  ;;  %v231_v28 = vld [vmem:[%s3413_s26 + $0x1a0] sm:$0xff] }
  0x1f   : > { %228 = vst [vmem:[%s3418_s27 + $0xd0] sm:$0xff] %v227_v26  ;;  %v233_v29 = vld [vmem:[%s3413_s26 + $0x1a8] sm:$0xff]  ;;  %230 = vst [vmem:[%s3418_s27 + $0xd8] sm:$0xff] %v229_v27  ;;  %v235_v30 = vld [vmem:[%s3413_s26 + $0x1b0] sm:$0xff] }
  0x20   : > { %232 = vst [vmem:[%s3418_s27 + $0xe0] sm:$0xff] %v231_v28  ;;  %234 = vst [vmem:[%s3418_s27 + $0xe8] sm:$0xff] %v233_v29  ;;  %v237_v31 = vld [vmem:[%s3413_s26 + $0x1b8] sm:$0xff]  ;;  %v239_v32 = vld [vmem:[%s3413_s26 + $0x200] sm:$0xff] }
  0x21   : > { %236 = vst [vmem:[%s3418_s27 + $0xf0] sm:$0xff] %v235_v30  ;;  %238 = vst [vmem:[%s3418_s27 + $0xf8] sm:$0xff] %v237_v31  ;;  %v241_v33 = vld [vmem:[%s3413_s26 + $0x208] sm:$0xff]  ;;  %v243_v34 = vld [vmem:[%s3413_s26 + $0x210] sm:$0xff] }
  0x22   : > { %240 = vst [vmem:[%s3418_s27 + $0x100] sm:$0xff] %v239_v32  ;;  %v245_v35 = vld [vmem:[%s3413_s26 + $0x218] sm:$0xff]  ;;  %242 = vst [vmem:[%s3418_s27 + $0x108] sm:$0xff] %v241_v33  ;;  %v247_v36 = vld [vmem:[%s3413_s26 + $0x220] sm:$0xff] }
  0x23   : > { %244 = vst [vmem:[%s3418_s27 + $0x110] sm:$0xff] %v243_v34  ;;  %246 = vst [vmem:[%s3418_s27 + $0x118] sm:$0xff] %v245_v35  ;;  %v249_v37 = vld [vmem:[%s3413_s26 + $0x228] sm:$0xff]  ;;  %v251_v38 = vld [vmem:[%s3413_s26 + $0x230] sm:$0xff] }
  0x24   : > { %248 = vst [vmem:[%s3418_s27 + $0x120] sm:$0xff] %v247_v36  ;;  %250 = vst [vmem:[%s3418_s27 + $0x128] sm:$0xff] %v249_v37  ;;  %v253_v39 = vld [vmem:[%s3413_s26 + $0x238] sm:$0xff]  ;;  %v255_v40 = vld [vmem:[%s3413_s26 + $0x280] sm:$0xff] }
  0x25   : > { %252 = vst [vmem:[%s3418_s27 + $0x130] sm:$0xff] %v251_v38  ;;  %v257_v41 = vld [vmem:[%s3413_s26 + $0x288] sm:$0xff]  ;;  %254 = vst [vmem:[%s3418_s27 + $0x138] sm:$0xff] %v253_v39  ;;  %v259_v42 = vld [vmem:[%s3413_s26 + $0x290] sm:$0xff] }
  0x26   : > { %256 = vst [vmem:[%s3418_s27 + $0x140] sm:$0xff] %v255_v40  ;;  %258 = vst [vmem:[%s3418_s27 + $0x148] sm:$0xff] %v257_v41  ;;  %v261_v43 = vld [vmem:[%s3413_s26 + $0x298] sm:$0xff]  ;;  %v263_v44 = vld [vmem:[%s3413_s26 + $0x2a0] sm:$0xff] }
  0x27   : > { %260 = vst [vmem:[%s3418_s27 + $0x150] sm:$0xff] %v259_v42  ;;  %262 = vst [vmem:[%s3418_s27 + $0x158] sm:$0xff] %v261_v43  ;;  %v265_v45 = vld [vmem:[%s3413_s26 + $0x2a8] sm:$0xff]  ;;  %v267_v46 = vld [vmem:[%s3413_s26 + $0x2b0] sm:$0xff] }
  0x28   : > { %264 = vst [vmem:[%s3418_s27 + $0x160] sm:$0xff] %v263_v44  ;;  %v269_v47 = vld [vmem:[%s3413_s26 + $0x2b8] sm:$0xff]  ;;  %266 = vst [vmem:[%s3418_s27 + $0x168] sm:$0xff] %v265_v45  ;;  %v271_v48 = vld [vmem:[%s3413_s26 + $0x300] sm:$0xff] }
  0x29   : > { %268 = vst [vmem:[%s3418_s27 + $0x170] sm:$0xff] %v267_v46  ;;  %270 = vst [vmem:[%s3418_s27 + $0x178] sm:$0xff] %v269_v47  ;;  %v273_v49 = vld [vmem:[%s3413_s26 + $0x308] sm:$0xff]  ;;  %v275_v50 = vld [vmem:[%s3413_s26 + $0x310] sm:$0xff] }
  0x2a   : > { %272 = vst [vmem:[%s3418_s27 + $0x180] sm:$0xff] %v271_v48  ;;  %274 = vst [vmem:[%s3418_s27 + $0x188] sm:$0xff] %v273_v49  ;;  %v277_v51 = vld [vmem:[%s3413_s26 + $0x318] sm:$0xff]  ;;  %v279_v52 = vld [vmem:[%s3413_s26 + $0x320] sm:$0xff] }
  0x2b   : > { %276 = vst [vmem:[%s3418_s27 + $0x190] sm:$0xff] %v275_v50  ;;  %v281_v53 = vld [vmem:[%s3413_s26 + $0x328] sm:$0xff]  ;;  %278 = vst [vmem:[%s3418_s27 + $0x198] sm:$0xff] %v277_v51  ;;  %v283_v54 = vld [vmem:[%s3413_s26 + $0x330] sm:$0xff] }
  0x2c   : > { %280 = vst [vmem:[%s3418_s27 + $0x1a0] sm:$0xff] %v279_v52  ;;  %282 = vst [vmem:[%s3418_s27 + $0x1a8] sm:$0xff] %v281_v53  ;;  %v285_v55 = vld [vmem:[%s3413_s26 + $0x338] sm:$0xff]  ;;  %v287_v56 = vld [vmem:[%s3413_s26 + $0x380] sm:$0xff] }
  0x2d   : > { %284 = vst [vmem:[%s3418_s27 + $0x1b0] sm:$0xff] %v283_v54  ;;  %286 = vst [vmem:[%s3418_s27 + $0x1b8] sm:$0xff] %v285_v55  ;;  %v289_v57 = vld [vmem:[%s3413_s26 + $0x388] sm:$0xff]  ;;  %v291_v58 = vld [vmem:[%s3413_s26 + $0x390] sm:$0xff] }
  0x2e   : > { %288 = vst [vmem:[%s3418_s27 + $0x1c0] sm:$0xff] %v287_v56  ;;  %v293_v59 = vld [vmem:[%s3413_s26 + $0x398] sm:$0xff]  ;;  %290 = vst [vmem:[%s3418_s27 + $0x1c8] sm:$0xff] %v289_v57  ;;  %v295_v60 = vld [vmem:[%s3413_s26 + $0x3a0] sm:$0xff] }
  0x2f   : > { %292 = vst [vmem:[%s3418_s27 + $0x1d0] sm:$0xff] %v291_v58  ;;  %294 = vst [vmem:[%s3418_s27 + $0x1d8] sm:$0xff] %v293_v59  ;;  %v297_v61 = vld [vmem:[%s3413_s26 + $0x3a8] sm:$0xff]  ;;  %v299_v62 = vld [vmem:[%s3413_s26 + $0x3b0] sm:$0xff] }
  0x30   : > { %296 = vst [vmem:[%s3418_s27 + $0x1e0] sm:$0xff] %v295_v60  ;;  %298 = vst [vmem:[%s3418_s27 + $0x1e8] sm:$0xff] %v297_v61  ;;  %v301_v63 = vld [vmem:[%s3413_s26 + $0x3b8] sm:$0xff]  ;;  %v303_v0 = vld [vmem:[%s3413_s26 + $0x400] sm:$0xff] }
  0x31   : > { %300 = vst [vmem:[%s3418_s27 + $0x1f0] sm:$0xff] %v299_v62  ;;  %v305_v1 = vld [vmem:[%s3413_s26 + $0x408] sm:$0xff]  ;;  %302 = vst [vmem:[%s3418_s27 + $0x1f8] sm:$0xff] %v301_v63  ;;  %v307_v2 = vld [vmem:[%s3413_s26 + $0x410] sm:$0xff] }
  0x32   : > { %304 = vst [vmem:[%s3418_s27 + $0x200] sm:$0xff] %v303_v0  ;;  %306 = vst [vmem:[%s3418_s27 + $0x208] sm:$0xff] %v305_v1  ;;  %v309_v3 = vld [vmem:[%s3413_s26 + $0x418] sm:$0xff]  ;;  %v311_v4 = vld [vmem:[%s3413_s26 + $0x420] sm:$0xff] }
  0x33   : > { %308 = vst [vmem:[%s3418_s27 + $0x210] sm:$0xff] %v307_v2  ;;  %310 = vst [vmem:[%s3418_s27 + $0x218] sm:$0xff] %v309_v3  ;;  %v313_v5 = vld [vmem:[%s3413_s26 + $0x428] sm:$0xff]  ;;  %v315_v6 = vld [vmem:[%s3413_s26 + $0x430] sm:$0xff] }
  0x34   : > { %312 = vst [vmem:[%s3418_s27 + $0x220] sm:$0xff] %v311_v4  ;;  %v317_v7 = vld [vmem:[%s3413_s26 + $0x438] sm:$0xff]  ;;  %314 = vst [vmem:[%s3418_s27 + $0x228] sm:$0xff] %v313_v5  ;;  %v319_v8 = vld [vmem:[%s3413_s26 + $0x480] sm:$0xff] }
  0x35   : > { %316 = vst [vmem:[%s3418_s27 + $0x230] sm:$0xff] %v315_v6  ;;  %318 = vst [vmem:[%s3418_s27 + $0x238] sm:$0xff] %v317_v7  ;;  %v321_v9 = vld [vmem:[%s3413_s26 + $0x488] sm:$0xff]  ;;  %v323_v10 = vld [vmem:[%s3413_s26 + $0x490] sm:$0xff] }
  0x36   : > { %320 = vst [vmem:[%s3418_s27 + $0x240] sm:$0xff] %v319_v8  ;;  %322 = vst [vmem:[%s3418_s27 + $0x248] sm:$0xff] %v321_v9  ;;  %v325_v11 = vld [vmem:[%s3413_s26 + $0x498] sm:$0xff]  ;;  %v327_v12 = vld [vmem:[%s3413_s26 + $0x4a0] sm:$0xff] }
  0x37   : > { %324 = vst [vmem:[%s3418_s27 + $0x250] sm:$0xff] %v323_v10  ;;  %v329_v13 = vld [vmem:[%s3413_s26 + $0x4a8] sm:$0xff]  ;;  %326 = vst [vmem:[%s3418_s27 + $0x258] sm:$0xff] %v325_v11  ;;  %v331_v14 = vld [vmem:[%s3413_s26 + $0x4b0] sm:$0xff] }
  0x38   : > { %328 = vst [vmem:[%s3418_s27 + $0x260] sm:$0xff] %v327_v12  ;;  %330 = vst [vmem:[%s3418_s27 + $0x268] sm:$0xff] %v329_v13  ;;  %v333_v15 = vld [vmem:[%s3413_s26 + $0x4b8] sm:$0xff]  ;;  %v335_v16 = vld [vmem:[%s3413_s26 + $0x500] sm:$0xff] }
  0x39   : > { %332 = vst [vmem:[%s3418_s27 + $0x270] sm:$0xff] %v331_v14  ;;  %334 = vst [vmem:[%s3418_s27 + $0x278] sm:$0xff] %v333_v15  ;;  %v337_v17 = vld [vmem:[%s3413_s26 + $0x508] sm:$0xff]  ;;  %v339_v18 = vld [vmem:[%s3413_s26 + $0x510] sm:$0xff] }
  0x3a   : > { %336 = vst [vmem:[%s3418_s27 + $0x280] sm:$0xff] %v335_v16  ;;  %v341_v19 = vld [vmem:[%s3413_s26 + $0x518] sm:$0xff]  ;;  %338 = vst [vmem:[%s3418_s27 + $0x288] sm:$0xff] %v337_v17  ;;  %v343_v20 = vld [vmem:[%s3413_s26 + $0x520] sm:$0xff] }
  0x3b   : > { %340 = vst [vmem:[%s3418_s27 + $0x290] sm:$0xff] %v339_v18  ;;  %342 = vst [vmem:[%s3418_s27 + $0x298] sm:$0xff] %v341_v19  ;;  %v345_v21 = vld [vmem:[%s3413_s26 + $0x528] sm:$0xff]  ;;  %v347_v22 = vld [vmem:[%s3413_s26 + $0x530] sm:$0xff] }
  0x3c   : > { %344 = vst [vmem:[%s3418_s27 + $0x2a0] sm:$0xff] %v343_v20  ;;  %346 = vst [vmem:[%s3418_s27 + $0x2a8] sm:$0xff] %v345_v21  ;;  %v349_v23 = vld [vmem:[%s3413_s26 + $0x538] sm:$0xff]  ;;  %v351_v24 = vld [vmem:[%s3413_s26 + $0x580] sm:$0xff] }
  0x3d   : > { %348 = vst [vmem:[%s3418_s27 + $0x2b0] sm:$0xff] %v347_v22  ;;  %v353_v25 = vld [vmem:[%s3413_s26 + $0x588] sm:$0xff]  ;;  %350 = vst [vmem:[%s3418_s27 + $0x2b8] sm:$0xff] %v349_v23  ;;  %v355_v26 = vld [vmem:[%s3413_s26 + $0x590] sm:$0xff] }
  0x3e   : > { %352 = vst [vmem:[%s3418_s27 + $0x2c0] sm:$0xff] %v351_v24  ;;  %354 = vst [vmem:[%s3418_s27 + $0x2c8] sm:$0xff] %v353_v25  ;;  %v357_v27 = vld [vmem:[%s3413_s26 + $0x598] sm:$0xff]  ;;  %v359_v28 = vld [vmem:[%s3413_s26 + $0x5a0] sm:$0xff] }
  0x3f   : > { %356 = vst [vmem:[%s3418_s27 + $0x2d0] sm:$0xff] %v355_v26  ;;  %358 = vst [vmem:[%s3418_s27 + $0x2d8] sm:$0xff] %v357_v27  ;;  %v361_v29 = vld [vmem:[%s3413_s26 + $0x5a8] sm:$0xff]  ;;  %v363_v30 = vld [vmem:[%s3413_s26 + $0x5b0] sm:$0xff] }
  0x40   : > { %360 = vst [vmem:[%s3418_s27 + $0x2e0] sm:$0xff] %v359_v28  ;;  %v365_v31 = vld [vmem:[%s3413_s26 + $0x5b8] sm:$0xff]  ;;  %362 = vst [vmem:[%s3418_s27 + $0x2e8] sm:$0xff] %v361_v29  ;;  %v367_v32 = vld [vmem:[%s3413_s26 + $0x600] sm:$0xff] }
  0x41   : > { %364 = vst [vmem:[%s3418_s27 + $0x2f0] sm:$0xff] %v363_v30  ;;  %366 = vst [vmem:[%s3418_s27 + $0x2f8] sm:$0xff] %v365_v31  ;;  %v369_v33 = vld [vmem:[%s3413_s26 + $0x608] sm:$0xff]  ;;  %v371_v34 = vld [vmem:[%s3413_s26 + $0x610] sm:$0xff] }
  0x42   : > { %368 = vst [vmem:[%s3418_s27 + $0x300] sm:$0xff] %v367_v32  ;;  %370 = vst [vmem:[%s3418_s27 + $0x308] sm:$0xff] %v369_v33  ;;  %v373_v35 = vld [vmem:[%s3413_s26 + $0x618] sm:$0xff]  ;;  %v375_v36 = vld [vmem:[%s3413_s26 + $0x620] sm:$0xff] }
  0x43   : > { %372 = vst [vmem:[%s3418_s27 + $0x310] sm:$0xff] %v371_v34  ;;  %v377_v37 = vld [vmem:[%s3413_s26 + $0x628] sm:$0xff]  ;;  %374 = vst [vmem:[%s3418_s27 + $0x318] sm:$0xff] %v373_v35  ;;  %v379_v38 = vld [vmem:[%s3413_s26 + $0x630] sm:$0xff] }
  0x44   : > { %376 = vst [vmem:[%s3418_s27 + $0x320] sm:$0xff] %v375_v36  ;;  %378 = vst [vmem:[%s3418_s27 + $0x328] sm:$0xff] %v377_v37  ;;  %v381_v39 = vld [vmem:[%s3413_s26 + $0x638] sm:$0xff]  ;;  %v383_v40 = vld [vmem:[%s3413_s26 + $0x680] sm:$0xff] }
  0x45   : > { %380 = vst [vmem:[%s3418_s27 + $0x330] sm:$0xff] %v379_v38  ;;  %382 = vst [vmem:[%s3418_s27 + $0x338] sm:$0xff] %v381_v39  ;;  %v385_v41 = vld [vmem:[%s3413_s26 + $0x688] sm:$0xff]  ;;  %v387_v42 = vld [vmem:[%s3413_s26 + $0x690] sm:$0xff] }
  0x46   : > { %384 = vst [vmem:[%s3418_s27 + $0x340] sm:$0xff] %v383_v40  ;;  %v389_v43 = vld [vmem:[%s3413_s26 + $0x698] sm:$0xff]  ;;  %386 = vst [vmem:[%s3418_s27 + $0x348] sm:$0xff] %v385_v41  ;;  %v391_v44 = vld [vmem:[%s3413_s26 + $0x6a0] sm:$0xff] }
  0x47   : > { %388 = vst [vmem:[%s3418_s27 + $0x350] sm:$0xff] %v387_v42  ;;  %390 = vst [vmem:[%s3418_s27 + $0x358] sm:$0xff] %v389_v43  ;;  %v393_v45 = vld [vmem:[%s3413_s26 + $0x6a8] sm:$0xff]  ;;  %v395_v46 = vld [vmem:[%s3413_s26 + $0x6b0] sm:$0xff] }
  0x48   : > { %392 = vst [vmem:[%s3418_s27 + $0x360] sm:$0xff] %v391_v44  ;;  %394 = vst [vmem:[%s3418_s27 + $0x368] sm:$0xff] %v393_v45  ;;  %v397_v47 = vld [vmem:[%s3413_s26 + $0x6b8] sm:$0xff]  ;;  %v399_v48 = vld [vmem:[%s3413_s26 + $0x700] sm:$0xff] }
  0x49   : > { %396 = vst [vmem:[%s3418_s27 + $0x370] sm:$0xff] %v395_v46  ;;  %v401_v49 = vld [vmem:[%s3413_s26 + $0x708] sm:$0xff]  ;;  %398 = vst [vmem:[%s3418_s27 + $0x378] sm:$0xff] %v397_v47  ;;  %v403_v50 = vld [vmem:[%s3413_s26 + $0x710] sm:$0xff] }
  0x4a   : > { %400 = vst [vmem:[%s3418_s27 + $0x380] sm:$0xff] %v399_v48  ;;  %402 = vst [vmem:[%s3418_s27 + $0x388] sm:$0xff] %v401_v49  ;;  %v405_v51 = vld [vmem:[%s3413_s26 + $0x718] sm:$0xff]  ;;  %v407_v52 = vld [vmem:[%s3413_s26 + $0x720] sm:$0xff] }
  0x4b   : > { %404 = vst [vmem:[%s3418_s27 + $0x390] sm:$0xff] %v403_v50  ;;  %406 = vst [vmem:[%s3418_s27 + $0x398] sm:$0xff] %v405_v51  ;;  %v409_v53 = vld [vmem:[%s3413_s26 + $0x728] sm:$0xff]  ;;  %v411_v54 = vld [vmem:[%s3413_s26 + $0x730] sm:$0xff] }
  0x4c   : > { %408 = vst [vmem:[%s3418_s27 + $0x3a0] sm:$0xff] %v407_v52  ;;  %v413_v55 = vld [vmem:[%s3413_s26 + $0x738] sm:$0xff]  ;;  %410 = vst [vmem:[%s3418_s27 + $0x3a8] sm:$0xff] %v409_v53  ;;  %v415_v56 = vld [vmem:[%s3413_s26 + $0x780] sm:$0xff] }
  0x4d   : > { %412 = vst [vmem:[%s3418_s27 + $0x3b0] sm:$0xff] %v411_v54  ;;  %414 = vst [vmem:[%s3418_s27 + $0x3b8] sm:$0xff] %v413_v55  ;;  %v417_v57 = vld [vmem:[%s3413_s26 + $0x788] sm:$0xff]  ;;  %v419_v58 = vld [vmem:[%s3413_s26 + $0x790] sm:$0xff] }
  0x4e   : > { %416 = vst [vmem:[%s3418_s27 + $0x3c0] sm:$0xff] %v415_v56  ;;  %418 = vst [vmem:[%s3418_s27 + $0x3c8] sm:$0xff] %v417_v57  ;;  %v421_v59 = vld [vmem:[%s3413_s26 + $0x798] sm:$0xff]  ;;  %v423_v60 = vld [vmem:[%s3413_s26 + $0x7a0] sm:$0xff] }
  0x4f   : > { %420 = vst [vmem:[%s3418_s27 + $0x3d0] sm:$0xff] %v419_v58  ;;  %v425_v61 = vld [vmem:[%s3413_s26 + $0x7a8] sm:$0xff]  ;;  %422 = vst [vmem:[%s3418_s27 + $0x3d8] sm:$0xff] %v421_v59  ;;  %v427_v62 = vld [vmem:[%s3413_s26 + $0x7b0] sm:$0xff] }
  0x50   : > { %424 = vst [vmem:[%s3418_s27 + $0x3e0] sm:$0xff] %v423_v60  ;;  %426 = vst [vmem:[%s3418_s27 + $0x3e8] sm:$0xff] %v425_v61  ;;  %v429_v63 = vld [vmem:[%s3413_s26 + $0x7b8] sm:$0xff]  ;;  %v431_v0 = vld [vmem:[%s3413_s26 + $0x800] sm:$0xff] }
  0x51   : > { %428 = vst [vmem:[%s3418_s27 + $0x3f0] sm:$0xff] %v427_v62  ;;  %430 = vst [vmem:[%s3418_s27 + $0x3f8] sm:$0xff] %v429_v63  ;;  %v433_v1 = vld [vmem:[%s3413_s26 + $0x808] sm:$0xff]  ;;  %v435_v2 = vld [vmem:[%s3413_s26 + $0x810] sm:$0xff] }
  0x52   : > { %432 = vst [vmem:[%s3418_s27 + $0x400] sm:$0xff] %v431_v0  ;;  %v437_v3 = vld [vmem:[%s3413_s26 + $0x818] sm:$0xff]  ;;  %434 = vst [vmem:[%s3418_s27 + $0x408] sm:$0xff] %v433_v1  ;;  %v439_v4 = vld [vmem:[%s3413_s26 + $0x820] sm:$0xff] }
  0x53   : > { %436 = vst [vmem:[%s3418_s27 + $0x410] sm:$0xff] %v435_v2  ;;  %438 = vst [vmem:[%s3418_s27 + $0x418] sm:$0xff] %v437_v3  ;;  %v441_v5 = vld [vmem:[%s3413_s26 + $0x828] sm:$0xff]  ;;  %v443_v6 = vld [vmem:[%s3413_s26 + $0x830] sm:$0xff] }
  0x54   : > { %440 = vst [vmem:[%s3418_s27 + $0x420] sm:$0xff] %v439_v4  ;;  %442 = vst [vmem:[%s3418_s27 + $0x428] sm:$0xff] %v441_v5  ;;  %v445_v7 = vld [vmem:[%s3413_s26 + $0x838] sm:$0xff]  ;;  %v447_v8 = vld [vmem:[%s3413_s26 + $0x880] sm:$0xff] }
  0x55   : > { %444 = vst [vmem:[%s3418_s27 + $0x430] sm:$0xff] %v443_v6  ;;  %v449_v9 = vld [vmem:[%s3413_s26 + $0x888] sm:$0xff]  ;;  %446 = vst [vmem:[%s3418_s27 + $0x438] sm:$0xff] %v445_v7  ;;  %v451_v10 = vld [vmem:[%s3413_s26 + $0x890] sm:$0xff] }
  0x56   : > { %448 = vst [vmem:[%s3418_s27 + $0x440] sm:$0xff] %v447_v8  ;;  %450 = vst [vmem:[%s3418_s27 + $0x448] sm:$0xff] %v449_v9  ;;  %v453_v11 = vld [vmem:[%s3413_s26 + $0x898] sm:$0xff]  ;;  %v455_v12 = vld [vmem:[%s3413_s26 + $0x8a0] sm:$0xff] }
  0x57   : > { %452 = vst [vmem:[%s3418_s27 + $0x450] sm:$0xff] %v451_v10  ;;  %454 = vst [vmem:[%s3418_s27 + $0x458] sm:$0xff] %v453_v11  ;;  %v457_v13 = vld [vmem:[%s3413_s26 + $0x8a8] sm:$0xff]  ;;  %v459_v14 = vld [vmem:[%s3413_s26 + $0x8b0] sm:$0xff] }
  0x58   : > { %456 = vst [vmem:[%s3418_s27 + $0x460] sm:$0xff] %v455_v12  ;;  %v461_v15 = vld [vmem:[%s3413_s26 + $0x8b8] sm:$0xff]  ;;  %458 = vst [vmem:[%s3418_s27 + $0x468] sm:$0xff] %v457_v13  ;;  %v463_v16 = vld [vmem:[%s3413_s26 + $0x900] sm:$0xff] }
  0x59   : > { %460 = vst [vmem:[%s3418_s27 + $0x470] sm:$0xff] %v459_v14  ;;  %462 = vst [vmem:[%s3418_s27 + $0x478] sm:$0xff] %v461_v15  ;;  %v465_v17 = vld [vmem:[%s3413_s26 + $0x908] sm:$0xff]  ;;  %v467_v18 = vld [vmem:[%s3413_s26 + $0x910] sm:$0xff] }
  0x5a   : > { %464 = vst [vmem:[%s3418_s27 + $0x480] sm:$0xff] %v463_v16  ;;  %466 = vst [vmem:[%s3418_s27 + $0x488] sm:$0xff] %v465_v17  ;;  %v469_v19 = vld [vmem:[%s3413_s26 + $0x918] sm:$0xff]  ;;  %v471_v20 = vld [vmem:[%s3413_s26 + $0x920] sm:$0xff] }
  0x5b   : > { %468 = vst [vmem:[%s3418_s27 + $0x490] sm:$0xff] %v467_v18  ;;  %v473_v21 = vld [vmem:[%s3413_s26 + $0x928] sm:$0xff]  ;;  %470 = vst [vmem:[%s3418_s27 + $0x498] sm:$0xff] %v469_v19  ;;  %v475_v22 = vld [vmem:[%s3413_s26 + $0x930] sm:$0xff] }
  0x5c   : > { %472 = vst [vmem:[%s3418_s27 + $0x4a0] sm:$0xff] %v471_v20  ;;  %474 = vst [vmem:[%s3418_s27 + $0x4a8] sm:$0xff] %v473_v21  ;;  %v477_v23 = vld [vmem:[%s3413_s26 + $0x938] sm:$0xff]  ;;  %v479_v24 = vld [vmem:[%s3413_s26 + $0x980] sm:$0xff] }
  0x5d   : > { %476 = vst [vmem:[%s3418_s27 + $0x4b0] sm:$0xff] %v475_v22  ;;  %478 = vst [vmem:[%s3418_s27 + $0x4b8] sm:$0xff] %v477_v23  ;;  %v481_v25 = vld [vmem:[%s3413_s26 + $0x988] sm:$0xff]  ;;  %v483_v26 = vld [vmem:[%s3413_s26 + $0x990] sm:$0xff] }
  0x5e   : > { %480 = vst [vmem:[%s3418_s27 + $0x4c0] sm:$0xff] %v479_v24  ;;  %v485_v27 = vld [vmem:[%s3413_s26 + $0x998] sm:$0xff]  ;;  %482 = vst [vmem:[%s3418_s27 + $0x4c8] sm:$0xff] %v481_v25  ;;  %v487_v28 = vld [vmem:[%s3413_s26 + $0x9a0] sm:$0xff] }
  0x5f   : > { %484 = vst [vmem:[%s3418_s27 + $0x4d0] sm:$0xff] %v483_v26  ;;  %486 = vst [vmem:[%s3418_s27 + $0x4d8] sm:$0xff] %v485_v27  ;;  %v489_v29 = vld [vmem:[%s3413_s26 + $0x9a8] sm:$0xff]  ;;  %v491_v30 = vld [vmem:[%s3413_s26 + $0x9b0] sm:$0xff] }
  0x60   : > { %488 = vst [vmem:[%s3418_s27 + $0x4e0] sm:$0xff] %v487_v28  ;;  %490 = vst [vmem:[%s3418_s27 + $0x4e8] sm:$0xff] %v489_v29  ;;  %v493_v31 = vld [vmem:[%s3413_s26 + $0x9b8] sm:$0xff]  ;;  %v495_v32 = vld [vmem:[%s3413_s26 + $0xa00] sm:$0xff] }
  0x61   : > { %492 = vst [vmem:[%s3418_s27 + $0x4f0] sm:$0xff] %v491_v30  ;;  %v497_v33 = vld [vmem:[%s3413_s26 + $0xa08] sm:$0xff]  ;;  %494 = vst [vmem:[%s3418_s27 + $0x4f8] sm:$0xff] %v493_v31  ;;  %v499_v34 = vld [vmem:[%s3413_s26 + $0xa10] sm:$0xff] }
  0x62   : > { %496 = vst [vmem:[%s3418_s27 + $0x500] sm:$0xff] %v495_v32  ;;  %498 = vst [vmem:[%s3418_s27 + $0x508] sm:$0xff] %v497_v33  ;;  %v501_v35 = vld [vmem:[%s3413_s26 + $0xa18] sm:$0xff]  ;;  %v503_v36 = vld [vmem:[%s3413_s26 + $0xa20] sm:$0xff] }
  0x63   : > { %500 = vst [vmem:[%s3418_s27 + $0x510] sm:$0xff] %v499_v34  ;;  %502 = vst [vmem:[%s3418_s27 + $0x518] sm:$0xff] %v501_v35  ;;  %v505_v37 = vld [vmem:[%s3413_s26 + $0xa28] sm:$0xff]  ;;  %v507_v38 = vld [vmem:[%s3413_s26 + $0xa30] sm:$0xff] }
  0x64   : > { %504 = vst [vmem:[%s3418_s27 + $0x520] sm:$0xff] %v503_v36  ;;  %v509_v39 = vld [vmem:[%s3413_s26 + $0xa38] sm:$0xff]  ;;  %506 = vst [vmem:[%s3418_s27 + $0x528] sm:$0xff] %v505_v37  ;;  %v511_v40 = vld [vmem:[%s3413_s26 + $0xa80] sm:$0xff] }
  0x65   : > { %508 = vst [vmem:[%s3418_s27 + $0x530] sm:$0xff] %v507_v38  ;;  %510 = vst [vmem:[%s3418_s27 + $0x538] sm:$0xff] %v509_v39  ;;  %v513_v41 = vld [vmem:[%s3413_s26 + $0xa88] sm:$0xff]  ;;  %v515_v42 = vld [vmem:[%s3413_s26 + $0xa90] sm:$0xff] }
  0x66   : > { %512 = vst [vmem:[%s3418_s27 + $0x540] sm:$0xff] %v511_v40  ;;  %514 = vst [vmem:[%s3418_s27 + $0x548] sm:$0xff] %v513_v41  ;;  %v517_v43 = vld [vmem:[%s3413_s26 + $0xa98] sm:$0xff]  ;;  %v519_v44 = vld [vmem:[%s3413_s26 + $0xaa0] sm:$0xff] }
  0x67   : > { %516 = vst [vmem:[%s3418_s27 + $0x550] sm:$0xff] %v515_v42  ;;  %v521_v45 = vld [vmem:[%s3413_s26 + $0xaa8] sm:$0xff]  ;;  %518 = vst [vmem:[%s3418_s27 + $0x558] sm:$0xff] %v517_v43  ;;  %v523_v46 = vld [vmem:[%s3413_s26 + $0xab0] sm:$0xff] }
  0x68   : > { %520 = vst [vmem:[%s3418_s27 + $0x560] sm:$0xff] %v519_v44  ;;  %522 = vst [vmem:[%s3418_s27 + $0x568] sm:$0xff] %v521_v45  ;;  %v525_v47 = vld [vmem:[%s3413_s26 + $0xab8] sm:$0xff]  ;;  %v527_v48 = vld [vmem:[%s3413_s26 + $0xb00] sm:$0xff] }
  0x69   : > { %524 = vst [vmem:[%s3418_s27 + $0x570] sm:$0xff] %v523_v46  ;;  %526 = vst [vmem:[%s3418_s27 + $0x578] sm:$0xff] %v525_v47  ;;  %v529_v49 = vld [vmem:[%s3413_s26 + $0xb08] sm:$0xff]  ;;  %v531_v50 = vld [vmem:[%s3413_s26 + $0xb10] sm:$0xff] }
  0x6a   : > { %528 = vst [vmem:[%s3418_s27 + $0x580] sm:$0xff] %v527_v48  ;;  %v533_v51 = vld [vmem:[%s3413_s26 + $0xb18] sm:$0xff]  ;;  %530 = vst [vmem:[%s3418_s27 + $0x588] sm:$0xff] %v529_v49  ;;  %v535_v52 = vld [vmem:[%s3413_s26 + $0xb20] sm:$0xff] }
  0x6b   : > { %532 = vst [vmem:[%s3418_s27 + $0x590] sm:$0xff] %v531_v50  ;;  %534 = vst [vmem:[%s3418_s27 + $0x598] sm:$0xff] %v533_v51  ;;  %v537_v53 = vld [vmem:[%s3413_s26 + $0xb28] sm:$0xff]  ;;  %v539_v54 = vld [vmem:[%s3413_s26 + $0xb30] sm:$0xff] }
  0x6c   : > { %536 = vst [vmem:[%s3418_s27 + $0x5a0] sm:$0xff] %v535_v52  ;;  %538 = vst [vmem:[%s3418_s27 + $0x5a8] sm:$0xff] %v537_v53  ;;  %v541_v55 = vld [vmem:[%s3413_s26 + $0xb38] sm:$0xff]  ;;  %v543_v56 = vld [vmem:[%s3413_s26 + $0xb80] sm:$0xff] }
  0x6d   : > { %540 = vst [vmem:[%s3418_s27 + $0x5b0] sm:$0xff] %v539_v54  ;;  %v545_v57 = vld [vmem:[%s3413_s26 + $0xb88] sm:$0xff]  ;;  %542 = vst [vmem:[%s3418_s27 + $0x5b8] sm:$0xff] %v541_v55  ;;  %v547_v58 = vld [vmem:[%s3413_s26 + $0xb90] sm:$0xff] }
  0x6e   : > { %544 = vst [vmem:[%s3418_s27 + $0x5c0] sm:$0xff] %v543_v56  ;;  %546 = vst [vmem:[%s3418_s27 + $0x5c8] sm:$0xff] %v545_v57  ;;  %v549_v59 = vld [vmem:[%s3413_s26 + $0xb98] sm:$0xff]  ;;  %v551_v60 = vld [vmem:[%s3413_s26 + $0xba0] sm:$0xff] }
  0x6f   : > { %548 = vst [vmem:[%s3418_s27 + $0x5d0] sm:$0xff] %v547_v58  ;;  %550 = vst [vmem:[%s3418_s27 + $0x5d8] sm:$0xff] %v549_v59  ;;  %v553_v61 = vld [vmem:[%s3413_s26 + $0xba8] sm:$0xff]  ;;  %v555_v62 = vld [vmem:[%s3413_s26 + $0xbb0] sm:$0xff] }
  0x70   : > { %552 = vst [vmem:[%s3418_s27 + $0x5e0] sm:$0xff] %v551_v60  ;;  %v557_v63 = vld [vmem:[%s3413_s26 + $0xbb8] sm:$0xff]  ;;  %554 = vst [vmem:[%s3418_s27 + $0x5e8] sm:$0xff] %v553_v61  ;;  %v559_v0 = vld [vmem:[%s3413_s26 + $0xc00] sm:$0xff] }
  0x71   : > { %556 = vst [vmem:[%s3418_s27 + $0x5f0] sm:$0xff] %v555_v62  ;;  %558 = vst [vmem:[%s3418_s27 + $0x5f8] sm:$0xff] %v557_v63  ;;  %v561_v1 = vld [vmem:[%s3413_s26 + $0xc08] sm:$0xff]  ;;  %v563_v2 = vld [vmem:[%s3413_s26 + $0xc10] sm:$0xff] }
  0x72   : > { %560 = vst [vmem:[%s3418_s27 + $0x600] sm:$0xff] %v559_v0  ;;  %562 = vst [vmem:[%s3418_s27 + $0x608] sm:$0xff] %v561_v1  ;;  %v565_v3 = vld [vmem:[%s3413_s26 + $0xc18] sm:$0xff]  ;;  %v567_v4 = vld [vmem:[%s3413_s26 + $0xc20] sm:$0xff] }
  0x73   : > { %564 = vst [vmem:[%s3418_s27 + $0x610] sm:$0xff] %v563_v2  ;;  %v569_v5 = vld [vmem:[%s3413_s26 + $0xc28] sm:$0xff]  ;;  %566 = vst [vmem:[%s3418_s27 + $0x618] sm:$0xff] %v565_v3  ;;  %v571_v6 = vld [vmem:[%s3413_s26 + $0xc30] sm:$0xff] }
  0x74   : > { %568 = vst [vmem:[%s3418_s27 + $0x620] sm:$0xff] %v567_v4  ;;  %570 = vst [vmem:[%s3418_s27 + $0x628] sm:$0xff] %v569_v5  ;;  %v573_v7 = vld [vmem:[%s3413_s26 + $0xc38] sm:$0xff]  ;;  %v575_v8 = vld [vmem:[%s3413_s26 + $0xc80] sm:$0xff] }
  0x75   : > { %572 = vst [vmem:[%s3418_s27 + $0x630] sm:$0xff] %v571_v6  ;;  %574 = vst [vmem:[%s3418_s27 + $0x638] sm:$0xff] %v573_v7  ;;  %v577_v9 = vld [vmem:[%s3413_s26 + $0xc88] sm:$0xff]  ;;  %v579_v10 = vld [vmem:[%s3413_s26 + $0xc90] sm:$0xff] }
  0x76   : > { %576 = vst [vmem:[%s3418_s27 + $0x640] sm:$0xff] %v575_v8  ;;  %v581_v11 = vld [vmem:[%s3413_s26 + $0xc98] sm:$0xff]  ;;  %578 = vst [vmem:[%s3418_s27 + $0x648] sm:$0xff] %v577_v9  ;;  %v583_v12 = vld [vmem:[%s3413_s26 + $0xca0] sm:$0xff] }
  0x77   : > { %580 = vst [vmem:[%s3418_s27 + $0x650] sm:$0xff] %v579_v10  ;;  %582 = vst [vmem:[%s3418_s27 + $0x658] sm:$0xff] %v581_v11  ;;  %v585_v13 = vld [vmem:[%s3413_s26 + $0xca8] sm:$0xff]  ;;  %v587_v14 = vld [vmem:[%s3413_s26 + $0xcb0] sm:$0xff] }
  0x78   : > { %584 = vst [vmem:[%s3418_s27 + $0x660] sm:$0xff] %v583_v12  ;;  %586 = vst [vmem:[%s3418_s27 + $0x668] sm:$0xff] %v585_v13  ;;  %v589_v15 = vld [vmem:[%s3413_s26 + $0xcb8] sm:$0xff]  ;;  %v591_v16 = vld [vmem:[%s3413_s26 + $0xd00] sm:$0xff] }
  0x79   : > { %588 = vst [vmem:[%s3418_s27 + $0x670] sm:$0xff] %v587_v14  ;;  %v593_v17 = vld [vmem:[%s3413_s26 + $0xd08] sm:$0xff]  ;;  %590 = vst [vmem:[%s3418_s27 + $0x678] sm:$0xff] %v589_v15  ;;  %v595_v18 = vld [vmem:[%s3413_s26 + $0xd10] sm:$0xff] }
  0x7a   : > { %592 = vst [vmem:[%s3418_s27 + $0x680] sm:$0xff] %v591_v16  ;;  %594 = vst [vmem:[%s3418_s27 + $0x688] sm:$0xff] %v593_v17  ;;  %v597_v19 = vld [vmem:[%s3413_s26 + $0xd18] sm:$0xff]  ;;  %v599_v20 = vld [vmem:[%s3413_s26 + $0xd20] sm:$0xff] }
  0x7b   : > { %596 = vst [vmem:[%s3418_s27 + $0x690] sm:$0xff] %v595_v18  ;;  %598 = vst [vmem:[%s3418_s27 + $0x698] sm:$0xff] %v597_v19  ;;  %v601_v21 = vld [vmem:[%s3413_s26 + $0xd28] sm:$0xff]  ;;  %v603_v22 = vld [vmem:[%s3413_s26 + $0xd30] sm:$0xff] }
  0x7c   : > { %600 = vst [vmem:[%s3418_s27 + $0x6a0] sm:$0xff] %v599_v20  ;;  %v605_v23 = vld [vmem:[%s3413_s26 + $0xd38] sm:$0xff]  ;;  %602 = vst [vmem:[%s3418_s27 + $0x6a8] sm:$0xff] %v601_v21  ;;  %v607_v24 = vld [vmem:[%s3413_s26 + $0xd80] sm:$0xff] }
  0x7d   : > { %604 = vst [vmem:[%s3418_s27 + $0x6b0] sm:$0xff] %v603_v22  ;;  %606 = vst [vmem:[%s3418_s27 + $0x6b8] sm:$0xff] %v605_v23  ;;  %v609_v25 = vld [vmem:[%s3413_s26 + $0xd88] sm:$0xff]  ;;  %v611_v26 = vld [vmem:[%s3413_s26 + $0xd90] sm:$0xff] }
  0x7e   : > { %608 = vst [vmem:[%s3418_s27 + $0x6c0] sm:$0xff] %v607_v24  ;;  %610 = vst [vmem:[%s3418_s27 + $0x6c8] sm:$0xff] %v609_v25  ;;  %v613_v27 = vld [vmem:[%s3413_s26 + $0xd98] sm:$0xff]  ;;  %v615_v28 = vld [vmem:[%s3413_s26 + $0xda0] sm:$0xff] }
  0x7f   : > { %612 = vst [vmem:[%s3418_s27 + $0x6d0] sm:$0xff] %v611_v26  ;;  %v617_v29 = vld [vmem:[%s3413_s26 + $0xda8] sm:$0xff]  ;;  %614 = vst [vmem:[%s3418_s27 + $0x6d8] sm:$0xff] %v613_v27  ;;  %v619_v30 = vld [vmem:[%s3413_s26 + $0xdb0] sm:$0xff] }
  0x80   : > { %616 = vst [vmem:[%s3418_s27 + $0x6e0] sm:$0xff] %v615_v28  ;;  %618 = vst [vmem:[%s3418_s27 + $0x6e8] sm:$0xff] %v617_v29  ;;  %v621_v31 = vld [vmem:[%s3413_s26 + $0xdb8] sm:$0xff]  ;;  %v623_v32 = vld [vmem:[%s3413_s26 + $0xe00] sm:$0xff] }
  0x81   : > { %620 = vst [vmem:[%s3418_s27 + $0x6f0] sm:$0xff] %v619_v30  ;;  %622 = vst [vmem:[%s3418_s27 + $0x6f8] sm:$0xff] %v621_v31  ;;  %v625_v33 = vld [vmem:[%s3413_s26 + $0xe08] sm:$0xff]  ;;  %v627_v34 = vld [vmem:[%s3413_s26 + $0xe10] sm:$0xff] }
  0x82   : > { %624 = vst [vmem:[%s3418_s27 + $0x700] sm:$0xff] %v623_v32  ;;  %v629_v35 = vld [vmem:[%s3413_s26 + $0xe18] sm:$0xff]  ;;  %626 = vst [vmem:[%s3418_s27 + $0x708] sm:$0xff] %v625_v33  ;;  %v631_v36 = vld [vmem:[%s3413_s26 + $0xe20] sm:$0xff] }
  0x83   : > { %628 = vst [vmem:[%s3418_s27 + $0x710] sm:$0xff] %v627_v34  ;;  %630 = vst [vmem:[%s3418_s27 + $0x718] sm:$0xff] %v629_v35  ;;  %v633_v37 = vld [vmem:[%s3413_s26 + $0xe28] sm:$0xff]  ;;  %v635_v38 = vld [vmem:[%s3413_s26 + $0xe30] sm:$0xff] }
  0x84   : > { %632 = vst [vmem:[%s3418_s27 + $0x720] sm:$0xff] %v631_v36  ;;  %634 = vst [vmem:[%s3418_s27 + $0x728] sm:$0xff] %v633_v37  ;;  %v637_v39 = vld [vmem:[%s3413_s26 + $0xe38] sm:$0xff]  ;;  %v639_v40 = vld [vmem:[%s3413_s26 + $0xe80] sm:$0xff] }
  0x85   : > { %636 = vst [vmem:[%s3418_s27 + $0x730] sm:$0xff] %v635_v38  ;;  %v641_v41 = vld [vmem:[%s3413_s26 + $0xe88] sm:$0xff]  ;;  %638 = vst [vmem:[%s3418_s27 + $0x738] sm:$0xff] %v637_v39  ;;  %v643_v42 = vld [vmem:[%s3413_s26 + $0xe90] sm:$0xff] }
  0x86   : > { %640 = vst [vmem:[%s3418_s27 + $0x740] sm:$0xff] %v639_v40  ;;  %642 = vst [vmem:[%s3418_s27 + $0x748] sm:$0xff] %v641_v41  ;;  %v645_v43 = vld [vmem:[%s3413_s26 + $0xe98] sm:$0xff]  ;;  %v647_v44 = vld [vmem:[%s3413_s26 + $0xea0] sm:$0xff] }
  0x87   : > { %644 = vst [vmem:[%s3418_s27 + $0x750] sm:$0xff] %v643_v42  ;;  %646 = vst [vmem:[%s3418_s27 + $0x758] sm:$0xff] %v645_v43  ;;  %v649_v45 = vld [vmem:[%s3413_s26 + $0xea8] sm:$0xff]  ;;  %v651_v46 = vld [vmem:[%s3413_s26 + $0xeb0] sm:$0xff] }
  0x88   : > { %648 = vst [vmem:[%s3418_s27 + $0x760] sm:$0xff] %v647_v44  ;;  %v653_v47 = vld [vmem:[%s3413_s26 + $0xeb8] sm:$0xff]  ;;  %650 = vst [vmem:[%s3418_s27 + $0x768] sm:$0xff] %v649_v45  ;;  %v655_v48 = vld [vmem:[%s3413_s26 + $0xf00] sm:$0xff] }
  0x89   : > { %652 = vst [vmem:[%s3418_s27 + $0x770] sm:$0xff] %v651_v46  ;;  %654 = vst [vmem:[%s3418_s27 + $0x778] sm:$0xff] %v653_v47  ;;  %v657_v49 = vld [vmem:[%s3413_s26 + $0xf08] sm:$0xff]  ;;  %v659_v50 = vld [vmem:[%s3413_s26 + $0xf10] sm:$0xff] }
  0x8a   : > { %656 = vst [vmem:[%s3418_s27 + $0x780] sm:$0xff] %v655_v48  ;;  %658 = vst [vmem:[%s3418_s27 + $0x788] sm:$0xff] %v657_v49  ;;  %v661_v51 = vld [vmem:[%s3413_s26 + $0xf18] sm:$0xff]  ;;  %v663_v52 = vld [vmem:[%s3413_s26 + $0xf20] sm:$0xff] }
  0x8b   : > { %660 = vst [vmem:[%s3418_s27 + $0x790] sm:$0xff] %v659_v50  ;;  %v665_v53 = vld [vmem:[%s3413_s26 + $0xf28] sm:$0xff]  ;;  %662 = vst [vmem:[%s3418_s27 + $0x798] sm:$0xff] %v661_v51  ;;  %v667_v54 = vld [vmem:[%s3413_s26 + $0xf30] sm:$0xff] }
  0x8c   : > { %664 = vst [vmem:[%s3418_s27 + $0x7a0] sm:$0xff] %v663_v52  ;;  %666 = vst [vmem:[%s3418_s27 + $0x7a8] sm:$0xff] %v665_v53  ;;  %v669_v55 = vld [vmem:[%s3413_s26 + $0xf38] sm:$0xff]  ;;  %v671_v56 = vld [vmem:[%s3413_s26 + $0xf80] sm:$0xff] }
  0x8d   : > { %668 = vst [vmem:[%s3418_s27 + $0x7b0] sm:$0xff] %v667_v54  ;;  %670 = vst [vmem:[%s3418_s27 + $0x7b8] sm:$0xff] %v669_v55  ;;  %v673_v57 = vld [vmem:[%s3413_s26 + $0xf88] sm:$0xff]  ;;  %v675_v58 = vld [vmem:[%s3413_s26 + $0xf90] sm:$0xff] }
  0x8e   : > { %672 = vst [vmem:[%s3418_s27 + $0x7c0] sm:$0xff] %v671_v56  ;;  %v677_v59 = vld [vmem:[%s3413_s26 + $0xf98] sm:$0xff]  ;;  %674 = vst [vmem:[%s3418_s27 + $0x7c8] sm:$0xff] %v673_v57  ;;  %v679_v60 = vld [vmem:[%s3413_s26 + $0xfa0] sm:$0xff] }
  0x8f   : > { %676 = vst [vmem:[%s3418_s27 + $0x7d0] sm:$0xff] %v675_v58  ;;  %678 = vst [vmem:[%s3418_s27 + $0x7d8] sm:$0xff] %v677_v59  ;;  %v681_v61 = vld [vmem:[%s3413_s26 + $0xfa8] sm:$0xff]  ;;  %v683_v62 = vld [vmem:[%s3413_s26 + $0xfb0] sm:$0xff] }
  0x90   : > { %680 = vst [vmem:[%s3418_s27 + $0x7e0] sm:$0xff] %v679_v60  ;;  %682 = vst [vmem:[%s3418_s27 + $0x7e8] sm:$0xff] %v681_v61  ;;  %v685_v63 = vld [vmem:[%s3413_s26 + $0xfb8] sm:$0xff] }
  0x91   : > { %684 = vst [vmem:[%s3418_s27 + $0x7f0] sm:$0xff] %v683_v62  ;;  %686 = vst [vmem:[%s3418_s27 + $0x7f8] sm:$0xff] %v685_v63 }
  0x92 PF: > { %p2996_p6 = scmp.ge.s32.totalorder %s3347_s16, 1  ;;  %p699_p7 = scmp.lt.s32.totalorder %s3347_s16, 3 }
  0x94   : > { %p700_p8 = pnand %p2996_p6, %p699_p7 }
  0x95   : > { %s706_s28 = sand.u32 (!%p700_p8), 1, %s3331_s12   ;;  %v1020_v0 = vlaneseq (!%p700_p8)  ;;  %v3935_v1 = vld.sshfl [vmem:[%s4295_s0] sm:$0x11 pattern:$0x75316420] (!%p700_p8)  ;;  %s2998_s6 = sshll.u32 (!%p700_p8), %s3339_s14, 4 }
  0x96   : > { %703 = sbr.rel (%p700_p8) target bundleno = 640 (0x280), region = 51  ;;  %s2997_s29 = sshll.u32 (!%p700_p8), %s706_s28, 11  ;;  %v3349_v3 = vmov (!%p700_p8), 1966171168   ;;  %v1108_v24 = vcombine.high (!%p700_p8), %v3935_v1, %v3935_v1 }
  0x97   : > { %v3937_v2 = vshrl.u32 (!%p700_p8), %v1020_v0, 7  ;;  %v1110_v4 = vunpack.c.l.s4 (!%p700_p8), %v3349_v3  ;;  %s3939_s5 = scalar_lea.vmem (!%p700_p8), [#allocation2], %s2997_s29  ;;  %p746_p9 = scmp.lt.s32.totalorder (!%p700_p8), %s2998_s6, 31 }
  0x98   : > { %v760_v5 = vld [vmem:[%s3939_s5] sm:$0xff] (!%p700_p8)  ;;  %v761_v7 = vld [vmem:[%s3939_s5 + $0x8] sm:$0xff] (!%p700_p8) }
  0x99   : > { %v768_v6 = vld [vmem:[%s3939_s5 + $0x40] sm:$0xff] (!%p700_p8)  ;;  %v769_v9 = vld [vmem:[%s3939_s5 + $0x48] sm:$0xff] (!%p700_p8)  ;;  %v1111_v13 = vunpack.c.0.s8 (!%p700_p8), %v1110_v4 }
  0x9a   : > { %v3002_v8 = vcombine.high (!%p700_p8), %v760_v5, %v768_v6  ;;  %v3001_v10 = vcombine.low (!%p700_p8), %v760_v5, %v768_v6  ;;  %v776_v11 = vld [vmem:[%s3939_s5 + $0x80] sm:$0xff] (!%p700_p8)  ;;  %v3004_v14 = vcombine.high (!%p700_p8), %v761_v7, %v769_v9  ;;  %v3003_v15 = vcombine.low (!%p700_p8), %v761_v7, %v769_v9  ;;  %v777_v17 = vld [vmem:[%s3939_s5 + $0x88] sm:$0xff] (!%p700_p8) }
  0x9b   : > { %v784_v12 = vld [vmem:[%s3939_s5 + $0xc0] sm:$0xff] (!%p700_p8)  ;;  %v785_v18 = vld [vmem:[%s3939_s5 + $0xc8] sm:$0xff] (!%p700_p8)  ;;  %v3956_v25 = vsub.s32 (!%p700_p8), %v1111_v13, %v3937_v2 }
  0x9c   : > { %v3018_v16 = vcombine.high (!%p700_p8), %v776_v11, %v784_v12  ;;  %v792_v19 = vld [vmem:[%s3939_s5 + $0x100] sm:$0xff] (!%p700_p8)  ;;  %2405 = vmatprep.subr.bf16.mxu0 (!%p700_p8), %v3002_v8  ;;  %v3020_v20 = vcombine.high (!%p700_p8), %v777_v17, %v785_v18  ;;  %v793_v22 = vld [vmem:[%s3939_s5 + $0x108] sm:$0xff] (!%p700_p8)  ;;  %2446 = vmatprep.subr.bf16.mxu1 (!%p700_p8), %v3004_v14  ;;  %v3017_v26 = vcombine.low (!%p700_p8), %v776_v11, %v784_v12 }
  0x9d   : > { %v800_v21 = vld [vmem:[%s3939_s5 + $0x140] sm:$0xff]  ;;  %v801_v23 = vld [vmem:[%s3939_s5 + $0x148] sm:$0xff]  ;;  %2406 = vmatpush1.bf16.msra.mxu0 %v3001_v10  ;;  %2447 = vmatpush1.bf16.msra.mxu1 %v3003_v15  ;;  %v3019_v27 = vcombine.low %v777_v17, %v785_v18  ;;  %v3963_v34 = vrot.slane %v1108_v24, %v3956_v25  ;;  %s4306_s6 = smov (!%p746_p9, %s2998_s6), 31 }
  0x9e   : > { %2407 = vmatprep.subr.bf16.mxu0 %v3018_v16  ;;  %v3034_v28 = vcombine.high %v792_v19, %v800_v21  ;;  %2448 = vmatprep.subr.bf16.mxu1 %v3020_v20  ;;  %v3036_v29 = vcombine.high %v793_v22, %v801_v23  ;;  %v808_v30 = vld [vmem:[%s3939_s5 + $0x180] sm:$0xff]  ;;  %v809_v32 = vld [vmem:[%s3939_s5 + $0x188] sm:$0xff]  ;;  %v3033_v35 = vcombine.low %v792_v19, %v800_v21  ;;  %s4232_s9 = scalar_lea.vmem %s4297_s2, %s4306_s6  ;;  %s4261_s12 = scalar_lea.vmem %s4298_s3, %s4306_s6 }
  0x9f   : > { %v816_v31 = vld [vmem:[%s3939_s5 + $0x1c0] sm:$0xff]  ;;  %v817_v33 = vld [vmem:[%s3939_s5 + $0x1c8] sm:$0xff]  ;;  %v3035_v36 = vcombine.low %v793_v22, %v801_v23  ;;  %2437 = vmatprep.mubr.bf16.mxu0 %v3963_v34  ;;  %2478 = vmatprep.mubr.bf16.mxu1 %v3963_v34 }
  0xa0   : > { %v3050_v37 = vcombine.high %v808_v30, %v816_v31  ;;  %v3052_v38 = vcombine.high %v809_v32, %v817_v33  ;;  %v824_v39 = vld [vmem:[%s3939_s5 + $0x200] sm:$0xff]  ;;  %v825_v41 = vld [vmem:[%s3939_s5 + $0x208] sm:$0xff]  ;;  %v3049_v43 = vcombine.low %v808_v30, %v816_v31  ;;  %v3051_v44 = vcombine.low %v809_v32, %v817_v33 }
  0xa1   : > { %2408 = vmatpush1.bf16.msra.mxu0 %v3017_v26  ;;  %2449 = vmatpush1.bf16.msra.mxu1 %v3019_v27  ;;  %v832_v40 = vld [vmem:[%s3939_s5 + $0x240] sm:$0xff]  ;;  %v833_v42 = vld [vmem:[%s3939_s5 + $0x248] sm:$0xff] }
  0xa2   : > { %2409 = vmatprep.subr.bf16.mxu0 %v3034_v28  ;;  %2450 = vmatprep.subr.bf16.mxu1 %v3036_v29  ;;  %v3066_v45 = vcombine.high %v824_v39, %v832_v40  ;;  %v3068_v46 = vcombine.high %v825_v41, %v833_v42  ;;  %v840_v47 = vld [vmem:[%s3939_s5 + $0x280] sm:$0xff]  ;;  %v841_v49 = vld [vmem:[%s3939_s5 + $0x288] sm:$0xff]  ;;  %v3065_v51 = vcombine.low %v824_v39, %v832_v40 }
  0xa3   : > { %v848_v48 = vld [vmem:[%s3939_s5 + $0x2c0] sm:$0xff]  ;;  %v849_v50 = vld [vmem:[%s3939_s5 + $0x2c8] sm:$0xff]  ;;  %v3067_v52 = vcombine.low %v825_v41, %v833_v42 }
  0xa4   : > { %v3082_v53 = vcombine.high %v840_v47, %v848_v48  ;;  %v3084_v54 = vcombine.high %v841_v49, %v849_v50  ;;  %v856_v55 = vld [vmem:[%s3939_s5 + $0x300] sm:$0xff]  ;;  %v857_v57 = vld [vmem:[%s3939_s5 + $0x308] sm:$0xff]  ;;  %v3081_v59 = vcombine.low %v840_v47, %v848_v48  ;;  %v3083_v60 = vcombine.low %v841_v49, %v849_v50 }
  0xa5   : > { %2410 = vmatpush1.bf16.msra.mxu0 %v3033_v35  ;;  %2451 = vmatpush1.bf16.msra.mxu1 %v3035_v36  ;;  %v864_v56 = vld [vmem:[%s3939_s5 + $0x340] sm:$0xff]  ;;  %v865_v58 = vld [vmem:[%s3939_s5 + $0x348] sm:$0xff] }
  0xa6   : > { %2411 = vmatprep.subr.bf16.mxu0 %v3050_v37  ;;  %2452 = vmatprep.subr.bf16.mxu1 %v3052_v38  ;;  %v3098_v61 = vcombine.high %v856_v55, %v864_v56  ;;  %v3100_v62 = vcombine.high %v857_v57, %v865_v58  ;;  %v872_v63 = vld [vmem:[%s3939_s5 + $0x380] sm:$0xff]  ;;  %v873_v3 = vld [vmem:[%s3939_s5 + $0x388] sm:$0xff]  ;;  %v3097_v5 = vcombine.low %v856_v55, %v864_v56 }
  0xa7   : > { %v880_v0 = vld [vmem:[%s3939_s5 + $0x3c0] sm:$0xff]  ;;  %v881_v4 = vld [vmem:[%s3939_s5 + $0x3c8] sm:$0xff]  ;;  %v3099_v6 = vcombine.low %v857_v57, %v865_v58 }
  0xa8   : > { %v3114_v7 = vcombine.high %v872_v63, %v880_v0  ;;  %v3116_v8 = vcombine.high %v873_v3, %v881_v4  ;;  %v888_v9 = vld [vmem:[%s3939_s5 + $0x400] sm:$0xff]  ;;  %v889_v11 = vld [vmem:[%s3939_s5 + $0x408] sm:$0xff]  ;;  %v3113_v13 = vcombine.low %v872_v63, %v880_v0  ;;  %v3115_v14 = vcombine.low %v873_v3, %v881_v4 }
  0xa9   : > { %2412 = vmatpush1.bf16.msra.mxu0 %v3049_v43  ;;  %2453 = vmatpush1.bf16.msra.mxu1 %v3051_v44  ;;  %v896_v10 = vld [vmem:[%s3939_s5 + $0x440] sm:$0xff]  ;;  %v897_v12 = vld [vmem:[%s3939_s5 + $0x448] sm:$0xff] }
  0xaa   : > { %2413 = vmatprep.subr.bf16.mxu0 %v3066_v45  ;;  %2454 = vmatprep.subr.bf16.mxu1 %v3068_v46  ;;  %v3130_v15 = vcombine.high %v888_v9, %v896_v10  ;;  %v3132_v16 = vcombine.high %v889_v11, %v897_v12  ;;  %v904_v17 = vld [vmem:[%s3939_s5 + $0x480] sm:$0xff]  ;;  %v905_v19 = vld [vmem:[%s3939_s5 + $0x488] sm:$0xff]  ;;  %v3129_v21 = vcombine.low %v888_v9, %v896_v10 }
  0xab   : > { %v912_v18 = vld [vmem:[%s3939_s5 + $0x4c0] sm:$0xff]  ;;  %v913_v20 = vld [vmem:[%s3939_s5 + $0x4c8] sm:$0xff]  ;;  %v3131_v22 = vcombine.low %v889_v11, %v897_v12 }
  0xac   : > { %v3146_v23 = vcombine.high %v904_v17, %v912_v18  ;;  %v3148_v24 = vcombine.high %v905_v19, %v913_v20  ;;  %v920_v26 = vld [vmem:[%s3939_s5 + $0x500] sm:$0xff]  ;;  %v921_v28 = vld [vmem:[%s3939_s5 + $0x508] sm:$0xff]  ;;  %v3145_v30 = vcombine.low %v904_v17, %v912_v18  ;;  %v3147_v31 = vcombine.low %v905_v19, %v913_v20 }
  0xad   : > { %2414 = vmatpush1.bf16.msra.mxu0 %v3065_v51  ;;  %2455 = vmatpush1.bf16.msra.mxu1 %v3067_v52  ;;  %v928_v27 = vld [vmem:[%s3939_s5 + $0x540] sm:$0xff]  ;;  %v929_v29 = vld [vmem:[%s3939_s5 + $0x548] sm:$0xff] }
  0xae   : > { %2415 = vmatprep.subr.bf16.mxu0 %v3082_v53  ;;  %2456 = vmatprep.subr.bf16.mxu1 %v3084_v54  ;;  %v3162_v32 = vcombine.high %v920_v26, %v928_v27  ;;  %v3164_v33 = vcombine.high %v921_v28, %v929_v29  ;;  %v936_v35 = vld [vmem:[%s3939_s5 + $0x580] sm:$0xff]  ;;  %v937_v37 = vld [vmem:[%s3939_s5 + $0x588] sm:$0xff]  ;;  %v3161_v39 = vcombine.low %v920_v26, %v928_v27  ;;  %v787_v26 = vld [vmem:[%s3939_s5 + $0xd8] sm:$0xff] }
  0xaf   : > { %v944_v36 = vld [vmem:[%s3939_s5 + $0x5c0] sm:$0xff]  ;;  %v945_v38 = vld [vmem:[%s3939_s5 + $0x5c8] sm:$0xff]  ;;  %v3163_v40 = vcombine.low %v921_v28, %v929_v29 }
  0xb0   : > { %v3178_v41 = vcombine.high %v936_v35, %v944_v36  ;;  %v3180_v42 = vcombine.high %v937_v37, %v945_v38  ;;  %v952_v43 = vld [vmem:[%s3939_s5 + $0x600] sm:$0xff]  ;;  %v953_v45 = vld [vmem:[%s3939_s5 + $0x608] sm:$0xff]  ;;  %v3177_v47 = vcombine.low %v936_v35, %v944_v36  ;;  %v3179_v48 = vcombine.low %v937_v37, %v945_v38 }
  0xb1   : > { %2416 = vmatpush1.bf16.msra.mxu0 %v3081_v59  ;;  %2457 = vmatpush1.bf16.msra.mxu1 %v3083_v60  ;;  %v960_v44 = vld [vmem:[%s3939_s5 + $0x640] sm:$0xff]  ;;  %v961_v46 = vld [vmem:[%s3939_s5 + $0x648] sm:$0xff] }
  0xb2   : > { %2417 = vmatprep.subr.bf16.mxu0 %v3098_v61  ;;  %2458 = vmatprep.subr.bf16.mxu1 %v3100_v62  ;;  %v3194_v49 = vcombine.high %v952_v43, %v960_v44  ;;  %v3196_v50 = vcombine.high %v953_v45, %v961_v46  ;;  %v968_v51 = vld [vmem:[%s3939_s5 + $0x680] sm:$0xff]  ;;  %v969_v53 = vld [vmem:[%s3939_s5 + $0x688] sm:$0xff]  ;;  %v3193_v55 = vcombine.low %v952_v43, %v960_v44 }
  0xb3   : > { %v976_v52 = vld [vmem:[%s3939_s5 + $0x6c0] sm:$0xff]  ;;  %v977_v54 = vld [vmem:[%s3939_s5 + $0x6c8] sm:$0xff]  ;;  %v3195_v56 = vcombine.low %v953_v45, %v961_v46 }
  0xb4   : > { %v3210_v57 = vcombine.high %v968_v51, %v976_v52  ;;  %v3212_v58 = vcombine.high %v969_v53, %v977_v54  ;;  %v984_v59 = vld [vmem:[%s3939_s5 + $0x700] sm:$0xff]  ;;  %v985_v61 = vld [vmem:[%s3939_s5 + $0x708] sm:$0xff]  ;;  %v3209_v63 = vcombine.low %v968_v51, %v976_v52  ;;  %v3211_v0 = vcombine.low %v969_v53, %v977_v54 }
  0xb5   : > { %2418 = vmatpush1.bf16.msra.mxu0 %v3097_v5  ;;  %2459 = vmatpush1.bf16.msra.mxu1 %v3099_v6  ;;  %v992_v60 = vld [vmem:[%s3939_s5 + $0x740] sm:$0xff]  ;;  %v993_v62 = vld [vmem:[%s3939_s5 + $0x748] sm:$0xff] }
  0xb6   : > { %2419 = vmatprep.subr.bf16.mxu0 %v3114_v7  ;;  %2460 = vmatprep.subr.bf16.mxu1 %v3116_v8  ;;  %v3226_v3 = vcombine.high %v984_v59, %v992_v60  ;;  %v3228_v4 = vcombine.high %v985_v61, %v993_v62  ;;  %v1000_v5 = vld [vmem:[%s3939_s5 + $0x780] sm:$0xff]  ;;  %v1001_v7 = vld [vmem:[%s3939_s5 + $0x788] sm:$0xff]  ;;  %v3225_v9 = vcombine.low %v984_v59, %v992_v60 }
  0xb7   : > { %v1008_v6 = vld [vmem:[%s3939_s5 + $0x7c0] sm:$0xff]  ;;  %v1009_v8 = vld [vmem:[%s3939_s5 + $0x7c8] sm:$0xff]  ;;  %v3227_v10 = vcombine.low %v985_v61, %v993_v62 }
  0xb8   : > { %v3242_v11 = vcombine.high %v1000_v5, %v1008_v6  ;;  %v3244_v12 = vcombine.high %v1001_v7, %v1009_v8  ;;  %v3241_v17 = vcombine.low %v1000_v5, %v1008_v6  ;;  %v3243_v18 = vcombine.low %v1001_v7, %v1009_v8 }
  0xb9   : > { %2420 = vmatpush1.bf16.msra.mxu0 %v3113_v13  ;;  %2461 = vmatpush1.bf16.msra.mxu1 %v3115_v14  ;;  %v762_v13 = vld [vmem:[%s3939_s5 + $0x10] sm:$0xff] }
  0xba   : > { %2421 = vmatprep.subr.bf16.mxu0 %v3130_v15  ;;  %2462 = vmatprep.subr.bf16.mxu1 %v3132_v16  ;;  %v770_v14 = vld [vmem:[%s3939_s5 + $0x50] sm:$0xff]  ;;  %v763_v15 = vld [vmem:[%s3939_s5 + $0x18] sm:$0xff] }
  0xbb   : > { %v771_v16 = vld [vmem:[%s3939_s5 + $0x58] sm:$0xff]  ;;  %v3006_v19 = vcombine.high %v762_v13, %v770_v14  ;;  %v3005_v27 = vcombine.low %v762_v13, %v770_v14 }
  0xbc   : > { %v3008_v20 = vcombine.high %v763_v15, %v771_v16  ;;  %v3007_v28 = vcombine.low %v763_v15, %v771_v16 }
  0xbd   : > { %2422 = vmatpush1.bf16.msra.mxu0 %v3129_v21  ;;  %2463 = vmatpush1.bf16.msra.mxu1 %v3131_v22  ;;  %v778_v21 = vld [vmem:[%s3939_s5 + $0x90] sm:$0xff] }
  0xbe   : > { %2423 = vmatprep.subr.bf16.mxu0 %v3146_v23  ;;  %2464 = vmatprep.subr.bf16.mxu1 %v3148_v24  ;;  %v786_v22 = vld [vmem:[%s3939_s5 + $0xd0] sm:$0xff]  ;;  %v4023_v23 = vrot.slane %v3935_v1, %v3956_v25  ;;  %v779_v24 = vld [vmem:[%s3939_s5 + $0x98] sm:$0xff] }
  0xbf   : > { %v3022_v29 = vcombine.high %v778_v21, %v786_v22  ;;  %v795_v1 = vld [vmem:[%s3939_s5 + $0x118] sm:$0xff]  ;;  %v3021_v35 = vcombine.low %v778_v21, %v786_v22  ;;  %v3023_v36 = vcombine.low %v779_v24, %v787_v26 }
  0xc1   : > { %2424 = vmatpush1.bf16.msra.mxu0 %v3145_v30  ;;  %2465 = vmatpush1.bf16.msra.mxu1 %v3147_v31  ;;  %v3024_v30 = vcombine.high %v779_v24, %v787_v26  ;;  %v794_v31 = vld [vmem:[%s3939_s5 + $0x110] sm:$0xff] }
  0xc2   : > { %2425 = vmatprep.subr.bf16.mxu0 %v3162_v32  ;;  %2466 = vmatprep.subr.bf16.mxu1 %v3164_v33  ;;  %v802_v32 = vld [vmem:[%s3939_s5 + $0x150] sm:$0xff]  ;;  %v803_v33 = vld [vmem:[%s3939_s5 + $0x158] sm:$0xff] }
  0xc3   : > { %v3038_v37 = vcombine.high %v794_v31, %v802_v32  ;;  %v3040_v38 = vcombine.high %v795_v1, %v803_v33  ;;  %v3037_v43 = vcombine.low %v794_v31, %v802_v32  ;;  %v3039_v44 = vcombine.low %v795_v1, %v803_v33 }
  0xc5   : > { %2426 = vmatpush1.bf16.msra.mxu0 %v3161_v39  ;;  %2467 = vmatpush1.bf16.msra.mxu1 %v3163_v40  ;;  %v810_v39 = vld [vmem:[%s3939_s5 + $0x190] sm:$0xff] }
  0xc6   : > { %2427 = vmatprep.subr.bf16.mxu0 %v3178_v41  ;;  %2468 = vmatprep.subr.bf16.mxu1 %v3180_v42  ;;  %v818_v40 = vld [vmem:[%s3939_s5 + $0x1d0] sm:$0xff]  ;;  %v811_v41 = vld [vmem:[%s3939_s5 + $0x198] sm:$0xff] }
  0xc7   : > { %v819_v42 = vld [vmem:[%s3939_s5 + $0x1d8] sm:$0xff]  ;;  %v3054_v45 = vcombine.high %v810_v39, %v818_v40  ;;  %v3053_v51 = vcombine.low %v810_v39, %v818_v40 }
  0xc8   : > { %v3056_v46 = vcombine.high %v811_v41, %v819_v42  ;;  %v3055_v52 = vcombine.low %v811_v41, %v819_v42 }
  0xc9   : > { %2428 = vmatpush1.bf16.msra.mxu0 %v3177_v47  ;;  %2469 = vmatpush1.bf16.msra.mxu1 %v3179_v48  ;;  %v826_v47 = vld [vmem:[%s3939_s5 + $0x210] sm:$0xff] }
  0xca   : > { %2429 = vmatprep.subr.bf16.mxu0 %v3194_v49  ;;  %2470 = vmatprep.subr.bf16.mxu1 %v3196_v50  ;;  %v834_v48 = vld [vmem:[%s3939_s5 + $0x250] sm:$0xff]  ;;  %v827_v49 = vld [vmem:[%s3939_s5 + $0x218] sm:$0xff] }
  0xcb   : > { %v835_v50 = vld [vmem:[%s3939_s5 + $0x258] sm:$0xff]  ;;  %v3070_v53 = vcombine.high %v826_v47, %v834_v48  ;;  %v3069_v59 = vcombine.low %v826_v47, %v834_v48 }
  0xcc   : > { %v3072_v54 = vcombine.high %v827_v49, %v835_v50  ;;  %v3071_v60 = vcombine.low %v827_v49, %v835_v50 }
  0xcd   : > { %2430 = vmatpush1.bf16.msra.mxu0 %v3193_v55  ;;  %2471 = vmatpush1.bf16.msra.mxu1 %v3195_v56  ;;  %v842_v55 = vld [vmem:[%s3939_s5 + $0x290] sm:$0xff] }
  0xce   : > { %2431 = vmatprep.subr.bf16.mxu0 %v3210_v57  ;;  %2472 = vmatprep.subr.bf16.mxu1 %v3212_v58  ;;  %v850_v56 = vld [vmem:[%s3939_s5 + $0x2d0] sm:$0xff]  ;;  %v843_v57 = vld [vmem:[%s3939_s5 + $0x298] sm:$0xff] }
  0xcf   : > { %v851_v58 = vld [vmem:[%s3939_s5 + $0x2d8] sm:$0xff]  ;;  %v3086_v61 = vcombine.high %v842_v55, %v850_v56  ;;  %v3085_v5 = vcombine.low %v842_v55, %v850_v56 }
  0xd0   : > { %v3088_v62 = vcombine.high %v843_v57, %v851_v58  ;;  %v3087_v6 = vcombine.low %v843_v57, %v851_v58 }
  0xd1   : > { %2432 = vmatpush1.bf16.msra.mxu0 %v3209_v63  ;;  %2473 = vmatpush1.bf16.msra.mxu1 %v3211_v0  ;;  %v858_v63 = vld [vmem:[%s3939_s5 + $0x310] sm:$0xff] }
  0xd2   : > { %2433 = vmatprep.subr.bf16.mxu0 %v3226_v3  ;;  %2474 = vmatprep.subr.bf16.mxu1 %v3228_v4  ;;  %v866_v0 = vld [vmem:[%s3939_s5 + $0x350] sm:$0xff]  ;;  %v859_v3 = vld [vmem:[%s3939_s5 + $0x318] sm:$0xff] }
  0xd3   : > { %v867_v4 = vld [vmem:[%s3939_s5 + $0x358] sm:$0xff]  ;;  %v3102_v7 = vcombine.high %v858_v63, %v866_v0  ;;  %v3101_v13 = vcombine.low %v858_v63, %v866_v0 }
  0xd4   : > { %v3104_v8 = vcombine.high %v859_v3, %v867_v4  ;;  %v3103_v14 = vcombine.low %v859_v3, %v867_v4 }
  0xd5   : > { %2434 = vmatpush1.bf16.msra.mxu0 %v3225_v9  ;;  %2475 = vmatpush1.bf16.msra.mxu1 %v3227_v10  ;;  %v874_v9 = vld [vmem:[%s3939_s5 + $0x390] sm:$0xff] }
  0xd6   : > { %2435 = vmatprep.subr.bf16.mxu0 %v3242_v11  ;;  %2476 = vmatprep.subr.bf16.mxu1 %v3244_v12  ;;  %v882_v10 = vld [vmem:[%s3939_s5 + $0x3d0] sm:$0xff]  ;;  %v875_v11 = vld [vmem:[%s3939_s5 + $0x398] sm:$0xff] }
  0xd7   : > { %v883_v12 = vld [vmem:[%s3939_s5 + $0x3d8] sm:$0xff]  ;;  %v3118_v15 = vcombine.high %v874_v9, %v882_v10  ;;  %v3117_v21 = vcombine.low %v874_v9, %v882_v10 }
  0xd8   : > { %v3120_v16 = vcombine.high %v875_v11, %v883_v12  ;;  %v3119_v22 = vcombine.low %v875_v11, %v883_v12 }
  0xd9   : > { %2436 = vmatpush1.bf16.msra.mxu0 %v3241_v17  ;;  %2477 = vmatpush1.bf16.msra.mxu1 %v3243_v18  ;;  %v890_v17 = vld [vmem:[%s3939_s5 + $0x410] sm:$0xff] }
  0xda   : > { %2487 = vmatprep.subr.bf16.mxu0 %v3006_v19  ;;  %2528 = vmatprep.subr.bf16.mxu1 %v3008_v20  ;;  %v898_v18 = vld [vmem:[%s3939_s5 + $0x450] sm:$0xff]  ;;  %v891_v19 = vld [vmem:[%s3939_s5 + $0x418] sm:$0xff] }
  0xdb   : > { %v899_v20 = vld [vmem:[%s3939_s5 + $0x458] sm:$0xff]  ;;  %v3134_v24 = vcombine.high %v890_v17, %v898_v18  ;;  %v3133_v31 = vcombine.low %v890_v17, %v898_v18 }
  0xdc   : > { %2438 = vmatmul.mubr.bf16.vlgmr.msra.gmra.mrb[0].mxu0 %v4023_v23  ;;  %2479 = vmatmul.mubr.bf16.vlgmr.msra.gmra.mrb[0].mxu1 %v4023_v23  ;;  %v3136_v26 = vcombine.high %v891_v19, %v899_v20  ;;  %v3135_v32 = vcombine.low %v891_v19, %v899_v20 }
  0xdd   : > { %2488 = vmatpush1.bf16.msra.mxu0 %v3005_v27  ;;  %2529 = vmatpush1.bf16.msra.mxu1 %v3007_v28  ;;  %v906_v27 = vld [vmem:[%s3939_s5 + $0x490] sm:$0xff] }
  0xde   : > { %2489 = vmatprep.subr.bf16.mxu0 %v3022_v29  ;;  %2530 = vmatprep.subr.bf16.mxu1 %v3024_v30  ;;  %v914_v28 = vld [vmem:[%s3939_s5 + $0x4d0] sm:$0xff]  ;;  %v907_v29 = vld [vmem:[%s3939_s5 + $0x498] sm:$0xff] }
  0xdf   : > { %2519 = vmatprep.mubr.bf16.mxu0 %v3963_v34  ;;  %2560 = vmatprep.mubr.bf16.mxu1 %v3963_v34  ;;  %v915_v30 = vld [vmem:[%s3939_s5 + $0x4d8] sm:$0xff]  ;;  %v3150_v1 = vcombine.high %v906_v27, %v914_v28  ;;  %v3149_v39 = vcombine.low %v906_v27, %v914_v28 }
  0xe0   : > { %v3152_v33 = vcombine.high %v907_v29, %v915_v30  ;;  %v3151_v40 = vcombine.low %v907_v29, %v915_v30 }
  0xe1   : > { %2490 = vmatpush1.bf16.msra.mxu0 %v3021_v35  ;;  %2531 = vmatpush1.bf16.msra.mxu1 %v3023_v36  ;;  %v922_v35 = vld [vmem:[%s3939_s5 + $0x510] sm:$0xff] }
  0xe2   : > { %2491 = vmatprep.subr.bf16.mxu0 %v3038_v37  ;;  %2532 = vmatprep.subr.bf16.mxu1 %v3040_v38  ;;  %v930_v36 = vld [vmem:[%s3939_s5 + $0x550] sm:$0xff]  ;;  %v923_v37 = vld [vmem:[%s3939_s5 + $0x518] sm:$0xff] }
  0xe3   : > { %v931_v38 = vld [vmem:[%s3939_s5 + $0x558] sm:$0xff]  ;;  %v3166_v41 = vcombine.high %v922_v35, %v930_v36  ;;  %v3165_v47 = vcombine.low %v922_v35, %v930_v36 }
  0xe4   : > { %v3168_v42 = vcombine.high %v923_v37, %v931_v38  ;;  %v3167_v48 = vcombine.low %v923_v37, %v931_v38 }
  0xe5   : > { %2492 = vmatpush1.bf16.msra.mxu0 %v3037_v43  ;;  %2533 = vmatpush1.bf16.msra.mxu1 %v3039_v44  ;;  %v938_v43 = vld [vmem:[%s3939_s5 + $0x590] sm:$0xff] }
  0xe6   : > { %2493 = vmatprep.subr.bf16.mxu0 %v3054_v45  ;;  %2534 = vmatprep.subr.bf16.mxu1 %v3056_v46  ;;  %v946_v44 = vld [vmem:[%s3939_s5 + $0x5d0] sm:$0xff]  ;;  %v939_v45 = vld [vmem:[%s3939_s5 + $0x598] sm:$0xff] }
  0xe7   : > { %v947_v46 = vld [vmem:[%s3939_s5 + $0x5d8] sm:$0xff]  ;;  %v3182_v49 = vcombine.high %v938_v43, %v946_v44  ;;  %v3181_v55 = vcombine.low %v938_v43, %v946_v44 }
  0xe8   : > { %v3184_v50 = vcombine.high %v939_v45, %v947_v46  ;;  %v3183_v56 = vcombine.low %v939_v45, %v947_v46 }
  0xe9   : > { %2494 = vmatpush1.bf16.msra.mxu0 %v3053_v51  ;;  %2535 = vmatpush1.bf16.msra.mxu1 %v3055_v52  ;;  %v954_v51 = vld [vmem:[%s3939_s5 + $0x610] sm:$0xff] }
  0xea   : > { %2495 = vmatprep.subr.bf16.mxu0 %v3070_v53  ;;  %2536 = vmatprep.subr.bf16.mxu1 %v3072_v54  ;;  %v962_v52 = vld [vmem:[%s3939_s5 + $0x650] sm:$0xff]  ;;  %v955_v53 = vld [vmem:[%s3939_s5 + $0x618] sm:$0xff] }
  0xeb   : > { %v963_v54 = vld [vmem:[%s3939_s5 + $0x658] sm:$0xff]  ;;  %v3198_v57 = vcombine.high %v954_v51, %v962_v52  ;;  %v3197_v63 = vcombine.low %v954_v51, %v962_v52 }
  0xec   : > { %v3200_v58 = vcombine.high %v955_v53, %v963_v54  ;;  %v3199_v0 = vcombine.low %v955_v53, %v963_v54 }
  0xed   : > { %2496 = vmatpush1.bf16.msra.mxu0 %v3069_v59  ;;  %2537 = vmatpush1.bf16.msra.mxu1 %v3071_v60  ;;  %v970_v59 = vld [vmem:[%s3939_s5 + $0x690] sm:$0xff] }
  0xee   : > { %2497 = vmatprep.subr.bf16.mxu0 %v3086_v61  ;;  %2538 = vmatprep.subr.bf16.mxu1 %v3088_v62  ;;  %v978_v60 = vld [vmem:[%s3939_s5 + $0x6d0] sm:$0xff]  ;;  %v971_v61 = vld [vmem:[%s3939_s5 + $0x698] sm:$0xff] }
  0xef   : > { %v979_v62 = vld [vmem:[%s3939_s5 + $0x6d8] sm:$0xff]  ;;  %v3214_v3 = vcombine.high %v970_v59, %v978_v60  ;;  %v3213_v9 = vcombine.low %v970_v59, %v978_v60 }
  0xf0   : > { %v3216_v4 = vcombine.high %v971_v61, %v979_v62  ;;  %v3215_v10 = vcombine.low %v971_v61, %v979_v62 }
  0xf1   : > { %2498 = vmatpush1.bf16.msra.mxu0 %v3085_v5  ;;  %2539 = vmatpush1.bf16.msra.mxu1 %v3087_v6  ;;  %v986_v5 = vld [vmem:[%s3939_s5 + $0x710] sm:$0xff] }
  0xf2   : > { %2499 = vmatprep.subr.bf16.mxu0 %v3102_v7  ;;  %2540 = vmatprep.subr.bf16.mxu1 %v3104_v8  ;;  %v994_v6 = vld [vmem:[%s3939_s5 + $0x750] sm:$0xff]  ;;  %v987_v7 = vld [vmem:[%s3939_s5 + $0x718] sm:$0xff] }
  0xf3   : > { %v995_v8 = vld [vmem:[%s3939_s5 + $0x758] sm:$0xff]  ;;  %v3230_v11 = vcombine.high %v986_v5, %v994_v6  ;;  %v3229_v17 = vcombine.low %v986_v5, %v994_v6 }
  0xf4   : > { %v3232_v12 = vcombine.high %v987_v7, %v995_v8  ;;  %v3231_v18 = vcombine.low %v987_v7, %v995_v8 }
  0xf5   : > { %2500 = vmatpush1.bf16.msra.mxu0 %v3101_v13  ;;  %2541 = vmatpush1.bf16.msra.mxu1 %v3103_v14  ;;  %v1002_v13 = vld [vmem:[%s3939_s5 + $0x790] sm:$0xff] }
  0xf6   : > { %2501 = vmatprep.subr.bf16.mxu0 %v3118_v15  ;;  %2542 = vmatprep.subr.bf16.mxu1 %v3120_v16  ;;  %v1010_v14 = vld [vmem:[%s3939_s5 + $0x7d0] sm:$0xff]  ;;  %v1003_v15 = vld [vmem:[%s3939_s5 + $0x798] sm:$0xff] }
  0xf7   : > { %v1011_v16 = vld [vmem:[%s3939_s5 + $0x7d8] sm:$0xff]  ;;  %v3246_v19 = vcombine.high %v1002_v13, %v1010_v14  ;;  %v3245_v27 = vcombine.low %v1002_v13, %v1010_v14 }
  0xf8   : > { %v3248_v20 = vcombine.high %v1003_v15, %v1011_v16  ;;  %v3247_v28 = vcombine.low %v1003_v15, %v1011_v16 }
  0xf9   : > { %2502 = vmatpush1.bf16.msra.mxu0 %v3117_v21  ;;  %2543 = vmatpush1.bf16.msra.mxu1 %v3119_v22  ;;  %v764_v21 = vld [vmem:[%s3939_s5 + $0x20] sm:$0xff] }
  0xfa   : > { %2503 = vmatprep.subr.bf16.mxu0 %v3134_v24  ;;  %2544 = vmatprep.subr.bf16.mxu1 %v3136_v26  ;;  %v772_v22 = vld [vmem:[%s3939_s5 + $0x60] sm:$0xff]  ;;  %v765_v24 = vld [vmem:[%s3939_s5 + $0x28] sm:$0xff] }
  0xfb   : > { %v773_v26 = vld [vmem:[%s3939_s5 + $0x68] sm:$0xff]  ;;  %v3010_v29 = vcombine.high %v764_v21, %v772_v22  ;;  %v3009_v35 = vcombine.low %v764_v21, %v772_v22 }
  0xfc   : > { %v3012_v30 = vcombine.high %v765_v24, %v773_v26  ;;  %v3011_v36 = vcombine.low %v765_v24, %v773_v26 }
  0xfd   : > { %2504 = vmatpush1.bf16.msra.mxu0 %v3133_v31  ;;  %2545 = vmatpush1.bf16.msra.mxu1 %v3135_v32  ;;  %v780_v31 = vld [vmem:[%s3939_s5 + $0xa0] sm:$0xff] }
  0xfe   : > { %2505 = vmatprep.subr.bf16.mxu0 %v3150_v1  ;;  %2546 = vmatprep.subr.bf16.mxu1 %v3152_v33  ;;  %v788_v32 = vld [vmem:[%s3939_s5 + $0xe0] sm:$0xff]  ;;  %v781_v1 = vld [vmem:[%s3939_s5 + $0xa8] sm:$0xff] }
  0xff   : > { %v789_v33 = vld [vmem:[%s3939_s5 + $0xe8] sm:$0xff]  ;;  %v3026_v37 = vcombine.high %v780_v31, %v788_v32  ;;  %v3025_v43 = vcombine.low %v780_v31, %v788_v32 }
 0x100   : > { %v3028_v38 = vcombine.high %v781_v1, %v789_v33  ;;  %v3027_v44 = vcombine.low %v781_v1, %v789_v33 }
 0x101   : > { %2506 = vmatpush1.bf16.msra.mxu0 %v3149_v39  ;;  %2547 = vmatpush1.bf16.msra.mxu1 %v3151_v40  ;;  %v796_v39 = vld [vmem:[%s3939_s5 + $0x120] sm:$0xff] }
 0x102   : > { %2507 = vmatprep.subr.bf16.mxu0 %v3166_v41  ;;  %2548 = vmatprep.subr.bf16.mxu1 %v3168_v42  ;;  %v804_v40 = vld [vmem:[%s3939_s5 + $0x160] sm:$0xff]  ;;  %v797_v41 = vld [vmem:[%s3939_s5 + $0x128] sm:$0xff] }
 0x103   : > { %v805_v42 = vld [vmem:[%s3939_s5 + $0x168] sm:$0xff]  ;;  %v3042_v45 = vcombine.high %v796_v39, %v804_v40  ;;  %v3041_v51 = vcombine.low %v796_v39, %v804_v40 }
 0x104   : > { %v3044_v46 = vcombine.high %v797_v41, %v805_v42  ;;  %v3043_v52 = vcombine.low %v797_v41, %v805_v42 }
 0x105   : > { %2508 = vmatpush1.bf16.msra.mxu0 %v3165_v47  ;;  %2549 = vmatpush1.bf16.msra.mxu1 %v3167_v48  ;;  %v812_v47 = vld [vmem:[%s3939_s5 + $0x1a0] sm:$0xff] }
 0x106   : > { %2509 = vmatprep.subr.bf16.mxu0 %v3182_v49  ;;  %2550 = vmatprep.subr.bf16.mxu1 %v3184_v50  ;;  %v820_v48 = vld [vmem:[%s3939_s5 + $0x1e0] sm:$0xff]  ;;  %v813_v49 = vld [vmem:[%s3939_s5 + $0x1a8] sm:$0xff] }
 0x107   : > { %v821_v50 = vld [vmem:[%s3939_s5 + $0x1e8] sm:$0xff]  ;;  %v3058_v53 = vcombine.high %v812_v47, %v820_v48  ;;  %v3057_v59 = vcombine.low %v812_v47, %v820_v48 }
 0x108   : > { %v3060_v54 = vcombine.high %v813_v49, %v821_v50  ;;  %v3059_v60 = vcombine.low %v813_v49, %v821_v50 }
 0x109   : > { %2510 = vmatpush1.bf16.msra.mxu0 %v3181_v55  ;;  %2551 = vmatpush1.bf16.msra.mxu1 %v3183_v56  ;;  %v828_v55 = vld [vmem:[%s3939_s5 + $0x220] sm:$0xff] }
 0x10a   : > { %2511 = vmatprep.subr.bf16.mxu0 %v3198_v57  ;;  %2552 = vmatprep.subr.bf16.mxu1 %v3200_v58  ;;  %v836_v56 = vld [vmem:[%s3939_s5 + $0x260] sm:$0xff]  ;;  %v829_v57 = vld [vmem:[%s3939_s5 + $0x228] sm:$0xff] }
 0x10b   : > { %v837_v58 = vld [vmem:[%s3939_s5 + $0x268] sm:$0xff]  ;;  %v3074_v61 = vcombine.high %v828_v55, %v836_v56  ;;  %v3073_v5 = vcombine.low %v828_v55, %v836_v56 }
 0x10c   : > { %v3076_v62 = vcombine.high %v829_v57, %v837_v58  ;;  %v3075_v6 = vcombine.low %v829_v57, %v837_v58 }
 0x10d   : > { %2512 = vmatpush1.bf16.msra.mxu0 %v3197_v63  ;;  %2553 = vmatpush1.bf16.msra.mxu1 %v3199_v0  ;;  %v844_v63 = vld [vmem:[%s3939_s5 + $0x2a0] sm:$0xff] }
 0x10e   : > { %2513 = vmatprep.subr.bf16.mxu0 %v3214_v3  ;;  %2554 = vmatprep.subr.bf16.mxu1 %v3216_v4  ;;  %v852_v0 = vld [vmem:[%s3939_s5 + $0x2e0] sm:$0xff]  ;;  %v845_v3 = vld [vmem:[%s3939_s5 + $0x2a8] sm:$0xff] }
 0x10f   : > { %v853_v4 = vld [vmem:[%s3939_s5 + $0x2e8] sm:$0xff]  ;;  %v3090_v7 = vcombine.high %v844_v63, %v852_v0  ;;  %v3089_v13 = vcombine.low %v844_v63, %v852_v0 }
 0x110   : > { %v3092_v8 = vcombine.high %v845_v3, %v853_v4  ;;  %v3091_v14 = vcombine.low %v845_v3, %v853_v4 }
 0x111   : > { %2514 = vmatpush1.bf16.msra.mxu0 %v3213_v9  ;;  %2555 = vmatpush1.bf16.msra.mxu1 %v3215_v10  ;;  %v860_v9 = vld [vmem:[%s3939_s5 + $0x320] sm:$0xff] }
 0x112   : > { %2515 = vmatprep.subr.bf16.mxu0 %v3230_v11  ;;  %2556 = vmatprep.subr.bf16.mxu1 %v3232_v12  ;;  %v868_v10 = vld [vmem:[%s3939_s5 + $0x360] sm:$0xff]  ;;  %v861_v11 = vld [vmem:[%s3939_s5 + $0x328] sm:$0xff] }
 0x113   : > { %v869_v12 = vld [vmem:[%s3939_s5 + $0x368] sm:$0xff]  ;;  %v3106_v15 = vcombine.high %v860_v9, %v868_v10  ;;  %v3105_v21 = vcombine.low %v860_v9, %v868_v10 }
 0x114   : > { %v3108_v16 = vcombine.high %v861_v11, %v869_v12  ;;  %v3107_v22 = vcombine.low %v861_v11, %v869_v12 }
 0x115   : > { %2516 = vmatpush1.bf16.msra.mxu0 %v3229_v17  ;;  %2557 = vmatpush1.bf16.msra.mxu1 %v3231_v18  ;;  %v876_v17 = vld [vmem:[%s3939_s5 + $0x3a0] sm:$0xff] }
 0x116   : > { %2517 = vmatprep.subr.bf16.mxu0 %v3246_v19  ;;  %2558 = vmatprep.subr.bf16.mxu1 %v3248_v20  ;;  %v884_v18 = vld [vmem:[%s3939_s5 + $0x3e0] sm:$0xff]  ;;  %v877_v19 = vld [vmem:[%s3939_s5 + $0x3a8] sm:$0xff] }
 0x117   : > { %v885_v20 = vld [vmem:[%s3939_s5 + $0x3e8] sm:$0xff]  ;;  %v3122_v24 = vcombine.high %v876_v17, %v884_v18  ;;  %v3121_v31 = vcombine.low %v876_v17, %v884_v18 }
 0x118   : > { %v3124_v26 = vcombine.high %v877_v19, %v885_v20  ;;  %v3123_v32 = vcombine.low %v877_v19, %v885_v20 }
 0x119   : > { %2518 = vmatpush1.bf16.msra.mxu0 %v3245_v27  ;;  %2559 = vmatpush1.bf16.msra.mxu1 %v3247_v28  ;;  %v892_v27 = vld [vmem:[%s3939_s5 + $0x420] sm:$0xff] }
 0x11a   : > { %2569 = vmatprep.subr.bf16.mxu0 %v3010_v29  ;;  %2610 = vmatprep.subr.bf16.mxu1 %v3012_v30  ;;  %v900_v28 = vld [vmem:[%s3939_s5 + $0x460] sm:$0xff]  ;;  %v893_v29 = vld [vmem:[%s3939_s5 + $0x428] sm:$0xff] }
 0x11b   : > { %v901_v30 = vld [vmem:[%s3939_s5 + $0x468] sm:$0xff]  ;;  %v3138_v1 = vcombine.high %v892_v27, %v900_v28  ;;  %v3137_v39 = vcombine.low %v892_v27, %v900_v28 }
 0x11c   : > { %2520 = vmatmul.mubr.bf16.vlgmr.msra.gmra.mrb[4].mxu0 %v4023_v23  ;;  %2561 = vmatmul.mubr.bf16.vlgmr.msra.gmra.mrb[4].mxu1 %v4023_v23  ;;  %v3140_v33 = vcombine.high %v893_v29, %v901_v30  ;;  %v3139_v40 = vcombine.low %v893_v29, %v901_v30 }
 0x11d   : > { %2570 = vmatpush1.bf16.msra.mxu0 %v3009_v35  ;;  %2611 = vmatpush1.bf16.msra.mxu1 %v3011_v36  ;;  %v908_v35 = vld [vmem:[%s3939_s5 + $0x4a0] sm:$0xff] }
 0x11e   : > { %2571 = vmatprep.subr.bf16.mxu0 %v3026_v37  ;;  %2612 = vmatprep.subr.bf16.mxu1 %v3028_v38  ;;  %v916_v36 = vld [vmem:[%s3939_s5 + $0x4e0] sm:$0xff]  ;;  %v909_v37 = vld [vmem:[%s3939_s5 + $0x4a8] sm:$0xff] }
 0x11f   : > { %2601 = vmatprep.mubr.bf16.mxu0 %v3963_v34  ;;  %2642 = vmatprep.mubr.bf16.mxu1 %v3963_v34  ;;  %v917_v38 = vld [vmem:[%s3939_s5 + $0x4e8] sm:$0xff]  ;;  %v3154_v41 = vcombine.high %v908_v35, %v916_v36  ;;  %v3153_v47 = vcombine.low %v908_v35, %v916_v36 }
 0x120   : > { %v3156_v42 = vcombine.high %v909_v37, %v917_v38  ;;  %v3155_v48 = vcombine.low %v909_v37, %v917_v38 }
 0x121   : > { %2572 = vmatpush1.bf16.msra.mxu0 %v3025_v43  ;;  %2613 = vmatpush1.bf16.msra.mxu1 %v3027_v44  ;;  %v924_v43 = vld [vmem:[%s3939_s5 + $0x520] sm:$0xff] }
 0x122   : > { %2573 = vmatprep.subr.bf16.mxu0 %v3042_v45  ;;  %2614 = vmatprep.subr.bf16.mxu1 %v3044_v46  ;;  %v932_v44 = vld [vmem:[%s3939_s5 + $0x560] sm:$0xff]  ;;  %v925_v45 = vld [vmem:[%s3939_s5 + $0x528] sm:$0xff] }
 0x123   : > { %v933_v46 = vld [vmem:[%s3939_s5 + $0x568] sm:$0xff]  ;;  %v3170_v49 = vcombine.high %v924_v43, %v932_v44  ;;  %v3169_v55 = vcombine.low %v924_v43, %v932_v44 }
 0x124   : > { %v3172_v50 = vcombine.high %v925_v45, %v933_v46  ;;  %v3171_v56 = vcombine.low %v925_v45, %v933_v46 }
 0x125   : > { %2574 = vmatpush1.bf16.msra.mxu0 %v3041_v51  ;;  %2615 = vmatpush1.bf16.msra.mxu1 %v3043_v52  ;;  %v940_v51 = vld [vmem:[%s3939_s5 + $0x5a0] sm:$0xff] }
 0x126   : > { %2575 = vmatprep.subr.bf16.mxu0 %v3058_v53  ;;  %2616 = vmatprep.subr.bf16.mxu1 %v3060_v54  ;;  %v948_v52 = vld [vmem:[%s3939_s5 + $0x5e0] sm:$0xff]  ;;  %v941_v53 = vld [vmem:[%s3939_s5 + $0x5a8] sm:$0xff] }
 0x127   : > { %v949_v54 = vld [vmem:[%s3939_s5 + $0x5e8] sm:$0xff]  ;;  %v3186_v57 = vcombine.high %v940_v51, %v948_v52  ;;  %v3185_v63 = vcombine.low %v940_v51, %v948_v52 }
 0x128   : > { %v3188_v58 = vcombine.high %v941_v53, %v949_v54  ;;  %v3187_v0 = vcombine.low %v941_v53, %v949_v54 }
 0x129   : > { %2576 = vmatpush1.bf16.msra.mxu0 %v3057_v59  ;;  %2617 = vmatpush1.bf16.msra.mxu1 %v3059_v60  ;;  %v956_v59 = vld [vmem:[%s3939_s5 + $0x620] sm:$0xff] }
 0x12a   : > { %2577 = vmatprep.subr.bf16.mxu0 %v3074_v61  ;;  %2618 = vmatprep.subr.bf16.mxu1 %v3076_v62  ;;  %v964_v60 = vld [vmem:[%s3939_s5 + $0x660] sm:$0xff]  ;;  %v957_v61 = vld [vmem:[%s3939_s5 + $0x628] sm:$0xff] }
 0x12b   : > { %v965_v62 = vld [vmem:[%s3939_s5 + $0x668] sm:$0xff]  ;;  %v3202_v3 = vcombine.high %v956_v59, %v964_v60  ;;  %v3201_v9 = vcombine.low %v956_v59, %v964_v60 }
 0x12c   : > { %v3204_v4 = vcombine.high %v957_v61, %v965_v62  ;;  %v3203_v10 = vcombine.low %v957_v61, %v965_v62 }
 0x12d   : > { %2578 = vmatpush1.bf16.msra.mxu0 %v3073_v5  ;;  %2619 = vmatpush1.bf16.msra.mxu1 %v3075_v6  ;;  %v972_v5 = vld [vmem:[%s3939_s5 + $0x6a0] sm:$0xff] }
 0x12e   : > { %2579 = vmatprep.subr.bf16.mxu0 %v3090_v7  ;;  %2620 = vmatprep.subr.bf16.mxu1 %v3092_v8  ;;  %v980_v6 = vld [vmem:[%s3939_s5 + $0x6e0] sm:$0xff]  ;;  %v973_v7 = vld [vmem:[%s3939_s5 + $0x6a8] sm:$0xff] }
 0x12f   : > { %v981_v8 = vld [vmem:[%s3939_s5 + $0x6e8] sm:$0xff]  ;;  %v3218_v11 = vcombine.high %v972_v5, %v980_v6  ;;  %v3217_v17 = vcombine.low %v972_v5, %v980_v6 }
 0x130   : > { %v3220_v12 = vcombine.high %v973_v7, %v981_v8  ;;  %v3219_v18 = vcombine.low %v973_v7, %v981_v8  ;;  %v846_v8 = vld [vmem:[%s3939_s5 + $0x2b0] sm:$0xff] }
 0x131   : > { %2580 = vmatpush1.bf16.msra.mxu0 %v3089_v13  ;;  %2621 = vmatpush1.bf16.msra.mxu1 %v3091_v14  ;;  %v988_v13 = vld [vmem:[%s3939_s5 + $0x720] sm:$0xff] }
 0x132   : > { %2581 = vmatprep.subr.bf16.mxu0 %v3106_v15  ;;  %2622 = vmatprep.subr.bf16.mxu1 %v3108_v16  ;;  %v996_v14 = vld [vmem:[%s3939_s5 + $0x760] sm:$0xff]  ;;  %v989_v15 = vld [vmem:[%s3939_s5 + $0x728] sm:$0xff] }
 0x133   : > { %v997_v16 = vld [vmem:[%s3939_s5 + $0x768] sm:$0xff]  ;;  %v3234_v19 = vcombine.high %v988_v13, %v996_v14  ;;  %v3233_v27 = vcombine.low %v988_v13, %v996_v14 }
 0x134   : > { %v3236_v20 = vcombine.high %v989_v15, %v997_v16  ;;  %v3235_v28 = vcombine.low %v989_v15, %v997_v16  ;;  %v862_v16 = vld [vmem:[%s3939_s5 + $0x330] sm:$0xff] }
 0x135   : > { %2582 = vmatpush1.bf16.msra.mxu0 %v3105_v21  ;;  %2623 = vmatpush1.bf16.msra.mxu1 %v3107_v22  ;;  %v1004_v21 = vld [vmem:[%s3939_s5 + $0x7a0] sm:$0xff] }
 0x136   : > { %2583 = vmatprep.subr.bf16.mxu0 %v3122_v24  ;;  %2624 = vmatprep.subr.bf16.mxu1 %v3124_v26  ;;  %v1012_v22 = vld [vmem:[%s3939_s5 + $0x7e0] sm:$0xff]  ;;  %v1005_v24 = vld [vmem:[%s3939_s5 + $0x7a8] sm:$0xff] }
 0x137   : > { %v1013_v26 = vld [vmem:[%s3939_s5 + $0x7e8] sm:$0xff]  ;;  %v3250_v29 = vcombine.high %v1004_v21, %v1012_v22  ;;  %v3249_v35 = vcombine.low %v1004_v21, %v1012_v22 }
 0x138   : > { %v3252_v30 = vcombine.high %v1005_v24, %v1013_v26  ;;  %v3251_v36 = vcombine.low %v1005_v24, %v1013_v26  ;;  %v878_v26 = vld [vmem:[%s3939_s5 + $0x3b0] sm:$0xff] }
 0x139   : > { %2584 = vmatpush1.bf16.msra.mxu0 %v3121_v31  ;;  %2625 = vmatpush1.bf16.msra.mxu1 %v3123_v32  ;;  %v766_v31 = vld [vmem:[%s3939_s5 + $0x30] sm:$0xff] }
 0x13a   : > { %2585 = vmatprep.subr.bf16.mxu0 %v3138_v1  ;;  %2626 = vmatprep.subr.bf16.mxu1 %v3140_v33  ;;  %v774_v32 = vld [vmem:[%s3939_s5 + $0x70] sm:$0xff]  ;;  %v767_v1 = vld [vmem:[%s3939_s5 + $0x38] sm:$0xff] }
 0x13b   : > { %v775_v33 = vld [vmem:[%s3939_s5 + $0x78] sm:$0xff]  ;;  %v3014_v37 = vcombine.high %v766_v31, %v774_v32  ;;  %v3013_v43 = vcombine.low %v766_v31, %v774_v32 }
 0x13c   : > { %v3016_v38 = vcombine.high %v767_v1, %v775_v33  ;;  %v3015_v44 = vcombine.low %v767_v1, %v775_v33  ;;  %v894_v33 = vld [vmem:[%s3939_s5 + $0x430] sm:$0xff] }
 0x13d   : > { %2586 = vmatpush1.bf16.msra.mxu0 %v3137_v39  ;;  %2627 = vmatpush1.bf16.msra.mxu1 %v3139_v40  ;;  %v782_v39 = vld [vmem:[%s3939_s5 + $0xb0] sm:$0xff] }
 0x13e   : > { %2587 = vmatprep.subr.bf16.mxu0 %v3154_v41  ;;  %2628 = vmatprep.subr.bf16.mxu1 %v3156_v42  ;;  %v790_v40 = vld [vmem:[%s3939_s5 + $0xf0] sm:$0xff]  ;;  %v783_v41 = vld [vmem:[%s3939_s5 + $0xb8] sm:$0xff] }
 0x13f   : > { %v791_v42 = vld [vmem:[%s3939_s5 + $0xf8] sm:$0xff]  ;;  %v3030_v45 = vcombine.high %v782_v39, %v790_v40  ;;  %v3029_v51 = vcombine.low %v782_v39, %v790_v40 }
 0x140   : > { %v3032_v46 = vcombine.high %v783_v41, %v791_v42  ;;  %v3031_v52 = vcombine.low %v783_v41, %v791_v42  ;;  %v910_v42 = vld [vmem:[%s3939_s5 + $0x4b0] sm:$0xff] }
 0x141   : > { %2588 = vmatpush1.bf16.msra.mxu0 %v3153_v47  ;;  %2629 = vmatpush1.bf16.msra.mxu1 %v3155_v48  ;;  %v798_v47 = vld [vmem:[%s3939_s5 + $0x130] sm:$0xff] }
 0x142   : > { %2589 = vmatprep.subr.bf16.mxu0 %v3170_v49  ;;  %2630 = vmatprep.subr.bf16.mxu1 %v3172_v50  ;;  %v806_v48 = vld [vmem:[%s3939_s5 + $0x170] sm:$0xff]  ;;  %v799_v49 = vld [vmem:[%s3939_s5 + $0x138] sm:$0xff] }
 0x143   : > { %v807_v50 = vld [vmem:[%s3939_s5 + $0x178] sm:$0xff]  ;;  %v3046_v53 = vcombine.high %v798_v47, %v806_v48  ;;  %v3045_v59 = vcombine.low %v798_v47, %v806_v48 }
 0x144   : > { %v3048_v54 = vcombine.high %v799_v49, %v807_v50  ;;  %v3047_v60 = vcombine.low %v799_v49, %v807_v50  ;;  %v926_v50 = vld [vmem:[%s3939_s5 + $0x530] sm:$0xff] }
 0x145   : > { %2590 = vmatpush1.bf16.msra.mxu0 %v3169_v55  ;;  %2631 = vmatpush1.bf16.msra.mxu1 %v3171_v56  ;;  %v814_v55 = vld [vmem:[%s3939_s5 + $0x1b0] sm:$0xff] }
 0x146   : > { %2591 = vmatprep.subr.bf16.mxu0 %v3186_v57  ;;  %2632 = vmatprep.subr.bf16.mxu1 %v3188_v58  ;;  %v822_v56 = vld [vmem:[%s3939_s5 + $0x1f0] sm:$0xff]  ;;  %v815_v57 = vld [vmem:[%s3939_s5 + $0x1b8] sm:$0xff] }
 0x147   : > { %v823_v58 = vld [vmem:[%s3939_s5 + $0x1f8] sm:$0xff]  ;;  %v3062_v61 = vcombine.high %v814_v55, %v822_v56  ;;  %v3061_v5 = vcombine.low %v814_v55, %v822_v56 }
 0x148   : > { %v3064_v62 = vcombine.high %v815_v57, %v823_v58 }
 0x149   : > { %2592 = vmatpush1.bf16.msra.mxu0 %v3185_v63  ;;  %2633 = vmatpush1.bf16.msra.mxu1 %v3187_v0  ;;  %v830_v63 = vld [vmem:[%s3939_s5 + $0x230] sm:$0xff] }
 0x14a   : > { %2593 = vmatprep.subr.bf16.mxu0 %v3202_v3  ;;  %2634 = vmatprep.subr.bf16.mxu1 %v3204_v4  ;;  %v838_v0 = vld [vmem:[%s3939_s5 + $0x270] sm:$0xff]  ;;  %v831_v3 = vld [vmem:[%s3939_s5 + $0x238] sm:$0xff] }
 0x14b   : > { %v839_v4 = vld [vmem:[%s3939_s5 + $0x278] sm:$0xff]  ;;  %v3078_v6 = vcombine.high %v830_v63, %v838_v0 }
 0x14c   : > { %v3080_v7 = vcombine.high %v831_v3, %v839_v4  ;;  %v3079_v13 = vcombine.low %v831_v3, %v839_v4  ;;  %v958_v4 = vld [vmem:[%s3939_s5 + $0x630] sm:$0xff] }
 0x14d   : > { %2594 = vmatpush1.bf16.msra.mxu0 %v3201_v9  ;;  %2635 = vmatpush1.bf16.msra.mxu1 %v3203_v10  ;;  %v854_v9 = vld [vmem:[%s3939_s5 + $0x2f0] sm:$0xff]  ;;  %v847_v10 = vld [vmem:[%s3939_s5 + $0x2b8] sm:$0xff] }
 0x14e   : > { %2595 = vmatprep.subr.bf16.mxu0 %v3218_v11  ;;  %2636 = vmatprep.subr.bf16.mxu1 %v3220_v12  ;;  %v855_v11 = vld [vmem:[%s3939_s5 + $0x2f8] sm:$0xff]  ;;  %v3077_v12 = vcombine.low %v830_v63, %v838_v0  ;;  %v3094_v14 = vcombine.high %v846_v8, %v854_v9 }
 0x14f   : > { %v3096_v15 = vcombine.high %v847_v10, %v855_v11  ;;  %v3095_v21 = vcombine.low %v847_v10, %v855_v11  ;;  %v974_v11 = vld [vmem:[%s3939_s5 + $0x6b0] sm:$0xff] }
 0x151   : > { %2596 = vmatpush1.bf16.msra.mxu0 %v3217_v17  ;;  %2637 = vmatpush1.bf16.msra.mxu1 %v3219_v18  ;;  %v870_v17 = vld [vmem:[%s3939_s5 + $0x370] sm:$0xff]  ;;  %v863_v18 = vld [vmem:[%s3939_s5 + $0x338] sm:$0xff] }
 0x152   : > { %2597 = vmatprep.subr.bf16.mxu0 %v3234_v19  ;;  %2638 = vmatprep.subr.bf16.mxu1 %v3236_v20  ;;  %v871_v19 = vld [vmem:[%s3939_s5 + $0x378] sm:$0xff]  ;;  %v3093_v20 = vcombine.low %v846_v8, %v854_v9  ;;  %v3110_v22 = vcombine.high %v862_v16, %v870_v17 }
 0x153   : > { %v3112_v24 = vcombine.high %v863_v18, %v871_v19  ;;  %v3111_v31 = vcombine.low %v863_v18, %v871_v19  ;;  %v990_v19 = vld [vmem:[%s3939_s5 + $0x730] sm:$0xff] }
 0x155   : > { %2598 = vmatpush1.bf16.msra.mxu0 %v3233_v27  ;;  %2639 = vmatpush1.bf16.msra.mxu1 %v3235_v28  ;;  %v886_v27 = vld [vmem:[%s3939_s5 + $0x3f0] sm:$0xff]  ;;  %v879_v28 = vld [vmem:[%s3939_s5 + $0x3b8] sm:$0xff] }
 0x156   : > { %2599 = vmatprep.subr.bf16.mxu0 %v3250_v29  ;;  %2640 = vmatprep.subr.bf16.mxu1 %v3252_v30  ;;  %v887_v29 = vld [vmem:[%s3939_s5 + $0x3f8] sm:$0xff]  ;;  %v3109_v30 = vcombine.low %v862_v16, %v870_v17  ;;  %v3126_v32 = vcombine.high %v878_v26, %v886_v27 }
 0x157   : > { %v3128_v1 = vcombine.high %v879_v28, %v887_v29  ;;  %v3127_v39 = vcombine.low %v879_v28, %v887_v29  ;;  %v1006_v29 = vld [vmem:[%s3939_s5 + $0x7b0] sm:$0xff] }
 0x159   : > { %2600 = vmatpush1.bf16.msra.mxu0 %v3249_v35  ;;  %2641 = vmatpush1.bf16.msra.mxu1 %v3251_v36  ;;  %v902_v35 = vld [vmem:[%s3939_s5 + $0x470] sm:$0xff]  ;;  %v895_v36 = vld [vmem:[%s3939_s5 + $0x438] sm:$0xff] }
 0x15a   : > { %2651 = vmatprep.subr.bf16.mxu0 %v3014_v37  ;;  %2692 = vmatprep.subr.bf16.mxu1 %v3016_v38  ;;  %v903_v37 = vld [vmem:[%s3939_s5 + $0x478] sm:$0xff]  ;;  %v3125_v38 = vcombine.low %v878_v26, %v886_v27  ;;  %v3142_v40 = vcombine.high %v894_v33, %v902_v35 }
 0x15b   : > { %v3144_v41 = vcombine.high %v895_v36, %v903_v37  ;;  %v3143_v47 = vcombine.low %v895_v36, %v903_v37 }
 0x15c   : > { %2602 = vmatmul.mubr.bf16.vlgmr.msra.gmra.mrb[8].mxu0 %v4023_v23  ;;  %2643 = vmatmul.mubr.bf16.vlgmr.msra.gmra.mrb[8].mxu1 %v4023_v23 }
 0x15d   : > { %2652 = vmatpush1.bf16.msra.mxu0 %v3013_v43  ;;  %2693 = vmatpush1.bf16.msra.mxu1 %v3015_v44  ;;  %v918_v43 = vld [vmem:[%s3939_s5 + $0x4f0] sm:$0xff]  ;;  %v911_v44 = vld [vmem:[%s3939_s5 + $0x4b8] sm:$0xff] }
 0x15e   : > { %2653 = vmatprep.subr.bf16.mxu0 %v3030_v45  ;;  %2694 = vmatprep.subr.bf16.mxu1 %v3032_v46  ;;  %v919_v45 = vld [vmem:[%s3939_s5 + $0x4f8] sm:$0xff]  ;;  %v3141_v46 = vcombine.low %v894_v33, %v902_v35  ;;  %v3158_v48 = vcombine.high %v910_v42, %v918_v43 }
 0x15f   : > { %2683 = vmatprep.mubr.bf16.mxu0 %v3963_v34  ;;  %2724 = vmatprep.mubr.bf16.mxu1 %v3963_v34  ;;  %v3063_v34 = vcombine.low %v815_v57, %v823_v58  ;;  %v3160_v49 = vcombine.high %v911_v44, %v919_v45  ;;  %v3159_v55 = vcombine.low %v911_v44, %v919_v45  ;;  %v942_v58 = vld [vmem:[%s3939_s5 + $0x5b0] sm:$0xff] }
 0x161   : > { %2654 = vmatpush1.bf16.msra.mxu0 %v3029_v51  ;;  %2695 = vmatpush1.bf16.msra.mxu1 %v3031_v52  ;;  %v934_v51 = vld [vmem:[%s3939_s5 + $0x570] sm:$0xff]  ;;  %v927_v52 = vld [vmem:[%s3939_s5 + $0x538] sm:$0xff] }
 0x162   : > { %2655 = vmatprep.subr.bf16.mxu0 %v3046_v53  ;;  %2696 = vmatprep.subr.bf16.mxu1 %v3048_v54  ;;  %v935_v53 = vld [vmem:[%s3939_s5 + $0x578] sm:$0xff]  ;;  %v3157_v54 = vcombine.low %v910_v42, %v918_v43  ;;  %v3174_v56 = vcombine.high %v926_v50, %v934_v51  ;;  %v1026_v42 = vsub.s32 1, %v3937_v2  ;;  %v1034_v43 = vsub.s32 3, %v3937_v2 }
 0x163   : > { %v3176_v57 = vcombine.high %v927_v52, %v935_v53  ;;  %v3175_v63 = vcombine.low %v927_v52, %v935_v53 }
 0x165   : > { %2656 = vmatpush1.bf16.msra.mxu0 %v3045_v59  ;;  %2697 = vmatpush1.bf16.msra.mxu1 %v3047_v60  ;;  %v950_v59 = vld [vmem:[%s3939_s5 + $0x5f0] sm:$0xff]  ;;  %v943_v60 = vld [vmem:[%s3939_s5 + $0x5b8] sm:$0xff] }
 0x166   : > { %2657 = vmatprep.subr.bf16.mxu0 %v3062_v61  ;;  %2698 = vmatprep.subr.bf16.mxu1 %v3064_v62  ;;  %v951_v61 = vld [vmem:[%s3939_s5 + $0x5f8] sm:$0xff]  ;;  %v3173_v62 = vcombine.low %v926_v50, %v934_v51  ;;  %v3190_v0 = vcombine.high %v942_v58, %v950_v59 }
 0x167   : > { %v3192_v3 = vcombine.high %v943_v60, %v951_v61  ;;  %v3191_v8 = vcombine.low %v943_v60, %v951_v61 }
 0x169   : > { %2658 = vmatpush1.bf16.msra.mxu0 %v3061_v5  ;;  %2699 = vmatpush1.bf16.msra.mxu1 %v3063_v34  ;;  %v966_v5 = vld [vmem:[%s3939_s5 + $0x670] sm:$0xff]  ;;  %v959_v34 = vld [vmem:[%s3939_s5 + $0x638] sm:$0xff] }
 0x16a   : > { %2659 = vmatprep.subr.bf16.mxu0 %v3078_v6  ;;  %2700 = vmatprep.subr.bf16.mxu1 %v3080_v7  ;;  %v967_v6 = vld [vmem:[%s3939_s5 + $0x678] sm:$0xff]  ;;  %v3189_v7 = vcombine.low %v942_v58, %v950_v59  ;;  %v3206_v9 = vcombine.high %v958_v4, %v966_v5 }
 0x16b   : > { %v3208_v10 = vcombine.high %v959_v34, %v967_v6  ;;  %v3207_v16 = vcombine.low %v959_v34, %v967_v6  ;;  %v1038_v34 = vsub.s32 4, %v3937_v2  ;;  %v1046_v6 = vsub.s32 6, %v3937_v2 }
 0x16d   : > { %2660 = vmatpush1.bf16.msra.mxu0 %v3077_v12  ;;  %2701 = vmatpush1.bf16.msra.mxu1 %v3079_v13  ;;  %v982_v12 = vld [vmem:[%s3939_s5 + $0x6f0] sm:$0xff]  ;;  %v975_v13 = vld [vmem:[%s3939_s5 + $0x6b8] sm:$0xff] }
 0x16e   : > { %2661 = vmatprep.subr.bf16.mxu0 %v3094_v14  ;;  %2702 = vmatprep.subr.bf16.mxu1 %v3096_v15  ;;  %v983_v14 = vld [vmem:[%s3939_s5 + $0x6f8] sm:$0xff]  ;;  %v3205_v15 = vcombine.low %v958_v4, %v966_v5  ;;  %v3222_v17 = vcombine.high %v974_v11, %v982_v12 }
 0x16f   : > { %v3224_v18 = vcombine.high %v975_v13, %v983_v14  ;;  %v3223_v26 = vcombine.low %v975_v13, %v983_v14 }
 0x171   : > { %2662 = vmatpush1.bf16.msra.mxu0 %v3093_v20  ;;  %2703 = vmatpush1.bf16.msra.mxu1 %v3095_v21  ;;  %v998_v20 = vld [vmem:[%s3939_s5 + $0x770] sm:$0xff]  ;;  %v991_v21 = vld [vmem:[%s3939_s5 + $0x738] sm:$0xff] }
 0x172   : > { %2663 = vmatprep.subr.bf16.mxu0 %v3110_v22  ;;  %2704 = vmatprep.subr.bf16.mxu1 %v3112_v24  ;;  %v999_v22 = vld [vmem:[%s3939_s5 + $0x778] sm:$0xff]  ;;  %v3221_v24 = vcombine.low %v974_v11, %v982_v12  ;;  %v3238_v27 = vcombine.high %v990_v19, %v998_v20 }
 0x173   : > { %v3240_v28 = vcombine.high %v991_v21, %v999_v22  ;;  %v3239_v33 = vcombine.low %v991_v21, %v999_v22 }
 0x175   : > { %2664 = vmatpush1.bf16.msra.mxu0 %v3109_v30  ;;  %2705 = vmatpush1.bf16.msra.mxu1 %v3111_v31  ;;  %v1014_v30 = vld [vmem:[%s3939_s5 + $0x7f0] sm:$0xff]  ;;  %v1007_v31 = vld [vmem:[%s3939_s5 + $0x7b8] sm:$0xff] }
 0x176   : > { %2665 = vmatprep.subr.bf16.mxu0 %v3126_v32  ;;  %2706 = vmatprep.subr.bf16.mxu1 %v3128_v1  ;;  %v1015_v32 = vld [vmem:[%s3939_s5 + $0x7f8] sm:$0xff]  ;;  %v3237_v1 = vcombine.low %v990_v19, %v998_v20  ;;  %v3254_v35 = vcombine.high %v1006_v29, %v1014_v30  ;;  %v3253_v37 = vcombine.low %v1006_v29, %v1014_v30 }
 0x177   : > { %v3256_v36 = vcombine.high %v1007_v31, %v1015_v32 }
 0x179   : > { %2666 = vmatpush1.bf16.msra.mxu0 %v3125_v38  ;;  %2707 = vmatpush1.bf16.msra.mxu1 %v3127_v39  ;;  %v3255_v38 = vcombine.low %v1007_v31, %v1015_v32  ;;  %v1022_v39 = vsub.s32 0, %v3937_v2 }
 0x17a   : > { %2667 = vmatprep.subr.bf16.mxu0 %v3142_v40  ;;  %2708 = vmatprep.subr.bf16.mxu1 %v3144_v41  ;;  %v1016_v40 = vld [vmem:[%s4232_s9] sm:$0xff]  ;;  %v1030_v41 = vsub.s32 2, %v3937_v2 }
 0x17b   : > { %v1027_v45 = vrot.slane %v1016_v40, %v1026_v42 }
 0x17c   : > { %v1031_v44 = vrot.slane %v1016_v40, %v1030_v41 }
 0x17d   : > { %2668 = vmatpush1.bf16.msra.mxu0 %v3141_v46  ;;  %2709 = vmatpush1.bf16.msra.mxu1 %v3143_v47  ;;  %v1035_v46 = vrot.slane %v1016_v40, %v1034_v43 }
 0x17e   : > { %2669 = vmatprep.subr.bf16.mxu0 %v3158_v48  ;;  %2710 = vmatprep.subr.bf16.mxu1 %v3160_v49 }
 0x181   : > { %2670 = vmatpush1.bf16.msra.mxu0 %v3157_v54  ;;  %2711 = vmatpush1.bf16.msra.mxu1 %v3159_v55 }
 0x182   : > { %2671 = vmatprep.subr.bf16.mxu0 %v3174_v56  ;;  %2712 = vmatprep.subr.bf16.mxu1 %v3176_v57 }
 0x185   : > { %2672 = vmatpush1.bf16.msra.mxu0 %v3173_v62  ;;  %2713 = vmatpush1.bf16.msra.mxu1 %v3175_v63 }
 0x186   : > { %2673 = vmatprep.subr.bf16.mxu0 %v3190_v0  ;;  %2714 = vmatprep.subr.bf16.mxu1 %v3192_v3 }
 0x189   : > { %2674 = vmatpush1.bf16.msra.mxu0 %v3189_v7  ;;  %2715 = vmatpush1.bf16.msra.mxu1 %v3191_v8  ;;  %v1042_v7 = vsub.s32 5, %v3937_v2  ;;  %v1050_v8 = vsub.s32 7, %v3937_v2 }
 0x18a   : > { %2675 = vmatprep.subr.bf16.mxu0 %v3206_v9  ;;  %2716 = vmatprep.subr.bf16.mxu1 %v3208_v10  ;;  %v1039_v9 = vrot.slane %v1016_v40, %v1038_v34  ;;  %v1047_v10 = vrot.slane %v1016_v40, %v1046_v6 }
 0x18b   : > { %v1043_v11 = vrot.slane %v1016_v40, %v1042_v7  ;;  %v1051_v12 = vrot.slane %v1016_v40, %v1050_v8 }
 0x18d   : > { %2676 = vmatpush1.bf16.msra.mxu0 %v3205_v15  ;;  %2717 = vmatpush1.bf16.msra.mxu1 %v3207_v16 }
 0x18e   : > { %2677 = vmatprep.subr.bf16.mxu0 %v3222_v17  ;;  %2718 = vmatprep.subr.bf16.mxu1 %v3224_v18 }
 0x191   : > { %2678 = vmatpush1.bf16.msra.mxu0 %v3221_v24  ;;  %2719 = vmatpush1.bf16.msra.mxu1 %v3223_v26 }
 0x192   : > { %2679 = vmatprep.subr.bf16.mxu0 %v3238_v27  ;;  %2720 = vmatprep.subr.bf16.mxu1 %v3240_v28 }
 0x195   : > { %2680 = vmatpush1.bf16.msra.mxu0 %v3237_v1  ;;  %2721 = vmatpush1.bf16.msra.mxu1 %v3239_v33 }
 0x196   : > { %2681 = vmatprep.subr.bf16.mxu0 %v3254_v35  ;;  %2722 = vmatprep.subr.bf16.mxu1 %v3256_v36 }
 0x199   : > { %2682 = vmatpush1.bf16.msra.mxu0 %v3253_v37  ;;  %2723 = vmatpush1.bf16.msra.mxu1 %v3255_v38 }
 0x19c   : > { %2684 = vmatmul.mubr.bf16.vlgmr.msra.gmra.mrb[12].mxu0 %v4023_v23  ;;  %2725 = vmatmul.mubr.bf16.vlgmr.msra.gmra.mrb[12].mxu1 %v4023_v23  ;;  %v1023_v23 = vrot.slane %v1016_v40, %v1022_v39  ;;  %v1017_v40 = vld [vmem:[%s4232_s9 + $0x8] sm:$0xff] }
 0x1af   : > { %v2439_v47 = vpop.f32.mrb[0].mxu0  ;;  %v2480_v49 = vpop.f32.mrb[0].mxu1 }
 0x1b0   : > { %v2440_v48 = vadd.f32 %v2439_v47, %v1023_v23  ;;  %v2441_v50 = vpop.f32.mrb[1].mxu0  ;;  %v2481_v51 = vadd.f32 %v2480_v49, %v1031_v44  ;;  %v2482_v53 = vpop.f32.mrb[1].mxu1  ;;  %v1055_v23 = vrot.slane %v1017_v40, %v1022_v39  ;;  %v1063_v44 = vrot.slane %v1017_v40, %v1030_v41 }
 0x1b1   : > { %v2442_v52 = vadd.f32 %v2441_v50, %v1027_v45  ;;  %v2443_v54 = vpop.f32.mrb[2].mxu0  ;;  %v2483_v56 = vadd.f32 %v2482_v53, %v1035_v46  ;;  %v2484_v57 = vpop.f32.mrb[2].mxu1  ;;  %v1059_v45 = vrot.slane %v1017_v40, %v1026_v42  ;;  %v1067_v46 = vrot.slane %v1017_v40, %v1034_v43 }
 0x1b2   : > { %v2733_v55 = vmax.f32 %v2440_v48, 0.0  ;;  %v2444_v58 = vpop.f32.mrb[3].mxu0  ;;  %v2735_v59 = vmax.f32 %v2481_v51, 0.0  ;;  %v2485_v61 = vpop.f32.mrb[3].mxu1 }
 0x1b3   : > { %v2734_v60 = vmax.f32 %v2442_v52, 0.0  ;;  %v2736_v62 = vmax.f32 %v2483_v56, 0.0 }
 0x1b5   : > { %v3257_v63 = vpack.c.bf16 %v2734_v60, %v2733_v55  ;;  %v3258_v0 = vpack.c.bf16 %v2736_v62, %v2735_v59 }
 0x1b7   : > { %v2791_v3 = vrot.slane %v3257_v63, %v3956_v25  ;;  %v2798_v4 = vrot.slane %v3258_v0, %v3956_v25  ;;  %v1071_v63 = vrot.slane %v1017_v40, %v1038_v34  ;;  %v1079_v0 = vrot.slane %v1017_v40, %v1046_v6 }
 0x1b9   : > { %v2813_v5 = vcombine.low %v2791_v3, %v2798_v4  ;;  %v1075_v3 = vrot.slane %v1017_v40, %v1042_v7  ;;  %v1083_v4 = vrot.slane %v1017_v40, %v1050_v8 }
 0x1bb   : > { %v2821_v36 = vrot.slane %v2813_v5, %v3956_v25 }
 0x1ef   : > { %v2521_v13 = vpop.f32.mrb[4].mxu0  ;;  %v2562_v15 = vpop.f32.mrb[4].mxu1 }
 0x1f0   : > { %v2522_v14 = vadd.f32 %v2521_v13, %v1039_v9  ;;  %v2523_v16 = vpop.f32.mrb[5].mxu0  ;;  %v2563_v17 = vadd.f32 %v2562_v15, %v1047_v10  ;;  %v2564_v19 = vpop.f32.mrb[5].mxu1 }
 0x1f1   : > { %v2524_v18 = vadd.f32 %v2523_v16, %v1043_v11  ;;  %v2525_v20 = vpop.f32.mrb[6].mxu0  ;;  %v2565_v22 = vadd.f32 %v2564_v19, %v1051_v12  ;;  %v2566_v24 = vpop.f32.mrb[6].mxu1 }
 0x1f2   : > { %v2737_v21 = vmax.f32 %v2522_v14, 0.0  ;;  %v2526_v26 = vpop.f32.mrb[7].mxu0  ;;  %v2739_v27 = vmax.f32 %v2563_v17, 0.0  ;;  %v2567_v29 = vpop.f32.mrb[7].mxu1 }
 0x1f3   : > { %v2738_v28 = vmax.f32 %v2524_v18, 0.0  ;;  %v2740_v30 = vmax.f32 %v2565_v22, 0.0 }
 0x1f5   : > { %v3259_v31 = vpack.c.bf16 %v2738_v28, %v2737_v21  ;;  %v3260_v32 = vpack.c.bf16 %v2740_v30, %v2739_v27 }
 0x1f7   : > { %v2805_v1 = vrot.slane %v3259_v31, %v3956_v25  ;;  %v2812_v33 = vrot.slane %v3260_v32, %v3956_v25 }
 0x1f9   : > { %v2814_v35 = vcombine.low %v2805_v1, %v2812_v33 }
 0x1fb   : > { %v2828_v37 = vrot.slane %v2814_v35, %v3956_v25 }
 0x1fd   : > { %v2829_v38 = vcombine.low %v2821_v36, %v2828_v37 }
 0x1ff   : > { %2881 = vst [vmem:[%s4261_s12] sm:$0xff] %v2829_v38 }
 0x22f   : > { %v2603_v47 = vpop.f32.mrb[8].mxu0  ;;  %v2644_v49 = vpop.f32.mrb[8].mxu1 }
 0x230   : > { %v2604_v48 = vadd.f32 %v2603_v47, %v1055_v23  ;;  %v2605_v50 = vpop.f32.mrb[9].mxu0  ;;  %v2645_v51 = vadd.f32 %v2644_v49, %v1063_v44  ;;  %v2646_v53 = vpop.f32.mrb[9].mxu1 }
 0x231   : > { %v2606_v52 = vadd.f32 %v2605_v50, %v1059_v45  ;;  %v2607_v54 = vpop.f32.mrb[10].mxu0  ;;  %v2647_v56 = vadd.f32 %v2646_v53, %v1067_v46  ;;  %v2648_v39 = vpop.f32.mrb[10].mxu1 }
 0x232   : > { %v2741_v55 = vmax.f32 %v2604_v48, 0.0  ;;  %v2608_v57 = vpop.f32.mrb[11].mxu0  ;;  %v2743_v58 = vmax.f32 %v2645_v51, 0.0  ;;  %v2649_v59 = vpop.f32.mrb[11].mxu1 }
 0x233   : > { %v2742_v41 = vmax.f32 %v2606_v52, 0.0  ;;  %v2744_v60 = vmax.f32 %v2647_v56, 0.0 }
 0x235   : > { %v3261_v42 = vpack.c.bf16 %v2742_v41, %v2741_v55  ;;  %v3262_v61 = vpack.c.bf16 %v2744_v60, %v2743_v58 }
 0x237   : > { %v2840_v2 = vrot.slane %v3261_v42, %v3956_v25  ;;  %v2847_v43 = vrot.slane %v3262_v61, %v3956_v25 }
 0x239   : > { %v2862_v62 = vcombine.low %v2840_v2, %v2847_v43 }
 0x23b   : > { %v2870_v27 = vrot.slane %v2862_v62, %v3956_v25 }
 0x26f   : > { %v2685_v5 = vpop.f32.mrb[12].mxu0  ;;  %v2726_v10 = vpop.f32.mrb[12].mxu1 }
 0x270   : > { %v2686_v9 = vadd.f32 %v2685_v5, %v1071_v63  ;;  %v2687_v11 = vpop.f32.mrb[13].mxu0  ;;  %v2727_v12 = vadd.f32 %v2726_v10, %v1079_v0  ;;  %v2728_v14 = vpop.f32.mrb[13].mxu1 }
 0x271   : > { %v2688_v13 = vadd.f32 %v2687_v11, %v1075_v3  ;;  %v2689_v15 = vpop.f32.mrb[14].mxu0  ;;  %v2729_v17 = vadd.f32 %v2728_v14, %v1083_v4  ;;  %v2730_v18 = vpop.f32.mrb[14].mxu1 }
 0x272   : > { %v2745_v16 = vmax.f32 %v2686_v9, 0.0  ;;  %v2690_v19 = vpop.f32.mrb[15].mxu0  ;;  %v2747_v20 = vmax.f32 %v2727_v12, 0.0  ;;  %v2731_v22 = vpop.f32.mrb[15].mxu1 }
 0x273   : > { %v2746_v21 = vmax.f32 %v2688_v13, 0.0  ;;  %v2748_v34 = vmax.f32 %v2729_v17, 0.0 }
 0x275   : > { %v3263_v6 = vpack.c.bf16 %v2746_v21, %v2745_v16  ;;  %v3264_v7 = vpack.c.bf16 %v2748_v34, %v2747_v20 }
 0x277   : > { %v2854_v8 = vrot.slane %v3263_v6, %v3956_v25  ;;  %v2861_v24 = vrot.slane %v3264_v7, %v3956_v25 }
 0x279   : > { %v2863_v26 = vcombine.low %v2854_v8, %v2861_v24 }
 0x27b   : > { %v2877_v28 = vrot.slane %v2863_v26, %v3956_v25 }
 0x27d   : > { %v2878_v29 = vcombine.low %v2870_v27, %v2877_v28 }
 0x27f   : > { %2882 = vst [vmem:[%s4261_s12 + $0x8] sm:$0xff] %v2878_v29 }
 0x280 PF: > { %s13_s16 = sadd.s32 1, %s3347_s16   ;;  %s4299_s12 = smov %s3335_s13 }
 0x281   : > { %p10_p10 = scmp.ge.s32.totalorder %s13_s16, 4   ;;  %s4300_s13 = smov %s3405_s20 }
 0x282   : > { %s4301_s14 = smov %s3343_s15  ;;  %s4302_s15 = smov %s4304_s17 }
 0x283   :  { %12 = sbr.rel (!%p10_p10) target bundleno = 3 (0x3), region = 96 }

// kernel: finetuner_forward.11
= control target key start
LH: loop header
LB: loop body
LE: loop exit
PB: predicated region body
PF: predicated region fallthrough
CT: control target
= control target key end

     0   :  { %v547_v28 = vlaneseq  ;;  %v3858_v36 = vmov 1966171168   ;;  %s4721_s0 = inlined_call_operand.vmem [shape: bf16[2,4096], index: 0, kind: input, shape index: {}]   ;;  %s4722_s1 = inlined_call_operand.vmem [shape: bf16[4096,50], index: 1, kind: input, shape index: {}]   ;;  %s4723_s2 = inlined_call_operand.vmem [shape: f32[1,50], index: 2, kind: input, shape index: {}]   ;;  %s4724_s3 = inlined_call_operand.hbm [shape: f32[2,50], index: 3, kind: output, shape index: {}]  }
   0x1   :  { %v3574_v0 = vld [vmem:[%s4722_s1 + $0x40] sm:$0xff]   ;;  %v3578_v4 = vld [vmem:[%s4722_s1 + $0x48] sm:$0xff]   ;;  %v3582_v8 = vld [vmem:[%s4722_s1 + $0x50] sm:$0xff]   ;;  %v545_v37 = vunpack.c.l.s4 %v3858_v36 }
   0x2   :  { %v3575_v1 = vld [vmem:[%s4722_s1 + $0xc0] sm:$0xff]   ;;  %3220 = vmatprep.subr.bf16.mxu0 %v3574_v0  ;;  %v3579_v5 = vld [vmem:[%s4722_s1 + $0xc8] sm:$0xff]   ;;  %v3583_v9 = vld [vmem:[%s4722_s1 + $0xd0] sm:$0xff]   ;;  %v548_v33 = vshrl.u32 %v547_v28, 7 }
   0x3   :  { %v3576_v2 = vld [vmem:[%s4722_s1] sm:$0xff]   ;;  %3242 = vmatprep.subr.bf16.mxu1 %v3575_v1  ;;  %v3580_v6 = vld [vmem:[%s4722_s1 + $0x8] sm:$0xff]   ;;  %v3584_v10 = vld [vmem:[%s4722_s1 + $0x10] sm:$0xff]   ;;  %v546_v40 = vunpack.c.0.s8 %v545_v37 }
   0x4   :  { %v3577_v3 = vld [vmem:[%s4722_s1 + $0x80] sm:$0xff]   ;;  %3221 = vmatpush3.bf16.msra.mxu0 %v3576_v2  ;;  %v3581_v7 = vld [vmem:[%s4722_s1 + $0x88] sm:$0xff]   ;;  %v3585_v11 = vld [vmem:[%s4722_s1 + $0x90] sm:$0xff]  }
   0x5   :  { %3243 = vmatpush3.bf16.msra.mxu1 %v3577_v3  ;;  %3222 = vmatprep.subr.bf16.mxu0 %v3578_v4  ;;  %v3586_v12 = vld [vmem:[%s4722_s1 + $0x58] sm:$0xff]   ;;  %v3590_v16 = vld [vmem:[%s4722_s1 + $0x60] sm:$0xff]   ;;  %v3594_v20 = vld [vmem:[%s4722_s1 + $0x68] sm:$0xff]   ;;  %v3985_v41 = vsub.s32 %v546_v40, %v548_v33 }
   0x6   :  { %3244 = vmatprep.subr.bf16.mxu1 %v3579_v5  ;;  %v3587_v13 = vld [vmem:[%s4722_s1 + $0xd8] sm:$0xff]   ;;  %v3591_v17 = vld [vmem:[%s4722_s1 + $0xe0] sm:$0xff]   ;;  %v3595_v21 = vld [vmem:[%s4722_s1 + $0xe8] sm:$0xff]  }
   0x7   :  { %v3588_v14 = vld [vmem:[%s4722_s1 + $0x18] sm:$0xff]   ;;  %v3592_v18 = vld [vmem:[%s4722_s1 + $0x20] sm:$0xff]   ;;  %v3596_v22 = vld [vmem:[%s4722_s1 + $0x28] sm:$0xff]  }
   0x8   :  { %3223 = vmatpush3.bf16.msra.mxu0 %v3580_v6  ;;  %v3589_v15 = vld [vmem:[%s4722_s1 + $0x98] sm:$0xff]   ;;  %v3593_v19 = vld [vmem:[%s4722_s1 + $0xa0] sm:$0xff]   ;;  %v3597_v23 = vld [vmem:[%s4722_s1 + $0xa8] sm:$0xff]  }
   0x9   :  { %3245 = vmatpush3.bf16.msra.mxu1 %v3581_v7  ;;  %3224 = vmatprep.subr.bf16.mxu0 %v3582_v8  ;;  %v3598_v24 = vld [vmem:[%s4722_s1 + $0x70] sm:$0xff]   ;;  %v3602_v29 = vld [vmem:[%s4722_s1 + $0x78] sm:$0xff]   ;;  %v16_v34 = vld [vmem:[%s4721_s0] sm:$0xff] }
   0xa   :  { %3246 = vmatprep.subr.bf16.mxu1 %v3583_v9  ;;  %v3599_v25 = vld [vmem:[%s4722_s1 + $0xf0] sm:$0xff]   ;;  %v3603_v30 = vld [vmem:[%s4722_s1 + $0xf8] sm:$0xff]   ;;  %v3607_v35 = vld [vmem:[%s4722_s1 + $0x140] sm:$0xff]   ;;  %v543_v39 = vcombine.high %v16_v34, %v16_v34  ;;  %v550_v42 = vrot.slane %v16_v34, %v3985_v41 }
   0xb   :  { %v3600_v26 = vld [vmem:[%s4722_s1 + $0x30] sm:$0xff]   ;;  %v3604_v31 = vld [vmem:[%s4722_s1 + $0x38] sm:$0xff]   ;;  %v3608_v38 = vld [vmem:[%s4722_s1 + $0x1c0] sm:$0xff]  }
   0xc   :  { %3225 = vmatpush3.bf16.msra.mxu0 %v3584_v10  ;;  %v3601_v27 = vld [vmem:[%s4722_s1 + $0xb0] sm:$0xff]   ;;  %v3605_v32 = vld [vmem:[%s4722_s1 + $0xb8] sm:$0xff]   ;;  %v3989_v43 = vrot.slane %v543_v39, %v3985_v41  ;;  %v558_v44 = vcombine.high %v550_v42, %v550_v42  ;;  %v566_v45 = vrot.slane %v550_v42, %v3985_v41  ;;  %v3609_v47 = vld [vmem:[%s4722_s1 + $0x100] sm:$0xff]  }
   0xd   :  { %3247 = vmatpush3.bf16.msra.mxu1 %v3585_v11  ;;  %3226 = vmatprep.subr.bf16.mxu0 %v3586_v12  ;;  %v3610_v49 = vld [vmem:[%s4722_s1 + $0x180] sm:$0xff]   ;;  %v3611_v52 = vld [vmem:[%s4722_s1 + $0x148] sm:$0xff]   ;;  %v3615_v58 = vld [vmem:[%s4722_s1 + $0x150] sm:$0xff]  }
   0xe   :  { %3248 = vmatprep.subr.bf16.mxu1 %v3587_v13  ;;  %v559_v46 = vcombine.high %v3989_v43, %v3989_v43  ;;  %v580_v48 = vrot.slane %v558_v44, %v3985_v41  ;;  %v588_v51 = vcombine.high %v566_v45, %v566_v45  ;;  %v3612_v54 = vld [vmem:[%s4722_s1 + $0x1c8] sm:$0xff]   ;;  %v3616_v59 = vld [vmem:[%s4722_s1 + $0x1d0] sm:$0xff]   ;;  %v3619_v62 = vld [vmem:[%s4722_s1 + $0x158] sm:$0xff]  }
   0xf   :  { %v3613_v55 = vld [vmem:[%s4722_s1 + $0x108] sm:$0xff]   ;;  %v3617_v60 = vld [vmem:[%s4722_s1 + $0x110] sm:$0xff]   ;;  %v3620_v63 = vld [vmem:[%s4722_s1 + $0x1d8] sm:$0xff]  }
  0x10   :  { %3227 = vmatpush3.bf16.msra.mxu0 %v3588_v14  ;;  %v587_v50 = vrot.slane %v559_v46, %v3985_v41  ;;  %2339 = vmatprep.mubr.bf16.mxu0 %v580_v48  ;;  %v590_v53 = vcombine.high %v580_v48, %v580_v48  ;;  %v3614_v57 = vld [vmem:[%s4722_s1 + $0x188] sm:$0xff]   ;;  %v3618_v61 = vld [vmem:[%s4722_s1 + $0x190] sm:$0xff]   ;;  %v3621_v0 = vld [vmem:[%s4722_s1 + $0x118] sm:$0xff]  }
  0x11   :  { %3249 = vmatpush3.bf16.msra.mxu1 %v3589_v15  ;;  %3228 = vmatprep.subr.bf16.mxu0 %v3590_v16  ;;  %v3622_v1 = vld [vmem:[%s4722_s1 + $0x198] sm:$0xff]   ;;  %v3623_v2 = vld [vmem:[%s4722_s1 + $0x160] sm:$0xff]   ;;  %v3627_v6 = vld [vmem:[%s4722_s1 + $0x168] sm:$0xff]  }
  0x12   :  { %3250 = vmatprep.subr.bf16.mxu1 %v3591_v17  ;;  %v591_v56 = vcombine.high %v587_v50, %v587_v50  ;;  %2379 = vmatprep.mubr.bf16.mxu1 %v590_v53  ;;  %v3624_v3 = vld [vmem:[%s4722_s1 + $0x1e0] sm:$0xff]   ;;  %v3628_v7 = vld [vmem:[%s4722_s1 + $0x1e8] sm:$0xff]   ;;  %v3631_v10 = vld [vmem:[%s4722_s1 + $0x170] sm:$0xff]  }
  0x13   :  { %v3625_v4 = vld [vmem:[%s4722_s1 + $0x120] sm:$0xff]   ;;  %v3629_v8 = vld [vmem:[%s4722_s1 + $0x128] sm:$0xff]   ;;  %v3632_v11 = vld [vmem:[%s4722_s1 + $0x1f0] sm:$0xff]  }
  0x14   :  { %3229 = vmatpush3.bf16.msra.mxu0 %v3592_v18  ;;  %v3626_v5 = vld [vmem:[%s4722_s1 + $0x1a0] sm:$0xff]   ;;  %v3630_v9 = vld [vmem:[%s4722_s1 + $0x1a8] sm:$0xff]   ;;  %v3633_v12 = vld [vmem:[%s4722_s1 + $0x130] sm:$0xff]   ;;  %v573_v18 = vrot.slane %v3989_v43, %v3985_v41 }
  0x15   :  { %3251 = vmatpush3.bf16.msra.mxu1 %v3593_v19  ;;  %3230 = vmatprep.subr.bf16.mxu0 %v3594_v20  ;;  %v3634_v13 = vld [vmem:[%s4722_s1 + $0x1b0] sm:$0xff]   ;;  %v3635_v14 = vld [vmem:[%s4722_s1 + $0x178] sm:$0xff]   ;;  %v3639_v19 = vld [vmem:[%s4722_s1 + $0x240] sm:$0xff]  }
  0x16   :  { %3252 = vmatprep.subr.bf16.mxu1 %v3595_v21  ;;  %v3636_v15 = vld [vmem:[%s4722_s1 + $0x1f8] sm:$0xff]   ;;  %v3640_v20 = vld [vmem:[%s4722_s1 + $0x2c0] sm:$0xff]   ;;  %v3647_v28 = vld [vmem:[%s4722_s1 + $0x250] sm:$0xff]  }
  0x17   :  { %v3637_v16 = vld [vmem:[%s4722_s1 + $0x138] sm:$0xff]   ;;  %v3641_v21 = vld [vmem:[%s4722_s1 + $0x200] sm:$0xff]   ;;  %v3659_v40 = vld [vmem:[%s4722_s1 + $0x268] sm:$0xff]  }
  0x18   :  { %3231 = vmatpush3.bf16.msra.mxu0 %v3596_v22  ;;  %v3638_v17 = vld [vmem:[%s4722_s1 + $0x1b8] sm:$0xff]   ;;  %v3642_v22 = vld [vmem:[%s4722_s1 + $0x280] sm:$0xff]   ;;  %v3660_v42 = vld [vmem:[%s4722_s1 + $0x2e8] sm:$0xff]  }
  0x19   :  { %3253 = vmatpush3.bf16.msra.mxu1 %v3597_v23  ;;  %3232 = vmatprep.subr.bf16.mxu0 %v3598_v24  ;;  %v589_v23 = vcombine.high %v573_v18, %v573_v18  ;;  %v3643_v24 = vld [vmem:[%s4722_s1 + $0x248] sm:$0xff]   ;;  %v3652_v33 = vld [vmem:[%s4722_s1 + $0x2d8] sm:$0xff]   ;;  %v3655_v36 = vld [vmem:[%s4722_s1 + $0x260] sm:$0xff]  }
  0x1a   :  { %3254 = vmatprep.subr.bf16.mxu1 %v3599_v25  ;;  %v3644_v25 = vld [vmem:[%s4722_s1 + $0x2c8] sm:$0xff]   ;;  %v3653_v34 = vld [vmem:[%s4722_s1 + $0x218] sm:$0xff]   ;;  %v3656_v37 = vld [vmem:[%s4722_s1 + $0x2e0] sm:$0xff]  }
  0x1b   :  { %v3658_v39 = vld [vmem:[%s4722_s1 + $0x2a0] sm:$0xff]   ;;  %v3661_v43 = vld [vmem:[%s4722_s1 + $0x228] sm:$0xff]  }
  0x1c   :  { %3233 = vmatpush3.bf16.msra.mxu0 %v3600_v26  ;;  %v3645_v26 = vld [vmem:[%s4722_s1 + $0x208] sm:$0xff]  }
  0x1d   :  { %3255 = vmatpush3.bf16.msra.mxu1 %v3601_v27  ;;  %3234 = vmatprep.subr.bf16.mxu0 %v3602_v29  ;;  %v3646_v27 = vld [vmem:[%s4722_s1 + $0x288] sm:$0xff]   ;;  %v3648_v29 = vld [vmem:[%s4722_s1 + $0x2d0] sm:$0xff]  }
  0x1e   :  { %3256 = vmatprep.subr.bf16.mxu1 %v3603_v30  ;;  %v3649_v30 = vld [vmem:[%s4722_s1 + $0x210] sm:$0xff]   ;;  %v3662_v44 = vld [vmem:[%s4722_s1 + $0x2a8] sm:$0xff]  }
  0x1f   :  { %v17_v46 = vld [vmem:[%s4721_s0 + $0x8] sm:$0xff] }
  0x20   :  { %3235 = vmatpush3.bf16.msra.mxu0 %v3604_v31  ;;  %v3650_v31 = vld [vmem:[%s4722_s1 + $0x290] sm:$0xff]   ;;  %v599_v48 = vrot.slane %v17_v46, %v3985_v41 }
  0x21   :  { %3257 = vmatpush3.bf16.msra.mxu1 %v3605_v32  ;;  %3264 = vmatprep.subr.bf16.mxu0 %v3607_v35  ;;  %v3651_v32 = vld [vmem:[%s4722_s1 + $0x258] sm:$0xff]  }
  0x22   :  { %3286 = vmatprep.subr.bf16.mxu1 %v3608_v38  ;;  %v3654_v35 = vld [vmem:[%s4722_s1 + $0x298] sm:$0xff]   ;;  %v3657_v38 = vld [vmem:[%s4722_s1 + $0x220] sm:$0xff]  }
  0x23   :  { %2340 = vmatmul.mubr.bf16.vlgmr.msra.gmra.mrb[0].mxu0 %v566_v45  ;;  %v3663_v45 = vld [vmem:[%s4722_s1 + $0x270] sm:$0xff]  }
  0x24   :  { %3265 = vmatpush3.bf16.msra.mxu0 %v3609_v47  ;;  %2380 = vmatmul.mubr.bf16.vlgmr.msra.gmra.mrb[0].mxu1 %v588_v51  ;;  %v3664_v47 = vld [vmem:[%s4722_s1 + $0x2f0] sm:$0xff]  }
  0x25   :  { %3266 = vmatprep.subr.bf16.mxu0 %v3611_v52  ;;  %3287 = vmatpush3.bf16.msra.mxu1 %v3610_v49  ;;  %v592_v49 = vcombine.high %v17_v46, %v17_v46  ;;  %v3666_v51 = vld [vmem:[%s4722_s1 + $0x2b0] sm:$0xff]   ;;  %v607_v52 = vcombine.high %v599_v48, %v599_v48 }
  0x26   :  { %2419 = vmatprep.mubr.bf16.mxu0 %v587_v50  ;;  %3288 = vmatprep.subr.bf16.mxu1 %v3612_v54  ;;  %v3665_v50 = vld [vmem:[%s4722_s1 + $0x230] sm:$0xff]   ;;  %v3667_v54 = vld [vmem:[%s4722_s1 + $0x278] sm:$0xff]  }
  0x27   :  { %2459 = vmatprep.mubr.bf16.mxu1 %v591_v56  ;;  %v4177_v53 = vrot.slane %v592_v49, %v3985_v41  ;;  %v629_v56 = vrot.slane %v607_v52, %v3985_v41  ;;  %v3714_v46 = vld [vmem:[%s4722_s1 + $0x410] sm:$0xff]   ;;  %v3717_v49 = vld [vmem:[%s4722_s1 + $0x4d8] sm:$0xff]   ;;  %v3720_v52 = vld [vmem:[%s4722_s1 + $0x460] sm:$0xff]  }
  0x28   :  { %3267 = vmatpush3.bf16.msra.mxu0 %v3613_v55  ;;  %v3668_v55 = vld [vmem:[%s4722_s1 + $0x2f8] sm:$0xff]  }
  0x29   :  { %3268 = vmatprep.subr.bf16.mxu0 %v3615_v58  ;;  %3289 = vmatpush3.bf16.msra.mxu1 %v3614_v57  ;;  %v608_v57 = vcombine.high %v4177_v53, %v4177_v53  ;;  %v3669_v58 = vld [vmem:[%s4722_s1 + $0x238] sm:$0xff]  }
  0x2a   :  { %3290 = vmatprep.subr.bf16.mxu1 %v3616_v59  ;;  %v3670_v59 = vld [vmem:[%s4722_s1 + $0x2b8] sm:$0xff]  }
  0x2c   :  { %3269 = vmatpush3.bf16.msra.mxu0 %v3617_v60  ;;  %v639_v60 = vcombine.high %v629_v56, %v629_v56 }
  0x2d   :  { %3270 = vmatprep.subr.bf16.mxu0 %v3619_v62  ;;  %3291 = vmatpush3.bf16.msra.mxu1 %v3618_v61  ;;  %v615_v61 = vrot.slane %v599_v48, %v3985_v41  ;;  %v3671_v62 = vld [vmem:[%s4722_s1 + $0x340] sm:$0xff]   ;;  %v3716_v48 = vld [vmem:[%s4722_s1 + $0x458] sm:$0xff]  }
  0x2e   :  { %3292 = vmatprep.subr.bf16.mxu1 %v3620_v63  ;;  %v3672_v63 = vld [vmem:[%s4722_s1 + $0x3c0] sm:$0xff]  }
  0x30   :  { %3271 = vmatpush3.bf16.msra.mxu0 %v3621_v0  ;;  %v636_v0 = vrot.slane %v608_v57, %v3985_v41  ;;  %v3725_v57 = vld [vmem:[%s4722_s1 + $0x4e8] sm:$0xff]  }
  0x31   :  { %3272 = vmatprep.subr.bf16.mxu0 %v3623_v2  ;;  %3293 = vmatpush3.bf16.msra.mxu1 %v3622_v1  ;;  %v3673_v1 = vld [vmem:[%s4722_s1 + $0x300] sm:$0xff]  }
  0x32   :  { %3294 = vmatprep.subr.bf16.mxu1 %v3624_v3  ;;  %v3674_v2 = vld [vmem:[%s4722_s1 + $0x380] sm:$0xff]   ;;  %v637_v3 = vcombine.high %v615_v61, %v615_v61 }
  0x34   :  { %3273 = vmatpush3.bf16.msra.mxu0 %v3625_v4  ;;  %v3675_v4 = vld [vmem:[%s4722_s1 + $0x348] sm:$0xff]  }
  0x35   :  { %3274 = vmatprep.subr.bf16.mxu0 %v3627_v6  ;;  %3295 = vmatpush3.bf16.msra.mxu1 %v3626_v5  ;;  %v3676_v5 = vld [vmem:[%s4722_s1 + $0x3c8] sm:$0xff]   ;;  %v640_v6 = vcombine.high %v636_v0, %v636_v0 }
  0x36   :  { %3296 = vmatprep.subr.bf16.mxu1 %v3628_v7  ;;  %v3677_v7 = vld [vmem:[%s4722_s1 + $0x308] sm:$0xff]  }
  0x38   :  { %3275 = vmatpush3.bf16.msra.mxu0 %v3629_v8  ;;  %v3678_v8 = vld [vmem:[%s4722_s1 + $0x388] sm:$0xff]  }
  0x39   :  { %3276 = vmatprep.subr.bf16.mxu0 %v3631_v10  ;;  %3297 = vmatpush3.bf16.msra.mxu1 %v3630_v9  ;;  %v3679_v9 = vld [vmem:[%s4722_s1 + $0x350] sm:$0xff]  }
  0x3a   :  { %3298 = vmatprep.subr.bf16.mxu1 %v3632_v11  ;;  %v3680_v10 = vld [vmem:[%s4722_s1 + $0x3d0] sm:$0xff]  }
  0x3b   :  { %v3681_v11 = vld [vmem:[%s4722_s1 + $0x310] sm:$0xff]  }
  0x3c   :  { %3277 = vmatpush3.bf16.msra.mxu0 %v3633_v12  ;;  %v3682_v12 = vld [vmem:[%s4722_s1 + $0x390] sm:$0xff]  }
  0x3d   :  { %3278 = vmatprep.subr.bf16.mxu0 %v3635_v14  ;;  %3299 = vmatpush3.bf16.msra.mxu1 %v3634_v13  ;;  %v3683_v13 = vld [vmem:[%s4722_s1 + $0x358] sm:$0xff]  }
  0x3e   :  { %3300 = vmatprep.subr.bf16.mxu1 %v3636_v15  ;;  %v3684_v14 = vld [vmem:[%s4722_s1 + $0x3d8] sm:$0xff]  }
  0x3f   :  { %v3685_v15 = vld [vmem:[%s4722_s1 + $0x318] sm:$0xff]  }
  0x40   :  { %3279 = vmatpush3.bf16.msra.mxu0 %v3637_v16  ;;  %v3686_v16 = vld [vmem:[%s4722_s1 + $0x398] sm:$0xff]  }
  0x41   :  { %3308 = vmatprep.subr.bf16.mxu0 %v3639_v19  ;;  %3301 = vmatpush3.bf16.msra.mxu1 %v3638_v17  ;;  %v3687_v17 = vld [vmem:[%s4722_s1 + $0x360] sm:$0xff]  }
  0x42   :  { %3330 = vmatprep.subr.bf16.mxu1 %v3640_v20  ;;  %v3689_v19 = vld [vmem:[%s4722_s1 + $0x320] sm:$0xff]  }
  0x43   :  { %2420 = vmatmul.mubr.bf16.vlgmr.msra.gmra.mrb[4].mxu0 %v573_v18  ;;  %v3688_v18 = vld [vmem:[%s4722_s1 + $0x3e0] sm:$0xff]  }
  0x44   :  { %3309 = vmatpush3.bf16.msra.mxu0 %v3641_v21  ;;  %2460 = vmatmul.mubr.bf16.vlgmr.msra.gmra.mrb[4].mxu1 %v589_v23  ;;  %v3690_v20 = vld [vmem:[%s4722_s1 + $0x3a0] sm:$0xff]   ;;  %v3691_v21 = vld [vmem:[%s4722_s1 + $0x368] sm:$0xff]  }
  0x45   :  { %3310 = vmatprep.subr.bf16.mxu0 %v3643_v24  ;;  %3331 = vmatpush3.bf16.msra.mxu1 %v3642_v22  ;;  %v3692_v22 = vld [vmem:[%s4722_s1 + $0x3e8] sm:$0xff]  }
  0x46   :  { %3332 = vmatprep.subr.bf16.mxu1 %v3644_v25  ;;  %2499 = vmatprep.mubr.bf16.mxu0 %v629_v56  ;;  %v3693_v23 = vld [vmem:[%s4722_s1 + $0x328] sm:$0xff]   ;;  %v3695_v25 = vld [vmem:[%s4722_s1 + $0x370] sm:$0xff]  }
  0x47   :  { %2539 = vmatprep.mubr.bf16.mxu1 %v639_v60  ;;  %v3694_v24 = vld [vmem:[%s4722_s1 + $0x3a8] sm:$0xff]   ;;  %v3728_v60 = vld [vmem:[%s4722_s1 + $0x470] sm:$0xff]  }
  0x48   :  { %3311 = vmatpush3.bf16.msra.mxu0 %v3645_v26  ;;  %v3696_v26 = vld [vmem:[%s4722_s1 + $0x3f0] sm:$0xff]   ;;  %v3724_v56 = vld [vmem:[%s4722_s1 + $0x468] sm:$0xff]  }
  0x49   :  { %3312 = vmatprep.subr.bf16.mxu0 %v3647_v28  ;;  %3333 = vmatpush3.bf16.msra.mxu1 %v3646_v27  ;;  %v3697_v27 = vld [vmem:[%s4722_s1 + $0x330] sm:$0xff]  }
  0x4a   :  { %3334 = vmatprep.subr.bf16.mxu1 %v3648_v29  ;;  %v3698_v28 = vld [vmem:[%s4722_s1 + $0x3b0] sm:$0xff]   ;;  %v3699_v29 = vld [vmem:[%s4722_s1 + $0x378] sm:$0xff]  }
  0x4c   :  { %3313 = vmatpush3.bf16.msra.mxu0 %v3649_v30  ;;  %v3700_v30 = vld [vmem:[%s4722_s1 + $0x3f8] sm:$0xff]  }
  0x4d   :  { %3314 = vmatprep.subr.bf16.mxu0 %v3651_v32  ;;  %3335 = vmatpush3.bf16.msra.mxu1 %v3650_v31  ;;  %v3701_v31 = vld [vmem:[%s4722_s1 + $0x338] sm:$0xff]  }
  0x4e   :  { %3336 = vmatprep.subr.bf16.mxu1 %v3652_v33  ;;  %v3702_v32 = vld [vmem:[%s4722_s1 + $0x3b8] sm:$0xff]   ;;  %v622_v33 = vrot.slane %v4177_v53, %v3985_v41  ;;  %v3721_v53 = vld [vmem:[%s4722_s1 + $0x4e0] sm:$0xff]  }
  0x50   :  { %3315 = vmatpush3.bf16.msra.mxu0 %v3653_v34  ;;  %v3704_v34 = vld [vmem:[%s4722_s1 + $0x440] sm:$0xff]  }
  0x51   :  { %3316 = vmatprep.subr.bf16.mxu0 %v3655_v36  ;;  %3337 = vmatpush3.bf16.msra.mxu1 %v3654_v35  ;;  %v3705_v35 = vld [vmem:[%s4722_s1 + $0x4c0] sm:$0xff]  }
  0x52   :  { %3338 = vmatprep.subr.bf16.mxu1 %v3656_v37  ;;  %v3706_v36 = vld [vmem:[%s4722_s1 + $0x400] sm:$0xff]  }
  0x53   :  { %v3707_v37 = vld [vmem:[%s4722_s1 + $0x480] sm:$0xff]  }
  0x54   :  { %3317 = vmatpush3.bf16.msra.mxu0 %v3657_v38  ;;  %v638_v38 = vcombine.high %v622_v33, %v622_v33 }
  0x55   :  { %3318 = vmatprep.subr.bf16.mxu0 %v3659_v40  ;;  %3339 = vmatpush3.bf16.msra.mxu1 %v3658_v39  ;;  %v3708_v39 = vld [vmem:[%s4722_s1 + $0x448] sm:$0xff]  }
  0x56   :  { %3340 = vmatprep.subr.bf16.mxu1 %v3660_v42  ;;  %v3709_v40 = vld [vmem:[%s4722_s1 + $0x4c8] sm:$0xff]  }
  0x57   :  { %v3710_v42 = vld [vmem:[%s4722_s1 + $0x408] sm:$0xff]  }
  0x58   :  { %3319 = vmatpush3.bf16.msra.mxu0 %v3661_v43  ;;  %v3711_v43 = vld [vmem:[%s4722_s1 + $0x488] sm:$0xff]  }
  0x59   :  { %3320 = vmatprep.subr.bf16.mxu0 %v3663_v45  ;;  %3341 = vmatpush3.bf16.msra.mxu1 %v3662_v44  ;;  %v3712_v44 = vld [vmem:[%s4722_s1 + $0x450] sm:$0xff]  }
  0x5a   :  { %3342 = vmatprep.subr.bf16.mxu1 %v3664_v47  ;;  %v3713_v45 = vld [vmem:[%s4722_s1 + $0x4d0] sm:$0xff]  }
  0x5b   :  { %v3715_v47 = vld [vmem:[%s4722_s1 + $0x490] sm:$0xff]  }
  0x5c   :  { %3321 = vmatpush3.bf16.msra.mxu0 %v3665_v50  ;;  %v3718_v50 = vld [vmem:[%s4722_s1 + $0x418] sm:$0xff]  }
  0x5d   :  { %3322 = vmatprep.subr.bf16.mxu0 %v3667_v54  ;;  %3343 = vmatpush3.bf16.msra.mxu1 %v3666_v51  ;;  %v3719_v51 = vld [vmem:[%s4722_s1 + $0x498] sm:$0xff]   ;;  %v3722_v54 = vld [vmem:[%s4722_s1 + $0x420] sm:$0xff]  }
  0x5e   :  { %3344 = vmatprep.subr.bf16.mxu1 %v3668_v55  ;;  %v3723_v55 = vld [vmem:[%s4722_s1 + $0x4a0] sm:$0xff]  }
  0x60   :  { %3323 = vmatpush3.bf16.msra.mxu0 %v3669_v58  ;;  %v3726_v58 = vld [vmem:[%s4722_s1 + $0x428] sm:$0xff]  }
  0x61   :  { %3352 = vmatprep.subr.bf16.mxu0 %v3671_v62  ;;  %3345 = vmatpush3.bf16.msra.mxu1 %v3670_v59  ;;  %v3727_v59 = vld [vmem:[%s4722_s1 + $0x4a8] sm:$0xff]   ;;  %v3729_v62 = vld [vmem:[%s4722_s1 + $0x4f0] sm:$0xff]  }
  0x62   :  { %3374 = vmatprep.subr.bf16.mxu1 %v3672_v63 }
  0x63   :  { %2500 = vmatmul.mubr.bf16.vlgmr.msra.gmra.mrb[8].mxu0 %v615_v61  ;;  %v18_v61 = vld [vmem:[%s4721_s0 + $0x10] sm:$0xff] }
  0x64   :  { %3353 = vmatpush3.bf16.msra.mxu0 %v3673_v1  ;;  %2579 = vmatprep.mubr.bf16.mxu0 %v636_v0  ;;  %v648_v63 = vrot.slane %v18_v61, %v3985_v41  ;;  %v641_v0 = vcombine.high %v18_v61, %v18_v61  ;;  %v3730_v1 = vld [vmem:[%s4722_s1 + $0x430] sm:$0xff]  }
  0x65   :  { %2540 = vmatmul.mubr.bf16.vlgmr.msra.gmra.mrb[8].mxu1 %v637_v3  ;;  %3354 = vmatprep.subr.bf16.mxu0 %v3675_v4  ;;  %v3779_v61 = vld [vmem:[%s4722_s1 + $0x610] sm:$0xff]  }
  0x66   :  { %3375 = vmatpush3.bf16.msra.mxu1 %v3674_v2  ;;  %2619 = vmatprep.mubr.bf16.mxu1 %v640_v6  ;;  %v3731_v2 = vld [vmem:[%s4722_s1 + $0x4b0] sm:$0xff]   ;;  %v656_v3 = vcombine.high %v648_v63, %v648_v63  ;;  %v4383_v4 = vrot.slane %v641_v0, %v3985_v41  ;;  %v3733_v6 = vld [vmem:[%s4722_s1 + $0x4f8] sm:$0xff]  }
  0x67   :  { %3376 = vmatprep.subr.bf16.mxu1 %v3676_v5  ;;  %v3732_v5 = vld [vmem:[%s4722_s1 + $0x478] sm:$0xff]  }
  0x68   :  { %3355 = vmatpush3.bf16.msra.mxu0 %v3677_v7  ;;  %v678_v7 = vrot.slane %v656_v3, %v3985_v41  ;;  %v3782_v0 = vld [vmem:[%s4722_s1 + $0x6d8] sm:$0xff]   ;;  %v3785_v3 = vld [vmem:[%s4722_s1 + $0x660] sm:$0xff]  }
  0x69   :  { %3356 = vmatprep.subr.bf16.mxu0 %v3679_v9  ;;  %v3734_v9 = vld [vmem:[%s4722_s1 + $0x438] sm:$0xff]  }
  0x6a   :  { %3377 = vmatpush3.bf16.msra.mxu1 %v3678_v8  ;;  %v657_v8 = vcombine.high %v4383_v4, %v4383_v4 }
  0x6b   :  { %3378 = vmatprep.subr.bf16.mxu1 %v3680_v10  ;;  %v3735_v10 = vld [vmem:[%s4722_s1 + $0x4b8] sm:$0xff]  }
  0x6c   :  { %3357 = vmatpush3.bf16.msra.mxu0 %v3681_v11  ;;  %v688_v11 = vcombine.high %v678_v7, %v678_v7 }
  0x6d   :  { %3358 = vmatprep.subr.bf16.mxu0 %v3683_v13  ;;  %v3736_v13 = vld [vmem:[%s4722_s1 + $0x540] sm:$0xff]  }
  0x6e   :  { %3379 = vmatpush3.bf16.msra.mxu1 %v3682_v12  ;;  %v664_v12 = vrot.slane %v648_v63, %v3985_v41  ;;  %v3781_v63 = vld [vmem:[%s4722_s1 + $0x658] sm:$0xff]  }
  0x6f   :  { %3380 = vmatprep.subr.bf16.mxu1 %v3684_v14  ;;  %v3737_v14 = vld [vmem:[%s4722_s1 + $0x5c0] sm:$0xff]  }
  0x70   :  { %3359 = vmatpush3.bf16.msra.mxu0 %v3685_v15  ;;  %v685_v15 = vrot.slane %v657_v8, %v3985_v41  ;;  %v3790_v8 = vld [vmem:[%s4722_s1 + $0x6e8] sm:$0xff]  }
  0x71   :  { %3360 = vmatprep.subr.bf16.mxu0 %v3687_v17  ;;  %v3739_v17 = vld [vmem:[%s4722_s1 + $0x580] sm:$0xff]  }
  0x72   :  { %3381 = vmatpush3.bf16.msra.mxu1 %v3686_v16  ;;  %v3738_v16 = vld [vmem:[%s4722_s1 + $0x500] sm:$0xff]  }
  0x73   :  { %3382 = vmatprep.subr.bf16.mxu1 %v3688_v18  ;;  %v686_v18 = vcombine.high %v664_v12, %v664_v12 }
  0x74   :  { %3361 = vmatpush3.bf16.msra.mxu0 %v3689_v19  ;;  %v3740_v19 = vld [vmem:[%s4722_s1 + $0x548] sm:$0xff]  }
  0x75   :  { %3362 = vmatprep.subr.bf16.mxu0 %v3691_v21  ;;  %v689_v21 = vcombine.high %v685_v15, %v685_v15 }
  0x76   :  { %3383 = vmatpush3.bf16.msra.mxu1 %v3690_v20  ;;  %v3741_v20 = vld [vmem:[%s4722_s1 + $0x5c8] sm:$0xff]  }
  0x77   :  { %3384 = vmatprep.subr.bf16.mxu1 %v3692_v22  ;;  %v3742_v22 = vld [vmem:[%s4722_s1 + $0x508] sm:$0xff]  }
  0x78   :  { %3363 = vmatpush3.bf16.msra.mxu0 %v3693_v23  ;;  %v3743_v23 = vld [vmem:[%s4722_s1 + $0x588] sm:$0xff]  }
  0x79   :  { %3364 = vmatprep.subr.bf16.mxu0 %v3695_v25  ;;  %v3745_v25 = vld [vmem:[%s4722_s1 + $0x5d0] sm:$0xff]  }
  0x7a   :  { %3385 = vmatpush3.bf16.msra.mxu1 %v3694_v24  ;;  %v3744_v24 = vld [vmem:[%s4722_s1 + $0x550] sm:$0xff]  }
  0x7b   :  { %3386 = vmatprep.subr.bf16.mxu1 %v3696_v26  ;;  %v3746_v26 = vld [vmem:[%s4722_s1 + $0x510] sm:$0xff]  }
  0x7c   :  { %3365 = vmatpush3.bf16.msra.mxu0 %v3697_v27  ;;  %v3747_v27 = vld [vmem:[%s4722_s1 + $0x590] sm:$0xff]  }
  0x7d   :  { %3366 = vmatprep.subr.bf16.mxu0 %v3699_v29  ;;  %v3749_v29 = vld [vmem:[%s4722_s1 + $0x5d8] sm:$0xff]  }
  0x7e   :  { %3387 = vmatpush3.bf16.msra.mxu1 %v3698_v28  ;;  %v3748_v28 = vld [vmem:[%s4722_s1 + $0x558] sm:$0xff]  }
  0x7f   :  { %3388 = vmatprep.subr.bf16.mxu1 %v3700_v30  ;;  %v3750_v30 = vld [vmem:[%s4722_s1 + $0x518] sm:$0xff]  }
  0x80   :  { %3367 = vmatpush3.bf16.msra.mxu0 %v3701_v31  ;;  %v3751_v31 = vld [vmem:[%s4722_s1 + $0x598] sm:$0xff]  }
  0x81   :  { %3396 = vmatprep.subr.bf16.mxu0 %v3704_v34  ;;  %v3754_v34 = vld [vmem:[%s4722_s1 + $0x520] sm:$0xff]  }
  0x82   :  { %3389 = vmatpush3.bf16.msra.mxu1 %v3702_v32  ;;  %v3752_v32 = vld [vmem:[%s4722_s1 + $0x560] sm:$0xff]  }
  0x83   :  { %2580 = vmatmul.mubr.bf16.vlgmr.msra.gmra.mrb[12].mxu0 %v622_v33  ;;  %3418 = vmatprep.subr.bf16.mxu1 %v3705_v35  ;;  %v3753_v33 = vld [vmem:[%s4722_s1 + $0x5e0] sm:$0xff]  }
  0x84   :  { %3397 = vmatpush3.bf16.msra.mxu0 %v3706_v36  ;;  %2659 = vmatprep.mubr.bf16.mxu0 %v678_v7  ;;  %v3755_v35 = vld [vmem:[%s4722_s1 + $0x5a0] sm:$0xff]   ;;  %v3756_v36 = vld [vmem:[%s4722_s1 + $0x568] sm:$0xff]  }
  0x85   :  { %2620 = vmatmul.mubr.bf16.vlgmr.msra.gmra.mrb[12].mxu1 %v638_v38  ;;  %3398 = vmatprep.subr.bf16.mxu0 %v3708_v39  ;;  %v3758_v38 = vld [vmem:[%s4722_s1 + $0x528] sm:$0xff]  }
  0x86   :  { %3419 = vmatpush3.bf16.msra.mxu1 %v3707_v37  ;;  %2699 = vmatprep.mubr.bf16.mxu1 %v688_v11  ;;  %v3757_v37 = vld [vmem:[%s4722_s1 + $0x5e8] sm:$0xff]   ;;  %v3793_v11 = vld [vmem:[%s4722_s1 + $0x670] sm:$0xff]  }
  0x87   :  { %3420 = vmatprep.subr.bf16.mxu1 %v3709_v40  ;;  %v3759_v39 = vld [vmem:[%s4722_s1 + $0x5a8] sm:$0xff]   ;;  %v3760_v40 = vld [vmem:[%s4722_s1 + $0x570] sm:$0xff]  }
  0x88   :  { %3399 = vmatpush3.bf16.msra.mxu0 %v3710_v42  ;;  %v3761_v42 = vld [vmem:[%s4722_s1 + $0x5f0] sm:$0xff]   ;;  %v3789_v7 = vld [vmem:[%s4722_s1 + $0x668] sm:$0xff]  }
  0x89   :  { %3400 = vmatprep.subr.bf16.mxu0 %v3712_v44  ;;  %v3763_v44 = vld [vmem:[%s4722_s1 + $0x5b0] sm:$0xff]  }
  0x8a   :  { %3421 = vmatpush3.bf16.msra.mxu1 %v3711_v43  ;;  %v3762_v43 = vld [vmem:[%s4722_s1 + $0x530] sm:$0xff]  }
  0x8b   :  { %3422 = vmatprep.subr.bf16.mxu1 %v3713_v45  ;;  %v3764_v45 = vld [vmem:[%s4722_s1 + $0x578] sm:$0xff]  }
  0x8c   :  { %3401 = vmatpush3.bf16.msra.mxu0 %v3714_v46  ;;  %v3765_v46 = vld [vmem:[%s4722_s1 + $0x5f8] sm:$0xff]  }
  0x8d   :  { %3402 = vmatprep.subr.bf16.mxu0 %v3716_v48  ;;  %v3767_v48 = vld [vmem:[%s4722_s1 + $0x5b8] sm:$0xff]  }
  0x8e   :  { %3423 = vmatpush3.bf16.msra.mxu1 %v3715_v47  ;;  %v3766_v47 = vld [vmem:[%s4722_s1 + $0x538] sm:$0xff]  }
  0x8f   :  { %3424 = vmatprep.subr.bf16.mxu1 %v3717_v49  ;;  %v671_v49 = vrot.slane %v4383_v4, %v3985_v41  ;;  %v3786_v4 = vld [vmem:[%s4722_s1 + $0x6e0] sm:$0xff]  }
  0x90   :  { %3403 = vmatpush3.bf16.msra.mxu0 %v3718_v50  ;;  %v3769_v50 = vld [vmem:[%s4722_s1 + $0x640] sm:$0xff]  }
  0x91   :  { %3404 = vmatprep.subr.bf16.mxu0 %v3720_v52  ;;  %v3771_v52 = vld [vmem:[%s4722_s1 + $0x600] sm:$0xff]  }
  0x92   :  { %3425 = vmatpush3.bf16.msra.mxu1 %v3719_v51  ;;  %v3770_v51 = vld [vmem:[%s4722_s1 + $0x6c0] sm:$0xff]  }
  0x93   :  { %3426 = vmatprep.subr.bf16.mxu1 %v3721_v53  ;;  %v3772_v53 = vld [vmem:[%s4722_s1 + $0x680] sm:$0xff]  }
  0x94   :  { %3405 = vmatpush3.bf16.msra.mxu0 %v3722_v54  ;;  %v687_v54 = vcombine.high %v671_v49, %v671_v49 }
  0x95   :  { %3406 = vmatprep.subr.bf16.mxu0 %v3724_v56  ;;  %v3774_v56 = vld [vmem:[%s4722_s1 + $0x6c8] sm:$0xff]  }
  0x96   :  { %3427 = vmatpush3.bf16.msra.mxu1 %v3723_v55  ;;  %v3773_v55 = vld [vmem:[%s4722_s1 + $0x648] sm:$0xff]  }
  0x97   :  { %3428 = vmatprep.subr.bf16.mxu1 %v3725_v57  ;;  %v3775_v57 = vld [vmem:[%s4722_s1 + $0x608] sm:$0xff]  }
  0x98   :  { %3407 = vmatpush3.bf16.msra.mxu0 %v3726_v58  ;;  %v3776_v58 = vld [vmem:[%s4722_s1 + $0x688] sm:$0xff]  }
  0x99   :  { %3408 = vmatprep.subr.bf16.mxu0 %v3728_v60  ;;  %v3778_v60 = vld [vmem:[%s4722_s1 + $0x6d0] sm:$0xff]  }
  0x9a   :  { %3429 = vmatpush3.bf16.msra.mxu1 %v3727_v59  ;;  %v3777_v59 = vld [vmem:[%s4722_s1 + $0x650] sm:$0xff]  }
  0x9b   :  { %3430 = vmatprep.subr.bf16.mxu1 %v3729_v62  ;;  %v3780_v62 = vld [vmem:[%s4722_s1 + $0x690] sm:$0xff]  }
  0x9c   :  { %3409 = vmatpush3.bf16.msra.mxu0 %v3730_v1  ;;  %v3783_v1 = vld [vmem:[%s4722_s1 + $0x618] sm:$0xff]  }
  0x9d   :  { %3410 = vmatprep.subr.bf16.mxu0 %v3732_v5  ;;  %v3787_v5 = vld [vmem:[%s4722_s1 + $0x620] sm:$0xff]  }
  0x9e   :  { %3431 = vmatpush3.bf16.msra.mxu1 %v3731_v2  ;;  %v3784_v2 = vld [vmem:[%s4722_s1 + $0x698] sm:$0xff]  }
  0x9f   :  { %3432 = vmatprep.subr.bf16.mxu1 %v3733_v6  ;;  %v3788_v6 = vld [vmem:[%s4722_s1 + $0x6a0] sm:$0xff]  }
  0xa0   :  { %3411 = vmatpush3.bf16.msra.mxu0 %v3734_v9  ;;  %v3791_v9 = vld [vmem:[%s4722_s1 + $0x628] sm:$0xff]  }
  0xa1   :  { %3440 = vmatprep.subr.bf16.mxu0 %v3736_v13  ;;  %v3794_v13 = vld [vmem:[%s4722_s1 + $0x6f0] sm:$0xff]  }
  0xa2   :  { %3433 = vmatpush3.bf16.msra.mxu1 %v3735_v10  ;;  %v3792_v10 = vld [vmem:[%s4722_s1 + $0x6a8] sm:$0xff]  }
  0xa3   :  { %2660 = vmatmul.mubr.bf16.vlgmr.msra.gmra.mrb[16].mxu0 %v664_v12  ;;  %3462 = vmatprep.subr.bf16.mxu1 %v3737_v14  ;;  %v19_v12 = vld [vmem:[%s4721_s0 + $0x18] sm:$0xff] }
  0xa4   :  { %3441 = vmatpush3.bf16.msra.mxu0 %v3738_v16  ;;  %2739 = vmatprep.mubr.bf16.mxu0 %v685_v15  ;;  %v697_v14 = vrot.slane %v19_v12, %v3985_v41  ;;  %v690_v15 = vcombine.high %v19_v12, %v19_v12  ;;  %v3795_v16 = vld [vmem:[%s4722_s1 + $0x630] sm:$0xff]  }
  0xa5   :  { %2700 = vmatmul.mubr.bf16.vlgmr.msra.gmra.mrb[16].mxu1 %v686_v18  ;;  %3442 = vmatprep.subr.bf16.mxu0 %v3740_v19 }
  0xa6   :  { %3463 = vmatpush3.bf16.msra.mxu1 %v3739_v17  ;;  %2779 = vmatprep.mubr.bf16.mxu1 %v689_v21  ;;  %v3797_v17 = vld [vmem:[%s4722_s1 + $0x678] sm:$0xff]   ;;  %v705_v18 = vcombine.high %v697_v14, %v697_v14  ;;  %v4589_v19 = vrot.slane %v690_v15, %v3985_v41 }
  0xa7   :  { %3464 = vmatprep.subr.bf16.mxu1 %v3741_v20  ;;  %v3796_v20 = vld [vmem:[%s4722_s1 + $0x6b0] sm:$0xff]   ;;  %v3798_v21 = vld [vmem:[%s4722_s1 + $0x6f8] sm:$0xff]  }
  0xa8   :  { %3443 = vmatpush3.bf16.msra.mxu0 %v3742_v22  ;;  %v727_v22 = vrot.slane %v705_v18, %v3985_v41 }
  0xa9   :  { %3444 = vmatprep.subr.bf16.mxu0 %v3744_v24  ;;  %v3799_v24 = vld [vmem:[%s4722_s1 + $0x638] sm:$0xff]  }
  0xaa   :  { %3465 = vmatpush3.bf16.msra.mxu1 %v3743_v23  ;;  %v706_v23 = vcombine.high %v4589_v19, %v4589_v19 }
  0xab   :  { %3466 = vmatprep.subr.bf16.mxu1 %v3745_v25  ;;  %v737_v25 = vcombine.high %v727_v22, %v727_v22 }
  0xac   :  { %3445 = vmatpush3.bf16.msra.mxu0 %v3746_v26  ;;  %v713_v26 = vrot.slane %v697_v14, %v3985_v41 }
  0xad   :  { %3446 = vmatprep.subr.bf16.mxu0 %v3748_v28  ;;  %v3800_v28 = vld [vmem:[%s4722_s1 + $0x6b8] sm:$0xff]  }
  0xae   :  { %3467 = vmatpush3.bf16.msra.mxu1 %v3747_v27  ;;  %v3801_v27 = vld [vmem:[%s4722_s1 + $0x740] sm:$0xff]  }
  0xaf   :  { %3468 = vmatprep.subr.bf16.mxu1 %v3749_v29  ;;  %v734_v29 = vrot.slane %v706_v23, %v3985_v41 }
  0xb0   :  { %3447 = vmatpush3.bf16.msra.mxu0 %v3750_v30  ;;  %v3802_v30 = vld [vmem:[%s4722_s1 + $0x7c0] sm:$0xff]  }
  0xb1   :  { %3448 = vmatprep.subr.bf16.mxu0 %v3752_v32  ;;  %v735_v32 = vcombine.high %v713_v26, %v713_v26 }
  0xb2   :  { %3469 = vmatpush3.bf16.msra.mxu1 %v3751_v31  ;;  %v3803_v31 = vld [vmem:[%s4722_s1 + $0x700] sm:$0xff]  }
  0xb3   :  { %3470 = vmatprep.subr.bf16.mxu1 %v3753_v33  ;;  %v3805_v33 = vld [vmem:[%s4722_s1 + $0x748] sm:$0xff]  }
  0xb4   :  { %3449 = vmatpush3.bf16.msra.mxu0 %v3754_v34  ;;  %v3804_v34 = vld [vmem:[%s4722_s1 + $0x780] sm:$0xff]  }
  0xb5   :  { %3450 = vmatprep.subr.bf16.mxu0 %v3756_v36  ;;  %v3806_v36 = vld [vmem:[%s4722_s1 + $0x7c8] sm:$0xff]  }
  0xb6   :  { %3471 = vmatpush3.bf16.msra.mxu1 %v3755_v35  ;;  %v738_v35 = vcombine.high %v734_v29, %v734_v29 }
  0xb7   :  { %3472 = vmatprep.subr.bf16.mxu1 %v3757_v37  ;;  %v3807_v37 = vld [vmem:[%s4722_s1 + $0x708] sm:$0xff]  }
  0xb8   :  { %3451 = vmatpush3.bf16.msra.mxu0 %v3758_v38  ;;  %v3809_v38 = vld [vmem:[%s4722_s1 + $0x750] sm:$0xff]  }
  0xb9   :  { %3452 = vmatprep.subr.bf16.mxu0 %v3760_v40  ;;  %v3810_v40 = vld [vmem:[%s4722_s1 + $0x7d0] sm:$0xff]  }
  0xba   :  { %3473 = vmatpush3.bf16.msra.mxu1 %v3759_v39  ;;  %v3808_v39 = vld [vmem:[%s4722_s1 + $0x788] sm:$0xff]  }
  0xbb   :  { %3474 = vmatprep.subr.bf16.mxu1 %v3761_v42  ;;  %v3811_v42 = vld [vmem:[%s4722_s1 + $0x710] sm:$0xff]  }
  0xbc   :  { %3453 = vmatpush3.bf16.msra.mxu0 %v3762_v43  ;;  %v3813_v43 = vld [vmem:[%s4722_s1 + $0x758] sm:$0xff]  }
  0xbd   :  { %3454 = vmatprep.subr.bf16.mxu0 %v3764_v45  ;;  %v3814_v45 = vld [vmem:[%s4722_s1 + $0x7d8] sm:$0xff]  }
  0xbe   :  { %3475 = vmatpush3.bf16.msra.mxu1 %v3763_v44  ;;  %v3812_v44 = vld [vmem:[%s4722_s1 + $0x790] sm:$0xff]  }
  0xbf   :  { %3476 = vmatprep.subr.bf16.mxu1 %v3765_v46  ;;  %v3815_v46 = vld [vmem:[%s4722_s1 + $0x718] sm:$0xff]  }
  0xc0   :  { %3455 = vmatpush3.bf16.msra.mxu0 %v3766_v47  ;;  %v3817_v47 = vld [vmem:[%s4722_s1 + $0x760] sm:$0xff]  }
  0xc1   :  { %3484 = vmatprep.subr.bf16.mxu0 %v3769_v50  ;;  %v3819_v50 = vld [vmem:[%s4722_s1 + $0x720] sm:$0xff]  }
  0xc2   :  { %3477 = vmatpush3.bf16.msra.mxu1 %v3767_v48  ;;  %v3816_v48 = vld [vmem:[%s4722_s1 + $0x798] sm:$0xff]  }
  0xc3   :  { %2740 = vmatmul.mubr.bf16.vlgmr.msra.gmra.mrb[20].mxu0 %v671_v49  ;;  %3506 = vmatprep.subr.bf16.mxu1 %v3770_v51  ;;  %v3818_v49 = vld [vmem:[%s4722_s1 + $0x7e0] sm:$0xff]   ;;  %v3821_v51 = vld [vmem:[%s4722_s1 + $0x768] sm:$0xff]  }
  0xc4   :  { %3485 = vmatpush3.bf16.msra.mxu0 %v3771_v52  ;;  %2819 = vmatprep.mubr.bf16.mxu0 %v727_v22  ;;  %v3820_v52 = vld [vmem:[%s4722_s1 + $0x7a0] sm:$0xff]  }
  0xc5   :  { %2780 = vmatmul.mubr.bf16.vlgmr.msra.gmra.mrb[20].mxu1 %v687_v54  ;;  %3486 = vmatprep.subr.bf16.mxu0 %v3773_v55  ;;  %v3823_v54 = vld [vmem:[%s4722_s1 + $0x728] sm:$0xff]   ;;  %v3825_v55 = vld [vmem:[%s4722_s1 + $0x770] sm:$0xff]  }
  0xc6   :  { %3507 = vmatpush3.bf16.msra.mxu1 %v3772_v53  ;;  %2859 = vmatprep.mubr.bf16.mxu1 %v737_v25  ;;  %v3822_v53 = vld [vmem:[%s4722_s1 + $0x7e8] sm:$0xff]  }
  0xc7   :  { %3508 = vmatprep.subr.bf16.mxu1 %v3774_v56 }
  0xc8   :  { %3487 = vmatpush3.bf16.msra.mxu0 %v3775_v57  ;;  %v3824_v57 = vld [vmem:[%s4722_s1 + $0x7a8] sm:$0xff]  }
  0xc9   :  { %3488 = vmatprep.subr.bf16.mxu0 %v3777_v59 }
  0xca   :  { %3509 = vmatpush3.bf16.msra.mxu1 %v3776_v58 }
  0xcb   :  { %3510 = vmatprep.subr.bf16.mxu1 %v3778_v60 }
  0xcc   :  { %3489 = vmatpush3.bf16.msra.mxu0 %v3779_v61 }
  0xcd   :  { %3490 = vmatprep.subr.bf16.mxu0 %v3781_v63 }
  0xce   :  { %3511 = vmatpush3.bf16.msra.mxu1 %v3780_v62 }
  0xcf   :  { %3512 = vmatprep.subr.bf16.mxu1 %v3782_v0 }
  0xd0   :  { %3491 = vmatpush3.bf16.msra.mxu0 %v3783_v1 }
  0xd1   :  { %3492 = vmatprep.subr.bf16.mxu0 %v3785_v3 }
  0xd2   :  { %3513 = vmatpush3.bf16.msra.mxu1 %v3784_v2 }
  0xd3   :  { %3514 = vmatprep.subr.bf16.mxu1 %v3786_v4 }
  0xd4   :  { %3493 = vmatpush3.bf16.msra.mxu0 %v3787_v5 }
  0xd5   :  { %3494 = vmatprep.subr.bf16.mxu0 %v3789_v7 }
  0xd6   :  { %3515 = vmatpush3.bf16.msra.mxu1 %v3788_v6 }
  0xd7   :  { %3516 = vmatprep.subr.bf16.mxu1 %v3790_v8 }
  0xd8   :  { %3495 = vmatpush3.bf16.msra.mxu0 %v3791_v9 }
  0xd9   :  { %3496 = vmatprep.subr.bf16.mxu0 %v3793_v11 }
  0xda   :  { %3517 = vmatpush3.bf16.msra.mxu1 %v3792_v10 }
  0xdb   :  { %3518 = vmatprep.subr.bf16.mxu1 %v3794_v13 }
  0xdc   :  { %3497 = vmatpush3.bf16.msra.mxu0 %v3795_v16 }
  0xdd   :  { %3498 = vmatprep.subr.bf16.mxu0 %v3797_v17 }
  0xde   :  { %3519 = vmatpush3.bf16.msra.mxu1 %v3796_v20 }
  0xdf   :  { %3520 = vmatprep.subr.bf16.mxu1 %v3798_v21 }
  0xe0   :  { %3499 = vmatpush3.bf16.msra.mxu0 %v3799_v24 }
  0xe1   :  { %3528 = vmatprep.subr.bf16.mxu0 %v3801_v27 }
  0xe2   :  { %3521 = vmatpush3.bf16.msra.mxu1 %v3800_v28 }
  0xe3   :  { %2820 = vmatmul.mubr.bf16.vlgmr.msra.gmra.mrb[24].mxu0 %v713_v26  ;;  %3550 = vmatprep.subr.bf16.mxu1 %v3802_v30 }
  0xe4   :  { %3529 = vmatpush3.bf16.msra.mxu0 %v3803_v31  ;;  %2899 = vmatprep.mubr.bf16.mxu0 %v734_v29 }
  0xe5   :  { %2860 = vmatmul.mubr.bf16.vlgmr.msra.gmra.mrb[24].mxu1 %v735_v32  ;;  %3530 = vmatprep.subr.bf16.mxu0 %v3805_v33 }
  0xe6   :  { %3551 = vmatpush3.bf16.msra.mxu1 %v3804_v34  ;;  %2939 = vmatprep.mubr.bf16.mxu1 %v738_v35 }
  0xe7   :  { %3552 = vmatprep.subr.bf16.mxu1 %v3806_v36 }
  0xe8   :  { %3531 = vmatpush3.bf16.msra.mxu0 %v3807_v37 }
  0xe9   :  { %3532 = vmatprep.subr.bf16.mxu0 %v3809_v38 }
  0xea   :  { %3553 = vmatpush3.bf16.msra.mxu1 %v3808_v39 }
  0xeb   :  { %3554 = vmatprep.subr.bf16.mxu1 %v3810_v40 }
  0xec   :  { %3533 = vmatpush3.bf16.msra.mxu0 %v3811_v42 }
  0xed   :  { %3534 = vmatprep.subr.bf16.mxu0 %v3813_v43 }
  0xee   :  { %3555 = vmatpush3.bf16.msra.mxu1 %v3812_v44 }
  0xef   :  { %3556 = vmatprep.subr.bf16.mxu1 %v3814_v45 }
  0xf0   :  { %3535 = vmatpush3.bf16.msra.mxu0 %v3815_v46 }
  0xf1   :  { %3536 = vmatprep.subr.bf16.mxu0 %v3817_v47 }
  0xf2   :  { %3557 = vmatpush3.bf16.msra.mxu1 %v3816_v48 }
  0xf3   :  { %3558 = vmatprep.subr.bf16.mxu1 %v3818_v49 }
  0xf4   :  { %3537 = vmatpush3.bf16.msra.mxu0 %v3819_v50 }
  0xf5   :  { %3538 = vmatprep.subr.bf16.mxu0 %v3821_v51 }
  0xf6   :  { %3559 = vmatpush3.bf16.msra.mxu1 %v3820_v52  ;;  %v3236_v56 = vpop.f32.mrb[0].mxu0 }
  0xf7   :  { %8 = vsyncpa [#allocation3], 0  ;;  %v2963_v58 = vld [vmem:[%s4723_s2] ss:$0 sm:$0xff]  ;;  %v3237_v59 = vpop.f32.mrb[1].mxu0  ;;  %3560 = vmatprep.subr.bf16.mxu1 %v3822_v53  ;;  %v3826_v60 = vld [vmem:[%s4722_s1 + $0x7f0] sm:$0xff]   ;;  %v720_v12 = vrot.slane %v4589_v19, %v3985_v41 }
  0xf8   :  { %v3258_v61 = vpop.f32.mrb[0].mxu1  ;;  %v3238_v62 = vadd.f32 %v3237_v59, %v3236_v56  ;;  %v3239_v63 = vpop.f32.mrb[2].mxu0  ;;  %3539 = vmatpush3.bf16.msra.mxu0 %v3823_v54  ;;  %v3827_v0 = vld [vmem:[%s4722_s1 + $0x730] sm:$0xff]   ;;  %v3829_v3 = vld [vmem:[%s4722_s1 + $0x778] sm:$0xff]   ;;  %vm2947_vm0 = vcmask 402432  }
  0xf9   :  { %v3259_v1 = vpop.f32.mrb[1].mxu1  ;;  %v3240_v2 = vpop.f32.mrb[3].mxu0  ;;  %3540 = vmatprep.subr.bf16.mxu0 %v3825_v55  ;;  %v3828_v7 = vld [vmem:[%s4722_s1 + $0x7b0] sm:$0xff]   ;;  %v3830_v9 = vld [vmem:[%s4722_s1 + $0x7f8] sm:$0xff]   ;;  %v736_v14 = vcombine.high %v720_v12, %v720_v12 }
  0xfa   :  { %v2342_v4 = vadd.f32 %v3238_v62, %v2963_v58  ;;  %v3260_v5 = vadd.f32 %v3259_v1, %v3258_v61  ;;  %v3261_v6 = vpop.f32.mrb[2].mxu1  ;;  %3561 = vmatpush3.bf16.msra.mxu1 %v3824_v57  ;;  %v3831_v11 = vld [vmem:[%s4722_s1 + $0x738] sm:$0xff]  }
  0xfb   :  { %v3262_v8 = vpop.f32.mrb[3].mxu1  ;;  %3562 = vmatprep.subr.bf16.mxu1 %v3826_v60  ;;  %v3832_v13 = vld [vmem:[%s4722_s1 + $0x7b8] sm:$0xff]   ;;  %s3859_s1 = smov [#allocation2]  }
  0xfc   :  { %v2382_v10 = vadd.f32 %v3260_v5, %v2342_v4  ;;  %3541 = vmatpush3.bf16.msra.mxu0 %v3827_v0  ;;  %s2955_s17 = sshll.u32 %s3859_s1, 4  ;;  %s2956_s17 = int_to_ptr.vmem [resolvable:$true] %s2955_s17 }
  0xfd   :  { %3542 = vmatprep.subr.bf16.mxu0 %v3829_v3  ;;  %s3834_s18 = scalar_lea.vmem %s2956_s17, 32  ;;  %p3839_p1 = scmp.lt.s32.totalorder %s2956_s17, %s2956_s17 }
  0xfe   :  { %3563 = vmatpush3.bf16.msra.mxu1 %v3828_v7  ;;  %p3835_p0 = scmp.ne.s32.totalorder %s2956_s17, %s3834_s18  ;;  %p3840_p2 = scmp.lt.s32.totalorder %s3834_s18, %s3834_s18 }
  0xff   :  { %3564 = vmatprep.subr.bf16.mxu1 %v3830_v9 }
 0x100   :  { %3543 = vmatpush3.bf16.msra.mxu0 %v3831_v11  ;;  %p3841_p3 = por %p3840_p2, %p3839_p1 }
 0x102   :  { %3565 = vmatpush3.bf16.msra.mxu1 %v3832_v13  ;;  %p3842_p4 = pnand %p3841_p3, %p3835_p0 }
 0x103   :  { %2900 = vmatmul.mubr.bf16.vlgmr.msra.gmra.mrb[28].mxu0 %v720_v12 }
 0x105   :  { %2940 = vmatmul.mubr.bf16.vlgmr.msra.gmra.mrb[28].mxu1 %v736_v14 }
 0x116   :  { %v3280_v15 = vpop.f32.mrb[4].mxu0 }
 0x117   :  { %v3281_v16 = vpop.f32.mrb[5].mxu0  ;;  %v3302_v17 = vpop.f32.mrb[4].mxu1 }
 0x118   :  { %v3282_v18 = vadd.f32 %v3281_v16, %v3280_v15  ;;  %v3283_v20 = vpop.f32.mrb[6].mxu0  ;;  %v3303_v21 = vpop.f32.mrb[5].mxu1 }
 0x119   :  { %v3284_v22 = vpop.f32.mrb[7].mxu0  ;;  %v3304_v41 = vadd.f32 %v3303_v21, %v3302_v17  ;;  %v3305_v19 = vpop.f32.mrb[6].mxu1 }
 0x11a   :  { %v2422_v23 = vadd.f32 %v3282_v18, %v2382_v10  ;;  %v3306_v24 = vpop.f32.mrb[7].mxu1 }
 0x11c   :  { %v2462_v25 = vadd.f32 %v3304_v41, %v2422_v23 }
 0x136   :  { %v3324_v26 = vpop.f32.mrb[8].mxu0 }
 0x137   :  { %v3325_v27 = vpop.f32.mrb[9].mxu0 }
 0x138   :  { %v3346_v28 = vpop.f32.mrb[8].mxu1  ;;  %v3326_v29 = vadd.f32 %v3325_v27, %v3324_v26  ;;  %v3327_v30 = vpop.f32.mrb[10].mxu0 }
 0x139   :  { %v3347_v31 = vpop.f32.mrb[9].mxu1  ;;  %v3328_v32 = vpop.f32.mrb[11].mxu0 }
 0x13a   :  { %v2502_v33 = vadd.f32 %v3326_v29, %v2462_v25  ;;  %v3348_v34 = vadd.f32 %v3347_v31, %v3346_v28  ;;  %v3349_v35 = vpop.f32.mrb[10].mxu1 }
 0x13b   :  { %v3350_v36 = vpop.f32.mrb[11].mxu1 }
 0x13c   :  { %v2542_v37 = vadd.f32 %v3348_v34, %v2502_v33 }
 0x156   :  { %v3368_v38 = vpop.f32.mrb[12].mxu0 }
 0x157   :  { %v3369_v39 = vpop.f32.mrb[13].mxu0 }
 0x158   :  { %v3390_v40 = vpop.f32.mrb[12].mxu1  ;;  %v3370_v42 = vadd.f32 %v3369_v39, %v3368_v38  ;;  %v3371_v43 = vpop.f32.mrb[14].mxu0 }
 0x159   :  { %v3391_v44 = vpop.f32.mrb[13].mxu1  ;;  %v3372_v45 = vpop.f32.mrb[15].mxu0 }
 0x15a   :  { %v2582_v46 = vadd.f32 %v3370_v42, %v2542_v37  ;;  %v3392_v47 = vadd.f32 %v3391_v44, %v3390_v40  ;;  %v3393_v48 = vpop.f32.mrb[14].mxu1 }
 0x15b   :  { %v3394_v49 = vpop.f32.mrb[15].mxu1 }
 0x15c   :  { %v2622_v50 = vadd.f32 %v3392_v47, %v2582_v46 }
 0x176   :  { %v3412_v51 = vpop.f32.mrb[16].mxu0 }
 0x177   :  { %v3413_v52 = vpop.f32.mrb[17].mxu0 }
 0x178   :  { %v3434_v53 = vpop.f32.mrb[16].mxu1  ;;  %v3414_v54 = vadd.f32 %v3413_v52, %v3412_v51  ;;  %v3415_v55 = vpop.f32.mrb[18].mxu0 }
 0x179   :  { %v3435_v56 = vpop.f32.mrb[17].mxu1  ;;  %v3416_v57 = vpop.f32.mrb[19].mxu0 }
 0x17a   :  { %v2662_v58 = vadd.f32 %v3414_v54, %v2622_v50  ;;  %v3436_v59 = vadd.f32 %v3435_v56, %v3434_v53  ;;  %v3437_v60 = vpop.f32.mrb[18].mxu1 }
 0x17b   :  { %v3438_v61 = vpop.f32.mrb[19].mxu1 }
 0x17c   :  { %v2702_v62 = vadd.f32 %v3436_v59, %v2662_v58 }
 0x196   :  { %v3456_v63 = vpop.f32.mrb[20].mxu0 }
 0x197   :  { %v3457_v0 = vpop.f32.mrb[21].mxu0 }
 0x198   :  { %v3478_v1 = vpop.f32.mrb[20].mxu1  ;;  %v3458_v2 = vadd.f32 %v3457_v0, %v3456_v63  ;;  %v3459_v3 = vpop.f32.mrb[22].mxu0 }
 0x199   :  { %v3479_v4 = vpop.f32.mrb[21].mxu1  ;;  %v3460_v5 = vpop.f32.mrb[23].mxu0 }
 0x19a   :  { %v2742_v6 = vadd.f32 %v3458_v2, %v2702_v62  ;;  %v3480_v7 = vadd.f32 %v3479_v4, %v3478_v1  ;;  %v3481_v8 = vpop.f32.mrb[22].mxu1 }
 0x19b   :  { %v3482_v9 = vpop.f32.mrb[23].mxu1 }
 0x19c   :  { %v2782_v10 = vadd.f32 %v3480_v7, %v2742_v6 }
 0x1b6   :  { %v3500_v11 = vpop.f32.mrb[24].mxu0 }
 0x1b7   :  { %v3501_v12 = vpop.f32.mrb[25].mxu0 }
 0x1b8   :  { %v3522_v13 = vpop.f32.mrb[24].mxu1  ;;  %v3502_v14 = vadd.f32 %v3501_v12, %v3500_v11  ;;  %v3503_v15 = vpop.f32.mrb[26].mxu0 }
 0x1b9   :  { %v3523_v16 = vpop.f32.mrb[25].mxu1  ;;  %v3504_v17 = vpop.f32.mrb[27].mxu0 }
 0x1ba   :  { %v2822_v18 = vadd.f32 %v3502_v14, %v2782_v10  ;;  %v3524_v20 = vadd.f32 %v3523_v16, %v3522_v13  ;;  %v3525_v21 = vpop.f32.mrb[26].mxu1 }
 0x1bb   :  { %v3526_v22 = vpop.f32.mrb[27].mxu1 }
 0x1bc   :  { %v2862_v23 = vadd.f32 %v3524_v20, %v2822_v18 }
 0x1d6   :  { %v3544_v41 = vpop.f32.mrb[28].mxu0 }
 0x1d7   :  { %v3545_v19 = vpop.f32.mrb[29].mxu0 }
 0x1d8   :  { %v3566_v24 = vpop.f32.mrb[28].mxu1  ;;  %v3546_v25 = vadd.f32 %v3545_v19, %v3544_v41  ;;  %v3547_v26 = vpop.f32.mrb[30].mxu0 }
 0x1d9   :  { %v3567_v27 = vpop.f32.mrb[29].mxu1  ;;  %v3548_v28 = vpop.f32.mrb[31].mxu0 }
 0x1da   :  { %v2902_v29 = vadd.f32 %v3546_v25, %v2862_v23  ;;  %v3568_v30 = vadd.f32 %v3567_v27, %v3566_v24  ;;  %v3569_v31 = vpop.f32.mrb[30].mxu1 }
 0x1db   :  { %v3570_v32 = vpop.f32.mrb[31].mxu1 }
 0x1dc   :  { %v2942_v33 = vadd.f32 %v3568_v30, %v2902_v29 }
 0x1de   :  { %2948 = vst.msk [vmem:[#allocation2] sm:$0x3] %vm2947_vm0, %v2942_v33 }
 0x1df   :  { %3845 = shalt.err (!%p3842_p4)
}
 0x1e0   :  { %s3846_s21 = scalar_lea.hbm %s4724_s3, 32 }
 0x1e1   :  { %p3847_p5 = scmp.ne.s32.totalorder %s4724_s3, %s3846_s21  ;;  %p3850_p6 = scmp.lt.u32.totalorder %s3846_s21, %s4724_s3 }
 0x1e3   :  { %p3852_p7 = pnand %p3850_p6, %p3847_p5 }
 0x1e5   :  { %3855 = shalt.err (!%p3852_p7)
}
 0x1e6   :  { %2958 = dma.vmem_to_hbm [thread:$0]  %s2956_s17, 32, %s4724_s3, [#allocation3]  }
 0x1e7   :  { %3856 = dma.done.wait [#allocation3], 32  }
 0x1e8   :  { %3857 = vsyncadd [#allocation3], 4294967264 }
 0x1e9   :  { %2962 = vsyncpa [#allocation3], 1 }

</bundles_post_ra>
